<compile_context>
chip_gen: v5e
topology: v5e:2x2
jax: 0.10.0
libtpu: 0.0.40
codegen_flags: <defaults>
</compile_context>

<pallas_src>
import functools

import jax
import jax.numpy as jnp
from jax.experimental import pallas as pl
from jax.experimental.pallas import tpu as pltpu

MAX_TILE_M = 2048
BN_EPS = 1e-5
VMEM_LIMIT = 32 * 1024 * 1024


# --------------------------------------------------------------------------
# helpers
# --------------------------------------------------------------------------
def _pick_tile(m, max_tile=MAX_TILE_M):
    """Largest row tile <= max_tile; equals M for small M, divides M for pow2 M."""
    if m <= max_tile:
        return m
    t = max_tile
    while t >= 8 and m % t:
        t //= 2
    return max(t, 8)


def _apply_act(y, act):
    if act == "leaky":
        return jnp.where(y > 0, y, 0.2 * y)
    if act == "relu":
        return jnp.maximum(y, 0.0)
    if act == "tanh":
        return jnp.tanh(y)
    return y


# --------------------------------------------------------------------------
# Pallas kernels
# --------------------------------------------------------------------------
def _gemm_stats_kernel(a_ref, w_ref, y_ref, sum_ref, ssq_ref):
    """y = a @ w (bf16 in, f32 acc) + fused per-column sum / sum-of-squares."""
    y = jnp.dot(a_ref[...], w_ref[...], preferred_element_type=jnp.float32)
    y_ref[...] = y.astype(y_ref.dtype)

    @pl.when(pl.program_id(1) == 0)
    def _():
        sum_ref[...] = jnp.zeros_like(sum_ref)
        ssq_ref[...] = jnp.zeros_like(ssq_ref)

    sum_ref[...] += jnp.sum(y, axis=0, keepdims=True)
    ssq_ref[...] += jnp.sum(y * y, axis=0, keepdims=True)


def _gemm_act_kernel(a_ref, w_ref, y_ref, *, act):
    """y = act(a @ w) with f32 accumulation (final tanh layer)."""
    y = jnp.dot(a_ref[...], w_ref[...], preferred_element_type=jnp.float32)
    y_ref[...] = _apply_act(y, act).astype(y_ref.dtype)


def _bn_act_kernel(y_ref, scale_ref, shift_ref, o_ref, *, act):
    y = y_ref[...].astype(jnp.float32) * scale_ref[...] + shift_ref[...]
    o_ref[...] = _apply_act(y, act).astype(o_ref.dtype)


def _head_kernel(emb_ref, z_ref, pw_ref, pb_ref, pg_ref, pbeta_ref,
                 w1h_ref, w1z_ref, y_ref, sum_ref, ssq_ref):
    """Fused head: Linear(+bias) -> BatchNorm1d (batch stats, centred variance)
    -> LeakyReLU(0.2) -> concat with z -> ct1 GEMM (+ fused bn1 column stats).
    """
    y1 = jnp.dot(emb_ref[...], pw_ref[...], preferred_element_type=jnp.float32)
    y1 = y1 + pb_ref[...]
    mean = jnp.mean(y1, axis=0, keepdims=True)
    d = y1 - mean
    var = jnp.mean(d * d, axis=0, keepdims=True)         # biased (training-mode BN)
    h = d * (pg_ref[...] * jax.lax.rsqrt(var + BN_EPS)) + pbeta_ref[...]
    h = jnp.where(h > 0, h, 0.2 * h)                      # LeakyReLU(0.2)
    # ct1 on a 1x1 input == GEMM of concat([h, z], axis=1) with the repacked
    # weight; done as two dots (h-part + z-part) to avoid an in-kernel concat.
    y2 = jnp.dot(h.astype(jnp.bfloat16), w1h_ref[...],
                 preferred_element_type=jnp.float32)
    y2 = y2 + jnp.dot(z_ref[...], w1z_ref[...],
                      preferred_element_type=jnp.float32)
    y_ref[...] = y2
    sum_ref[...] = jnp.sum(y2, axis=0, keepdims=True)
    ssq_ref[...] = jnp.sum(y2 * y2, axis=0, keepdims=True)


# --------------------------------------------------------------------------
# pallas_call wrappers
# --------------------------------------------------------------------------
def gemm_bn_stats(a, w, *, stats, act=None, out_dtype=jnp.float32):
    """Lane-dense GEMM (M, K) @ (K, N) with optional fused per-column stats.

    bf16 inputs, f32 MXU accumulation.  Returns y (or y, sum, ssq).
    The leading grid axis is a 2-way "parallel" split of M (v7x megacore, a
    cheap no-op on v5e/v6e); the inner M axis is "arbitrary" because the stat
    blocks are resident accumulators.
    """
    a = a.astype(jnp.bfloat16)
    w = w.astype(jnp.bfloat16)
    M, K = a.shape
    _, N = w.shape

    n_split = 2 if (M % 16 == 0 and M >= 256) else 1
    ms = M // n_split
    tile = _pick_tile(ms)
    n_tiles = pl.cdiv(ms, tile)
    Mp = n_split * n_tiles * tile
    if Mp != M:  # zero rows contribute nothing to sum/ssq (fallback path only)
        a = jnp.pad(a, ((0, Mp - M), (0, 0)))

    grid = (n_split, n_tiles)
    a_spec = pl.BlockSpec((tile, K), lambda p, i: (p * n_tiles + i, 0))
    w_spec = pl.BlockSpec((K, N), lambda p, i: (0, 0))
    y_spec = pl.BlockSpec((tile, N), lambda p, i: (p * n_tiles + i, 0))
    y_shape = jax.ShapeDtypeStruct((Mp, N), out_dtype)

    if stats:
        stat_spec = pl.BlockSpec((None, 1, N), lambda p, i: (p, 0, 0))
        stat_shape = jax.ShapeDtypeStruct((n_split, 1, N), jnp.float32)
        y, s, ss = pl.pallas_call(
            _gemm_stats_kernel,
            grid=grid,
            in_specs=[a_spec, w_spec],
            out_specs=(y_spec, stat_spec, stat_spec),
            out_shape=(y_shape, stat_shape, stat_shape),
            compiler_params=pltpu.CompilerParams(
                dimension_semantics=("parallel", "arbitrary"),
                vmem_limit_bytes=VMEM_LIMIT),
        )(a, w)
        if Mp != M:
            y = y[:M]
        return y, s, ss

    y = pl.pallas_call(
        functools.partial(_gemm_act_kernel, act=act),
        grid=grid,
        in_specs=[a_spec, w_spec],
        out_specs=y_spec,
        out_shape=y_shape,
        compiler_params=pltpu.CompilerParams(
            dimension_semantics=("parallel", "parallel"),
            vmem_limit_bytes=VMEM_LIMIT),
    )(a, w)
    return y[:M] if Mp != M else y


def bn_act(y2d, scale_c, shift_c, act, out_dtype=jnp.bfloat16):
    """out = act(y * scale + shift) with per-channel scale/shift.

    Columns of y2d are `N // C` repeats of the C-channel pattern.  Rows are
    folded into the minor dim until it is >= 128 lanes (lane-dense VPU work
    and unmasked stores), e.g. bn4: (512, 64) -> (256, 128).
    """
    M, N = y2d.shape
    C = scale_c.shape[0]
    reps = N // C
    k = 1
    while (N * k) < 128 and (M % (2 * k)) == 0:
        k *= 2
    rows, cols = M // k, N * k
    y2d = y2d.reshape(rows, cols)                       # row-major -> free reshape
    scale = jnp.tile(scale_c.reshape(1, C), (1, reps * k)).astype(jnp.float32)
    shift = jnp.tile(shift_c.reshape(1, C), (1, reps * k)).astype(jnp.float32)

    tile = _pick_tile(rows)
    n_tiles = pl.cdiv(rows, tile)
    rp = n_tiles * tile
    if rp != rows:
        y2d = jnp.pad(y2d, ((0, rp - rows), (0, 0)))
    out = pl.pallas_call(
        functools.partial(_bn_act_kernel, act=act),
        grid=(n_tiles,),
        in_specs=[
            pl.BlockSpec((tile, cols), lambda i: (i, 0)),
            pl.BlockSpec((1, cols), lambda i: (0, 0)),
            pl.BlockSpec((1, cols), lambda i: (0, 0)),
        ],
        out_specs=pl.BlockSpec((tile, cols), lambda i: (i, 0)),
        out_shape=jax.ShapeDtypeStruct((rp, cols), out_dtype),
        compiler_params=pltpu.CompilerParams(
            dimension_semantics=("parallel",),
            vmem_limit_bytes=VMEM_LIMIT),
    )(y2d, scale, shift)
    if rp != rows:
        out = out[:rows]
    return out.reshape(M, N)


def head_fused(prep, embedding, z):
    """projection + BN1d + LeakyReLU + concat(z) + ct1 GEMM in ONE pallas_call.

    Output: y2 (B, 16*Cout1) f32 with columns ordered (oy, ox, co) plus fused
    per-column sum / sum-of-squares for the bn1 batch statistics.  The grid is
    a 2-way "parallel" split of the ct1 N dimension (v7x megacore); the tiny
    projection is recomputed per half.
    """
    B, nx = embedding.shape
    nz = z.shape[1]
    emb_out = prep["proj_gamma"].shape[1]
    Nt = prep["wm1_h"].shape[1]

    n_split = 2 if (Nt % 256 == 0) else 1
    Nh = Nt // n_split

    def full(shape):
        return pl.BlockSpec(shape, lambda j: (0,) * len(shape))

    y, s, ss = pl.pallas_call(
        _head_kernel,
        grid=(n_split,),
        in_specs=[
            full((B, nx)), full((B, nz)), full((nx, emb_out)),
            full((1, emb_out)), full((1, emb_out)), full((1, emb_out)),
            pl.BlockSpec((emb_out, Nh), lambda j: (0, j)),
            pl.BlockSpec((nz, Nh), lambda j: (0, j)),
        ],
        out_specs=(pl.BlockSpec((B, Nh), lambda j: (0, j)),
                   pl.BlockSpec((1, Nh), lambda j: (0, j)),
                   pl.BlockSpec((1, Nh), lambda j: (0, j))),
        out_shape=(jax.ShapeDtypeStruct((B, Nt), jnp.float32),
                   jax.ShapeDtypeStruct((1, Nt), jnp.float32),
                   jax.ShapeDtypeStruct((1, Nt), jnp.float32)),
        compiler_params=pltpu.CompilerParams(
            dimension_semantics=("parallel",),
            vmem_limit_bytes=VMEM_LIMIT),
    )(embedding.astype(jnp.bfloat16), z.astype(jnp.bfloat16),
      prep["proj_wT"], prep["proj_b"], prep["proj_gamma"], prep["proj_beta"],
      prep["wm1_h"], prep["wm1_z"])
    return y, s, ss


# --------------------------------------------------------------------------
# JAX glue: BN folding, 9-tap sub-pixel decomposition, weight prepack
# --------------------------------------------------------------------------
def _reduce_cols(s, c):
    """Per-column stats (any leading shape, last dim a multiple of c) -> (c,)."""
    return s.reshape(-1, c).sum(axis=0).astype(jnp.float32)


def bn_scale_shift(sum_c, ssq_c, count, gamma, beta, eps=BN_EPS):
    """Training-mode BN (batch stats, biased variance) folded to scale/shift.

    Variance via E[x^2]-E[x]^2 in f32, clamped >= 0 as a cancellation guard
    (activations here are ReLU/LeakyReLU outputs with moderate range)."""
    mean = sum_c / count
    var = jnp.maximum(ssq_c / count - mean * mean, 0.0)
    scale = gamma.astype(jnp.float32) * jax.lax.rsqrt(var + eps)
    shift = beta.astype(jnp.float32) - mean * scale
    return scale, shift


def _nine_tap_patches(x_nhwc):
    """Shared 3x3 (9-tap) im2col for ConvTranspose2d(k=4, stride=2, pad=1).

    Every output parity class (py, px) only needs input taps inside the
    1-padded 3x3 neighbourhood of its source pixel, so ONE patch matrix
    (M, 9*Cin) serves all four parity sub-convolutions at once.
    """
    # TODO(synk): do this gather in-kernel (halo DMA from the padded NHWC
    # activation) to remove one XLA HBM pass per layer.
    B, H, W, Cin = x_nhwc.shape
    xp = jnp.pad(x_nhwc, ((0, 0), (1, 1), (1, 1), (0, 0)))
    taps = [xp[:, ro:ro + H, co:co + W, :] for ro in range(3) for co in range(3)]
    pat = jnp.stack(taps, axis=3)                        # (B, H, W, 9, Cin)
    return pat.reshape(B * H * W, 9 * Cin).astype(jnp.bfloat16)


# parity -> {3x3 neighbourhood offset : transposed-conv kernel index}
_TAP_MAP = {0: {0: 3, 1: 1}, 1: {1: 2, 2: 0}}


def _prepack_ct_weight(w):
    """(Cin, Cout, 4, 4) ConvTranspose2d weight -> (9*Cin, 4*Cout) matrix whose
    four N groups are the output parity classes (py, px); unused taps are 0."""
    Cin, Cout = w.shape[0], w.shape[1]
    wcat = jnp.zeros((9, Cin, 4, Cout), jnp.float32)
    for py in (0, 1):
        for px in (0, 1):
            g = 2 * py + px
            for ro, kr in _TAP_MAP[py].items():
                for co, kc in _TAP_MAP[px].items():
                    wcat = wcat.at[ro * 3 + co, :, g, :].set(w[:, :, kr, kc])
    return wcat.reshape(9 * Cin, 4 * Cout).astype(jnp.bfloat16)


def _interleave_parities(y, B, H, W, C):
    """(B*H*W, 4*C) with column groups (py, px, c) -> NHWC (B, 2H, 2W, C)."""
    # TODO(synk): fold this scatter into the bn_act / final-GEMM out_spec.
    y6 = y.reshape(B, H, W, 2, 2, C)
    return jnp.transpose(y6, (0, 1, 3, 2, 4, 5)).reshape(B, 2 * H, 2 * W, C)


def prepack_params(params):
    """One-time weight repacking (transposes, parity concat, bf16 casts),
    hoisted out of the jitted forward pass."""
    emb_out = params["proj_gamma"].shape[0]
    w1 = params["ct1"]
    Cout1 = w1.shape[1]
    # ct1 on a 1x1 input: out[b, oy, ox, co] = sum_ci x[b, ci] * w[ci, co, oy, ox]
    wm1 = jnp.transpose(w1, (0, 2, 3, 1)).reshape(w1.shape[0], 16 * Cout1)
    prep = {
        "proj_wT": params["proj_w"].T.astype(jnp.bfloat16),
        "proj_b": params["proj_b"].reshape(1, -1).astype(jnp.float32),
        "proj_gamma": params["proj_gamma"].reshape(1, -1).astype(jnp.float32),
        "proj_beta": params["proj_beta"].reshape(1, -1).astype(jnp.float32),
        "wm1_h": wm1[:emb_out].astype(jnp.bfloat16),
        "wm1_z": wm1[emb_out:].astype(jnp.bfloat16),
        "bn1_g": params["bn1_g"].astype(jnp.float32),
        "bn1_b": params["bn1_b"].astype(jnp.float32),
    }
    for name, bn in (("ct2", "bn2"), ("ct3", "bn3"), ("ct4", "bn4"),
                     ("ct5", None)):
        prep[name] = _prepack_ct_weight(params[name])
        if bn is not None:
            prep[bn + "_g"] = params[bn + "_g"].astype(jnp.float32)
            prep[bn + "_b"] = params[bn + "_b"].astype(jnp.float32)
    return prep


# --------------------------------------------------------------------------
# Generator forward
# --------------------------------------------------------------------------
def generator_forward(prep, embedding, z):
    B = embedding.shape[0]
    Cout1 = prep["bn1_g"].shape[0]

    # Fused head: projection + BN1d + LeakyReLU + concat(z) + ct1 (+ bn1 stats).
    y2, s, ss = head_fused(prep, embedding, z)
    scale, shift = bn_scale_shift(_reduce_cols(s, Cout1), _reduce_cols(ss, Cout1),
                                  B * 16, prep["bn1_g"], prep["bn1_b"])
    h = bn_act(y2.reshape(B * 16, Cout1), scale, shift, "relu")
    cur = h.reshape(B, 4, 4, Cout1)                            # NHWC

    # ct2..ct5: stride-2 transposed convs, sub-pixel decomposition with the
    # four parity GEMMs concatenated along N (lane-dense outputs).
    for name, bn, act in (("ct2", "bn2", "relu"), ("ct3", "bn3", "relu"),
                          ("ct4", "bn4", "relu"), ("ct5", None, "tanh")):
        Bc, H, W, _ = cur.shape
        wcat = prep[name]
        Cout = wcat.shape[1] // 4
        A = _nine_tap_patches(cur)
        M = Bc * H * W
        if bn is not None:
            y, s, ss = gemm_bn_stats(A, wcat, stats=True)
            scale, shift = bn_scale_shift(_reduce_cols(s, Cout),
                                          _reduce_cols(ss, Cout),
                                          4 * M, prep[bn + "_g"],
                                          prep[bn + "_b"])
            ya = bn_act(y, scale, shift, act)
        else:   # final layer: no BN, tanh fused into the GEMM epilogue
            ya = gemm_bn_stats(A, wcat, stats=False, act="tanh",
                               out_dtype=jnp.float32)
        cur = _interleave_parities(ya, Bc, H, W, Cout)

    return jnp.transpose(cur, (0, 3, 1, 2)).astype(jnp.float32)   # NCHW


# --------------------------------------------------------------------------
# Deterministic parameter init (synthetic, not a checkpoint)
# --------------------------------------------------------------------------
def init_params(key, nx, emb_out, nz, ngf, nc):
    ks = jax.random.split(key, 20)

    def nrm(k, shape, s=0.05):
        return (s * jax.random.normal(k, shape)).astype(jnp.float32)

    cin0 = emb_out + nz
    return {
        "proj_w": nrm(ks[0], (emb_out, nx)),
        "proj_b": nrm(ks[1], (emb_out,)),
        "proj_gamma": 1.0 + nrm(ks[2], (emb_out,)),
        "proj_beta": nrm(ks[3], (emb_out,)),
        "ct1": nrm(ks[4], (cin0, ngf * 8, 4, 4)),
        "bn1_g": 1.0 + nrm(ks[5], (ngf * 8,)), "bn1_b": nrm(ks[6], (ngf * 8,)),
        "ct2": nrm(ks[7], (ngf * 8, ngf * 4, 4, 4)),
        "bn2_g": 1.0 + nrm(ks[8], (ngf * 4,)), "bn2_b": nrm(ks[9], (ngf * 4,)),
        "ct3": nrm(ks[10], (ngf * 4, ngf * 2, 4, 4)),
        "bn3_g": 1.0 + nrm(ks[11], (ngf * 2,)), "bn3_b": nrm(ks[12], (ngf * 2,)),
        "ct4": nrm(ks[13], (ngf * 2, ngf, 4, 4)),
        "bn4_g": 1.0 + nrm(ks[14], (ngf,)), "bn4_b": nrm(ks[15], (ngf,)),
        "ct5": nrm(ks[16], (ngf, nc, 4, 4)),
    }


if __name__ == "__main__":
    # Small config consistent with the module structure
    # (nx=64, embedding_out=32, nz=16, ngf=16, nc=3, batch=2).
    nx, emb_out, nz, ngf, nc, B = 64, 32, 16, 16, 3, 2

    key = jax.random.PRNGKey(0)
    kp, ke, kz = jax.random.split(key, 3)
    params = init_params(kp, nx, emb_out, nz, ngf, nc)
    embedding = jax.random.normal(ke, (B, nx), jnp.float32)
    z = jax.random.normal(kz, (B, nz), jnp.float32)

    prep = prepack_params(params)                 # one-time weight repack
    out = jax.jit(generator_forward)(prep, embedding, z)
    out = jax.block_until_ready(out)

    assert out.shape == (B, nc, 64, 64), out.shape
    assert out.dtype == jnp.float32
    assert bool(jnp.all(jnp.isfinite(out)))
    assert bool(jnp.all(jnp.abs(out) <= 1.0 + 1e-6))  # tanh output range
    print("KERNEL_OK")
</pallas_src>

<mosaic_0001>
module attributes {stable_mosaic.version = 11 : i64} {
  func.func @_head_kernel(%arg0: i32, %arg1: memref<2x64xbf16, #tpu.memory_space<vmem>>, %arg2: memref<2x16xbf16, #tpu.memory_space<vmem>>, %arg3: memref<64x32xbf16, #tpu.memory_space<vmem>>, %arg4: memref<1x32xf32, #tpu.memory_space<vmem>>, %arg5: memref<1x32xf32, #tpu.memory_space<vmem>>, %arg6: memref<1x32xf32, #tpu.memory_space<vmem>>, %arg7: memref<32x1024xbf16, #tpu.memory_space<vmem>>, %arg8: memref<16x1024xbf16, #tpu.memory_space<vmem>>, %arg9: memref<2x1024xf32, #tpu.memory_space<vmem>>, %arg10: memref<1x1024xf32, #tpu.memory_space<vmem>>, %arg11: memref<1x1024xf32, #tpu.memory_space<vmem>>) attributes {dimension_semantics = [#tpu.dimension_semantics<parallel>], iteration_bounds = array<i64: 2>, scalar_prefetch = 0 : i64, scratch_operands = 0 : i64, tpu.core_type = #tpu.core_type<tc>, window_params = [{pipeline_mode = #tpu.pipeline_mode<synchronous>, transform_indices = @transform_0, window_bounds = array<i64: 2, 64>}, {pipeline_mode = #tpu.pipeline_mode<synchronous>, transform_indices = @transform_1, window_bounds = array<i64: 2, 16>}, {pipeline_mode = #tpu.pipeline_mode<synchronous>, transform_indices = @transform_2, window_bounds = array<i64: 64, 32>}, {pipeline_mode = #tpu.pipeline_mode<synchronous>, transform_indices = @transform_3, window_bounds = array<i64: 1, 32>}, {pipeline_mode = #tpu.pipeline_mode<synchronous>, transform_indices = @transform_4, window_bounds = array<i64: 1, 32>}, {pipeline_mode = #tpu.pipeline_mode<synchronous>, transform_indices = @transform_5, window_bounds = array<i64: 1, 32>}, {transform_indices = @transform_6, window_bounds = array<i64: 32, 1024>}, {transform_indices = @transform_7, window_bounds = array<i64: 16, 1024>}, {transform_indices = @transform_8, window_bounds = array<i64: 2, 1024>}, {transform_indices = @transform_9, window_bounds = array<i64: 1, 1024>}, {transform_indices = @transform_10, window_bounds = array<i64: 1, 1024>}]} {
    %c0 = arith.constant 0 : index
    %c0_0 = arith.constant 0 : index
    %0 = vector.load %arg1[%c0, %c0_0] : memref<2x64xbf16, #tpu.memory_space<vmem>>, vector<2x64xbf16>
    %c0_1 = arith.constant 0 : index
    %c0_2 = arith.constant 0 : index
    %1 = vector.load %arg3[%c0_1, %c0_2] : memref<64x32xbf16, #tpu.memory_space<vmem>>, vector<64x32xbf16>
    %cst = arith.constant dense<0.000000e+00> : vector<2x32xf32>
    %2 = tpu.matmul %0, %1, %cst {dimension_numbers = #tpu.dot_dimension_numbers<[1], [0], [0], [1], [0, 0, 1, 1], [], []>} : vector<2x64xbf16>, vector<64x32xbf16>, vector<2x32xf32> -> vector<2x32xf32>
    %c0_3 = arith.constant 0 : index
    %c0_4 = arith.constant 0 : index
    %3 = vector.load %arg4[%c0_3, %c0_4] : memref<1x32xf32, #tpu.memory_space<vmem>>, vector<1x32xf32>
    %4 = vector.broadcast %3 : vector<1x32xf32> to vector<2x32xf32>
    %5 = arith.addf %2, %4 : vector<2x32xf32>
    %cst_5 = arith.constant dense<0.000000e+00> : vector<32xf32>
    %6 = vector.multi_reduction <add>, %5, %cst_5 [0] : vector<2x32xf32> to vector<32xf32>
    %7 = vector.shape_cast %6 : vector<32xf32> to vector<1x32xf32>
    %cst_6 = arith.constant 2.000000e+00 : f32
    %8 = vector.broadcast %cst_6 : f32 to vector<1x32xf32>
    %9 = arith.divf %7, %8 : vector<1x32xf32>
    %10 = vector.broadcast %9 : vector<1x32xf32> to vector<2x32xf32>
    %11 = arith.subf %5, %10 : vector<2x32xf32>
    %12 = arith.mulf %11, %11 : vector<2x32xf32>
    %cst_7 = arith.constant dense<0.000000e+00> : vector<32xf32>
    %13 = vector.multi_reduction <add>, %12, %cst_7 [0] : vector<2x32xf32> to vector<32xf32>
    %14 = vector.shape_cast %13 : vector<32xf32> to vector<1x32xf32>
    %cst_8 = arith.constant 2.000000e+00 : f32
    %15 = vector.broadcast %cst_8 : f32 to vector<1x32xf32>
    %16 = arith.divf %14, %15 : vector<1x32xf32>
    %c0_9 = arith.constant 0 : index
    %c0_10 = arith.constant 0 : index
    %17 = vector.load %arg5[%c0_9, %c0_10] : memref<1x32xf32, #tpu.memory_space<vmem>>, vector<1x32xf32>
    %cst_11 = arith.constant 9.99999974E-6 : f32
    %18 = vector.broadcast %cst_11 : f32 to vector<1x32xf32>
    %19 = arith.addf %16, %18 : vector<1x32xf32>
    %20 = math.rsqrt %19 : vector<1x32xf32>
    %21 = arith.mulf %17, %20 : vector<1x32xf32>
    %22 = vector.broadcast %21 : vector<1x32xf32> to vector<2x32xf32>
    %23 = arith.mulf %11, %22 : vector<2x32xf32>
    %c0_12 = arith.constant 0 : index
    %c0_13 = arith.constant 0 : index
    %24 = vector.load %arg6[%c0_12, %c0_13] : memref<1x32xf32, #tpu.memory_space<vmem>>, vector<1x32xf32>
    %25 = vector.broadcast %24 : vector<1x32xf32> to vector<2x32xf32>
    %26 = arith.addf %23, %25 : vector<2x32xf32>
    %cst_14 = arith.constant 0.000000e+00 : f32
    %27 = vector.broadcast %cst_14 : f32 to vector<2x32xf32>
    %28 = arith.cmpf ogt, %26, %27 : vector<2x32xf32>
    %cst_15 = arith.constant 2.000000e-01 : f32
    %29 = vector.broadcast %cst_15 : f32 to vector<2x32xf32>
    %30 = arith.mulf %29, %26 : vector<2x32xf32>
    %31 = arith.select %28, %26, %30 : vector<2x32xi1>, vector<2x32xf32>
    %32 = arith.truncf %31 : vector<2x32xf32> to vector<2x32xbf16>
    %c0_16 = arith.constant 0 : index
    %c0_17 = arith.constant 0 : index
    %33 = vector.load %arg7[%c0_16, %c0_17] : memref<32x1024xbf16, #tpu.memory_space<vmem>>, vector<32x1024xbf16>
    %cst_18 = arith.constant dense<0.000000e+00> : vector<2x1024xf32>
    %34 = tpu.matmul %32, %33, %cst_18 {dimension_numbers = #tpu.dot_dimension_numbers<[1], [0], [0], [1], [0, 0, 1, 1], [], []>} : vector<2x32xbf16>, vector<32x1024xbf16>, vector<2x1024xf32> -> vector<2x1024xf32>
    %c0_19 = arith.constant 0 : index
    %c0_20 = arith.constant 0 : index
    %35 = vector.load %arg2[%c0_19, %c0_20] : memref<2x16xbf16, #tpu.memory_space<vmem>>, vector<2x16xbf16>
    %c0_21 = arith.constant 0 : index
    %c0_22 = arith.constant 0 : index
    %36 = vector.load %arg8[%c0_21, %c0_22] : memref<16x1024xbf16, #tpu.memory_space<vmem>>, vector<16x1024xbf16>
    %cst_23 = arith.constant dense<0.000000e+00> : vector<2x1024xf32>
    %37 = tpu.matmul %35, %36, %cst_23 {dimension_numbers = #tpu.dot_dimension_numbers<[1], [0], [0], [1], [0, 0, 1, 1], [], []>} : vector<2x16xbf16>, vector<16x1024xbf16>, vector<2x1024xf32> -> vector<2x1024xf32>
    %38 = arith.addf %34, %37 : vector<2x1024xf32>
    %c0_24 = arith.constant 0 : index
    %c0_25 = arith.constant 0 : index
    %39 = vector.load %arg9[%c0_24, %c0_25] : memref<2x1024xf32, #tpu.memory_space<vmem>>, vector<2x1024xf32>
    tpu.vector_store %arg9[%c0_24, %c0_25], %38 {strides = array<i32>} : memref<2x1024xf32, #tpu.memory_space<vmem>>, vector<2x1024xf32>,
    %cst_26 = arith.constant dense<0.000000e+00> : vector<1024xf32>
    %40 = vector.multi_reduction <add>, %38, %cst_26 [0] : vector<2x1024xf32> to vector<1024xf32>
    %41 = vector.shape_cast %40 : vector<1024xf32> to vector<1x1024xf32>
    %c0_27 = arith.constant 0 : index
    %c0_28 = arith.constant 0 : index
    %42 = vector.load %arg10[%c0_27, %c0_28] : memref<1x1024xf32, #tpu.memory_space<vmem>>, vector<1x1024xf32>
    tpu.vector_store %arg10[%c0_27, %c0_28], %41 {strides = array<i32>} : memref<1x1024xf32, #tpu.memory_space<vmem>>, vector<1x1024xf32>,
    %43 = arith.mulf %38, %38 : vector<2x1024xf32>
    %cst_29 = arith.constant dense<0.000000e+00> : vector<1024xf32>
    %44 = vector.multi_reduction <add>, %43, %cst_29 [0] : vector<2x1024xf32> to vector<1024xf32>
    %45 = vector.shape_cast %44 : vector<1024xf32> to vector<1x1024xf32>
    %c0_30 = arith.constant 0 : index
    %c0_31 = arith.constant 0 : index
    %46 = vector.load %arg11[%c0_30, %c0_31] : memref<1x1024xf32, #tpu.memory_space<vmem>>, vector<1x1024xf32>
    tpu.vector_store %arg11[%c0_30, %c0_31], %45 {strides = array<i32>} : memref<1x1024xf32, #tpu.memory_space<vmem>>, vector<1x1024xf32>,
    return
  }
  func.func @transform_0(%arg0: i32) -> (i32, i32) {
    %c0_i32 = arith.constant 0 : i32
    %c0_i32_0 = arith.constant 0 : i32
    %c0_i32_1 = arith.constant 0 : i32
    return %c0_i32, %c0_i32_0 : i32, i32
  }
  func.func @transform_1(%arg0: i32) -> (i32, i32) {
    %c0_i32 = arith.constant 0 : i32
    %c0_i32_0 = arith.constant 0 : i32
    %c0_i32_1 = arith.constant 0 : i32
    return %c0_i32, %c0_i32_0 : i32, i32
  }
  func.func @transform_2(%arg0: i32) -> (i32, i32) {
    %c0_i32 = arith.constant 0 : i32
    %c0_i32_0 = arith.constant 0 : i32
    %c0_i32_1 = arith.constant 0 : i32
    return %c0_i32, %c0_i32_0 : i32, i32
  }
  func.func @transform_3(%arg0: i32) -> (i32, i32) {
    %c0_i32 = arith.constant 0 : i32
    %c0_i32_0 = arith.constant 0 : i32
    %c0_i32_1 = arith.constant 0 : i32
    return %c0_i32, %c0_i32_0 : i32, i32
  }
  func.func @transform_4(%arg0: i32) -> (i32, i32) {
    %c0_i32 = arith.constant 0 : i32
    %c0_i32_0 = arith.constant 0 : i32
    %c0_i32_1 = arith.constant 0 : i32
    return %c0_i32, %c0_i32_0 : i32, i32
  }
  func.func @transform_5(%arg0: i32) -> (i32, i32) {
    %c0_i32 = arith.constant 0 : i32
    %c0_i32_0 = arith.constant 0 : i32
    %c0_i32_1 = arith.constant 0 : i32
    return %c0_i32, %c0_i32_0 : i32, i32
  }
  func.func @transform_6(%arg0: i32) -> (i32, i32) {
    %c0_i32 = arith.constant 0 : i32
    %c0_i32_0 = arith.constant 0 : i32
    return %c0_i32, %arg0 : i32, i32
  }
  func.func @transform_7(%arg0: i32) -> (i32, i32) {
    %c0_i32 = arith.constant 0 : i32
    %c0_i32_0 = arith.constant 0 : i32
    return %c0_i32, %arg0 : i32, i32
  }
  func.func @transform_8(%arg0: i32) -> (i32, i32) {
    %c0_i32 = arith.constant 0 : i32
    %c0_i32_0 = arith.constant 0 : i32
    return %c0_i32, %arg0 : i32, i32
  }
  func.func @transform_9(%arg0: i32) -> (i32, i32) {
    %c0_i32 = arith.constant 0 : i32
    %c0_i32_0 = arith.constant 0 : i32
    return %c0_i32, %arg0 : i32, i32
  }
  func.func @transform_10(%arg0: i32) -> (i32, i32) {
    %c0_i32 = arith.constant 0 : i32
    %c0_i32_0 = arith.constant 0 : i32
    return %c0_i32, %arg0 : i32, i32
  }
}

module attributes {stable_mosaic.version = 11 : i64} {
  func.func @_bn_act_kernel(%arg0: i32, %arg1: memref<32x128xf32, #tpu.memory_space<vmem>>, %arg2: memref<1x128xf32, #tpu.memory_space<vmem>>, %arg3: memref<1x128xf32, #tpu.memory_space<vmem>>, %arg4: memref<32x128xbf16, #tpu.memory_space<vmem>>) attributes {dimension_semantics = [#tpu.dimension_semantics<parallel>], iteration_bounds = array<i64: 1>, scalar_prefetch = 0 : i64, scratch_operands = 0 : i64, tpu.core_type = #tpu.core_type<tc>, window_params = [{transform_indices = @transform_0, window_bounds = array<i64: 32, 128>}, {pipeline_mode = #tpu.pipeline_mode<synchronous>, transform_indices = @transform_1, window_bounds = array<i64: 1, 128>}, {pipeline_mode = #tpu.pipeline_mode<synchronous>, transform_indices = @transform_2, window_bounds = array<i64: 1, 128>}, {transform_indices = @transform_3, window_bounds = array<i64: 32, 128>}]} {
    %c0 = arith.constant 0 : index
    %c0_0 = arith.constant 0 : index
    %0 = vector.load %arg1[%c0, %c0_0] : memref<32x128xf32, #tpu.memory_space<vmem>>, vector<32x128xf32>
    %c0_1 = arith.constant 0 : index
    %c0_2 = arith.constant 0 : index
    %1 = vector.load %arg2[%c0_1, %c0_2] : memref<1x128xf32, #tpu.memory_space<vmem>>, vector<1x128xf32>
    %2 = vector.broadcast %1 : vector<1x128xf32> to vector<32x128xf32>
    %3 = arith.mulf %0, %2 : vector<32x128xf32>
    %c0_3 = arith.constant 0 : index
    %c0_4 = arith.constant 0 : index
    %4 = vector.load %arg3[%c0_3, %c0_4] : memref<1x128xf32, #tpu.memory_space<vmem>>, vector<1x128xf32>
    %5 = vector.broadcast %4 : vector<1x128xf32> to vector<32x128xf32>
    %6 = arith.addf %3, %5 : vector<32x128xf32>
    %cst = arith.constant 0.000000e+00 : f32
    %7 = vector.broadcast %cst : f32 to vector<32x128xf32>
    %8 = arith.maximumf %6, %7 : vector<32x128xf32>
    %9 = arith.truncf %8 : vector<32x128xf32> to vector<32x128xbf16>
    %c0_5 = arith.constant 0 : index
    %c0_6 = arith.constant 0 : index
    %10 = vector.load %arg4[%c0_5, %c0_6] : memref<32x128xbf16, #tpu.memory_space<vmem>>, vector<32x128xbf16>
    tpu.vector_store %arg4[%c0_5, %c0_6], %9 {strides = array<i32>} : memref<32x128xbf16, #tpu.memory_space<vmem>>, vector<32x128xbf16>,
    return
  }
  func.func @transform_0(%arg0: i32) -> (i32, i32) {
    %c0_i32 = arith.constant 0 : i32
    %c0_i32_0 = arith.constant 0 : i32
    return %arg0, %c0_i32 : i32, i32
  }
  func.func @transform_1(%arg0: i32) -> (i32, i32) {
    %c0_i32 = arith.constant 0 : i32
    %c0_i32_0 = arith.constant 0 : i32
    %c0_i32_1 = arith.constant 0 : i32
    return %c0_i32, %c0_i32_0 : i32, i32
  }
  func.func @transform_2(%arg0: i32) -> (i32, i32) {
    %c0_i32 = arith.constant 0 : i32
    %c0_i32_0 = arith.constant 0 : i32
    %c0_i32_1 = arith.constant 0 : i32
    return %c0_i32, %c0_i32_0 : i32, i32
  }
  func.func @transform_3(%arg0: i32) -> (i32, i32) {
    %c0_i32 = arith.constant 0 : i32
    %c0_i32_0 = arith.constant 0 : i32
    return %arg0, %c0_i32 : i32, i32
  }
}

module attributes {stable_mosaic.version = 11 : i64} {
  func.func @_gemm_stats_kernel(%arg0: i32, %arg1: i32, %arg2: memref<32x1152xbf16, #tpu.memory_space<vmem>>, %arg3: memref<1152x256xbf16, #tpu.memory_space<vmem>>, %arg4: memref<32x256xf32, #tpu.memory_space<vmem>>, %arg5: memref<1x1x256xf32, #tpu.memory_space<vmem>>, %arg6: memref<1x1x256xf32, #tpu.memory_space<vmem>>) attributes {dimension_semantics = [#tpu.dimension_semantics<parallel>, #tpu.dimension_semantics<arbitrary>], iteration_bounds = array<i64: 1, 1>, scalar_prefetch = 0 : i64, scratch_operands = 0 : i64, tpu.core_type = #tpu.core_type<tc>, window_params = [{transform_indices = @transform_0, window_bounds = array<i64: 32, 1152>}, {pipeline_mode = #tpu.pipeline_mode<synchronous>, transform_indices = @transform_1, window_bounds = array<i64: 1152, 256>}, {transform_indices = @transform_2, window_bounds = array<i64: 32, 256>}, {transform_indices = @transform_3, window_bounds = array<i64: 1, 1, 256>}, {transform_indices = @transform_4, window_bounds = array<i64: 1, 1, 256>}]} {
    %c0 = arith.constant 0 : index
    %c0_0 = arith.constant 0 : index
    %0 = vector.load %arg2[%c0, %c0_0] : memref<32x1152xbf16, #tpu.memory_space<vmem>>, vector<32x1152xbf16>
    %c0_1 = arith.constant 0 : index
    %c0_2 = arith.constant 0 : index
    %1 = vector.load %arg3[%c0_1, %c0_2] : memref<1152x256xbf16, #tpu.memory_space<vmem>>, vector<1152x256xbf16>
    %cst = arith.constant dense<0.000000e+00> : vector<32x256xf32>
    %2 = tpu.matmul %0, %1, %cst {dimension_numbers = #tpu.dot_dimension_numbers<[1], [0], [0], [1], [0, 0, 1, 1], [], []>} : vector<32x1152xbf16>, vector<1152x256xbf16>, vector<32x256xf32> -> vector<32x256xf32>
    %c0_3 = arith.constant 0 : index
    %c0_4 = arith.constant 0 : index
    %3 = vector.load %arg4[%c0_3, %c0_4] : memref<32x256xf32, #tpu.memory_space<vmem>>, vector<32x256xf32>
    tpu.vector_store %arg4[%c0_3, %c0_4], %2 {strides = array<i32>} : memref<32x256xf32, #tpu.memory_space<vmem>>, vector<32x256xf32>,
    %c0_i32 = arith.constant 0 : i32
    %4 = arith.cmpi eq, %arg1, %c0_i32 : i32
    %5 = arith.extui %4 : i1 to i32
    %c0_i32_5 = arith.constant 0 : i32
    %6 = arith.cmpi ne, %5, %c0_i32_5 : i32
    scf.if %6 {
      %cst_20 = arith.constant 0.000000e+00 : f32
      %24 = vector.broadcast %cst_20 : f32 to vector<1x256xf32>
      %c0_21 = arith.constant 0 : index
      %c0_22 = arith.constant 0 : index
      %c0_23 = arith.constant 0 : index
      %25 = vector.load %arg5[%c0_21, %c0_22, %c0_23] : memref<1x1x256xf32, #tpu.memory_space<vmem>>, vector<1x1x256xf32>
      %26 = vector.shape_cast %25 : vector<1x1x256xf32> to vector<1x256xf32>
      %27 = vector.shape_cast %24 : vector<1x256xf32> to vector<1x1x256xf32>
      tpu.vector_store %arg5[%c0_21, %c0_22, %c0_23], %27 {strides = array<i32>} : memref<1x1x256xf32, #tpu.memory_space<vmem>>, vector<1x1x256xf32>,
      %cst_24 = arith.constant 0.000000e+00 : f32
      %28 = vector.broadcast %cst_24 : f32 to vector<1x256xf32>
      %c0_25 = arith.constant 0 : index
      %c0_26 = arith.constant 0 : index
      %c0_27 = arith.constant 0 : index
      %29 = vector.load %arg6[%c0_25, %c0_26, %c0_27] : memref<1x1x256xf32, #tpu.memory_space<vmem>>, vector<1x1x256xf32>
      %30 = vector.shape_cast %29 : vector<1x1x256xf32> to vector<1x256xf32>
      %31 = vector.shape_cast %28 : vector<1x256xf32> to vector<1x1x256xf32>
      tpu.vector_store %arg6[%c0_25, %c0_26, %c0_27], %31 {strides = array<i32>} : memref<1x1x256xf32, #tpu.memory_space<vmem>>, vector<1x1x256xf32>,
    } else {
    }
    %c0_6 = arith.constant 0 : index
    %c0_7 = arith.constant 0 : index
    %c0_8 = arith.constant 0 : index
    %7 = vector.load %arg5[%c0_6, %c0_7, %c0_8] : memref<1x1x256xf32, #tpu.memory_space<vmem>>, vector<1x1x256xf32>
    %8 = vector.shape_cast %7 : vector<1x1x256xf32> to vector<1x256xf32>
    %cst_9 = arith.constant dense<0.000000e+00> : vector<256xf32>
    %9 = vector.multi_reduction <add>, %2, %cst_9 [0] : vector<32x256xf32> to vector<256xf32>
    %10 = vector.shape_cast %9 : vector<256xf32> to vector<1x256xf32>
    %11 = arith.addf %8, %10 : vector<1x256xf32>
    %c0_10 = arith.constant 0 : index
    %c0_11 = arith.constant 0 : index
    %c0_12 = arith.constant 0 : index
    %12 = vector.load %arg5[%c0_10, %c0_11, %c0_12] : memref<1x1x256xf32, #tpu.memory_space<vmem>>, vector<1x1x256xf32>
    %13 = vector.shape_cast %12 : vector<1x1x256xf32> to vector<1x256xf32>
    %14 = vector.shape_cast %11 : vector<1x256xf32> to vector<1x1x256xf32>
    tpu.vector_store %arg5[%c0_10, %c0_11, %c0_12], %14 {strides = array<i32>} : memref<1x1x256xf32, #tpu.memory_space<vmem>>, vector<1x1x256xf32>,
    %c0_13 = arith.constant 0 : index
    %c0_14 = arith.constant 0 : index
    %c0_15 = arith.constant 0 : index
    %15 = vector.load %arg6[%c0_13, %c0_14, %c0_15] : memref<1x1x256xf32, #tpu.memory_space<vmem>>, vector<1x1x256xf32>
    %16 = vector.shape_cast %15 : vector<1x1x256xf32> to vector<1x256xf32>
    %17 = arith.mulf %2, %2 : vector<32x256xf32>
    %cst_16 = arith.constant dense<0.000000e+00> : vector<256xf32>
    %18 = vector.multi_reduction <add>, %17, %cst_16 [0] : vector<32x256xf32> to vector<256xf32>
    %19 = vector.shape_cast %18 : vector<256xf32> to vector<1x256xf32>
    %20 = arith.addf %16, %19 : vector<1x256xf32>
    %c0_17 = arith.constant 0 : index
    %c0_18 = arith.constant 0 : index
    %c0_19 = arith.constant 0 : index
    %21 = vector.load %arg6[%c0_17, %c0_18, %c0_19] : memref<1x1x256xf32, #tpu.memory_space<vmem>>, vector<1x1x256xf32>
    %22 = vector.shape_cast %21 : vector<1x1x256xf32> to vector<1x256xf32>
    %23 = vector.shape_cast %20 : vector<1x256xf32> to vector<1x1x256xf32>
    tpu.vector_store %arg6[%c0_17, %c0_18, %c0_19], %23 {strides = array<i32>} : memref<1x1x256xf32, #tpu.memory_space<vmem>>, vector<1x1x256xf32>,
    return
  }
  func.func @transform_0(%arg0: i32, %arg1: i32) -> (i32, i32) {
    %c1_i32 = arith.constant 1 : i32
    %0 = arith.muli %arg0, %c1_i32 : i32
    %1 = arith.addi %0, %arg1 : i32
    %c0_i32 = arith.constant 0 : i32
    %c0_i32_0 = arith.constant 0 : i32
    return %1, %c0_i32 : i32, i32
  }
  func.func @transform_1(%arg0: i32, %arg1: i32) -> (i32, i32) {
    %c0_i32 = arith.constant 0 : i32
    %c0_i32_0 = arith.constant 0 : i32
    %c0_i32_1 = arith.constant 0 : i32
    return %c0_i32, %c0_i32_0 : i32, i32
  }
  func.func @transform_2(%arg0: i32, %arg1: i32) -> (i32, i32) {
    %c1_i32 = arith.constant 1 : i32
    %0 = arith.muli %arg0, %c1_i32 : i32
    %1 = arith.addi %0, %arg1 : i32
    %c0_i32 = arith.constant 0 : i32
    %c0_i32_0 = arith.constant 0 : i32
    return %1, %c0_i32 : i32, i32
  }
  func.func @transform_3(%arg0: i32, %arg1: i32) -> (i32, i32, i32) {
    %c0_i32 = arith.constant 0 : i32
    %c0_i32_0 = arith.constant 0 : i32
    %c0_i32_1 = arith.constant 0 : i32
    return %arg0, %c0_i32, %c0_i32_0 : i32, i32, i32
  }
  func.func @transform_4(%arg0: i32, %arg1: i32) -> (i32, i32, i32) {
    %c0_i32 = arith.constant 0 : i32
    %c0_i32_0 = arith.constant 0 : i32
    %c0_i32_1 = arith.constant 0 : i32
    return %arg0, %c0_i32, %c0_i32_0 : i32, i32, i32
  }
}

module attributes {stable_mosaic.version = 11 : i64} {
  func.func @_bn_act_kernel(%arg0: i32, %arg1: memref<32x256xf32, #tpu.memory_space<vmem>>, %arg2: memref<1x256xf32, #tpu.memory_space<vmem>>, %arg3: memref<1x256xf32, #tpu.memory_space<vmem>>, %arg4: memref<32x256xbf16, #tpu.memory_space<vmem>>) attributes {dimension_semantics = [#tpu.dimension_semantics<parallel>], iteration_bounds = array<i64: 1>, scalar_prefetch = 0 : i64, scratch_operands = 0 : i64, tpu.core_type = #tpu.core_type<tc>, window_params = [{transform_indices = @transform_0, window_bounds = array<i64: 32, 256>}, {pipeline_mode = #tpu.pipeline_mode<synchronous>, transform_indices = @transform_1, window_bounds = array<i64: 1, 256>}, {pipeline_mode = #tpu.pipeline_mode<synchronous>, transform_indices = @transform_2, window_bounds = array<i64: 1, 256>}, {transform_indices = @transform_3, window_bounds = array<i64: 32, 256>}]} {
    %c0 = arith.constant 0 : index
    %c0_0 = arith.constant 0 : index
    %0 = vector.load %arg1[%c0, %c0_0] : memref<32x256xf32, #tpu.memory_space<vmem>>, vector<32x256xf32>
    %c0_1 = arith.constant 0 : index
    %c0_2 = arith.constant 0 : index
    %1 = vector.load %arg2[%c0_1, %c0_2] : memref<1x256xf32, #tpu.memory_space<vmem>>, vector<1x256xf32>
    %2 = vector.broadcast %1 : vector<1x256xf32> to vector<32x256xf32>
    %3 = arith.mulf %0, %2 : vector<32x256xf32>
    %c0_3 = arith.constant 0 : index
    %c0_4 = arith.constant 0 : index
    %4 = vector.load %arg3[%c0_3, %c0_4] : memref<1x256xf32, #tpu.memory_space<vmem>>, vector<1x256xf32>
    %5 = vector.broadcast %4 : vector<1x256xf32> to vector<32x256xf32>
    %6 = arith.addf %3, %5 : vector<32x256xf32>
    %cst = arith.constant 0.000000e+00 : f32
    %7 = vector.broadcast %cst : f32 to vector<32x256xf32>
    %8 = arith.maximumf %6, %7 : vector<32x256xf32>
    %9 = arith.truncf %8 : vector<32x256xf32> to vector<32x256xbf16>
    %c0_5 = arith.constant 0 : index
    %c0_6 = arith.constant 0 : index
    %10 = vector.load %arg4[%c0_5, %c0_6] : memref<32x256xbf16, #tpu.memory_space<vmem>>, vector<32x256xbf16>
    tpu.vector_store %arg4[%c0_5, %c0_6], %9 {strides = array<i32>} : memref<32x256xbf16, #tpu.memory_space<vmem>>, vector<32x256xbf16>,
    return
  }
  func.func @transform_0(%arg0: i32) -> (i32, i32) {
    %c0_i32 = arith.constant 0 : i32
    %c0_i32_0 = arith.constant 0 : i32
    return %arg0, %c0_i32 : i32, i32
  }
  func.func @transform_1(%arg0: i32) -> (i32, i32) {
    %c0_i32 = arith.constant 0 : i32
    %c0_i32_0 = arith.constant 0 : i32
    %c0_i32_1 = arith.constant 0 : i32
    return %c0_i32, %c0_i32_0 : i32, i32
  }
  func.func @transform_2(%arg0: i32) -> (i32, i32) {
    %c0_i32 = arith.constant 0 : i32
    %c0_i32_0 = arith.constant 0 : i32
    %c0_i32_1 = arith.constant 0 : i32
    return %c0_i32, %c0_i32_0 : i32, i32
  }
  func.func @transform_3(%arg0: i32) -> (i32, i32) {
    %c0_i32 = arith.constant 0 : i32
    %c0_i32_0 = arith.constant 0 : i32
    return %arg0, %c0_i32 : i32, i32
  }
}

module attributes {stable_mosaic.version = 11 : i64} {
  func.func @_gemm_stats_kernel(%arg0: i32, %arg1: i32, %arg2: memref<128x576xbf16, #tpu.memory_space<vmem>>, %arg3: memref<576x128xbf16, #tpu.memory_space<vmem>>, %arg4: memref<128x128xf32, #tpu.memory_space<vmem>>, %arg5: memref<1x1x128xf32, #tpu.memory_space<vmem>>, %arg6: memref<1x1x128xf32, #tpu.memory_space<vmem>>) attributes {dimension_semantics = [#tpu.dimension_semantics<parallel>, #tpu.dimension_semantics<arbitrary>], iteration_bounds = array<i64: 1, 1>, scalar_prefetch = 0 : i64, scratch_operands = 0 : i64, tpu.core_type = #tpu.core_type<tc>, window_params = [{transform_indices = @transform_0, window_bounds = array<i64: 128, 576>}, {pipeline_mode = #tpu.pipeline_mode<synchronous>, transform_indices = @transform_1, window_bounds = array<i64: 576, 128>}, {transform_indices = @transform_2, window_bounds = array<i64: 128, 128>}, {transform_indices = @transform_3, window_bounds = array<i64: 1, 1, 128>}, {transform_indices = @transform_4, window_bounds = array<i64: 1, 1, 128>}]} {
    %c0 = arith.constant 0 : index
    %c0_0 = arith.constant 0 : index
    %0 = vector.load %arg2[%c0, %c0_0] : memref<128x576xbf16, #tpu.memory_space<vmem>>, vector<128x576xbf16>
    %c0_1 = arith.constant 0 : index
    %c0_2 = arith.constant 0 : index
    %1 = vector.load %arg3[%c0_1, %c0_2] : memref<576x128xbf16, #tpu.memory_space<vmem>>, vector<576x128xbf16>
    %cst = arith.constant dense<0.000000e+00> : vector<128x128xf32>
    %2 = tpu.matmul %0, %1, %cst {dimension_numbers = #tpu.dot_dimension_numbers<[1], [0], [0], [1], [0, 0, 1, 1], [], []>} : vector<128x576xbf16>, vector<576x128xbf16>, vector<128x128xf32> -> vector<128x128xf32>
    %c0_3 = arith.constant 0 : index
    %c0_4 = arith.constant 0 : index
    %3 = vector.load %arg4[%c0_3, %c0_4] : memref<128x128xf32, #tpu.memory_space<vmem>>, vector<128x128xf32>
    tpu.vector_store %arg4[%c0_3, %c0_4], %2 {strides = array<i32>} : memref<128x128xf32, #tpu.memory_space<vmem>>, vector<128x128xf32>,
    %c0_i32 = arith.constant 0 : i32
    %4 = arith.cmpi eq, %arg1, %c0_i32 : i32
    %5 = arith.extui %4 : i1 to i32
    %c0_i32_5 = arith.constant 0 : i32
    %6 = arith.cmpi ne, %5, %c0_i32_5 : i32
    scf.if %6 {
      %cst_20 = arith.constant 0.000000e+00 : f32
      %24 = vector.broadcast %cst_20 : f32 to vector<1x128xf32>
      %c0_21 = arith.constant 0 : index
      %c0_22 = arith.constant 0 : index
      %c0_23 = arith.constant 0 : index
      %25 = vector.load %arg5[%c0_21, %c0_22, %c0_23] : memref<1x1x128xf32, #tpu.memory_space<vmem>>, vector<1x1x128xf32>
      %26 = vector.shape_cast %25 : vector<1x1x128xf32> to vector<1x128xf32>
      %27 = vector.shape_cast %24 : vector<1x128xf32> to vector<1x1x128xf32>
      tpu.vector_store %arg5[%c0_21, %c0_22, %c0_23], %27 {strides = array<i32>} : memref<1x1x128xf32, #tpu.memory_space<vmem>>, vector<1x1x128xf32>,
      %cst_24 = arith.constant 0.000000e+00 : f32
      %28 = vector.broadcast %cst_24 : f32 to vector<1x128xf32>
      %c0_25 = arith.constant 0 : index
      %c0_26 = arith.constant 0 : index
      %c0_27 = arith.constant 0 : index
      %29 = vector.load %arg6[%c0_25, %c0_26, %c0_27] : memref<1x1x128xf32, #tpu.memory_space<vmem>>, vector<1x1x128xf32>
      %30 = vector.shape_cast %29 : vector<1x1x128xf32> to vector<1x128xf32>
      %31 = vector.shape_cast %28 : vector<1x128xf32> to vector<1x1x128xf32>
      tpu.vector_store %arg6[%c0_25, %c0_26, %c0_27], %31 {strides = array<i32>} : memref<1x1x128xf32, #tpu.memory_space<vmem>>, vector<1x1x128xf32>,
    } else {
    }
    %c0_6 = arith.constant 0 : index
    %c0_7 = arith.constant 0 : index
    %c0_8 = arith.constant 0 : index
    %7 = vector.load %arg5[%c0_6, %c0_7, %c0_8] : memref<1x1x128xf32, #tpu.memory_space<vmem>>, vector<1x1x128xf32>
    %8 = vector.shape_cast %7 : vector<1x1x128xf32> to vector<1x128xf32>
    %cst_9 = arith.constant dense<0.000000e+00> : vector<128xf32>
    %9 = vector.multi_reduction <add>, %2, %cst_9 [0] : vector<128x128xf32> to vector<128xf32>
    %10 = vector.shape_cast %9 : vector<128xf32> to vector<1x128xf32>
    %11 = arith.addf %8, %10 : vector<1x128xf32>
    %c0_10 = arith.constant 0 : index
    %c0_11 = arith.constant 0 : index
    %c0_12 = arith.constant 0 : index
    %12 = vector.load %arg5[%c0_10, %c0_11, %c0_12] : memref<1x1x128xf32, #tpu.memory_space<vmem>>, vector<1x1x128xf32>
    %13 = vector.shape_cast %12 : vector<1x1x128xf32> to vector<1x128xf32>
    %14 = vector.shape_cast %11 : vector<1x128xf32> to vector<1x1x128xf32>
    tpu.vector_store %arg5[%c0_10, %c0_11, %c0_12], %14 {strides = array<i32>} : memref<1x1x128xf32, #tpu.memory_space<vmem>>, vector<1x1x128xf32>,
    %c0_13 = arith.constant 0 : index
    %c0_14 = arith.constant 0 : index
    %c0_15 = arith.constant 0 : index
    %15 = vector.load %arg6[%c0_13, %c0_14, %c0_15] : memref<1x1x128xf32, #tpu.memory_space<vmem>>, vector<1x1x128xf32>
    %16 = vector.shape_cast %15 : vector<1x1x128xf32> to vector<1x128xf32>
    %17 = arith.mulf %2, %2 : vector<128x128xf32>
    %cst_16 = arith.constant dense<0.000000e+00> : vector<128xf32>
    %18 = vector.multi_reduction <add>, %17, %cst_16 [0] : vector<128x128xf32> to vector<128xf32>
    %19 = vector.shape_cast %18 : vector<128xf32> to vector<1x128xf32>
    %20 = arith.addf %16, %19 : vector<1x128xf32>
    %c0_17 = arith.constant 0 : index
    %c0_18 = arith.constant 0 : index
    %c0_19 = arith.constant 0 : index
    %21 = vector.load %arg6[%c0_17, %c0_18, %c0_19] : memref<1x1x128xf32, #tpu.memory_space<vmem>>, vector<1x1x128xf32>
    %22 = vector.shape_cast %21 : vector<1x1x128xf32> to vector<1x128xf32>
    %23 = vector.shape_cast %20 : vector<1x128xf32> to vector<1x1x128xf32>
    tpu.vector_store %arg6[%c0_17, %c0_18, %c0_19], %23 {strides = array<i32>} : memref<1x1x128xf32, #tpu.memory_space<vmem>>, vector<1x1x128xf32>,
    return
  }
  func.func @transform_0(%arg0: i32, %arg1: i32) -> (i32, i32) {
    %c1_i32 = arith.constant 1 : i32
    %0 = arith.muli %arg0, %c1_i32 : i32
    %1 = arith.addi %0, %arg1 : i32
    %c0_i32 = arith.constant 0 : i32
    %c0_i32_0 = arith.constant 0 : i32
    return %1, %c0_i32 : i32, i32
  }
  func.func @transform_1(%arg0: i32, %arg1: i32) -> (i32, i32) {
    %c0_i32 = arith.constant 0 : i32
    %c0_i32_0 = arith.constant 0 : i32
    %c0_i32_1 = arith.constant 0 : i32
    return %c0_i32, %c0_i32_0 : i32, i32
  }
  func.func @transform_2(%arg0: i32, %arg1: i32) -> (i32, i32) {
    %c1_i32 = arith.constant 1 : i32
    %0 = arith.muli %arg0, %c1_i32 : i32
    %1 = arith.addi %0, %arg1 : i32
    %c0_i32 = arith.constant 0 : i32
    %c0_i32_0 = arith.constant 0 : i32
    return %1, %c0_i32 : i32, i32
  }
  func.func @transform_3(%arg0: i32, %arg1: i32) -> (i32, i32, i32) {
    %c0_i32 = arith.constant 0 : i32
    %c0_i32_0 = arith.constant 0 : i32
    %c0_i32_1 = arith.constant 0 : i32
    return %arg0, %c0_i32, %c0_i32_0 : i32, i32, i32
  }
  func.func @transform_4(%arg0: i32, %arg1: i32) -> (i32, i32, i32) {
    %c0_i32 = arith.constant 0 : i32
    %c0_i32_0 = arith.constant 0 : i32
    %c0_i32_1 = arith.constant 0 : i32
    return %arg0, %c0_i32, %c0_i32_0 : i32, i32, i32
  }
}

module attributes {stable_mosaic.version = 11 : i64} {
  func.func @_bn_act_kernel(%arg0: i32, %arg1: memref<128x128xf32, #tpu.memory_space<vmem>>, %arg2: memref<1x128xf32, #tpu.memory_space<vmem>>, %arg3: memref<1x128xf32, #tpu.memory_space<vmem>>, %arg4: memref<128x128xbf16, #tpu.memory_space<vmem>>) attributes {dimension_semantics = [#tpu.dimension_semantics<parallel>], iteration_bounds = array<i64: 1>, scalar_prefetch = 0 : i64, scratch_operands = 0 : i64, tpu.core_type = #tpu.core_type<tc>, window_params = [{transform_indices = @transform_0, window_bounds = array<i64: 128, 128>}, {pipeline_mode = #tpu.pipeline_mode<synchronous>, transform_indices = @transform_1, window_bounds = array<i64: 1, 128>}, {pipeline_mode = #tpu.pipeline_mode<synchronous>, transform_indices = @transform_2, window_bounds = array<i64: 1, 128>}, {transform_indices = @transform_3, window_bounds = array<i64: 128, 128>}]} {
    %c0 = arith.constant 0 : index
    %c0_0 = arith.constant 0 : index
    %0 = vector.load %arg1[%c0, %c0_0] : memref<128x128xf32, #tpu.memory_space<vmem>>, vector<128x128xf32>
    %c0_1 = arith.constant 0 : index
    %c0_2 = arith.constant 0 : index
    %1 = vector.load %arg2[%c0_1, %c0_2] : memref<1x128xf32, #tpu.memory_space<vmem>>, vector<1x128xf32>
    %2 = vector.broadcast %1 : vector<1x128xf32> to vector<128x128xf32>
    %3 = arith.mulf %0, %2 : vector<128x128xf32>
    %c0_3 = arith.constant 0 : index
    %c0_4 = arith.constant 0 : index
    %4 = vector.load %arg3[%c0_3, %c0_4] : memref<1x128xf32, #tpu.memory_space<vmem>>, vector<1x128xf32>
    %5 = vector.broadcast %4 : vector<1x128xf32> to vector<128x128xf32>
    %6 = arith.addf %3, %5 : vector<128x128xf32>
    %cst = arith.constant 0.000000e+00 : f32
    %7 = vector.broadcast %cst : f32 to vector<128x128xf32>
    %8 = arith.maximumf %6, %7 : vector<128x128xf32>
    %9 = arith.truncf %8 : vector<128x128xf32> to vector<128x128xbf16>
    %c0_5 = arith.constant 0 : index
    %c0_6 = arith.constant 0 : index
    %10 = vector.load %arg4[%c0_5, %c0_6] : memref<128x128xbf16, #tpu.memory_space<vmem>>, vector<128x128xbf16>
    tpu.vector_store %arg4[%c0_5, %c0_6], %9 {strides = array<i32>} : memref<128x128xbf16, #tpu.memory_space<vmem>>, vector<128x128xbf16>,
    return
  }
  func.func @transform_0(%arg0: i32) -> (i32, i32) {
    %c0_i32 = arith.constant 0 : i32
    %c0_i32_0 = arith.constant 0 : i32
    return %arg0, %c0_i32 : i32, i32
  }
  func.func @transform_1(%arg0: i32) -> (i32, i32) {
    %c0_i32 = arith.constant 0 : i32
    %c0_i32_0 = arith.constant 0 : i32
    %c0_i32_1 = arith.constant 0 : i32
    return %c0_i32, %c0_i32_0 : i32, i32
  }
  func.func @transform_2(%arg0: i32) -> (i32, i32) {
    %c0_i32 = arith.constant 0 : i32
    %c0_i32_0 = arith.constant 0 : i32
    %c0_i32_1 = arith.constant 0 : i32
    return %c0_i32, %c0_i32_0 : i32, i32
  }
  func.func @transform_3(%arg0: i32) -> (i32, i32) {
    %c0_i32 = arith.constant 0 : i32
    %c0_i32_0 = arith.constant 0 : i32
    return %arg0, %c0_i32 : i32, i32
  }
}

module attributes {stable_mosaic.version = 11 : i64} {
  func.func @_gemm_stats_kernel(%arg0: i32, %arg1: i32, %arg2: memref<256x288xbf16, #tpu.memory_space<vmem>>, %arg3: memref<288x64xbf16, #tpu.memory_space<vmem>>, %arg4: memref<256x64xf32, #tpu.memory_space<vmem>>, %arg5: memref<1x1x64xf32, #tpu.memory_space<vmem>>, %arg6: memref<1x1x64xf32, #tpu.memory_space<vmem>>) attributes {dimension_semantics = [#tpu.dimension_semantics<parallel>, #tpu.dimension_semantics<arbitrary>], iteration_bounds = array<i64: 2, 1>, scalar_prefetch = 0 : i64, scratch_operands = 0 : i64, tpu.core_type = #tpu.core_type<tc>, window_params = [{transform_indices = @transform_0, window_bounds = array<i64: 256, 288>}, {pipeline_mode = #tpu.pipeline_mode<synchronous>, transform_indices = @transform_1, window_bounds = array<i64: 288, 64>}, {transform_indices = @transform_2, window_bounds = array<i64: 256, 64>}, {transform_indices = @transform_3, window_bounds = array<i64: 1, 1, 64>}, {transform_indices = @transform_4, window_bounds = array<i64: 1, 1, 64>}]} {
    %c0 = arith.constant 0 : index
    %c0_0 = arith.constant 0 : index
    %0 = vector.load %arg2[%c0, %c0_0] : memref<256x288xbf16, #tpu.memory_space<vmem>>, vector<256x288xbf16>
    %c0_1 = arith.constant 0 : index
    %c0_2 = arith.constant 0 : index
    %1 = vector.load %arg3[%c0_1, %c0_2] : memref<288x64xbf16, #tpu.memory_space<vmem>>, vector<288x64xbf16>
    %cst = arith.constant dense<0.000000e+00> : vector<256x64xf32>
    %2 = tpu.matmul %0, %1, %cst {dimension_numbers = #tpu.dot_dimension_numbers<[1], [0], [0], [1], [0, 0, 1, 1], [], []>} : vector<256x288xbf16>, vector<288x64xbf16>, vector<256x64xf32> -> vector<256x64xf32>
    %c0_3 = arith.constant 0 : index
    %c0_4 = arith.constant 0 : index
    %3 = vector.load %arg4[%c0_3, %c0_4] : memref<256x64xf32, #tpu.memory_space<vmem>>, vector<256x64xf32>
    tpu.vector_store %arg4[%c0_3, %c0_4], %2 {strides = array<i32>} : memref<256x64xf32, #tpu.memory_space<vmem>>, vector<256x64xf32>,
    %c0_i32 = arith.constant 0 : i32
    %4 = arith.cmpi eq, %arg1, %c0_i32 : i32
    %5 = arith.extui %4 : i1 to i32
    %c0_i32_5 = arith.constant 0 : i32
    %6 = arith.cmpi ne, %5, %c0_i32_5 : i32
    scf.if %6 {
      %cst_20 = arith.constant 0.000000e+00 : f32
      %24 = vector.broadcast %cst_20 : f32 to vector<1x64xf32>
      %c0_21 = arith.constant 0 : index
      %c0_22 = arith.constant 0 : index
      %c0_23 = arith.constant 0 : index
      %25 = vector.load %arg5[%c0_21, %c0_22, %c0_23] : memref<1x1x64xf32, #tpu.memory_space<vmem>>, vector<1x1x64xf32>
      %26 = vector.shape_cast %25 : vector<1x1x64xf32> to vector<1x64xf32>
      %27 = vector.shape_cast %24 : vector<1x64xf32> to vector<1x1x64xf32>
      tpu.vector_store %arg5[%c0_21, %c0_22, %c0_23], %27 {strides = array<i32>} : memref<1x1x64xf32, #tpu.memory_space<vmem>>, vector<1x1x64xf32>,
      %cst_24 = arith.constant 0.000000e+00 : f32
      %28 = vector.broadcast %cst_24 : f32 to vector<1x64xf32>
      %c0_25 = arith.constant 0 : index
      %c0_26 = arith.constant 0 : index
      %c0_27 = arith.constant 0 : index
      %29 = vector.load %arg6[%c0_25, %c0_26, %c0_27] : memref<1x1x64xf32, #tpu.memory_space<vmem>>, vector<1x1x64xf32>
      %30 = vector.shape_cast %29 : vector<1x1x64xf32> to vector<1x64xf32>
      %31 = vector.shape_cast %28 : vector<1x64xf32> to vector<1x1x64xf32>
      tpu.vector_store %arg6[%c0_25, %c0_26, %c0_27], %31 {strides = array<i32>} : memref<1x1x64xf32, #tpu.memory_space<vmem>>, vector<1x1x64xf32>,
    } else {
    }
    %c0_6 = arith.constant 0 : index
    %c0_7 = arith.constant 0 : index
    %c0_8 = arith.constant 0 : index
    %7 = vector.load %arg5[%c0_6, %c0_7, %c0_8] : memref<1x1x64xf32, #tpu.memory_space<vmem>>, vector<1x1x64xf32>
    %8 = vector.shape_cast %7 : vector<1x1x64xf32> to vector<1x64xf32>
    %cst_9 = arith.constant dense<0.000000e+00> : vector<64xf32>
    %9 = vector.multi_reduction <add>, %2, %cst_9 [0] : vector<256x64xf32> to vector<64xf32>
    %10 = vector.shape_cast %9 : vector<64xf32> to vector<1x64xf32>
    %11 = arith.addf %8, %10 : vector<1x64xf32>
    %c0_10 = arith.constant 0 : index
    %c0_11 = arith.constant 0 : index
    %c0_12 = arith.constant 0 : index
    %12 = vector.load %arg5[%c0_10, %c0_11, %c0_12] : memref<1x1x64xf32, #tpu.memory_space<vmem>>, vector<1x1x64xf32>
    %13 = vector.shape_cast %12 : vector<1x1x64xf32> to vector<1x64xf32>
    %14 = vector.shape_cast %11 : vector<1x64xf32> to vector<1x1x64xf32>
    tpu.vector_store %arg5[%c0_10, %c0_11, %c0_12], %14 {strides = array<i32>} : memref<1x1x64xf32, #tpu.memory_space<vmem>>, vector<1x1x64xf32>,
    %c0_13 = arith.constant 0 : index
    %c0_14 = arith.constant 0 : index
    %c0_15 = arith.constant 0 : index
    %15 = vector.load %arg6[%c0_13, %c0_14, %c0_15] : memref<1x1x64xf32, #tpu.memory_space<vmem>>, vector<1x1x64xf32>
    %16 = vector.shape_cast %15 : vector<1x1x64xf32> to vector<1x64xf32>
    %17 = arith.mulf %2, %2 : vector<256x64xf32>
    %cst_16 = arith.constant dense<0.000000e+00> : vector<64xf32>
    %18 = vector.multi_reduction <add>, %17, %cst_16 [0] : vector<256x64xf32> to vector<64xf32>
    %19 = vector.shape_cast %18 : vector<64xf32> to vector<1x64xf32>
    %20 = arith.addf %16, %19 : vector<1x64xf32>
    %c0_17 = arith.constant 0 : index
    %c0_18 = arith.constant 0 : index
    %c0_19 = arith.constant 0 : index
    %21 = vector.load %arg6[%c0_17, %c0_18, %c0_19] : memref<1x1x64xf32, #tpu.memory_space<vmem>>, vector<1x1x64xf32>
    %22 = vector.shape_cast %21 : vector<1x1x64xf32> to vector<1x64xf32>
    %23 = vector.shape_cast %20 : vector<1x64xf32> to vector<1x1x64xf32>
    tpu.vector_store %arg6[%c0_17, %c0_18, %c0_19], %23 {strides = array<i32>} : memref<1x1x64xf32, #tpu.memory_space<vmem>>, vector<1x1x64xf32>,
    return
  }
  func.func @transform_0(%arg0: i32, %arg1: i32) -> (i32, i32) {
    %c1_i32 = arith.constant 1 : i32
    %0 = arith.muli %arg0, %c1_i32 : i32
    %1 = arith.addi %0, %arg1 : i32
    %c0_i32 = arith.constant 0 : i32
    %c0_i32_0 = arith.constant 0 : i32
    return %1, %c0_i32 : i32, i32
  }
  func.func @transform_1(%arg0: i32, %arg1: i32) -> (i32, i32) {
    %c0_i32 = arith.constant 0 : i32
    %c0_i32_0 = arith.constant 0 : i32
    %c0_i32_1 = arith.constant 0 : i32
    return %c0_i32, %c0_i32_0 : i32, i32
  }
  func.func @transform_2(%arg0: i32, %arg1: i32) -> (i32, i32) {
    %c1_i32 = arith.constant 1 : i32
    %0 = arith.muli %arg0, %c1_i32 : i32
    %1 = arith.addi %0, %arg1 : i32
    %c0_i32 = arith.constant 0 : i32
    %c0_i32_0 = arith.constant 0 : i32
    return %1, %c0_i32 : i32, i32
  }
  func.func @transform_3(%arg0: i32, %arg1: i32) -> (i32, i32, i32) {
    %c0_i32 = arith.constant 0 : i32
    %c0_i32_0 = arith.constant 0 : i32
    %c0_i32_1 = arith.constant 0 : i32
    return %arg0, %c0_i32, %c0_i32_0 : i32, i32, i32
  }
  func.func @transform_4(%arg0: i32, %arg1: i32) -> (i32, i32, i32) {
    %c0_i32 = arith.constant 0 : i32
    %c0_i32_0 = arith.constant 0 : i32
    %c0_i32_1 = arith.constant 0 : i32
    return %arg0, %c0_i32, %c0_i32_0 : i32, i32, i32
  }
}

module attributes {stable_mosaic.version = 11 : i64} {
  func.func @_bn_act_kernel(%arg0: i32, %arg1: memref<256x128xf32, #tpu.memory_space<vmem>>, %arg2: memref<1x128xf32, #tpu.memory_space<vmem>>, %arg3: memref<1x128xf32, #tpu.memory_space<vmem>>, %arg4: memref<256x128xbf16, #tpu.memory_space<vmem>>) attributes {dimension_semantics = [#tpu.dimension_semantics<parallel>], iteration_bounds = array<i64: 1>, scalar_prefetch = 0 : i64, scratch_operands = 0 : i64, tpu.core_type = #tpu.core_type<tc>, window_params = [{transform_indices = @transform_0, window_bounds = array<i64: 256, 128>}, {pipeline_mode = #tpu.pipeline_mode<synchronous>, transform_indices = @transform_1, window_bounds = array<i64: 1, 128>}, {pipeline_mode = #tpu.pipeline_mode<synchronous>, transform_indices = @transform_2, window_bounds = array<i64: 1, 128>}, {transform_indices = @transform_3, window_bounds = array<i64: 256, 128>}]} {
    %c0 = arith.constant 0 : index
    %c0_0 = arith.constant 0 : index
    %0 = vector.load %arg1[%c0, %c0_0] : memref<256x128xf32, #tpu.memory_space<vmem>>, vector<256x128xf32>
    %c0_1 = arith.constant 0 : index
    %c0_2 = arith.constant 0 : index
    %1 = vector.load %arg2[%c0_1, %c0_2] : memref<1x128xf32, #tpu.memory_space<vmem>>, vector<1x128xf32>
    %2 = vector.broadcast %1 : vector<1x128xf32> to vector<256x128xf32>
    %3 = arith.mulf %0, %2 : vector<256x128xf32>
    %c0_3 = arith.constant 0 : index
    %c0_4 = arith.constant 0 : index
    %4 = vector.load %arg3[%c0_3, %c0_4] : memref<1x128xf32, #tpu.memory_space<vmem>>, vector<1x128xf32>
    %5 = vector.broadcast %4 : vector<1x128xf32> to vector<256x128xf32>
    %6 = arith.addf %3, %5 : vector<256x128xf32>
    %cst = arith.constant 0.000000e+00 : f32
    %7 = vector.broadcast %cst : f32 to vector<256x128xf32>
    %8 = arith.maximumf %6, %7 : vector<256x128xf32>
    %9 = arith.truncf %8 : vector<256x128xf32> to vector<256x128xbf16>
    %c0_5 = arith.constant 0 : index
    %c0_6 = arith.constant 0 : index
    %10 = vector.load %arg4[%c0_5, %c0_6] : memref<256x128xbf16, #tpu.memory_space<vmem>>, vector<256x128xbf16>
    tpu.vector_store %arg4[%c0_5, %c0_6], %9 {strides = array<i32>} : memref<256x128xbf16, #tpu.memory_space<vmem>>, vector<256x128xbf16>,
    return
  }
  func.func @transform_0(%arg0: i32) -> (i32, i32) {
    %c0_i32 = arith.constant 0 : i32
    %c0_i32_0 = arith.constant 0 : i32
    return %arg0, %c0_i32 : i32, i32
  }
  func.func @transform_1(%arg0: i32) -> (i32, i32) {
    %c0_i32 = arith.constant 0 : i32
    %c0_i32_0 = arith.constant 0 : i32
    %c0_i32_1 = arith.constant 0 : i32
    return %c0_i32, %c0_i32_0 : i32, i32
  }
  func.func @transform_2(%arg0: i32) -> (i32, i32) {
    %c0_i32 = arith.constant 0 : i32
    %c0_i32_0 = arith.constant 0 : i32
    %c0_i32_1 = arith.constant 0 : i32
    return %c0_i32, %c0_i32_0 : i32, i32
  }
  func.func @transform_3(%arg0: i32) -> (i32, i32) {
    %c0_i32 = arith.constant 0 : i32
    %c0_i32_0 = arith.constant 0 : i32
    return %arg0, %c0_i32 : i32, i32
  }
}

module attributes {stable_mosaic.version = 11 : i64} {
  func.func @_gemm_act_kernel(%arg0: i32, %arg1: i32, %arg2: memref<1024x144xbf16, #tpu.memory_space<vmem>>, %arg3: memref<144x12xbf16, #tpu.memory_space<vmem>>, %arg4: memref<1024x12xf32, #tpu.memory_space<vmem>>) attributes {dimension_semantics = [#tpu.dimension_semantics<parallel>, #tpu.dimension_semantics<parallel>], iteration_bounds = array<i64: 2, 1>, scalar_prefetch = 0 : i64, scratch_operands = 0 : i64, tpu.core_type = #tpu.core_type<tc>, window_params = [{transform_indices = @transform_0, window_bounds = array<i64: 1024, 144>}, {pipeline_mode = #tpu.pipeline_mode<synchronous>, transform_indices = @transform_1, window_bounds = array<i64: 144, 12>}, {transform_indices = @transform_2, window_bounds = array<i64: 1024, 12>}]} {
    %c0 = arith.constant 0 : index
    %c0_0 = arith.constant 0 : index
    %0 = vector.load %arg2[%c0, %c0_0] : memref<1024x144xbf16, #tpu.memory_space<vmem>>, vector<1024x144xbf16>
    %c0_1 = arith.constant 0 : index
    %c0_2 = arith.constant 0 : index
    %1 = vector.load %arg3[%c0_1, %c0_2] : memref<144x12xbf16, #tpu.memory_space<vmem>>, vector<144x12xbf16>
    %cst = arith.constant dense<0.000000e+00> : vector<1024x12xf32>
    %2 = tpu.matmul %0, %1, %cst {dimension_numbers = #tpu.dot_dimension_numbers<[1], [0], [0], [1], [0, 0, 1, 1], [], []>} : vector<1024x144xbf16>, vector<144x12xbf16>, vector<1024x12xf32> -> vector<1024x12xf32>
    %3 = math.tanh %2 : vector<1024x12xf32>
    %c0_3 = arith.constant 0 : index
    %c0_4 = arith.constant 0 : index
    %4 = vector.load %arg4[%c0_3, %c0_4] : memref<1024x12xf32, #tpu.memory_space<vmem>>, vector<1024x12xf32>
    tpu.vector_store %arg4[%c0_3, %c0_4], %3 {strides = array<i32>} : memref<1024x12xf32, #tpu.memory_space<vmem>>, vector<1024x12xf32>,
    return
  }
  func.func @transform_0(%arg0: i32, %arg1: i32) -> (i32, i32) {
    %c1_i32 = arith.constant 1 : i32
    %0 = arith.muli %arg0, %c1_i32 : i32
    %1 = arith.addi %0, %arg1 : i32
    %c0_i32 = arith.constant 0 : i32
    %c0_i32_0 = arith.constant 0 : i32
    return %1, %c0_i32 : i32, i32
  }
  func.func @transform_1(%arg0: i32, %arg1: i32) -> (i32, i32) {
    %c0_i32 = arith.constant 0 : i32
    %c0_i32_0 = arith.constant 0 : i32
    %c0_i32_1 = arith.constant 0 : i32
    return %c0_i32, %c0_i32_0 : i32, i32
  }
  func.func @transform_2(%arg0: i32, %arg1: i32) -> (i32, i32) {
    %c1_i32 = arith.constant 1 : i32
    %0 = arith.muli %arg0, %c1_i32 : i32
    %1 = arith.addi %0, %arg1 : i32
    %c0_i32 = arith.constant 0 : i32
    %c0_i32_0 = arith.constant 0 : i32
    return %1, %c0_i32 : i32, i32
  }
}

</mosaic_0001>

<bundles_post_ra>
// kernel: generator_forward.10
= control target key start
LH: loop header
LB: loop body
LE: loop exit
PB: predicated region body
PF: predicated region fallthrough
CT: control target
= control target key end

     0   :  { %s107_s0 = inlined_call_operand.vmem [shape: f32[32,128], index: 0, kind: input, shape index: {}]   ;;  %s108_s1 = inlined_call_operand.vmem [shape: f32[1,128], index: 1, kind: input, shape index: {}]   ;;  %s109_s2 = inlined_call_operand.vmem [shape: f32[1,128], index: 2, kind: input, shape index: {}]   ;;  %s110_s3 = inlined_call_operand.vmem [shape: bf16[32,128], index: 3, kind: output, shape index: {}]  }
   0x1   :  { %v14_v0 = vld [vmem:[%s107_s0] sm:$0xff]  ;;  %v15_v1 = vld [vmem:[%s107_s0 + $0x8] sm:$0xff]  ;;  %v16_v4 = vld [vmem:[%s107_s0 + $0x10] sm:$0xff] }
   0x2   :  { %v61_v2 = vld [vmem:[%s108_s1] ss:$0 sm:$0xff]  ;;  %v17_v5 = vld [vmem:[%s107_s0 + $0x18] sm:$0xff] }
   0x3   :  { %v62_v3 = vld [vmem:[%s109_s2] ss:$0 sm:$0xff]  ;;  %v22_v6 = vmul.f32 %v61_v2, %v14_v0  ;;  %v23_v7 = vmul.f32 %v61_v2, %v15_v1  ;;  %v24_v8 = vmul.f32 %v61_v2, %v16_v4  ;;  %v25_v9 = vmul.f32 %v61_v2, %v17_v5 }
   0x5   :  { %v30_v10 = vadd.f32 %v62_v3, %v22_v6  ;;  %v31_v11 = vadd.f32 %v62_v3, %v23_v7  ;;  %v32_v12 = vadd.f32 %v62_v3, %v24_v8  ;;  %v33_v13 = vadd.f32 %v62_v3, %v25_v9 }
   0x7   :  { %v34_v14 = vmax.f32 %v30_v10, 0.0  ;;  %v35_v15 = vmax.f32 %v31_v11, 0.0  ;;  %v36_v16 = vmax.f32 %v32_v12, 0.0  ;;  %v37_v17 = vmax.f32 %v33_v13, 0.0 }
   0x9   :  { %v53_v18 = vpack.c.bf16 %v35_v15, %v34_v14  ;;  %v58_v19 = vpack.c.bf16 %v37_v17, %v36_v16 }
   0xb   :  { %54 = vst [vmem:[%s110_s3] sm:$0xff] %v53_v18  }
   0xc   :  { %60 = vst [vmem:[%s110_s3 + $0x8] sm:$0xff] %v58_v19  }

// kernel: generator_forward.9
= control target key start
LH: loop header
LB: loop body
LE: loop exit
PB: predicated region body
PF: predicated region fallthrough
CT: control target
= control target key end

     0   :  { %s2177_s0 = inlined_call_operand.vmem [shape: bf16[2,64], index: 0, kind: input, shape index: {}]   ;;  %s2178_s1 = inlined_call_operand.vmem [shape: bf16[2,16], index: 1, kind: input, shape index: {}]   ;;  %s2179_s2 = inlined_call_operand.vmem [shape: bf16[64,32], index: 2, kind: input, shape index: {}]   ;;  %s2180_s3 = inlined_call_operand.hbm [shape: f32[1,32], index: 3, kind: input, shape index: {}]   ;;  %s2181_s4 = inlined_call_operand.hbm [shape: f32[1,32], index: 4, kind: input, shape index: {}]   ;;  %s2182_s5 = inlined_call_operand.hbm [shape: f32[1,32], index: 5, kind: input, shape index: {}]   ;;  %s2183_s6 = inlined_call_operand.hbm [shape: bf16[32,2048], index: 6, kind: input, shape index: {}]   ;;  %s2184_s7 = inlined_call_operand.hbm [shape: bf16[16,2048], index: 7, kind: input, shape index: {}]   ;;  %s2185_s8 = inlined_call_operand.vmem [shape: f32[2,2048], index: 8, kind: output, shape index: {0}]   ;;  %s2186_s9 = inlined_call_operand.vmem [shape: f32[1,2048], index: 9, kind: output, shape index: {1}]   ;;  %s2187_s10 = inlined_call_operand.vmem [shape: f32[1,2048], index: 10, kind: output, shape index: {2}]  }
   0x1   :  { %2191 = sst [smem:[#allocation16_spill]] %s2181_s4 }
   0x2   :  { %2192 = sst [smem:[#allocation17_spill]] %s2183_s6 }
   0x3   :  { %2193 = sst [smem:[#allocation18_spill]] %s2186_s9 }
   0x4   :  { %2194 = sst [smem:[#allocation19_spill]] %s2187_s10 }
   0x5   :  { %16 = vsyncpa [#allocation3], 0 }
   0x6   :  { %17 = vsyncpa [#allocation5], 0 }
   0x7   :  { %18 = vsyncpa [#allocation8], 0 }
   0x8   :  { %20 = vsyncpa [#allocation8 + $0x1], 0  ;;  %s1857_s13 = smov 0   ;;  %s1859_s14 = smov 0  }
   0x9   :  { %s1861_s15 = smov 0   ;;  %s1863_s16 = smov 0  }
   0xa LB: > { %2195 = sst [smem:[#allocation13_spill]] %s1789_s15  ;;  %s1876_s17 = sadd.s32 4294967295, %s1793_s16   ;;  %s1793_s16 = sphi %s1863_s16, %s2207_s16   ;;  %s1789_s15 = sphi %s1861_s15, %s2209_s15   ;;  %s1785_s14 = sphi %s1859_s14, %s2211_s14   ;;  %s1781_s13 = sphi %s1857_s13, %s2210_s13  }
   0xb   : > { %s1879_s18 = sadd.s32 1, %s1793_s16   ;;  %s159_s20 = sadd.s32 1, %s1789_s15 }
   0xc   : > { %2196 = sst [smem:[#allocation14_spill]] %s1879_s18  ;;  %s156_s19 = ssub.s32 %s1793_s16, %s1879_s18 }
   0xd   : > { %p157_p0 = scmp.eq.s32.totalorder %s156_s19, 0  ;;  %p166_p1 = scmp.ne.s32.totalorder %s1789_s15, %s1785_s14 }
   0xe   : > { %p167_p2 = scmp.eq.s32.totalorder %s1793_s16, 0  ;;  %p172_p3 = scmp.ne.s32.totalorder %s1785_s14, %s1781_s13 }
   0xf   : > { %s1889_s21 = scalar_select %p157_p0, %s1789_s15, %s159_s20  }
  0x10   : > { %p1891_p4 = por %p167_p2, %p166_p1  ;;  %p173_p5 = scmp.eq.s32.totalorder %s1876_s17, 0 }
  0x11   : > { %2197 = sst [smem:[#allocation15_spill]] %s1889_s21  ;;  %p1334_p6 = scmp.ge.s32.totalorder %s1793_s16, 1 }
  0x12   : > { %p287_p7 = scmp.lt.s32.totalorder %s1793_s16, 3  ;;  %p1900_p8 = por %p173_p5, %p172_p3 }
  0x13   : > { %s2201_s4 = sld [smem:[#allocation16_spill]]  ;;  %s1795_s28 = smov [#allocation4]  }
  0x14   : > { %p1904_p9 = pnand %p1334_p6, %p287_p7  ;;  %s322_s29 = sshll.u32 %s1795_s28, 4  ;;  %s323_s29 = int_to_ptr.vmem [resolvable:$true] %s322_s29 }
  0x15   : > { %p1552_p12 = scmp.lt.s32.totalorder %s1793_s16, 2  ;;  %s345_s11 = sand.u32 1, %s1793_s16  }
  0x16   : > { %p1532_p10 = pneg %p1904_p9  ;;  %s347_s12 = sand.u32 1, %s1789_s15  }
  0x17   : > { %p1924_p13 = pnand %p1552_p12, %p1891_p4  ;;  %s1339_s19 = sshll.u32 %s347_s12, 7 }
  0x18   : > { %p1915_p11 = pnand %p1532_p10, %p173_p5  ;;  %s1486_s20 = sshll.u32 %s1793_s16, 5 }
  0x19   : > { %s320_s27 = sshll.u32 %s2201_s4, 4  ;;  %s2204_s6 = sld [smem:[#allocation17_spill]]  ;;  %s321_s27 = int_to_ptr.hbm [resolvable:$true] %s320_s27 }
  0x1a   : > { %1538 = dma.hbm_to_vmem [thread:$0]  (!%p1915_p11), %s321_s27, 16, %s323_s29, [#allocation5]  }
  0x1b   : > { %s349_s21 = scalar_lea.vmem [#allocation7], %s1339_s19  ;;  %s1342_s22 = sshll.u32 %s347_s12, 6 }
  0x1c   : > { %s357_s18 = sshll.u32 %s349_s21, 4  ;;  %s1936_s15 = scalar_lea.sflag [#allocation8], %s345_s11  ;;  %s358_s18 = int_to_ptr.vmem [resolvable:$true] %s357_s18 }
  0x1d   : > { %p1635_p1 = pneg %p1924_p13 }
  0x1f   : > { %s354_s28 = scalar_lea.hbm %s2204_s6, %s1486_s20  ;;  %s1638_s19 = scalar_lea.hbm %s2204_s6, 256 }
  0x20   : > { %s355_s4 = sshll.u32 %s354_s28, 4  ;;  %s356_s4 = int_to_ptr.hbm [resolvable:$true] %s355_s4 }
  0x21   : > { %s1631_s10 = sshra.s32 %s356_s4, 4  ;;  %s1632_s10 = int_to_ptr.hbm [resolvable:$true] %s1631_s10 }
  0x22   : > { %s1633_s9 = scalar_lea.hbm %s1632_s10, 128  ;;  %p1639_p4 = scmp.lt.s32.totalorder %s1632_s10, %s2204_s6 }
  0x23   : > { %p1634_p0 = scmp.ne.s32.totalorder %s1632_s10, %s1633_s9  ;;  %p1640_p6 = scmp.lt.s32.totalorder %s1638_s19, %s1633_s9 }
  0x25   : > { %p1636_p2 = pnand %p1635_p1, %p1634_p0  ;;  %p1641_p7 = por %p1640_p6, %p1639_p4 }
  0x27   : > { %p1637_p3 = pneg %p1636_p2 }
  0x29   : > { %p1642_p10 = pnand %p1641_p7, %p1637_p3 }
  0x2b   : > { %1645 = shalt.err (!%p1642_p10)
}
  0x2c   : > { %s1796_s11 = smov 1024   ;;  %s1797_s12 = smov 512  }
  0x2d   : > { %s1798_s26 = smov 32   ;;  %s376_s9 = scalar_lea.hbm %s2184_s7, %s1486_s20 }
  0x2e   : > { %1545 = dma.hbm_to_vmem [thread:$0]  (!%p1924_p13), %s356_s4, 2048, %s358_s18, %s1936_s15, %s1796_s11, %s1797_s12, %s1798_s26  }
  0x2f   : > { %s377_s10 = sshll.u32 %s376_s9, 4  ;;  %s371_s29 = scalar_lea.vmem [#allocation9], %s1342_s22  ;;  %s1960_s10 = int_to_ptr.hbm [resolvable:$true] %s377_s10 }
  0x30   : > { %s1962_s19 = sshll.u32 %s371_s29, 4  ;;  %s308_s6 = sshll.u32 %s2180_s3, 4  ;;  %s309_s6 = int_to_ptr.hbm [resolvable:$true] %s308_s6  ;;  %s380_s19 = int_to_ptr.vmem [resolvable:$true] %s1962_s19 }
  0x31   : > { %s1799_s4 = smov [#allocation2]   ;;  %s332_s28 = sshll.u32 %s2182_s5, 4  ;;  %s333_s28 = int_to_ptr.hbm [resolvable:$true] %s332_s28 }
  0x32   : > { %s310_s16 = sshll.u32 %s1799_s4, 4  ;;  %s1800_s22 = smov [#allocation6]   ;;  %s311_s16 = int_to_ptr.vmem [resolvable:$true] %s310_s16 }
  0x33   : > { %1535 = dma.hbm_to_vmem [thread:$0]  (!%p1915_p11), %s309_s6, 16, %s311_s16, [#allocation3]  }
  0x34   : > { %s334_s27 = sshll.u32 %s1800_s22, 4  ;;  %s1721_s9 = sshra.s32 %s1960_s10, 4  ;;  %s335_s27 = int_to_ptr.vmem [resolvable:$true] %s334_s27  ;;  %s1722_s9 = int_to_ptr.hbm [resolvable:$true] %s1721_s9 }
  0x35   : > { %1541 = dma.hbm_to_vmem [thread:$0]  (!%p1915_p11), %s333_s28, 16, %s335_s27, [#allocation5]  }
  0x36   : > { %s1723_s29 = scalar_lea.hbm %s1722_s9, 64  ;;  %s1728_s4 = scalar_lea.hbm %s2184_s7, 128 }
  0x37   : > { %p1724_p12 = scmp.ne.s32.totalorder %s1722_s9, %s1723_s29  ;;  %p1729_p3 = scmp.lt.s32.totalorder %s1722_s9, %s2184_s7 }
  0x38   : > { %p1730_p4 = scmp.lt.s32.totalorder %s1728_s4, %s1723_s29 }
  0x39   : > { %p1726_p0 = pnand %p1724_p12, %p1635_p1 }
  0x3a   : > { %p1731_p6 = por %p1730_p4, %p1729_p3 }
  0x3b   : > { %p1727_p2 = pneg %p1726_p0 }
  0x3d   : > { %p1732_p7 = pnand %p1731_p6, %p1727_p2 }
  0x3f   : > { %1735 = shalt.err (!%p1732_p7)
}
  0x40   : > { %1548 = dma.hbm_to_vmem [thread:$0]  (!%p1924_p13), %s1960_s10, 1024, %s380_s19, %s1936_s15, %s1796_s11, %s1797_s12, %s1798_s26  }
  0x41   : > { %391 = sbr.rel (%p1904_p9) target bundleno = 468 (0x1d4), region = 52 }
  0x46   : > { %1768 = dma.done.wait (%p173_p5), [#allocation3], 16  }
  0x47   : > { %1770 = vsyncadd (%p173_p5), [#allocation3], 4294967280 }
  0x48   : > { %1772 = dma.done.wait (%p173_p5), [#allocation5], 32  }
  0x49   : > { %1774 = vsyncadd (%p173_p5), [#allocation5], 4294967264  ;;  %s408_s30 = sand.u32 1, %s1876_s17   ;;  %s410_s15 = sand.u32 1, %s1785_s14  }
  0x4a   : > { %s1349_s13 = sshll.u32 %s410_s15, 7  ;;  %s409_s24 = scalar_lea.sflag [#allocation8], %s408_s30 }
  0x4b   : > { %s2004_s11 = scalar_lea.vmem [#allocation7], %s1349_s13 }
  0x4c   : > { %1776 = dma.done.wait (%p1900_p8), %s409_s24, 3072  }
  0x4d   : > { %1778 = vsyncadd (%p1900_p8), %s409_s24, 4294964224  ;;  %v1491_v0 = vld [vmem:[%s2179_s2 + $0x18] sm:$0xff]  ;;  %v1490_v1 = vld [vmem:[%s2179_s2 + $0x10] sm:$0xff]  ;;  %vm529_vm0 = vcmask 523264   ;;  %s1350_s9 = sshll.u32 %s410_s15, 6  ;;  %vm663_vm1 = vcmask 130048  }
  0x4e   : > { %537 = vmatpush.bf16.msra.mxu0 %v1491_v0  ;;  %v1489_v2 = vld [vmem:[%s2179_s2 + $0x8] sm:$0xff]  ;;  %v1488_v3 = vld [vmem:[%s2179_s2] sm:$0xff]  ;;  %s2025_s29 = scalar_lea.vmem [#allocation9], %s1350_s9  ;;  %v1801_v9 = vmov 2.0   ;;  %vm546_vm2 = vcmask 254976   ;;  %vm851_vm8 = vcmask 261120  }
  0x4f   : > { %v492_v4 = vld [vmem:[%s2177_s0] sm:$0x1]  ;;  %v1374_v5 = vld [vmem:[%s2025_s29] sm:$0xf]  ;;  %1597 = vrcp.f32 %v1801_v9  ;;  %v1508_v10 = vld [vmem:[%s2025_s29 + $0x4] sm:$0xf] }
  0x50   : > { %v1512_v6 = vld [vmem:[%s2025_s29 + $0x1c] sm:$0xf0]  ;;  %v614_v8 = vld [vmem:[%s2178_s1] sm:$0x1]  ;;  %v1376_v11 = vld [vmem:[%s2025_s29 + $0x20] sm:$0xf0] }
  0x51   : > { %v1375_v7 = vor.u32 %v1512_v6, %v1374_v5  ;;  %v1382_v12 = vld [vmem:[%s2025_s29 + $0x8] sm:$0xf]  ;;  %v1379_v13 = vor.u32 %v1508_v10, %v1376_v11  ;;  %v1595_v17 = vld [vmem:[#allocation2] ss:$0 sm:$0xff]  ;;  %v1509_v19 = vld [vmem:[%s2025_s29 + $0xc] sm:$0xf] }
  0x52   : > { %538 = vmatpush.bf16.msra.mxu0 %v1490_v1  ;;  %v1513_v14 = vld [vmem:[%s2025_s29 + $0x24] sm:$0xf0]  ;;  %v1384_v20 = vld [vmem:[%s2025_s29 + $0x28] sm:$0xf0]  ;;  %v1390_v31 = vld [vmem:[%s2025_s29 + $0x10] sm:$0xf] }
  0x53   : > { %674 = vmatpush.bf16.msra.mxu1 %v1375_v7  ;;  %v1383_v16 = vor.u32 %v1513_v14, %v1382_v12  ;;  %687 = vmatpush.bf16.msra.mxu2 %v1379_v13  ;;  %v1387_v21 = vor.u32 %v1509_v19, %v1384_v20  ;;  %v1514_v32 = vld [vmem:[%s2025_s29 + $0x2c] sm:$0xf0]  ;;  %v1510_v35 = vld [vmem:[%s2025_s29 + $0x14] sm:$0xf]  ;;  %v1398_v42 = vld [vmem:[%s2025_s29 + $0x18] sm:$0xf] }
  0x54   : > { %v1391_v34 = vor.u32 %v1514_v32, %v1390_v31  ;;  %v1392_v36 = vld [vmem:[%s2025_s29 + $0x30] sm:$0xf0]  ;;  %v1515_v43 = vld [vmem:[%s2025_s29 + $0x34] sm:$0xf0]  ;;  %v1511_v44 = vld [vmem:[%s2025_s29 + $0x1c] sm:$0xf] }
  0x55   : > { %v1598_v15 = vpop.eup %1597  ;;  %700 = vmatpush.bf16.msra.mxu3 %v1383_v16  ;;  %v1395_v38 = vor.u32 %v1510_v35, %v1392_v36  ;;  %v1399_v45 = vor.u32 %v1515_v43, %v1398_v42  ;;  %v1400_v46 = vld [vmem:[%s2025_s29 + $0x38] sm:$0xf0]  ;;  %v1446_v55 = vld [vmem:[%s2004_s11 + $0x40] sm:$0xf]  ;;  %v1500_v57 = vld [vmem:[%s2004_s11 + $0x44] sm:$0xf] }
  0x56   : > { %539 = vmatpush.bf16.msra.mxu0 %v1489_v2  ;;  %1404 = vmatmul.msk.bf16.vlgmr.msra.gmra.mxu1 %vm663_vm1, %v614_v8  ;;  %v555_v18 = vmul.f32 2.0, %v1598_v15  ;;  %vm559_vm3 = vweird.f32 %v1598_v15  ;;  %v1403_v48 = vor.u32 %v1511_v44, %v1400_v46  ;;  %v1504_v56 = vld [vmem:[%s2004_s11 + $0x5c] sm:$0xf0]  ;;  %v1448_v60 = vld [vmem:[%s2004_s11 + $0x60] sm:$0xf0]  ;;  %s1351_s4 = sshll.u32 %s1876_s17, 3 }
  0x57   : > { %1405 = vmatmul.msk.bf16.vlgmr.msra.gmra.mxu2 %vm663_vm1, %v614_v8  ;;  %713 = vmatpush.bf16.msrb.mxu1 %v1387_v21  ;;  %v1447_v59 = vor.u32 %v1504_v56, %v1446_v55  ;;  %v1454_v61 = vld [vmem:[%s2004_s11 + $0x48] sm:$0xf]  ;;  %v1451_v62 = vor.u32 %v1500_v57, %v1448_v60  ;;  %v1501_v0 = vld [vmem:[%s2004_s11 + $0x4c] sm:$0xf]  ;;  %v1414_v5 = vld [vmem:[%s2004_s11] sm:$0xf] }
  0x58   : > { %1406 = vmatmul.msk.bf16.vlgmr.msra.gmra.mxu3 %vm663_vm1, %v614_v8  ;;  %v556_v24 = vsub.f32 1.0, %v555_v18  ;;  %726 = vmatpush.bf16.msrb.mxu2 %v1391_v34  ;;  %v1505_v63 = vld [vmem:[%s2004_s11 + $0x64] sm:$0xf0]  ;;  %v1456_v1 = vld [vmem:[%s2004_s11 + $0x68] sm:$0xf0]  ;;  %vm973_vm9 = vcmask 1041408  }
  0x59   : > { %739 = vmatpush.bf16.msrb.mxu3 %v1395_v38  ;;  %v1496_v6 = vld [vmem:[%s2004_s11 + $0x1c] sm:$0xf0]  ;;  %v1492_v7 = vld [vmem:[%s2004_s11 + $0x4] sm:$0xf]  ;;  %v1422_v11 = vld [vmem:[%s2004_s11 + $0x8] sm:$0xf] }
  0x5a   : > { %540 = vmatpush.bf16.msra.mxu0 %v1488_v3  ;;  %v557_v27 = vmul.f32 %v1598_v15, %v556_v24  ;;  %v1455_v3 = vor.u32 %v1505_v63, %v1454_v61  ;;  %v1415_v9 = vor.u32 %v1496_v6, %v1414_v5  ;;  %v1416_v10 = vld [vmem:[%s2004_s11 + $0x20] sm:$0xf0]  ;;  %v1497_v12 = vld [vmem:[%s2004_s11 + $0x24] sm:$0xf0]  ;;  %v1424_v16 = vld [vmem:[%s2004_s11 + $0x28] sm:$0xf0] }
  0x5b   : > { %765 = vmatpush.bf16.msra.mxu1 %v1403_v48  ;;  %v1419_v13 = vor.u32 %v1492_v7, %v1416_v10  ;;  %v1423_v14 = vor.u32 %v1497_v12, %v1422_v11  ;;  %v1462_v20 = vld [vmem:[%s2004_s11 + $0x50] sm:$0xf]  ;;  %v1464_v24 = vld [vmem:[%s2004_s11 + $0x70] sm:$0xf0]  ;;  %v1438_v38 = vld [vmem:[%s2004_s11 + $0x18] sm:$0xf] }
  0x5c   : > { %v558_v33 = vadd.f32 %v1598_v15, %v557_v27  ;;  %861 = vmatpush.bf16.msra.mxu2 %v1447_v59  ;;  %v1506_v21 = vld [vmem:[%s2004_s11 + $0x6c] sm:$0xf0]  ;;  %v1494_v34 = vld [vmem:[%s2004_s11 + $0x14] sm:$0xf]  ;;  %v1440_v42 = vld [vmem:[%s2004_s11 + $0x38] sm:$0xf0] }
  0x5d   : > { %1371 = vmatmul.msk.bf16.vlgmr.msra.gmra.mxu0 %vm529_vm0, %v492_v4  ;;  %v1459_v4 = vor.u32 %v1501_v0, %v1456_v1  ;;  %874 = vmatpush.bf16.msra.mxu3 %v1451_v62  ;;  %v1430_v31 = vld [vmem:[%s2004_s11 + $0x10] sm:$0xf]  ;;  %v1432_v35 = vld [vmem:[%s2004_s11 + $0x30] sm:$0xf0]  ;;  %v1596_v55 = vld [vmem:[#allocation6] ss:$0 sm:$0xff] }
  0x5e   : > { %v560_v40 = vsel %vm559_vm3, %v1598_v15, %v558_v33  ;;  %752 = vmatpush.bf16.msrb.mxu0 %v1399_v45  ;;  %v1493_v15 = vld [vmem:[%s2004_s11 + $0xc] sm:$0xf]  ;;  %v1498_v33 = vld [vmem:[%s2004_s11 + $0x2c] sm:$0xf0]  ;;  %p476_p5 = scmp.lt.s32.totalorder %s1351_s4, 15  ;;  %vm975_vm10 = vcmask 1045508  }
  0x5f   : > { %v1427_v18 = vor.u32 %v1493_v15, %v1424_v16  ;;  %v1431_v36 = vor.u32 %v1498_v33, %v1430_v31  ;;  %vm977_vm11 = vcmask 1043456   ;;  %vm1059_vm12 = vcmask 1042434   ;;  %s2205_s24 = sld [smem:[#allocation18_spill]] }
  0x60   : > { %862 = vmatpush.bf16.msra.mxu2 %v1415_v9  ;;  %s2213_s4 = smov (!%p476_p5, %s1351_s4), 15  ;;  %vm1064_vm13 = vcmask 1046534   ;;  %vm1057_vm14 = vcmask 1040384   ;;  %vm1062_vm15 = vcmask 1044484   ;;  %s2206_s10 = sld [smem:[#allocation19_spill]] }
  0x61   : > { %875 = vmatpush.bf16.msra.mxu3 %v1419_v13  ;;  %s1352_s17 = sshll.u32 %s2213_s4, 1 }
  0x62   : > { %887 = vmatpush.bf16.msra.mxu0 %v1455_v3  ;;  %s2113_s30 = scalar_lea.vmem %s2185_s8, %s1352_s17 }
  0x66   : > { %1407 = vmatmul.msk.bf16.vlgmr.msrb.gmra.mxu1 %vm663_vm1, %v614_v8  ;;  %888 = vmatpush.bf16.msra.mxu0 %v1423_v14  ;;  %s489_s19 = scalar_lea.vmem %s2206_s10, %s2213_s4 }
  0x67   : > { %1408 = vmatmul.msk.bf16.vlgmr.msrb.gmra.mxu2 %vm663_vm1, %v614_v8  ;;  %900 = vmatpush.bf16.msrb.mxu1 %v1459_v4 }
  0x68   : > { %1409 = vmatmul.msk.bf16.vlgmr.msrb.gmra.mxu3 %vm663_vm1, %v614_v8 }
  0x6b   : > { %901 = vmatpush.bf16.msrb.mxu1 %v1427_v18 }
  0x6d   : > { %1410 = vmatmul.msk.bf16.vlgmr.msrb.gmra.mxu0 %vm663_vm1, %v614_v8 }
  0x76   : > { %1411 = vmatmul.msk.bf16.vlgmr.msra.gmra.mxu1 %vm663_vm1, %v614_v8 }
  0xd3   : > { %v676_v61 = vpop.f32.mrf.mxu1 }
  0xda   : > { %v542_v22 = vpop.f32.mrf.mxu0  ;;  %v689_v63 = vpop.f32.mrf.mxu2 }
  0xdb   : > { %v543_v23 = vadd.f32 %v1595_v17, %v542_v22  ;;  %v1502_v22 = vld [vmem:[%s2004_s11 + $0x54] sm:$0xf]  ;;  %v678_v62 = vpop.f32.mrf.mxu1 }
  0xdc   : > { %v1467_v27 = vor.u32 %v1502_v22, %v1464_v24 }
  0xdd   : > { %v547_v25 = vsel %vm546_vm2, %v543_v23, 0.0 }
  0xde   : > { %v548_v26 = vrot.slane %v547_v25, 4  ;;  %926 = vmatpush.bf16.msrb.mxu3 %v1467_v27 }
  0xe0   : > { %v549_v28 = vadd.f32 %v548_v26, %v547_v25  ;;  %v1470_v25 = vld [vmem:[%s2004_s11 + $0x58] sm:$0xf] }
  0xe1   : > { %v1507_v26 = vld [vmem:[%s2004_s11 + $0x74] sm:$0xf0] }
  0xe2   : > { %v550_v29 = vrot.slane %v549_v28, 2  ;;  %v544_v30 = vpop.f32.mrf.mxu0  ;;  %v691_v1 = vpop.f32.mrf.mxu2 }
  0xe3   : > { %v1472_v30 = vld [vmem:[%s2004_s11 + $0x78] sm:$0xf0]  ;;  %v715_v0 = vpop.f32.mrf.mxu1 }
  0xe4   : > { %v551_v37 = vadd.f32 %v550_v29, %v549_v28  ;;  %v1471_v28 = vor.u32 %v1507_v26, %v1470_v25  ;;  %v1503_v29 = vld [vmem:[%s2004_s11 + $0x5c] sm:$0xf] }
  0xe5   : > { %v1475_v32 = vor.u32 %v1503_v29, %v1472_v30 }
  0xe6   : > { %v552_v39 = vrot.slane %v551_v37, 1  ;;  %939 = vmatpush.bf16.msrb.mxu0 %v1471_v28 }
  0xe7   : > { %952 = vmatpush.bf16.msra.mxu1 %v1475_v32 }
  0xe8   : > { %v553_v41 = vadd.f32 %v552_v39, %v551_v37  ;;  %v1435_v37 = vor.u32 %v1494_v34, %v1432_v35  ;;  %v1499_v39 = vld [vmem:[%s2004_s11 + $0x34] sm:$0xf0] }
  0xea   : > { %v561_v47 = vmul.f32 %v560_v40, %v553_v41  ;;  %v1439_v41 = vor.u32 %v1499_v39, %v1438_v38  ;;  %927 = vmatpush.bf16.msrb.mxu3 %v1435_v37  ;;  %v2093_v4 = vpop.f32.mrf.mxu2  ;;  %v2095_v5 = vpop.f32.mrf.mxu0 }
  0xec   : > { %v2053_v49 = vsub.f32 %v543_v23, %v561_v47  ;;  %v1463_v23 = vor.u32 %v1506_v21, %v1462_v20  ;;  %940 = vmatpush.bf16.msrb.mxu0 %v1439_v41 }
  0xee   : > { %v563_v50 = vmul.f32 %v2053_v49, %v2053_v49  ;;  %913 = vmatpush.bf16.msrb.mxu2 %v1463_v23 }
  0xf0   : > { %v564_v51 = vsel %vm546_vm2, %v563_v50, 0.0  ;;  %v572_v50 = vld [vmem:[#allocation4] sm:$0x1] }
  0xf1   : > { %v565_v52 = vrot.slane %v564_v51, 4 }
  0xf2   : > { %914 = vmatpush.bf16.msrb.mxu2 %v1431_v36  ;;  %v756_v9 = vpop.f32.mrf.mxu0 }
  0xf3   : > { %v566_v53 = vadd.f32 %v565_v52, %v564_v51 }
  0xf5   : > { %v567_v54 = vrot.slane %v566_v53, 2 }
  0xf7   : > { %v568_v58 = vadd.f32 %v567_v54, %v566_v53 }
  0xf9   : > { %v569_v2 = vrot.slane %v568_v58, 1 }
  0xfb   : > { %v570_v8 = vadd.f32 %v569_v2, %v568_v58  ;;  %v717_v2 = vpop.f32.mrf.mxu1 }
  0xfd   : > { %v571_v17 = vmul.f32 %v570_v8, %v560_v40  ;;  %v1495_v40 = vld [vmem:[%s2004_s11 + $0x1c] sm:$0xf]  ;;  %v730_v8 = vpop.f32.mrf.mxu2  ;;  %s484_s11 = scalar_lea.vmem %s2205_s24, %s2213_s4 }
  0xfe   : > { %v1443_v44 = vor.u32 %v1495_v40, %v1440_v42 }
  0xff   : > { %v573_v19 = vadd.f32 1e-05, %v571_v17 }
 0x100   : > { %953 = vmatpush.bf16.msra.mxu1 %v1443_v44 }
 0x101   : > { %1599 = vrsqrt.f32 %v573_v19  ;;  %vm580_vm5 = vweird.f32 %v573_v19 }
 0x103   : > { %v2099_v7 = vpop.f32.mrf.mxu1 }
 0x107   : > { %v1600_v43 = vpop.eup %1599 }
 0x108   : > { %v575_v45 = vmul.f32 %v1600_v43, %v573_v19  ;;  %vm581_vm4 = vweird.f32 %v1600_v43 }
 0x109   : > { %vm582_vm6 = vmor %vm580_vm5, %vm581_vm4 }
 0x10a   : > { %v576_v46 = vmul.f32 %v1600_v43, %v575_v45 }
 0x10b   : > { %v769_v11 = vpop.f32.mrf.mxu1 }
 0x10c   : > { %v577_v47 = vmul.f32 0.5, %v576_v46 }
 0x10e   : > { %v578_v48 = vsub.f32 1.5, %v577_v47 }
 0x110   : > { %v579_v51 = vmul.f32 %v1600_v43, %v578_v48 }
 0x112   : > { %v583_v52 = vsel %vm582_vm6, %v1600_v43, %v579_v51 }
 0x113   : > { %v584_v53 = vmul.f32 %v583_v52, %v572_v50 }
 0x115   : > { %v586_v54 = vperm.slane %v584_v53, 0 }
 0x117   : > { %v588_v56 = vmul.f32 %v586_v54, %v2053_v49  ;;  %v702_v49 = vpop.f32.mrf.mxu3 }
 0x119   : > { %v593_v57 = vadd.f32 %v1596_v55, %v588_v56 }
 0x11b   : > { %vm594_vm7 = vcmp.gt.f32.partialorder %v593_v57, 0.0  ;;  %v595_v58 = vmul.f32 0.2, %v593_v57 }
 0x11d   : > { %v596_v59 = vsel %vm594_vm7, %v593_v57, %v595_v58 }
 0x11e   : > { %v597_v60 = vpack.c.bf16 %v596_v59, %v596_v59 }
 0x11f   : > { %v704_v3 = vpop.f32.mrf.mxu3 }
 0x120   : > { %1476 = vmatmul.msk.bf16.vlgmr.msra.gmra.mxu2 %vm851_vm8, %v597_v60  ;;  %1477 = vmatmul.msk.bf16.vlgmr.msra.gmra.mxu3 %vm851_vm8, %v597_v60 }
 0x121   : > { %1478 = vmatmul.msk.bf16.vlgmr.msra.gmra.mxu0 %vm851_vm8, %v597_v60  ;;  %1479 = vmatmul.msk.bf16.vlgmr.msrb.gmra.mxu1 %vm851_vm8, %v597_v60 }
 0x127   : > { %v2097_v6 = vpop.f32.mrf.mxu3 }
 0x12f   : > { %v743_v10 = vpop.f32.mrf.mxu3 }
 0x130   : > { %1480 = vmatmul.msk.bf16.vlgmr.msrb.gmra.mxu2 %vm851_vm8, %v597_v60  ;;  %1481 = vmatmul.msk.bf16.vlgmr.msrb.gmra.mxu3 %vm851_vm8, %v597_v60 }
 0x131   : > { %1482 = vmatmul.msk.bf16.vlgmr.msrb.gmra.mxu0 %vm851_vm8, %v597_v60  ;;  %1483 = vmatmul.msk.bf16.vlgmr.msra.gmra.mxu1 %vm851_vm8, %v597_v60 }
 0x19e   : > { %v890_v12 = vpop.f32.mrf.mxu0  ;;  %v903_v13 = vpop.f32.mrf.mxu1 }
 0x19f   : > { %v891_v14 = vadd.f32 %v890_v12, %v702_v49  ;;  %v904_v15 = vadd.f32 %v903_v13, %v715_v0 }
 0x1a1   : > { %v968_v16 = vrot.slane %v891_v14, 4  ;;  %v1000_v17 = vsel %vm973_vm9, %v891_v14, 0.0  ;;  %v1072_v18 = vmul.f32 %v891_v14, %v891_v14  ;;  %v969_v19 = vrot.slane %v904_v15, 2 }
 0x1a2   : > { %v1001_v20 = vrot.slane %v1000_v17, 4  ;;  %v1007_v21 = vsel %vm973_vm9, %v904_v15, 0.0  ;;  %v1073_v22 = vmul.f32 %v904_v15, %v904_v15 }
 0x1a3   : > { %v1092_v23 = vsel %vm973_vm9, %v1072_v18, 0.0  ;;  %v976_v24 = vsel %vm975_vm10, %v968_v16, %v969_v19  ;;  %v1008_v25 = vrot.slane %v1007_v21, 4  ;;  %v864_v26 = vpop.f32.mrf.mxu2  ;;  %v877_v27 = vpop.f32.mrf.mxu3 }
 0x1a4   : > { %v1002_v28 = vadd.f32 %v1001_v20, %v1000_v17  ;;  %v1093_v29 = vrot.slane %v1092_v23, 4  ;;  %v1099_v30 = vsel %vm973_vm9, %v1073_v22, 0.0  ;;  %v878_v33 = vadd.f32 %v877_v27, %v689_v63 }
 0x1a5   : > { %v1009_v31 = vadd.f32 %v1008_v25, %v1007_v21  ;;  %v1100_v32 = vrot.slane %v1099_v30, 4  ;;  %v865_v43 = vadd.f32 %v864_v26, %v676_v61 }
 0x1a6   : > { %v1003_v34 = vrot.slane %v1002_v28, 2  ;;  %v1094_v35 = vadd.f32 %v1093_v29, %v1092_v23  ;;  %v892_v36 = vpop.f32.mrf.mxu0  ;;  %v905_v37 = vpop.f32.mrf.mxu1  ;;  %v967_v40 = vrot.slane %v878_v33, 6  ;;  %v993_v60 = vsel %vm973_vm9, %v878_v33, 0.0 }
 0x1a7   : > { %v1010_v38 = vrot.slane %v1009_v31, 2  ;;  %v1101_v39 = vadd.f32 %v1100_v32, %v1099_v30  ;;  %v986_v56 = vsel %vm973_vm9, %v865_v43, 0.0  ;;  %v1070_v63 = vmul.f32 %v865_v43, %v865_v43 }
 0x1a8   : > { %v1004_v41 = vadd.f32 %v1003_v34, %v1002_v28  ;;  %v1095_v42 = vrot.slane %v1094_v35, 2  ;;  %v974_v48 = vsel %vm973_vm9, %v865_v43, %v967_v40  ;;  %v1071_v0 = vmul.f32 %v878_v33, %v878_v33 }
 0x1a9   : > { %v1011_v44 = vadd.f32 %v1010_v38, %v1009_v31  ;;  %v1102_v45 = vrot.slane %v1101_v39, 2  ;;  %v978_v57 = vsel %vm977_vm11, %v974_v48, %v976_v24  ;;  %v987_v8 = vrot.slane %v986_v56, 4 }
 0x1aa   : > { %v1005_v46 = vrot.slane %v1004_v41, 1  ;;  %v1096_v47 = vadd.f32 %v1095_v42, %v1094_v35  ;;  %984 = vst [vmem:[%s2113_s30] sm:$0xff] %v978_v57  ;;  %v994_v10 = vrot.slane %v993_v60, 4  ;;  %v1078_v14 = vsel %vm973_vm9, %v1070_v63, 0.0 }
 0x1ab   : > { %v1012_v50 = vrot.slane %v1011_v44, 1  ;;  %v1103_v51 = vadd.f32 %v1102_v45, %v1101_v39  ;;  %v866_v52 = vpop.f32.mrf.mxu2  ;;  %v879_v53 = vpop.f32.mrf.mxu3  ;;  %v1085_v15 = vsel %vm973_vm9, %v1071_v0, 0.0  ;;  %v988_v18 = vadd.f32 %v987_v8, %v986_v56 }
 0x1ac   : > { %v1006_v54 = vadd.f32 %v1005_v46, %v1004_v41  ;;  %v1097_v55 = vrot.slane %v1096_v47, 1  ;;  %v995_v23 = vadd.f32 %v994_v10, %v993_v60  ;;  %v1086_v26 = vrot.slane %v1085_v15, 4 }
 0x1ad   : > { %v1013_v58 = vadd.f32 %v1012_v50, %v1011_v44  ;;  %v1104_v59 = vrot.slane %v1103_v51, 1  ;;  %v1079_v29 = vrot.slane %v1078_v14, 4 }
 0x1ae   : > { %v1051_v61 = vrot.slane %v1006_v54, 6  ;;  %v1098_v62 = vadd.f32 %v1097_v55, %v1096_v47  ;;  %v942_v49 = vpop.f32.mrf.mxu0  ;;  %v955_v1 = vpop.f32.mrf.mxu1  ;;  %v996_v39 = vrot.slane %v995_v23, 2  ;;  %v1087_v41 = vadd.f32 %v1086_v26, %v1085_v15 }
 0x1af   : > { %v1052_v2 = vrot.slane %v1013_v58, 5  ;;  %v1105_v3 = vadd.f32 %v1104_v59, %v1103_v51  ;;  %v943_v11 = vadd.f32 %v942_v49, %v2095_v5  ;;  %v956_v24 = vadd.f32 %v955_v1, %v2099_v7 }
 0x1b0   : > { %v1143_v9 = vrot.slane %v1098_v62, 6  ;;  %v989_v7 = vrot.slane %v988_v18, 2  ;;  %v1080_v45 = vadd.f32 %v1079_v29, %v1078_v14  ;;  %v997_v55 = vadd.f32 %v996_v39, %v995_v23 }
 0x1b1   : > { %v2122_v12 = vsel %vm1059_vm12, %v1051_v61, %v1052_v2  ;;  %v1144_v13 = vrot.slane %v1105_v3, 5  ;;  %v1028_v16 = vsel %vm973_vm9, %v943_v11, 0.0  ;;  %v1076_v20 = vmul.f32 %v943_v11, %v943_v11 }
 0x1b2   : > { %v1029_v19 = vrot.slane %v1028_v16, 4  ;;  %v971_v5 = vrot.slane %v943_v11, 4  ;;  %v972_v31 = vrot.slane %v956_v24, 2  ;;  %v1035_v36 = vsel %vm973_vm9, %v956_v24, 0.0 }
 0x1b3   : > { %v2128_v17 = vsel %vm1059_vm12, %v1143_v9, %v1144_v13  ;;  %v916_v21 = vpop.f32.mrf.mxu2  ;;  %v929_v22 = vpop.f32.mrf.mxu3  ;;  %v1120_v28 = vsel %vm973_vm9, %v1076_v20, 0.0  ;;  %v1077_v37 = vmul.f32 %v956_v24, %v956_v24  ;;  %v1036_v43 = vrot.slane %v1035_v36, 4 }
 0x1b4   : > { %v917_v25 = vadd.f32 %v916_v21, %v2093_v4  ;;  %v1030_v27 = vadd.f32 %v1029_v19, %v1028_v16  ;;  %v1121_v30 = vrot.slane %v1120_v28, 4  ;;  %v930_v32 = vadd.f32 %v929_v22, %v2097_v6 }
 0x1b5   : > { %v980_v40 = vsel %vm975_vm10, %v971_v5, %v972_v31  ;;  %v1127_v44 = vsel %vm973_vm9, %v1077_v37, 0.0  ;;  %v1037_v50 = vadd.f32 %v1036_v43, %v1035_v36  ;;  %v1088_v59 = vrot.slane %v1087_v41, 2 }
 0x1b6   : > { %v944_v33 = vpop.f32.mrf.mxu0  ;;  %v957_v34 = vpop.f32.mrf.mxu1  ;;  %v1031_v35 = vrot.slane %v1030_v27, 2  ;;  %v1014_v38 = vsel %vm973_vm9, %v917_v25, 0.0  ;;  %v1122_v4 = vadd.f32 %v1121_v30, %v1120_v28  ;;  %v1128_v46 = vrot.slane %v1127_v44, 4 }
 0x1b7   : > { %v1015_v47 = vrot.slane %v1014_v38, 4  ;;  %v1074_v51 = vmul.f32 %v917_v25, %v917_v25  ;;  %v970_v52 = vrot.slane %v930_v32, 6  ;;  %v1038_v60 = vrot.slane %v1037_v50, 2 }
 0x1b8   : > { %v1032_v42 = vadd.f32 %v1031_v35, %v1030_v27  ;;  %v1123_v6 = vrot.slane %v1122_v4, 2  ;;  %v1129_v57 = vadd.f32 %v1128_v46, %v1127_v44  ;;  %v990_v2 = vadd.f32 %v989_v7, %v988_v18 }
 0x1b9   : > { %v1016_v58 = vadd.f32 %v1015_v47, %v1014_v38  ;;  %v1106_v61 = vsel %vm973_vm9, %v1074_v51, 0.0  ;;  %v979_v62 = vsel %vm973_vm9, %v917_v25, %v970_v52  ;;  %v1039_v3 = vadd.f32 %v1038_v60, %v1037_v50 }
 0x1ba   : > { %v1033_v48 = vrot.slane %v1032_v42, 1  ;;  %v1124_v56 = vadd.f32 %v1123_v6, %v1122_v4  ;;  %v1130_v49 = vrot.slane %v1129_v57, 2  ;;  %v1107_v8 = vrot.slane %v1106_v61, 4 }
 0x1bb   : > { %v918_v53 = vpop.f32.mrf.mxu2  ;;  %v931_v54 = vpop.f32.mrf.mxu3  ;;  %v1017_v1 = vrot.slane %v1016_v58, 2  ;;  %v981_v9 = vsel %vm977_vm11, %v979_v62, %v980_v40  ;;  %v1081_v10 = vrot.slane %v1080_v45, 2  ;;  %v998_v15 = vrot.slane %v997_v55, 1 }
 0x1bc   : > { %v1034_v63 = vadd.f32 %v1033_v48, %v1032_v42  ;;  %v1125_v0 = vrot.slane %v1124_v56, 1  ;;  %v1131_v13 = vadd.f32 %v1130_v49, %v1129_v57  ;;  %985 = vst [vmem:[%s2113_s30 + $0x8] sm:$0xff] %v981_v9  ;;  %v1040_v16 = vrot.slane %v1039_v3, 1 }
 0x1bd   : > { %v1018_v14 = vadd.f32 %v1017_v1, %v1016_v58  ;;  %v1108_v19 = vadd.f32 %v1107_v8, %v1106_v61  ;;  %v1021_v20 = vsel %vm973_vm9, %v930_v32, 0.0  ;;  %v1089_v21 = vadd.f32 %v1088_v59, %v1087_v41 }
 0x1be   : > { %v1126_v11 = vadd.f32 %v1125_v0, %v1124_v56  ;;  %v1055_v22 = vrot.slane %v1034_v63, 2  ;;  %v1132_v23 = vrot.slane %v1131_v13, 1  ;;  %v1022_v5 = vrot.slane %v1021_v20, 4 }
 0x1bf   : > { %v1041_v24 = vadd.f32 %v1040_v16, %v1039_v3  ;;  %v1019_v18 = vrot.slane %v1018_v14, 1  ;;  %v1109_v25 = vrot.slane %v1108_v19, 2  ;;  %v1075_v26 = vmul.f32 %v930_v32, %v930_v32 }
 0x1c0   : > { %v1147_v27 = vrot.slane %v1126_v11, 2  ;;  %v1133_v28 = vadd.f32 %v1132_v23, %v1131_v13  ;;  %v1023_v29 = vadd.f32 %v1022_v5, %v1021_v20  ;;  %v999_v30 = vadd.f32 %v998_v15, %v997_v55 }
 0x1c1   : > { %v1056_v31 = vrot.slane %v1041_v24, 1  ;;  %v1110_v33 = vadd.f32 %v1109_v25, %v1108_v19  ;;  %v1113_v34 = vsel %vm973_vm9, %v1075_v26, 0.0  ;;  %v1090_v35 = vrot.slane %v1089_v21, 1 }
 0x1c2   : > { %v1148_v36 = vrot.slane %v1133_v28, 1  ;;  %v1024_v37 = vrot.slane %v1023_v29, 2  ;;  %v1114_v38 = vrot.slane %v1113_v34, 4  ;;  %v991_v7 = vrot.slane %v990_v2, 1 }
 0x1c3   : > { %v1082_v39 = vadd.f32 %v1081_v10, %v1080_v45  ;;  %v1065_v4 = vsel %vm1064_vm13, %v1055_v22, %v1056_v31  ;;  %v1020_v40 = vadd.f32 %v1019_v18, %v1018_v14  ;;  %v1111_v42 = vrot.slane %v1110_v33, 1 }
 0x1c4   : > { %v1153_v41 = vsel %vm1064_vm13, %v1147_v27, %v1148_v36  ;;  %v1025_v32 = vadd.f32 %v1024_v37, %v1023_v29  ;;  %v1115_v43 = vadd.f32 %v1114_v38, %v1113_v34  ;;  %v1050_v44 = vrot.slane %v999_v30, 7 }
 0x1c5   : > { %v1091_v6 = vadd.f32 %v1090_v35, %v1089_v21  ;;  %v992_v48 = vadd.f32 %v991_v7, %v990_v2  ;;  %v1083_v50 = vrot.slane %v1082_v39, 1  ;;  %v1053_v51 = vrot.slane %v1020_v40, 4 }
 0x1c6   : > { %v1026_v46 = vrot.slane %v1025_v32, 1  ;;  %v1116_v47 = vrot.slane %v1115_v43, 2  ;;  %v1112_v52 = vadd.f32 %v1111_v42, %v1110_v33 }
 0x1c7   : > { %v1058_v45 = vsel %vm1057_vm14, %v992_v48, %v1050_v44  ;;  %v1142_v55 = vrot.slane %v1091_v6, 7  ;;  %v1084_v58 = vadd.f32 %v1083_v50, %v1082_v39 }
 0x1c8   : > { %v1027_v53 = vadd.f32 %v1026_v46, %v1025_v32  ;;  %v1117_v54 = vadd.f32 %v1116_v47, %v1115_v43  ;;  %v1145_v59 = vrot.slane %v1112_v52, 4  ;;  %v1061_v62 = vsel %vm973_vm9, %v1058_v45, %v2122_v12 }
 0x1c9   : > { %v1149_v0 = vsel %vm1057_vm14, %v1084_v58, %v1142_v55 }
 0x1ca   : > { %v1054_v56 = vrot.slane %v1027_v53, 3  ;;  %v1118_v57 = vrot.slane %v1117_v54, 1  ;;  %v1151_v3 = vsel %vm973_vm9, %v1149_v0, %v2128_v17 }
 0x1cc   : > { %v1063_v60 = vsel %vm1062_vm15, %v1053_v51, %v1054_v56  ;;  %v1119_v61 = vadd.f32 %v1118_v57, %v1117_v54 }
 0x1cd   : > { %v1066_v63 = vsel %vm975_vm10, %v1063_v60, %v1065_v4 }
 0x1ce   : > { %v1067_v49 = vsel %vm977_vm11, %v1061_v62, %v1066_v63  ;;  %v1146_v1 = vrot.slane %v1119_v61, 3 }
 0x1cf   : > { %1069 = vst [vmem:[%s484_s11] sm:$0xff] %v1067_v49 }
 0x1d0   : > { %v1152_v2 = vsel %vm1062_vm15, %v1145_v59, %v1146_v1 }
 0x1d1   : > { %v1154_v8 = vsel %vm975_vm10, %v1152_v2, %v1153_v41 }
 0x1d2   : > { %v1155_v12 = vsel %vm977_vm11, %v1151_v3, %v1154_v8 }
 0x1d3   : > { %1157 = vst [vmem:[%s489_s19] sm:$0xff] %v1155_v12 }
 0x1d4 PF: > { %s2207_s16 = sld [smem:[#allocation14_spill]]  ;;  %s2210_s13 = smov %s1785_s14 }
 0x1d5   : > { %s2208_s18 = sld [smem:[#allocation13_spill]] }
 0x1d6   : > { %s2209_s15 = sld [smem:[#allocation15_spill]] }
 0x1da   : > { %p23_p8 = scmp.ge.s32.totalorder %s2207_s16, 4  }
 0x1db   : > { %s2211_s14 = smov %s2208_s18 }
 0x1dc   :  { %25 = sbr.rel (!%p23_p8) target bundleno = 10 (0xa), region = 140 }
 0x1e1   :  { %1210 = vsyncpa [#allocation3], 1 }
 0x1e2   :  { %1212 = vsyncpa [#allocation3 + $0x1], 1 }
 0x1e3   :  { %1213 = vsyncpa [#allocation5], 1 }
 0x1e4   :  { %1214 = vsyncpa [#allocation8], 1 }
 0x1e5   :  { %1216 = vsyncpa [#allocation8 + $0x1], 1 }

// kernel: generator_forward.12
= control target key start
LH: loop header
LB: loop body
LE: loop exit
PB: predicated region body
PF: predicated region fallthrough
CT: control target
= control target key end

     0   :  { %s132_s0 = inlined_call_operand.vmem [shape: f32[32,256], index: 0, kind: input, shape index: {}]   ;;  %s133_s1 = inlined_call_operand.vmem [shape: f32[1,256], index: 1, kind: input, shape index: {}]   ;;  %s134_s2 = inlined_call_operand.vmem [shape: f32[1,256], index: 2, kind: input, shape index: {}]   ;;  %s135_s3 = inlined_call_operand.vmem [shape: bf16[32,256], index: 3, kind: output, shape index: {}]  }
   0x1   :  { %v14_v0 = vld [vmem:[%s132_s0] sm:$0xff]  ;;  %v15_v1 = vld [vmem:[%s132_s0 + $0x8] sm:$0xff]  ;;  %v16_v6 = vld [vmem:[%s132_s0 + $0x10] sm:$0xff] }
   0x2   :  { %v22_v2 = vld [vmem:[%s133_s1] sm:$0x3]  ;;  %v17_v7 = vld [vmem:[%s132_s0 + $0x18] sm:$0xff]  ;;  %v19_v11 = vld [vmem:[%s132_s0 + $0x28] sm:$0xff] }
   0x3   :  { %v24_v3 = vperm.slane %v22_v2, 0  ;;  %v25_v4 = vperm.slane %v22_v2, 1  ;;  %v36_v5 = vld [vmem:[%s134_s2] sm:$0x3]  ;;  %v20_v12 = vld [vmem:[%s132_s0 + $0x30] sm:$0xff]  ;;  %v21_v17 = vld [vmem:[%s132_s0 + $0x38] sm:$0xff] }
   0x4   :  { %v38_v8 = vperm.slane %v36_v5, 0  ;;  %v39_v9 = vperm.slane %v36_v5, 1  ;;  %v18_v10 = vld [vmem:[%s132_s0 + $0x20] sm:$0xff] }
   0x5   :  { %v28_v13 = vmul.f32 %v24_v3, %v14_v0  ;;  %v29_v14 = vmul.f32 %v25_v4, %v15_v1  ;;  %v30_v15 = vmul.f32 %v24_v3, %v16_v6  ;;  %v31_v16 = vmul.f32 %v25_v4, %v17_v7 }
   0x6   :  { %v32_v18 = vmul.f32 %v24_v3, %v18_v10  ;;  %v33_v19 = vmul.f32 %v25_v4, %v19_v11  ;;  %v34_v20 = vmul.f32 %v24_v3, %v20_v12  ;;  %v35_v21 = vmul.f32 %v25_v4, %v21_v17 }
   0x7   :  { %v42_v22 = vadd.f32 %v38_v8, %v28_v13  ;;  %v43_v23 = vadd.f32 %v39_v9, %v29_v14  ;;  %v44_v24 = vadd.f32 %v38_v8, %v30_v15  ;;  %v45_v25 = vadd.f32 %v39_v9, %v31_v16 }
   0x8   :  { %v46_v26 = vadd.f32 %v38_v8, %v32_v18  ;;  %v47_v27 = vadd.f32 %v39_v9, %v33_v19  ;;  %v48_v28 = vadd.f32 %v38_v8, %v34_v20  ;;  %v49_v29 = vadd.f32 %v39_v9, %v35_v21 }
   0x9   :  { %v50_v30 = vmax.f32 %v42_v22, 0.0  ;;  %v51_v31 = vmax.f32 %v43_v23, 0.0  ;;  %v52_v32 = vmax.f32 %v44_v24, 0.0  ;;  %v53_v33 = vmax.f32 %v45_v25, 0.0 }
   0xa   :  { %v54_v34 = vmax.f32 %v46_v26, 0.0  ;;  %v55_v35 = vmax.f32 %v47_v27, 0.0  ;;  %v56_v36 = vmax.f32 %v48_v28, 0.0  ;;  %v57_v37 = vmax.f32 %v49_v29, 0.0 }
   0xb   :  { %v58_v38 = vpack.c.bf16 %v51_v31, %v50_v30  ;;  %v59_v39 = vpack.c.bf16 %v53_v33, %v52_v32 }
   0xc   :  { %v60_v40 = vpack.c.bf16 %v55_v35, %v54_v34  ;;  %v61_v41 = vpack.c.bf16 %v57_v37, %v56_v36 }
   0xd   :  { %62 = vst [vmem:[%s135_s3] sm:$0xff] %v58_v38 }
   0xe   :  { %63 = vst [vmem:[%s135_s3 + $0x8] sm:$0xff] %v59_v39 }
   0xf   :  { %64 = vst [vmem:[%s135_s3 + $0x10] sm:$0xff] %v60_v40 }
  0x10   :  { %65 = vst [vmem:[%s135_s3 + $0x18] sm:$0xff] %v61_v41 }

// kernel: generator_forward.11
= control target key start
LH: loop header
LB: loop body
LE: loop exit
PB: predicated region body
PF: predicated region fallthrough
CT: control target
= control target key end

     0   :  { %10 = vsyncpa [#allocation3], 0  ;;  %s2371_s18 = smov [#allocation2]   ;;  %s2372_s20 = smov 128   ;;  %s2643_s0 = inlined_call_operand.vmem [shape: bf16[32,1152], index: 0, kind: input, shape index: {}]   ;;  %s2644_s1 = inlined_call_operand.hbm [shape: bf16[1152,256], index: 1, kind: input, shape index: {}]   ;;  %s2645_s2 = inlined_call_operand.vmem [shape: f32[32,256], index: 2, kind: output, shape index: {0}]   ;;  %s2646_s3 = inlined_call_operand.vmem [shape: f32[1,1,256], index: 3, kind: output, shape index: {1}]   ;;  %s2647_s4 = inlined_call_operand.vmem [shape: f32[1,1,256], index: 4, kind: output, shape index: {2}]  }
   0x1   :  { %s26_s17 = sshll.u32 %s2644_s1, 4  ;;  %s28_s19 = sshll.u32 %s2371_s18, 4  ;;  %s27_s17 = int_to_ptr.hbm [resolvable:$true] %s26_s17  ;;  %s29_s19 = int_to_ptr.vmem [resolvable:$true] %s28_s19 }
   0x2   :  { %s2373_s21 = smov 8  }
   0x3   :  { %34 = dma.hbm_to_vmem [thread:$0]  %s27_s17, 18432, %s29_s19, [#allocation3], %s2372_s20, %s2372_s20, %s2373_s21  }
   0x4   :  { %2369 = dma.done.wait [#allocation3], 18432  }
   0x5   :  { %2370 = vsyncadd [#allocation3], 4294948864  ;;  %v1645_v0 = vld [vmem:[#allocation2 + $0x70] sm:$0xf]  ;;  %v2196_v1 = vld [vmem:[#allocation2 + $0x74] sm:$0xf0] }
   0x6   :  { %v1709_v2 = vld [vmem:[#allocation2 + $0xf0] sm:$0xf]  ;;  %v1646_v3 = vor.u32 %v2196_v1, %v1645_v0  ;;  %v2212_v4 = vld [vmem:[#allocation2 + $0xf4] sm:$0xf0]  ;;  %v1637_v11 = vld [vmem:[#allocation2 + $0x60] sm:$0xf] }
   0x7   :  { %v1773_v5 = vld [vmem:[#allocation2 + $0x170] sm:$0xf]  ;;  %v2228_v6 = vld [vmem:[#allocation2 + $0x174] sm:$0xf0]  ;;  %v1710_v7 = vor.u32 %v2212_v4, %v1709_v2  ;;  %v2194_v13 = vld [vmem:[#allocation2 + $0x64] sm:$0xf0] }
   0x8   :  { %v1774_v8 = vor.u32 %v2228_v6, %v1773_v5  ;;  %v1837_v9 = vld [vmem:[#allocation2 + $0x1f0] sm:$0xf]  ;;  %v2244_v10 = vld [vmem:[#allocation2 + $0x1f4] sm:$0xf0]  ;;  %1047 = vmatpush.bf16.msra.mxu0 %v1646_v3  ;;  %v1701_v14 = vld [vmem:[#allocation2 + $0xe0] sm:$0xf]  ;;  %v1638_v16 = vor.u32 %v2194_v13, %v1637_v11 }
   0x9   :  { %v1838_v12 = vor.u32 %v2244_v10, %v1837_v9  ;;  %v2210_v15 = vld [vmem:[#allocation2 + $0xe4] sm:$0xf0]  ;;  %1066 = vmatpush.bf16.msra.mxu1 %v1710_v7  ;;  %v1765_v18 = vld [vmem:[#allocation2 + $0x160] sm:$0xf]  ;;  %v1629_v23 = vld [vmem:[#allocation2 + $0x50] sm:$0xf] }
   0xa   :  { %1085 = vmatpush.bf16.msra.mxu2 %v1774_v8  ;;  %v1702_v17 = vor.u32 %v2210_v15, %v1701_v14  ;;  %v2226_v19 = vld [vmem:[#allocation2 + $0x164] sm:$0xf0]  ;;  %v1829_v20 = vld [vmem:[#allocation2 + $0x1e0] sm:$0xf]  ;;  %v2192_v24 = vld [vmem:[#allocation2 + $0x54] sm:$0xf0] }
   0xb   :  { %1104 = vmatpush.bf16.msra.mxu3 %v1838_v12  ;;  %v1766_v21 = vor.u32 %v2226_v19, %v1765_v18  ;;  %v2242_v22 = vld [vmem:[#allocation2 + $0x1e4] sm:$0xf0]  ;;  %v1693_v26 = vld [vmem:[#allocation2 + $0xd0] sm:$0xf]  ;;  %v2208_v27 = vld [vmem:[#allocation2 + $0xd4] sm:$0xf0]  ;;  %v1630_v29 = vor.u32 %v2192_v24, %v1629_v23 }
   0xc   :  { %v1830_v25 = vor.u32 %v2242_v22, %v1829_v20  ;;  %v1757_v28 = vld [vmem:[#allocation2 + $0x150] sm:$0xf]  ;;  %1048 = vmatpush.bf16.msra.mxu0 %v1638_v16  ;;  %v2224_v30 = vld [vmem:[#allocation2 + $0x154] sm:$0xf0]  ;;  %v1694_v33 = vor.u32 %v2208_v27, %v1693_v26  ;;  %v1621_v35 = vld [vmem:[#allocation2 + $0x40] sm:$0xf] }
   0xd   :  { %v1821_v31 = vld [vmem:[#allocation2 + $0x1d0] sm:$0xf]  ;;  %v2240_v32 = vld [vmem:[#allocation2 + $0x1d4] sm:$0xf0]  ;;  %1067 = vmatpush.bf16.msra.mxu1 %v1702_v17  ;;  %v1758_v34 = vor.u32 %v2224_v30, %v1757_v28  ;;  %v2190_v36 = vld [vmem:[#allocation2 + $0x44] sm:$0xf0] }
   0xe   :  { %1086 = vmatpush.bf16.msra.mxu2 %v1766_v21  ;;  %v1685_v37 = vld [vmem:[#allocation2 + $0xc0] sm:$0xf]  ;;  %v1822_v38 = vor.u32 %v2240_v32, %v1821_v31  ;;  %v2206_v39 = vld [vmem:[#allocation2 + $0xc4] sm:$0xf0]  ;;  %v1622_v44 = vor.u32 %v2190_v36, %v1621_v35  ;;  %v1613_v47 = vld [vmem:[#allocation2 + $0x30] sm:$0xf] }
   0xf   :  { %1105 = vmatpush.bf16.msra.mxu3 %v1830_v25  ;;  %v1749_v40 = vld [vmem:[#allocation2 + $0x140] sm:$0xf]  ;;  %v2222_v41 = vld [vmem:[#allocation2 + $0x144] sm:$0xf0]  ;;  %v1686_v45 = vor.u32 %v2206_v39, %v1685_v37  ;;  %v2188_v48 = vld [vmem:[#allocation2 + $0x34] sm:$0xf0] }
  0x10   :  { %v1813_v42 = vld [vmem:[#allocation2 + $0x1c0] sm:$0xf]  ;;  %v2238_v43 = vld [vmem:[#allocation2 + $0x1c4] sm:$0xf0]  ;;  %1049 = vmatpush.bf16.msra.mxu0 %v1630_v29  ;;  %v1750_v46 = vor.u32 %v2222_v41, %v1749_v40  ;;  %v1677_v49 = vld [vmem:[#allocation2 + $0xb0] sm:$0xf]  ;;  %v1614_v56 = vor.u32 %v2188_v48, %v1613_v47 }
  0x11   :  { %1068 = vmatpush.bf16.msra.mxu1 %v1694_v33  ;;  %v1814_v50 = vor.u32 %v2238_v43, %v1813_v42  ;;  %v2204_v51 = vld [vmem:[#allocation2 + $0xb4] sm:$0xf0]  ;;  %v1741_v52 = vld [vmem:[#allocation2 + $0x130] sm:$0xf]  ;;  %v1605_v59 = vld [vmem:[#allocation2 + $0x20] sm:$0xf] }
  0x12   :  { %1087 = vmatpush.bf16.msra.mxu2 %v1758_v34  ;;  %v2220_v53 = vld [vmem:[#allocation2 + $0x134] sm:$0xf0]  ;;  %v1805_v54 = vld [vmem:[#allocation2 + $0x1b0] sm:$0xf]  ;;  %v1678_v57 = vor.u32 %v2204_v51, %v1677_v49  ;;  %v2186_v60 = vld [vmem:[#allocation2 + $0x24] sm:$0xf0] }
  0x13   :  { %1106 = vmatpush.bf16.msra.mxu3 %v1822_v38  ;;  %v2236_v55 = vld [vmem:[#allocation2 + $0x1b4] sm:$0xf0]  ;;  %v1742_v58 = vor.u32 %v2220_v53, %v1741_v52  ;;  %v1669_v61 = vld [vmem:[#allocation2 + $0xa0] sm:$0xf]  ;;  %v2202_v63 = vld [vmem:[#allocation2 + $0xa4] sm:$0xf0]  ;;  %v1606_v4 = vor.u32 %v2186_v60, %v1605_v59 }
  0x14   :  { %1050 = vmatpush.bf16.msra.mxu0 %v1622_v44  ;;  %v1806_v62 = vor.u32 %v2236_v55, %v1805_v54  ;;  %v1733_v0 = vld [vmem:[#allocation2 + $0x120] sm:$0xf]  ;;  %v2218_v1 = vld [vmem:[#allocation2 + $0x124] sm:$0xf0]  ;;  %v1670_v5 = vor.u32 %v2202_v63, %v1669_v61  ;;  %v1597_v7 = vld [vmem:[#allocation2 + $0x10] sm:$0xf] }
  0x15   :  { %1069 = vmatpush.bf16.msra.mxu1 %v1686_v45  ;;  %v1797_v2 = vld [vmem:[#allocation2 + $0x1a0] sm:$0xf]  ;;  %v2234_v3 = vld [vmem:[#allocation2 + $0x1a4] sm:$0xf0]  ;;  %v1734_v6 = vor.u32 %v2218_v1, %v1733_v0  ;;  %v2184_v8 = vld [vmem:[#allocation2 + $0x14] sm:$0xf0] }
  0x16   :  { %1088 = vmatpush.bf16.msra.mxu2 %v1750_v46  ;;  %v1661_v9 = vld [vmem:[#allocation2 + $0x90] sm:$0xf]  ;;  %v1798_v10 = vor.u32 %v2234_v3, %v1797_v2  ;;  %v2200_v11 = vld [vmem:[#allocation2 + $0x94] sm:$0xf0]  ;;  %v1589_v16 = vld [vmem:[#allocation2] sm:$0xf]  ;;  %v1598_v17 = vor.u32 %v2184_v8, %v1597_v7 }
  0x17   :  { %1107 = vmatpush.bf16.msra.mxu3 %v1814_v50  ;;  %v1725_v12 = vld [vmem:[#allocation2 + $0x110] sm:$0xf]  ;;  %v2216_v13 = vld [vmem:[#allocation2 + $0x114] sm:$0xf0]  ;;  %v2182_v18 = vld [vmem:[#allocation2 + $0x4] sm:$0xf0]  ;;  %v1662_v21 = vor.u32 %v2200_v11, %v1661_v9 }
  0x18   :  { %1051 = vmatpush.bf16.msra.mxu0 %v1614_v56  ;;  %v1789_v14 = vld [vmem:[#allocation2 + $0x190] sm:$0xf]  ;;  %v2232_v15 = vld [vmem:[#allocation2 + $0x194] sm:$0xf0]  ;;  %v1653_v19 = vld [vmem:[#allocation2 + $0x80] sm:$0xf]  ;;  %v1726_v22 = vor.u32 %v2216_v13, %v1725_v12  ;;  %v1590_v34 = vor.u32 %v2182_v18, %v1589_v16 }
  0x19   :  { %1070 = vmatpush.bf16.msra.mxu1 %v1678_v57  ;;  %v2198_v20 = vld [vmem:[#allocation2 + $0x84] sm:$0xf0]  ;;  %v1717_v23 = vld [vmem:[#allocation2 + $0x100] sm:$0xf]  ;;  %v1790_v26 = vor.u32 %v2232_v15, %v1789_v14  ;;  %v2167_v29 = vld [vmem:[%s2643_s0 + $0x20] sm:$0xf0] }
  0x1a   :  { %1089 = vmatpush.bf16.msra.mxu2 %v1742_v58  ;;  %v2214_v24 = vld [vmem:[#allocation2 + $0x104] sm:$0xf0]  ;;  %v1781_v25 = vld [vmem:[#allocation2 + $0x180] sm:$0xf]  ;;  %v2163_v30 = vld [vmem:[%s2643_s0 + $0x4] sm:$0xf]  ;;  %v1654_v38 = vor.u32 %v2198_v20, %v1653_v19 }
  0x1b   :  { %1108 = vmatpush.bf16.msra.mxu3 %v1806_v62  ;;  %v2230_v27 = vld [vmem:[#allocation2 + $0x184] sm:$0xf0]  ;;  %v1517_v28 = vld [vmem:[%s2643_s0] sm:$0xf]  ;;  %v2029_v32 = vld [vmem:[#allocation2 + $0x370] sm:$0xf]  ;;  %v1718_v39 = vor.u32 %v2214_v24, %v1717_v23 }
  0x1c   :  { %1052 = vmatpush.bf16.msra.mxu0 %v1606_v4  ;;  %v1519_v31 = vld [vmem:[%s2643_s0 + $0x24] sm:$0xf0]  ;;  %v2292_v33 = vld [vmem:[#allocation2 + $0x374] sm:$0xf0]  ;;  %v1965_v36 = vld [vmem:[#allocation2 + $0x2f0] sm:$0xf]  ;;  %v1782_v43 = vor.u32 %v2230_v27, %v1781_v25  ;;  %v2427_v48 = vor.u32 %v2167_v29, %v1517_v28 }
  0x1d   :  { %1071 = vmatpush.bf16.msra.mxu1 %v1670_v5  ;;  %v1525_v35 = vld [vmem:[%s2643_s0 + $0x8] sm:$0xf]  ;;  %v2276_v37 = vld [vmem:[#allocation2 + $0x2f4] sm:$0xf0]  ;;  %v2168_v40 = vld [vmem:[%s2643_s0 + $0x28] sm:$0xf0]  ;;  %v2030_v44 = vor.u32 %v2292_v33, %v2029_v32  ;;  %v2429_v53 = vor.u32 %v2163_v30, %v1519_v31 }
  0x1e   :  { %1090 = vmatpush.bf16.msra.mxu2 %v1734_v6  ;;  %v2164_v41 = vld [vmem:[%s2643_s0 + $0xc] sm:$0xf]  ;;  %v1527_v42 = vld [vmem:[%s2643_s0 + $0x2c] sm:$0xf0]  ;;  %v2260_v46 = vld [vmem:[#allocation2 + $0x274] sm:$0xf0]  ;;  %v1966_v49 = vor.u32 %v2276_v37, %v1965_v36  ;;  %v2431_v54 = vor.u32 %v2168_v40, %v1525_v35 }
  0x1f   :  { %1109 = vmatpush.bf16.msra.mxu3 %v1798_v10  ;;  %v1901_v45 = vld [vmem:[#allocation2 + $0x270] sm:$0xf]  ;;  %v2308_v50 = vld [vmem:[#allocation2 + $0x3f4] sm:$0xf0]  ;;  %v2021_v51 = vld [vmem:[#allocation2 + $0x360] sm:$0xf]  ;;  %v2433_v57 = vor.u32 %v2164_v41, %v1527_v42 }
  0x20   :  { %1053 = vmatpush.bf16.msra.mxu0 %v1598_v17  ;;  %v2093_v47 = vld [vmem:[#allocation2 + $0x3f0] sm:$0xf]  ;;  %v2290_v52 = vld [vmem:[#allocation2 + $0x364] sm:$0xf0]  ;;  %v1957_v55 = vld [vmem:[#allocation2 + $0x2e0] sm:$0xf]  ;;  %v1902_v58 = vor.u32 %v2260_v46, %v1901_v45 }
  0x21   :  { %1072 = vmatpush.bf16.msra.mxu1 %v1662_v21  ;;  %v2274_v56 = vld [vmem:[#allocation2 + $0x2e4] sm:$0xf0]  ;;  %v2094_v59 = vor.u32 %v2308_v50, %v2093_v47  ;;  %v2022_v60 = vor.u32 %v2290_v52, %v2021_v51  ;;  %v1893_v61 = vld [vmem:[#allocation2 + $0x260] sm:$0xf]  ;;  %v2013_v2 = vld [vmem:[#allocation2 + $0x350] sm:$0xf] }
  0x22   :  { %1091 = vmatpush.bf16.msra.mxu2 %v1726_v22  ;;  %v2258_v62 = vld [vmem:[#allocation2 + $0x264] sm:$0xf0]  ;;  %v2085_v63 = vld [vmem:[#allocation2 + $0x3e0] sm:$0xf]  ;;  %v1958_v0 = vor.u32 %v2274_v56, %v1957_v55  ;;  %v2288_v3 = vld [vmem:[#allocation2 + $0x354] sm:$0xf0] }
  0x23   :  { %1110 = vmatpush.bf16.msra.mxu3 %v1790_v26  ;;  %v2306_v1 = vld [vmem:[#allocation2 + $0x3e4] sm:$0xf0]  ;;  %v1949_v4 = vld [vmem:[#allocation2 + $0x2d0] sm:$0xf]  ;;  %v2272_v5 = vld [vmem:[#allocation2 + $0x2d4] sm:$0xf0]  ;;  %v1894_v6 = vor.u32 %v2258_v62, %v1893_v61  ;;  %v2014_v8 = vor.u32 %v2288_v3, %v2013_v2 }
  0x24   :  { %1054 = vmatpush.bf16.msra.mxu0 %v1590_v34  ;;  %v2086_v7 = vor.u32 %v2306_v1, %v2085_v63  ;;  %v1885_v9 = vld [vmem:[#allocation2 + $0x250] sm:$0xf]  ;;  %v2256_v10 = vld [vmem:[#allocation2 + $0x254] sm:$0xf0]  ;;  %v1950_v12 = vor.u32 %v2272_v5, %v1949_v4  ;;  %v2005_v14 = vld [vmem:[#allocation2 + $0x340] sm:$0xf] }
  0x25   :  { %1073 = vmatpush.bf16.msra.mxu1 %v1654_v38  ;;  %v2077_v11 = vld [vmem:[#allocation2 + $0x3d0] sm:$0xf]  ;;  %v2304_v13 = vld [vmem:[#allocation2 + $0x3d4] sm:$0xf0]  ;;  %v2286_v15 = vld [vmem:[#allocation2 + $0x344] sm:$0xf0]  ;;  %v1886_v18 = vor.u32 %v2256_v10, %v1885_v9 }
  0x26   :  { %1092 = vmatpush.bf16.msra.mxu2 %v1718_v39  ;;  %v1941_v16 = vld [vmem:[#allocation2 + $0x2c0] sm:$0xf]  ;;  %v2270_v17 = vld [vmem:[#allocation2 + $0x2c4] sm:$0xf0]  ;;  %v2078_v22 = vor.u32 %v2304_v13, %v2077_v11  ;;  %v2006_v23 = vor.u32 %v2286_v15, %v2005_v14  ;;  %v2176_v26 = vld [vmem:[%s2643_s0 + $0x68] sm:$0xf0] }
  0x27   :  { %1111 = vmatpush.bf16.msra.mxu3 %v1782_v43  ;;  %1055 = vmatmul.bf16.vlgmr.msra.gmra.mxu0 %v2427_v48  ;;  %v1877_v19 = vld [vmem:[#allocation2 + $0x240] sm:$0xf]  ;;  %v2254_v20 = vld [vmem:[#allocation2 + $0x244] sm:$0xf0]  ;;  %v1942_v27 = vor.u32 %v2270_v17, %v1941_v16  ;;  %v2172_v28 = vld [vmem:[%s2643_s0 + $0x4c] sm:$0xf] }
  0x28   :  { %1074 = vmatmul.bf16.vlgmr.msra.gmra.mxu1 %v2429_v53  ;;  %1123 = vmatpush.bf16.msrb.mxu0 %v1902_v58  ;;  %v2069_v21 = vld [vmem:[#allocation2 + $0x3c0] sm:$0xf]  ;;  %v2302_v24 = vld [vmem:[#allocation2 + $0x3c4] sm:$0xf0]  ;;  %v1555_v29 = vld [vmem:[%s2643_s0 + $0x6c] sm:$0xf0]  ;;  %v1878_v35 = vor.u32 %v2254_v20, %v1877_v19 }
  0x29   :  { %1142 = vmatpush.bf16.msrb.mxu1 %v1966_v49  ;;  %1093 = vmatmul.bf16.vlgmr.msra.gmra.mxu2 %v2431_v54  ;;  %v1553_v25 = vld [vmem:[%s2643_s0 + $0x48] sm:$0xf]  ;;  %v1997_v30 = vld [vmem:[#allocation2 + $0x330] sm:$0xf]  ;;  %v2284_v31 = vld [vmem:[#allocation2 + $0x334] sm:$0xf0]  ;;  %v2070_v39 = vor.u32 %v2302_v24, %v2069_v21  ;;  %v2465_v50 = vor.u32 %v2172_v28, %v1555_v29 }
  0x2a   :  { %1161 = vmatpush.bf16.msrb.mxu2 %v2030_v44  ;;  %1112 = vmatmul.bf16.vlgmr.msra.gmra.mxu3 %v2433_v57  ;;  %v1561_v32 = vld [vmem:[%s2643_s0 + $0x50] sm:$0xf]  ;;  %v2268_v34 = vld [vmem:[#allocation2 + $0x2b4] sm:$0xf0]  ;;  %v2177_v36 = vld [vmem:[%s2643_s0 + $0x70] sm:$0xf0]  ;;  %v1998_v40 = vor.u32 %v2284_v31, %v1997_v30  ;;  %v2463_v44 = vor.u32 %v2176_v26, %v1553_v25 }
  0x2b   :  { %1180 = vmatpush.bf16.msrb.mxu3 %v2094_v59  ;;  %v1933_v33 = vld [vmem:[#allocation2 + $0x2b0] sm:$0xf]  ;;  %v2173_v37 = vld [vmem:[%s2643_s0 + $0x54] sm:$0xf]  ;;  %v1563_v38 = vld [vmem:[%s2643_s0 + $0x74] sm:$0xf0]  ;;  %v2467_v51 = vor.u32 %v2177_v36, %v1561_v32 }
  0x2c   :  { %1124 = vmatpush.bf16.msrb.mxu0 %v1894_v6  ;;  %v1869_v41 = vld [vmem:[#allocation2 + $0x230] sm:$0xf]  ;;  %v2252_v42 = vld [vmem:[#allocation2 + $0x234] sm:$0xf0]  ;;  %v1934_v45 = vor.u32 %v2268_v34, %v1933_v33  ;;  %v1989_v47 = vld [vmem:[#allocation2 + $0x320] sm:$0xf]  ;;  %v2469_v56 = vor.u32 %v2173_v37, %v1563_v38 }
  0x2d   :  { %1143 = vmatpush.bf16.msrb.mxu1 %v1958_v0  ;;  %v2061_v43 = vld [vmem:[#allocation2 + $0x3b0] sm:$0xf]  ;;  %v2300_v46 = vld [vmem:[#allocation2 + $0x3b4] sm:$0xf0]  ;;  %v2282_v49 = vld [vmem:[#allocation2 + $0x324] sm:$0xf0]  ;;  %v1870_v58 = vor.u32 %v2252_v42, %v1869_v41 }
  0x2e   :  { %1162 = vmatpush.bf16.msrb.mxu2 %v2022_v60  ;;  %v1925_v52 = vld [vmem:[#allocation2 + $0x2a0] sm:$0xf]  ;;  %v2266_v55 = vld [vmem:[#allocation2 + $0x2a4] sm:$0xf0]  ;;  %v2062_v59 = vor.u32 %v2300_v46, %v2061_v43  ;;  %v1990_v60 = vor.u32 %v2282_v49, %v1989_v47  ;;  %v1981_v2 = vld [vmem:[#allocation2 + $0x310] sm:$0xf] }
  0x2f   :  { %1181 = vmatpush.bf16.msrb.mxu3 %v2086_v7  ;;  %v1861_v61 = vld [vmem:[#allocation2 + $0x220] sm:$0xf]  ;;  %v2250_v62 = vld [vmem:[#allocation2 + $0x224] sm:$0xf0]  ;;  %v1926_v0 = vor.u32 %v2266_v55, %v1925_v52  ;;  %v2280_v3 = vld [vmem:[#allocation2 + $0x314] sm:$0xf0] }
  0x30   :  { %1125 = vmatpush.bf16.msrb.mxu0 %v1886_v18  ;;  %v2053_v63 = vld [vmem:[#allocation2 + $0x3a0] sm:$0xf]  ;;  %v2298_v1 = vld [vmem:[#allocation2 + $0x3a4] sm:$0xf0]  ;;  %v1917_v4 = vld [vmem:[#allocation2 + $0x290] sm:$0xf]  ;;  %v1862_v6 = vor.u32 %v2250_v62, %v1861_v61  ;;  %v1982_v9 = vor.u32 %v2280_v3, %v1981_v2 }
  0x31   :  { %1144 = vmatpush.bf16.msrb.mxu1 %v1950_v12  ;;  %v2264_v5 = vld [vmem:[#allocation2 + $0x294] sm:$0xf0]  ;;  %v1853_v7 = vld [vmem:[#allocation2 + $0x210] sm:$0xf]  ;;  %v1973_v14 = vld [vmem:[#allocation2 + $0x300] sm:$0xf] }
  0x32   :  { %1163 = vmatpush.bf16.msrb.mxu2 %v2014_v8  ;;  %v2054_v8 = vor.u32 %v2298_v1, %v2053_v63  ;;  %v2248_v10 = vld [vmem:[#allocation2 + $0x214] sm:$0xf0]  ;;  %v2045_v11 = vld [vmem:[#allocation2 + $0x390] sm:$0xf]  ;;  %v1918_v13 = vor.u32 %v2264_v5, %v1917_v4  ;;  %v2278_v15 = vld [vmem:[#allocation2 + $0x304] sm:$0xf0] }
  0x33   :  { %1182 = vmatpush.bf16.msrb.mxu3 %v2078_v22  ;;  %v2296_v12 = vld [vmem:[#allocation2 + $0x394] sm:$0xf0]  ;;  %v1909_v16 = vld [vmem:[#allocation2 + $0x280] sm:$0xf]  ;;  %v2262_v17 = vld [vmem:[#allocation2 + $0x284] sm:$0xf0]  ;;  %v1854_v20 = vor.u32 %v2248_v10, %v1853_v7  ;;  %v1974_v25 = vor.u32 %v2278_v15, %v1973_v14 }
  0x34   :  { %1126 = vmatpush.bf16.msrb.mxu0 %v1878_v35  ;;  %v2211_v18 = vld [vmem:[#allocation2 + $0xf4] sm:$0xf]  ;;  %v1711_v19 = vld [vmem:[#allocation2 + $0xf8] sm:$0xf0]  ;;  %v1845_v21 = vld [vmem:[#allocation2 + $0x200] sm:$0xf]  ;;  %v2046_v24 = vor.u32 %v2296_v12, %v2045_v11  ;;  %v1910_v29 = vor.u32 %v2262_v17, %v1909_v16 }
  0x35   :  { %1145 = vmatpush.bf16.msrb.mxu1 %v1942_v27  ;;  %v2195_v22 = vld [vmem:[#allocation2 + $0x74] sm:$0xf]  ;;  %v2246_v26 = vld [vmem:[#allocation2 + $0x204] sm:$0xf0]  ;;  %v2037_v27 = vld [vmem:[#allocation2 + $0x380] sm:$0xf]  ;;  %v1714_v34 = vor.u32 %v2211_v18, %v1711_v19 }
  0x36   :  { %1164 = vmatpush.bf16.msrb.mxu2 %v2006_v23  ;;  %v1647_v23 = vld [vmem:[#allocation2 + $0x78] sm:$0xf0]  ;;  %v2294_v28 = vld [vmem:[#allocation2 + $0x384] sm:$0xf0]  ;;  %v1533_v30 = vld [vmem:[%s2643_s0 + $0x10] sm:$0xf]  ;;  %v1846_v42 = vor.u32 %v2246_v26, %v1845_v21 }
  0x37   :  { %1183 = vmatpush.bf16.msrb.mxu3 %v2070_v39  ;;  %1060 = vmatmul.bf16.gmra.mxu0 %v2463_v44  ;;  %v2169_v31 = vld [vmem:[%s2643_s0 + $0x30] sm:$0xf0]  ;;  %v1535_v33 = vld [vmem:[%s2643_s0 + $0x34] sm:$0xf0]  ;;  %v2157_v35 = vld [vmem:[#allocation2 + $0x470] sm:$0xf]  ;;  %v1650_v38 = vor.u32 %v2195_v22, %v1647_v23  ;;  %v2038_v47 = vor.u32 %v2294_v28, %v2037_v27 }
  0x38   :  { %1079 = vmatmul.bf16.gmra.mxu1 %v2465_v50  ;;  %1127 = vmatpush.bf16.msrb.mxu0 %v1870_v58  ;;  %v2165_v32 = vld [vmem:[%s2643_s0 + $0x14] sm:$0xf]  ;;  %v2324_v36 = vld [vmem:[#allocation2 + $0x474] sm:$0xf0]  ;;  %v1775_v39 = vld [vmem:[#allocation2 + $0x178] sm:$0xf0] }
  0x39   :  { %1146 = vmatpush.bf16.msrb.mxu1 %v1934_v45  ;;  %1098 = vmatmul.bf16.gmra.mxu2 %v2467_v51  ;;  %v2227_v37 = vld [vmem:[#allocation2 + $0x174] sm:$0xf]  ;;  %v1703_v41 = vld [vmem:[#allocation2 + $0xe8] sm:$0xf0]  ;;  %v1541_v43 = vld [vmem:[%s2643_s0 + $0x18] sm:$0xf]  ;;  %v2158_v52 = vor.u32 %v2324_v36, %v2157_v35  ;;  %v2501_v1 = vor.u32 %v2165_v32, %v1535_v33 }
  0x3a   :  { %1165 = vmatpush.bf16.msrb.mxu2 %v1998_v40  ;;  %1117 = vmatmul.bf16.gmra.mxu3 %v2469_v56  ;;  %v2209_v40 = vld [vmem:[#allocation2 + $0xe4] sm:$0xf]  ;;  %v2170_v45 = vld [vmem:[%s2643_s0 + $0x38] sm:$0xf0]  ;;  %v1543_v49 = vld [vmem:[%s2643_s0 + $0x3c] sm:$0xf0] }
  0x3b   :  { %1184 = vmatpush.bf16.msrb.mxu3 %v2062_v59  ;;  %v2166_v46 = vld [vmem:[%s2643_s0 + $0x1c] sm:$0xf]  ;;  %v2149_v55 = vld [vmem:[#allocation2 + $0x460] sm:$0xf]  ;;  %v2322_v58 = vld [vmem:[#allocation2 + $0x464] sm:$0xf0]  ;;  %v1778_v59 = vor.u32 %v2227_v37, %v1775_v39  ;;  %v2503_v5 = vor.u32 %v2170_v45, %v1541_v43 }
  0x3c   :  { %1128 = vmatpush.bf16.msrb.mxu0 %v1862_v6  ;;  %v2193_v61 = vld [vmem:[#allocation2 + $0x64] sm:$0xf]  ;;  %v1639_v62 = vld [vmem:[#allocation2 + $0x68] sm:$0xf0]  ;;  %v2207_v3 = vld [vmem:[#allocation2 + $0xd4] sm:$0xf]  ;;  %v2505_v6 = vor.u32 %v2166_v46, %v1543_v49  ;;  %v2150_v7 = vor.u32 %v2322_v58, %v2149_v55 }
  0x3d   :  { %1147 = vmatpush.bf16.msrb.mxu1 %v1926_v0  ;;  %v2225_v63 = vld [vmem:[#allocation2 + $0x164] sm:$0xf]  ;;  %v2499_v0 = vor.u32 %v2169_v31, %v1533_v30  ;;  %v1767_v2 = vld [vmem:[#allocation2 + $0x168] sm:$0xf0]  ;;  %v1695_v4 = vld [vmem:[#allocation2 + $0xd8] sm:$0xf0] }
  0x3e   :  { %1166 = vmatpush.bf16.msrb.mxu2 %v1990_v60  ;;  %v1706_v60 = vor.u32 %v2209_v40, %v1703_v41  ;;  %v2320_v10 = vld [vmem:[#allocation2 + $0x454] sm:$0xf0]  ;;  %v1770_v11 = vor.u32 %v2225_v63, %v1767_v2  ;;  %v1698_v12 = vor.u32 %v2207_v3, %v1695_v4  ;;  %v1631_v14 = vld [vmem:[#allocation2 + $0x58] sm:$0xf0]  ;;  %v2223_v15 = vld [vmem:[#allocation2 + $0x154] sm:$0xf] }
  0x3f   :  { %1185 = vmatpush.bf16.msrb.mxu3 %v2054_v8  ;;  %v1642_v8 = vor.u32 %v2193_v61, %v1639_v62  ;;  %v1759_v16 = vld [vmem:[#allocation2 + $0x158] sm:$0xf0]  ;;  %v2205_v17 = vld [vmem:[#allocation2 + $0xc4] sm:$0xf]  ;;  %v1687_v18 = vld [vmem:[#allocation2 + $0xc8] sm:$0xf0] }
  0x40   :  { %1129 = vmatpush.bf16.msrb.mxu0 %v1854_v20  ;;  %v2133_v21 = vld [vmem:[#allocation2 + $0x440] sm:$0xf]  ;;  %v2318_v22 = vld [vmem:[#allocation2 + $0x444] sm:$0xf0]  ;;  %v1762_v23 = vor.u32 %v2223_v15, %v1759_v16  ;;  %v1623_v26 = vld [vmem:[#allocation2 + $0x48] sm:$0xf0] }
  0x41   :  { %1148 = vmatpush.bf16.msrb.mxu1 %v1918_v13  ;;  %v2191_v13 = vld [vmem:[#allocation2 + $0x54] sm:$0xf]  ;;  %v2221_v27 = vld [vmem:[#allocation2 + $0x144] sm:$0xf]  ;;  %v1751_v28 = vld [vmem:[#allocation2 + $0x148] sm:$0xf0]  ;;  %v2134_v31 = vor.u32 %v2318_v22, %v2133_v21 }
  0x42   :  { %1167 = vmatpush.bf16.msrb.mxu2 %v1982_v9  ;;  %v2141_v9 = vld [vmem:[#allocation2 + $0x450] sm:$0xf]  ;;  %v1634_v20 = vor.u32 %v2191_v13, %v1631_v14  ;;  %v1679_v30 = vld [vmem:[#allocation2 + $0xb8] sm:$0xf0]  ;;  %v1754_v35 = vor.u32 %v2221_v27, %v1751_v28  ;;  %v1569_v36 = vld [vmem:[%s2643_s0 + $0x58] sm:$0xf] }
  0x43   :  { %1186 = vmatpush.bf16.msrb.mxu3 %v2046_v24  ;;  %v2142_v19 = vor.u32 %v2320_v10, %v2141_v9  ;;  %v1690_v24 = vor.u32 %v2205_v17, %v1687_v18  ;;  %v2125_v33 = vld [vmem:[#allocation2 + $0x430] sm:$0xf]  ;;  %v2178_v37 = vld [vmem:[%s2643_s0 + $0x78] sm:$0xf0]  ;;  %v1571_v39 = vld [vmem:[%s2643_s0 + $0x7c] sm:$0xf0] }
  0x44   :  { %1130 = vmatpush.bf16.msrb.mxu0 %v1846_v42  ;;  %v2187_v41 = vld [vmem:[#allocation2 + $0x34] sm:$0xf]  ;;  %v1615_v42 = vld [vmem:[#allocation2 + $0x38] sm:$0xf0]  ;;  %v2201_v46 = vld [vmem:[#allocation2 + $0xa4] sm:$0xf] }
  0x45   :  { %1149 = vmatpush.bf16.msrb.mxu1 %v1910_v29  ;;  %v2203_v29 = vld [vmem:[#allocation2 + $0xb4] sm:$0xf]  ;;  %v1743_v45 = vld [vmem:[#allocation2 + $0x138] sm:$0xf0]  ;;  %v1577_v49 = vld [vmem:[%s2643_s0 + $0x60] sm:$0xf] }
  0x46   :  { %1168 = vmatpush.bf16.msrb.mxu2 %v1974_v25  ;;  %v2189_v25 = vld [vmem:[#allocation2 + $0x44] sm:$0xf]  ;;  %v1682_v40 = vor.u32 %v2203_v29, %v1679_v30  ;;  %v2219_v43 = vld [vmem:[#allocation2 + $0x134] sm:$0xf]  ;;  %v1579_v58 = vld [vmem:[%s2643_s0 + $0x84] sm:$0xf0] }
  0x47   :  { %1187 = vmatpush.bf16.msrb.mxu3 %v2038_v47  ;;  %1131 = vmatmul.bf16.vlgmr.msrb.gmra.mxu0 %v2499_v0  ;;  %v1626_v32 = vor.u32 %v2189_v25, %v1623_v26  ;;  %v1671_v47 = vld [vmem:[#allocation2 + $0xa8] sm:$0xf0]  ;;  %v2175_v55 = vld [vmem:[%s2643_s0 + $0x64] sm:$0xf]  ;;  %v2117_v61 = vld [vmem:[#allocation2 + $0x420] sm:$0xf]  ;;  %v1746_v63 = vor.u32 %v2219_v43, %v1743_v45 }
  0x48   :  { %1199 = vmatpush.bf16.msra.mxu0 %v2158_v52  ;;  %1150 = vmatmul.bf16.vlgmr.msrb.gmra.mxu1 %v2501_v1  ;;  %v2179_v52 = vld [vmem:[%s2643_s0 + $0x80] sm:$0xf0]  ;;  %v2314_v62 = vld [vmem:[#allocation2 + $0x424] sm:$0xf0]  ;;  %v1674_v2 = vor.u32 %v2201_v46, %v1671_v47  ;;  %v1607_v4 = vld [vmem:[#allocation2 + $0x28] sm:$0xf0]  ;;  %v2541_v14 = vor.u32 %v2175_v55, %v1579_v58 }
  0x49   :  { %1218 = vmatpush.bf16.msra.mxu1 %v1650_v38  ;;  %1169 = vmatmul.bf16.vlgmr.msrb.gmra.mxu2 %v2503_v5  ;;  %v2174_v38 = vld [vmem:[%s2643_s0 + $0x5c] sm:$0xf]  ;;  %v2185_v3 = vld [vmem:[#allocation2 + $0x24] sm:$0xf]  ;;  %v1735_v10 = vld [vmem:[#allocation2 + $0x128] sm:$0xf0]  ;;  %v2539_v13 = vor.u32 %v2179_v52, %v1577_v49  ;;  %v2118_v15 = vor.u32 %v2314_v62, %v2117_v61 }
  0x4a   :  { %1237 = vmatpush.bf16.msra.mxu2 %v1714_v34  ;;  %1188 = vmatmul.bf16.vlgmr.msrb.gmra.mxu3 %v2505_v6  ;;  %v2316_v34 = vld [vmem:[#allocation2 + $0x434] sm:$0xf0]  ;;  %v2537_v9 = vor.u32 %v2174_v38, %v1571_v39  ;;  %v1610_v16 = vor.u32 %v2185_v3, %v1607_v4  ;;  %v2109_v17 = vld [vmem:[#allocation2 + $0x410] sm:$0xf]  ;;  %v2183_v21 = vld [vmem:[#allocation2 + $0x14] sm:$0xf] }
  0x4b   :  { %1256 = vmatpush.bf16.msra.mxu3 %v1778_v59  ;;  %v2126_v59 = vor.u32 %v2316_v34, %v2125_v33  ;;  %v2312_v18 = vld [vmem:[#allocation2 + $0x414] sm:$0xf0]  ;;  %v1599_v22 = vld [vmem:[#allocation2 + $0x18] sm:$0xf0]  ;;  %v2197_v25 = vld [vmem:[#allocation2 + $0x84] sm:$0xf] }
  0x4c   :  { %1200 = vmatpush.bf16.msra.mxu0 %v2150_v7  ;;  %v2217_v7 = vld [vmem:[#allocation2 + $0x124] sm:$0xf]  ;;  %v1655_v26 = vld [vmem:[#allocation2 + $0x88] sm:$0xf0]  ;;  %v2275_v27 = vld [vmem:[#allocation2 + $0x2f4] sm:$0xf]  ;;  %v2110_v29 = vor.u32 %v2312_v18, %v2109_v17  ;;  %v1602_v30 = vor.u32 %v2183_v21, %v1599_v22 }
  0x4d   :  { %1219 = vmatpush.bf16.msra.mxu1 %v1642_v8  ;;  %v2535_v8 = vor.u32 %v2178_v37, %v1569_v36  ;;  %v1967_v28 = vld [vmem:[#allocation2 + $0x2f8] sm:$0xf0]  ;;  %v2181_v33 = vld [vmem:[#allocation2 + $0x4] sm:$0xf]  ;;  %v1591_v36 = vld [vmem:[#allocation2 + $0x8] sm:$0xf0] }
  0x4e   :  { %1238 = vmatpush.bf16.msra.mxu2 %v1706_v60  ;;  %v1618_v60 = vor.u32 %v2187_v41, %v1615_v42  ;;  %v2213_v37 = vld [vmem:[#allocation2 + $0x104] sm:$0xf]  ;;  %v1719_v38 = vld [vmem:[#allocation2 + $0x108] sm:$0xf0]  ;;  %v1970_v39 = vor.u32 %v2275_v27, %v1967_v28  ;;  %v1839_v41 = vld [vmem:[#allocation2 + $0x1f8] sm:$0xf0]  ;;  %v1594_v49 = vor.u32 %v2181_v33, %v1591_v36 }
  0x4f   :  { %1257 = vmatpush.bf16.msra.mxu3 %v1770_v11  ;;  %v2199_v11 = vld [vmem:[#allocation2 + $0x94] sm:$0xf]  ;;  %v1903_v43 = vld [vmem:[#allocation2 + $0x278] sm:$0xf0]  ;;  %v2273_v52 = vld [vmem:[#allocation2 + $0x2e4] sm:$0xf]  ;;  %v1722_v58 = vor.u32 %v2213_v37, %v1719_v38 }
  0x50   :  { %1201 = vmatpush.bf16.msra.mxu0 %v2142_v19  ;;  %v1738_v19 = vor.u32 %v2217_v7, %v1735_v10  ;;  %v2259_v42 = vld [vmem:[#allocation2 + $0x274] sm:$0xf]  ;;  %v2031_v46 = vld [vmem:[#allocation2 + $0x378] sm:$0xf0]  ;;  %v1959_v55 = vld [vmem:[#allocation2 + $0x2e8] sm:$0xf0] }
  0x51   :  { %1220 = vmatpush.bf16.msra.mxu1 %v1634_v20  ;;  %v2291_v45 = vld [vmem:[#allocation2 + $0x374] sm:$0xf]  ;;  %v2241_v62 = vld [vmem:[#allocation2 + $0x1e4] sm:$0xf]  ;;  %v1962_v4 = vor.u32 %v2273_v52, %v1959_v55  ;;  %v1895_v10 = vld [vmem:[#allocation2 + $0x268] sm:$0xf0] }
  0x52   :  { %1239 = vmatpush.bf16.msra.mxu2 %v1698_v12  ;;  %v1663_v12 = vld [vmem:[#allocation2 + $0x98] sm:$0xf0]  ;;  %v2034_v61 = vor.u32 %v2291_v45, %v2031_v46  ;;  %v2171_v3 = vld [vmem:[%s2643_s0 + $0x40] sm:$0xf0]  ;;  %v2287_v27 = vld [vmem:[#allocation2 + $0x354] sm:$0xf] }
  0x53   :  { %1258 = vmatpush.bf16.msra.mxu3 %v1762_v23  ;;  %v1666_v20 = vor.u32 %v2199_v11, %v1663_v12  ;;  %v2215_v23 = vld [vmem:[#allocation2 + $0x114] sm:$0xf]  ;;  %v2257_v7 = vld [vmem:[#allocation2 + $0x264] sm:$0xf]  ;;  %v1951_v18 = vld [vmem:[#allocation2 + $0x2d8] sm:$0xf0] }
  0x54   :  { %1202 = vmatpush.bf16.msra.mxu0 %v2134_v31  ;;  %v2101_v31 = vld [vmem:[#allocation2 + $0x400] sm:$0xf]  ;;  %v2289_v12 = vld [vmem:[#allocation2 + $0x364] sm:$0xf]  ;;  %v1898_v21 = vor.u32 %v2257_v7, %v1895_v10  ;;  %v2015_v28 = vld [vmem:[#allocation2 + $0x358] sm:$0xf0] }
  0x55   :  { %1221 = vmatpush.bf16.msra.mxu1 %v1626_v32  ;;  %v2310_v32 = vld [vmem:[#allocation2 + $0x404] sm:$0xf0]  ;;  %v1879_v36 = vld [vmem:[#allocation2 + $0x248] sm:$0xf0]  ;;  %v2251_v45 = vld [vmem:[#allocation2 + $0x234] sm:$0xf] }
  0x56   :  { %1240 = vmatpush.bf16.msra.mxu2 %v1690_v24  ;;  %v1727_v24 = vld [vmem:[#allocation2 + $0x118] sm:$0xf0]  ;;  %v2102_v47 = vor.u32 %v2310_v32, %v2101_v31  ;;  %v2237_v31 = vld [vmem:[#allocation2 + $0x1c4] sm:$0xf]  ;;  %v1815_v32 = vld [vmem:[#allocation2 + $0x1c8] sm:$0xf0] }
  0x57   :  { %1259 = vmatpush.bf16.msra.mxu3 %v1754_v35  ;;  %1136 = vmatmul.bf16.gmra.mxu0 %v2535_v8  ;;  %v1730_v34 = vor.u32 %v2215_v23, %v1727_v24  ;;  %v1658_v35 = vor.u32 %v2197_v25, %v1655_v26  ;;  %v2255_v23 = vld [vmem:[#allocation2 + $0x254] sm:$0xf]  ;;  %v1887_v24 = vld [vmem:[#allocation2 + $0x258] sm:$0xf0]  ;;  %v1818_v38 = vor.u32 %v2237_v31, %v1815_v32  ;;  %v1863_v7 = vld [vmem:[#allocation2 + $0x228] sm:$0xf0] }
  0x58   :  { %1203 = vmatpush.bf16.msra.mxu0 %v2126_v59  ;;  %1155 = vmatmul.bf16.gmra.mxu1 %v2537_v9  ;;  %v1890_v33 = vor.u32 %v2255_v23, %v1887_v24  ;;  %v1871_v46 = vld [vmem:[#allocation2 + $0x238] sm:$0xf0]  ;;  %v2283_v52 = vld [vmem:[#allocation2 + $0x334] sm:$0xf]  ;;  %v1911_v31 = vld [vmem:[#allocation2 + $0x288] sm:$0xf0] }
  0x59   :  { %1222 = vmatpush.bf16.msra.mxu1 %v1618_v60  ;;  %1174 = vmatmul.bf16.gmra.mxu2 %v2539_v13  ;;  %v1906_v60 = vor.u32 %v2259_v42, %v1903_v43  ;;  %v2235_v42 = vld [vmem:[#allocation2 + $0x1b4] sm:$0xf]  ;;  %v1807_v43 = vld [vmem:[#allocation2 + $0x1b8] sm:$0xf0]  ;;  %v2229_v32 = vld [vmem:[#allocation2 + $0x184] sm:$0xf] }
  0x5a   :  { %1241 = vmatpush.bf16.msra.mxu2 %v1682_v40  ;;  %1193 = vmatmul.bf16.gmra.mxu3 %v2541_v14  ;;  %v2243_v40 = vld [vmem:[#allocation2 + $0x1f4] sm:$0xf]  ;;  %v1999_v55 = vld [vmem:[#allocation2 + $0x338] sm:$0xf0]  ;;  %vm1429_vm1 = vcmask 1040384  }
  0x5b   :  { %1260 = vmatpush.bf16.msra.mxu3 %v1746_v63  ;;  %v1842_v59 = vor.u32 %v2243_v40, %v1839_v41  ;;  %v1831_v63 = vld [vmem:[#allocation2 + $0x1e8] sm:$0xf0]  ;;  %v1935_v41 = vld [vmem:[#allocation2 + $0x2b8] sm:$0xf0]  ;;  %v2247_v24 = vld [vmem:[#allocation2 + $0x214] sm:$0xf] }
  0x5c   :  { %1204 = vmatpush.bf16.msra.mxu0 %v2118_v15  ;;  %v1834_v11 = vor.u32 %v2241_v62, %v1831_v63  ;;  %v2023_v15 = vld [vmem:[#allocation2 + $0x368] sm:$0xf0]  ;;  %v1585_v62 = vld [vmem:[%s2643_s0 + $0x68] sm:$0xf] }
  0x5d   :  { %1223 = vmatpush.bf16.msra.mxu1 %v1610_v16  ;;  %v2271_v16 = vld [vmem:[#allocation2 + $0x2d4] sm:$0xf]  ;;  %v2026_v22 = vor.u32 %v2289_v12, %v2023_v15  ;;  %v2007_v40 = vld [vmem:[#allocation2 + $0x348] sm:$0xf0]  ;;  %v2281_v12 = vld [vmem:[#allocation2 + $0x324] sm:$0xf] }
  0x5e   :  { %1242 = vmatpush.bf16.msra.mxu2 %v1674_v2  ;;  %v1549_v2 = vld [vmem:[%s2643_s0 + $0x20] sm:$0xf]  ;;  %v1954_v25 = vor.u32 %v2271_v16, %v1951_v18  ;;  %v2180_v63 = vld [vmem:[%s2643_s0 + $0x88] sm:$0xf0]  ;;  %v2263_v16 = vld [vmem:[#allocation2 + $0x294] sm:$0xf] }
  0x5f   :  { %1261 = vmatpush.bf16.msra.mxu3 %v1738_v19  ;;  %v2553_v17 = vor.u32 %v2171_v3, %v1549_v2  ;;  %v2239_v19 = vld [vmem:[#allocation2 + $0x1d4] sm:$0xf]  ;;  %v1874_v2 = vor.u32 %v2251_v45, %v1871_v46  ;;  %v2002_v3 = vor.u32 %v2283_v52, %v1999_v55  ;;  %v1991_v15 = vld [vmem:[#allocation2 + $0x328] sm:$0xf0]  ;;  %v2565_v18 = vor.u32 %v2180_v63, %v1585_v62 }
  0x60   :  { %1205 = vmatpush.bf16.msra.mxu0 %v2110_v29  ;;  %v2269_v29 = vld [vmem:[#allocation2 + $0x2c4] sm:$0xf]  ;;  %v1994_v23 = vor.u32 %v2281_v12, %v1991_v15  ;;  %v2151_v52 = vld [vmem:[#allocation2 + $0x468] sm:$0xf0]  ;;  %v2299_v12 = vld [vmem:[#allocation2 + $0x3b4] sm:$0xf] }
  0x61   :  { %1224 = vmatpush.bf16.msra.mxu1 %v1602_v30  ;;  %v1943_v30 = vld [vmem:[#allocation2 + $0x2c8] sm:$0xf0]  ;;  %v2063_v15 = vld [vmem:[#allocation2 + $0x3b8] sm:$0xf0] }
  0x62   :  { %1243 = vmatpush.bf16.msra.mxu2 %v1666_v20  ;;  %v1823_v20 = vld [vmem:[#allocation2 + $0x1d8] sm:$0xf0]  ;;  %v1946_v37 = vor.u32 %v2269_v29, %v1943_v30  ;;  %v2261_v30 = vld [vmem:[#allocation2 + $0x284] sm:$0xf] }
  0x63   :  { %1262 = vmatpush.bf16.msra.mxu3 %v1730_v34  ;;  %v1826_v26 = vor.u32 %v2239_v19, %v1823_v20  ;;  %v2018_v34 = vor.u32 %v2287_v27, %v2015_v28  ;;  %v1919_v19 = vld [vmem:[#allocation2 + $0x298] sm:$0xf0]  ;;  %v2231_v20 = vld [vmem:[#allocation2 + $0x194] sm:$0xf] }
  0x64   :  { %1206 = vmatpush.bf16.msra.mxu0 %v2102_v47  ;;  %v2279_v28 = vld [vmem:[#allocation2 + $0x314] sm:$0xf]  ;;  %v1983_v29 = vld [vmem:[#allocation2 + $0x318] sm:$0xf0] }
  0x65   :  { %1225 = vmatpush.bf16.msra.mxu1 %v1594_v49  ;;  %v1810_v49 = vor.u32 %v2235_v42, %v1807_v43  ;;  %v2323_v43 = vld [vmem:[#allocation2 + $0x474] sm:$0xf] }
  0x66   :  { %1244 = vmatpush.bf16.msra.mxu2 %v1658_v35  ;;  %v2253_v35 = vld [vmem:[#allocation2 + $0x244] sm:$0xf] }
  0x67   :  { %1263 = vmatpush.bf16.msra.mxu3 %v1722_v58  ;;  %1207 = vmatmul.bf16.vlgmr.msra.gmra.mxu0 %v2553_v17  ;;  %v2265_v58 = vld [vmem:[#allocation2 + $0x2a4] sm:$0xf] }
  0x68   :  { %1275 = vmatpush.bf16.msrb.mxu0 %v1842_v59  ;;  %1226 = vmatmul.bf16.vlgmr.msra.gmra.mxu1 %v2427_v48  ;;  %v2267_v48 = vld [vmem:[#allocation2 + $0x2b4] sm:$0xf]  ;;  %v1927_v59 = vld [vmem:[#allocation2 + $0x2a8] sm:$0xf0] }
  0x69   :  { %1294 = vmatpush.bf16.msrb.mxu1 %v1906_v60  ;;  %1245 = vmatmul.bf16.vlgmr.msra.gmra.mxu2 %v2429_v53  ;;  %v1882_v53 = vor.u32 %v2253_v35, %v1879_v36  ;;  %v1938_v47 = vor.u32 %v2267_v48, %v1935_v41  ;;  %v2233_v60 = vld [vmem:[#allocation2 + $0x1a4] sm:$0xf]  ;;  %v1930_v10 = vor.u32 %v2265_v58, %v1927_v59  ;;  %v2095_v35 = vld [vmem:[#allocation2 + $0x3f8] sm:$0xf0]  ;;  %v1847_v48 = vld [vmem:[#allocation2 + $0x208] sm:$0xf0] }
  0x6a   :  { %1313 = vmatpush.bf16.msrb.mxu2 %v1970_v39  ;;  %1264 = vmatmul.bf16.vlgmr.msra.gmra.mxu3 %v2431_v54  ;;  %v2285_v39 = vld [vmem:[#allocation2 + $0x344] sm:$0xf]  ;;  %v1975_v41 = vld [vmem:[#allocation2 + $0x308] sm:$0xf0]  ;;  %v2303_v58 = vld [vmem:[#allocation2 + $0x3d4] sm:$0xf] }
  0x6b   :  { %1332 = vmatpush.bf16.msrb.mxu3 %v2034_v61  ;;  %v2010_v54 = vor.u32 %v2285_v39, %v2007_v40  ;;  %v1799_v61 = vld [vmem:[#allocation2 + $0x1a8] sm:$0xf0]  ;;  %v1914_v39 = vor.u32 %v2261_v30, %v1911_v31  ;;  %v2079_v59 = vld [vmem:[#allocation2 + $0x3d8] sm:$0xf0]  ;;  %v2293_v30 = vld [vmem:[#allocation2 + $0x384] sm:$0xf] }
  0x6c   :  { %1276 = vmatpush.bf16.msrb.mxu0 %v1834_v11  ;;  %v1802_v11 = vor.u32 %v2233_v60, %v1799_v61  ;;  %v2319_v60 = vld [vmem:[#allocation2 + $0x454] sm:$0xf]  ;;  %v2143_v61 = vld [vmem:[#allocation2 + $0x458] sm:$0xf0]  ;;  %v2082_v62 = vor.u32 %v2303_v58, %v2079_v59  ;;  %v2039_v31 = vld [vmem:[#allocation2 + $0x388] sm:$0xf0] }
  0x6d   :  { %1295 = vmatpush.bf16.msrb.mxu1 %v1898_v21  ;;  %v1791_v21 = vld [vmem:[#allocation2 + $0x198] sm:$0xf0]  ;;  %v2146_v63 = vor.u32 %v2319_v60, %v2143_v61 }
  0x6e   :  { %1314 = vmatpush.bf16.msrb.mxu2 %v1962_v4  ;;  %v2249_v4 = vld [vmem:[#allocation2 + $0x224] sm:$0xf]  ;;  %v1794_v27 = vor.u32 %v2231_v20, %v1791_v21 }
  0x6f   :  { %1333 = vmatpush.bf16.msrb.mxu3 %v2026_v22  ;;  %v1866_v22 = vor.u32 %v2249_v4, %v1863_v7  ;;  %v2317_v4 = vld [vmem:[#allocation2 + $0x444] sm:$0xf]  ;;  %v2135_v7 = vld [vmem:[#allocation2 + $0x448] sm:$0xf0] }
  0x70   :  { %1277 = vmatpush.bf16.msrb.mxu0 %v1826_v26  ;;  %v1922_v26 = vor.u32 %v2263_v16, %v1919_v19  ;;  %v2315_v16 = vld [vmem:[#allocation2 + $0x434] sm:$0xf]  ;;  %v2127_v19 = vld [vmem:[#allocation2 + $0x438] sm:$0xf0]  ;;  %v2297_v20 = vld [vmem:[#allocation2 + $0x3a4] sm:$0xf] }
  0x71   :  { %1296 = vmatpush.bf16.msrb.mxu1 %v1890_v33  ;;  %v1783_v33 = vld [vmem:[#allocation2 + $0x188] sm:$0xf0]  ;;  %v2313_v21 = vld [vmem:[#allocation2 + $0x424] sm:$0xf] }
  0x72   :  { %1315 = vmatpush.bf16.msrb.mxu2 %v1954_v25  ;;  %v1855_v25 = vld [vmem:[#allocation2 + $0x218] sm:$0xf0]  ;;  %v1786_v40 = vor.u32 %v2229_v32, %v1783_v33  ;;  %v2309_v32 = vld [vmem:[#allocation2 + $0x404] sm:$0xf]  ;;  %v2103_v33 = vld [vmem:[#allocation2 + $0x408] sm:$0xf0] }
  0x73   :  { %1334 = vmatpush.bf16.msrb.mxu3 %v2018_v34  ;;  %v2307_v34 = vld [vmem:[#allocation2 + $0x3f4] sm:$0xf]  ;;  %v1858_v36 = vor.u32 %v2247_v24, %v1855_v25  ;;  %v2047_v25 = vld [vmem:[#allocation2 + $0x398] sm:$0xf0] }
  0x74   :  { %1278 = vmatpush.bf16.msrb.mxu0 %v1818_v38  ;;  %v2245_v38 = vld [vmem:[#allocation2 + $0x204] sm:$0xf]  ;;  %v2098_v42 = vor.u32 %v2307_v34, %v2095_v35  ;;  %v2295_v24 = vld [vmem:[#allocation2 + $0x394] sm:$0xf]  ;;  %v2042_v34 = vor.u32 %v2293_v30, %v2039_v31  ;;  %v2106_v35 = vor.u32 %v2309_v32, %v2103_v33 }
  0x75   :  { %1297 = vmatpush.bf16.msrb.mxu1 %v1882_v53  ;;  %v2159_v53 = vld [vmem:[#allocation2 + $0x478] sm:$0xf0] }
  0x76   :  { %1316 = vmatpush.bf16.msrb.mxu2 %v1946_v37  ;;  %v1986_v37 = vor.u32 %v2279_v28, %v1983_v29  ;;  %v2162_v46 = vor.u32 %v2323_v43, %v2159_v53  ;;  %v2050_v28 = vor.u32 %v2295_v24, %v2047_v25 }
  0x77   :  { %1335 = vmatpush.bf16.msrb.mxu3 %v2010_v54  ;;  %1212 = vmatmul.bf16.gmra.mxu0 %v2565_v18  ;;  %v2087_v54 = vld [vmem:[#allocation2 + $0x3e8] sm:$0xf0] }
  0x78   :  { %1279 = vmatpush.bf16.msrb.mxu0 %v1810_v49  ;;  %1231 = vmatmul.bf16.gmra.mxu1 %v2463_v44  ;;  %v2277_v44 = vld [vmem:[#allocation2 + $0x304] sm:$0xf] }
  0x79   :  { %1298 = vmatpush.bf16.msrb.mxu1 %v1874_v2  ;;  %1250 = vmatmul.bf16.gmra.mxu2 %v2465_v50  ;;  %v2305_v50 = vld [vmem:[#allocation2 + $0x3e4] sm:$0xf]  ;;  %v1978_v45 = vor.u32 %v2277_v44, %v1975_v41 }
  0x7a   :  { %1317 = vmatpush.bf16.msrb.mxu2 %v1938_v47  ;;  %1269 = vmatmul.bf16.gmra.mxu3 %v2467_v51  ;;  %v1850_v51 = vor.u32 %v2245_v38, %v1847_v48  ;;  %v2090_v47 = vor.u32 %v2305_v50, %v2087_v54  ;;  %v2321_v49 = vld [vmem:[#allocation2 + $0x464] sm:$0xf] }
  0x7b   :  { %1336 = vmatpush.bf16.msrb.mxu3 %v2002_v3  ;;  %v2154_v55 = vor.u32 %v2321_v49, %v2151_v52  ;;  %v2301_v2 = vld [vmem:[#allocation2 + $0x3c4] sm:$0xf]  ;;  %v2071_v3 = vld [vmem:[#allocation2 + $0x3c8] sm:$0xf0] }
  0x7c   :  { %1280 = vmatpush.bf16.msrb.mxu0 %v1802_v11  ;;  %v2138_v11 = vor.u32 %v2317_v4, %v2135_v7 }
  0x7d   :  { %1299 = vmatpush.bf16.msrb.mxu1 %v1866_v22 }
  0x7e   :  { %1318 = vmatpush.bf16.msrb.mxu2 %v1930_v10  ;;  %v2074_v10 = vor.u32 %v2301_v2, %v2071_v3 }
  0x7f   :  { %1337 = vmatpush.bf16.msrb.mxu3 %v1994_v23 }
  0x80   :  { %1281 = vmatpush.bf16.msrb.mxu0 %v1794_v27  ;;  %v2111_v27 = vld [vmem:[#allocation2 + $0x418] sm:$0xf0] }
  0x81   :  { %1300 = vmatpush.bf16.msrb.mxu1 %v1858_v36 }
  0x82   :  { %1319 = vmatpush.bf16.msrb.mxu2 %v1922_v26  ;;  %v2311_v26 = vld [vmem:[#allocation2 + $0x414] sm:$0xf] }
  0x83   :  { %1338 = vmatpush.bf16.msrb.mxu3 %v1986_v37  ;;  %v2114_v29 = vor.u32 %v2311_v26, %v2111_v27 }
  0x84   :  { %1282 = vmatpush.bf16.msrb.mxu0 %v1786_v40 }
  0x85   :  { %1301 = vmatpush.bf16.msrb.mxu1 %v1850_v51 }
  0x86   :  { %1320 = vmatpush.bf16.msrb.mxu2 %v1914_v39 }
  0x87   :  { %1339 = vmatpush.bf16.msrb.mxu3 %v1978_v45  ;;  %1283 = vmatmul.bf16.vlgmr.msrb.gmra.mxu0 %v2433_v57  ;;  %v2066_v57 = vor.u32 %v2299_v12, %v2063_v15 }
  0x88   :  { %1351 = vmatpush.bf16.msra.mxu0 %v2098_v42  ;;  %1302 = vmatmul.bf16.vlgmr.msrb.gmra.mxu1 %v2499_v0  ;;  %v2130_v0 = vor.u32 %v2315_v16, %v2127_v19 }
  0x89   :  { %1370 = vmatpush.bf16.msra.mxu1 %v2162_v46  ;;  %1321 = vmatmul.bf16.vlgmr.msrb.gmra.mxu2 %v2501_v1  ;;  %v2055_v1 = vld [vmem:[#allocation2 + $0x3a8] sm:$0xf0] }
  0x8a   :  { %2325 = vmatpush.bf16.msra.mxu2 %v2098_v42  ;;  %1340 = vmatmul.bf16.vlgmr.msrb.gmra.mxu3 %v2503_v5  ;;  %v2119_v5 = vld [vmem:[#allocation2 + $0x428] sm:$0xf0]  ;;  %v2058_v22 = vor.u32 %v2297_v20, %v2055_v1 }
  0x8b   :  { %2333 = vmatpush.bf16.msra.mxu3 %v2162_v46  ;;  %v2122_v23 = vor.u32 %v2313_v21, %v2119_v5 }
  0x8c   :  { %1352 = vmatpush.bf16.msra.mxu0 %v2090_v47 }
  0x8d   :  { %1371 = vmatpush.bf16.msra.mxu1 %v2154_v55 }
  0x8e   :  { %2326 = vmatpush.bf16.msra.mxu2 %v2090_v47 }
  0x8f   :  { %2334 = vmatpush.bf16.msra.mxu3 %v2154_v55 }
  0x90   :  { %1353 = vmatpush.bf16.msra.mxu0 %v2082_v62 }
  0x91   :  { %1372 = vmatpush.bf16.msra.mxu1 %v2146_v63 }
  0x92   :  { %2327 = vmatpush.bf16.msra.mxu2 %v2082_v62 }
  0x93   :  { %2335 = vmatpush.bf16.msra.mxu3 %v2146_v63 }
  0x94   :  { %1354 = vmatpush.bf16.msra.mxu0 %v2074_v10 }
  0x95   :  { %1373 = vmatpush.bf16.msra.mxu1 %v2138_v11 }
  0x96   :  { %2328 = vmatpush.bf16.msra.mxu2 %v2074_v10 }
  0x97   :  { %2336 = vmatpush.bf16.msra.mxu3 %v2138_v11  ;;  %1288 = vmatmul.bf16.gmra.mxu0 %v2469_v56 }
  0x98   :  { %1355 = vmatpush.bf16.msra.mxu0 %v2066_v57  ;;  %1307 = vmatmul.bf16.gmra.mxu1 %v2535_v8 }
  0x99   :  { %1374 = vmatpush.bf16.msra.mxu1 %v2130_v0  ;;  %1326 = vmatmul.bf16.gmra.mxu2 %v2537_v9 }
  0x9a   :  { %2329 = vmatpush.bf16.msra.mxu2 %v2066_v57  ;;  %1345 = vmatmul.bf16.gmra.mxu3 %v2539_v13 }
  0x9b   :  { %2337 = vmatpush.bf16.msra.mxu3 %v2130_v0 }
  0x9c   :  { %1356 = vmatpush.bf16.msra.mxu0 %v2058_v22 }
  0x9d   :  { %1375 = vmatpush.bf16.msra.mxu1 %v2122_v23 }
  0x9e   :  { %2330 = vmatpush.bf16.msra.mxu2 %v2058_v22 }
  0x9f   :  { %2338 = vmatpush.bf16.msra.mxu3 %v2122_v23 }
  0xa0   :  { %1357 = vmatpush.bf16.msra.mxu0 %v2050_v28 }
  0xa1   :  { %1376 = vmatpush.bf16.msra.mxu1 %v2114_v29 }
  0xa2   :  { %2331 = vmatpush.bf16.msra.mxu2 %v2050_v28 }
  0xa3   :  { %2339 = vmatpush.bf16.msra.mxu3 %v2114_v29 }
  0xa4   :  { %1358 = vmatpush.bf16.msra.mxu0 %v2042_v34  ;;  %v1056_v36 = vpop.f32.mrf.mxu0 }
  0xa5   :  { %1377 = vmatpush.bf16.msra.mxu1 %v2106_v35  ;;  %v1075_v56 = vpop.f32.mrf.mxu1 }
  0xa6   :  { %2332 = vmatpush.bf16.msra.mxu2 %v2042_v34  ;;  %v1076_v45 = vadd.f32 %v1075_v56, %v1056_v36 }
  0xa7   :  { %2340 = vmatpush.bf16.msra.mxu3 %v2106_v35  ;;  %1359 = vmatmul.bf16.vlgmr.msra.gmra.mxu0 %v2505_v6 }
  0xa8   :  { %1378 = vmatmul.bf16.vlgmr.msra.gmra.mxu1 %v2553_v17 }
  0xa9   :  { %1364 = vmatmul.bf16.vlgmr.msra.gmra.mxu2 %v2541_v14 }
  0xaa   :  { %1383 = vmatmul.bf16.vlgmr.msra.gmra.mxu3 %v2565_v18 }
  0xac   :  { %v1094_v8 = vpop.f32.mrf.mxu2  ;;  %v1058_v13 = vpop.f32.mrf.mxu0 }
  0xad   :  { %v1113_v9 = vpop.f32.mrf.mxu3  ;;  %v1077_v37 = vpop.f32.mrf.mxu1  ;;  %v1095_v46 = vadd.f32 %v1094_v8, %v1076_v45 }
  0xae   :  { %v1078_v59 = vadd.f32 %v1077_v37, %v1058_v13 }
  0xaf   :  { %v1114_v58 = vadd.f32 %v1113_v9, %v1095_v46 }
  0xb4   :  { %v1096_v38 = vpop.f32.mrf.mxu2  ;;  %v1061_v40 = vpop.f32.mrf.mxu0 }
  0xb5   :  { %v1115_v39 = vpop.f32.mrf.mxu3  ;;  %v1080_v48 = vpop.f32.mrf.mxu1  ;;  %v1097_v61 = vadd.f32 %v1096_v38, %v1078_v59 }
  0xb6   :  { %v1081_v11 = vadd.f32 %v1080_v48, %v1061_v40 }
  0xb7   :  { %v1116_v7 = vadd.f32 %v1115_v39, %v1097_v61 }
  0xbc   :  { %v1099_v44 = vpop.f32.mrf.mxu2  ;;  %v1063_v42 = vpop.f32.mrf.mxu0 }
  0xbd   :  { %v1118_v41 = vpop.f32.mrf.mxu3  ;;  %v1082_v43 = vpop.f32.mrf.mxu1  ;;  %v1100_v15 = vadd.f32 %v1099_v44, %v1081_v11 }
  0xbe   :  { %v1083_v23 = vadd.f32 %v1082_v43, %v1063_v42 }
  0xbf   :  { %v1119_v5 = vadd.f32 %v1118_v41, %v1100_v15 }
  0xc4   :  { %v1101_v53 = vpop.f32.mrf.mxu2  ;;  %v1132_v50 = vpop.f32.mrf.mxu0 }
  0xc5   :  { %v1120_v6 = vpop.f32.mrf.mxu3  ;;  %v1151_v17 = vpop.f32.mrf.mxu1  ;;  %v1133_v60 = vadd.f32 %v1132_v50, %v1114_v58  ;;  %v1102_v25 = vadd.f32 %v1101_v53, %v1083_v23 }
  0xc7   :  { %v1152_v4 = vadd.f32 %v1151_v17, %v1133_v60  ;;  %v1121_v33 = vadd.f32 %v1120_v6, %v1102_v25 }
  0xcc   :  { %v1170_v54 = vpop.f32.mrf.mxu2  ;;  %v1134_v51 = vpop.f32.mrf.mxu0 }
  0xcd   :  { %v1189_v14 = vpop.f32.mrf.mxu3  ;;  %v1153_v18 = vpop.f32.mrf.mxu1  ;;  %v1171_v10 = vadd.f32 %v1170_v54, %v1152_v4  ;;  %v1135_v12 = vadd.f32 %v1134_v51, %v1116_v7 }
  0xcf   :  { %v1190_v16 = vadd.f32 %v1189_v14, %v1171_v10  ;;  %v1154_v1 = vadd.f32 %v1153_v18, %v1135_v12 }
  0xd4   :  { %v1172_v47 = vpop.f32.mrf.mxu2  ;;  %v1137_v52 = vpop.f32.mrf.mxu0 }
  0xd5   :  { %v1191_v49 = vpop.f32.mrf.mxu3  ;;  %v1156_v55 = vpop.f32.mrf.mxu1  ;;  %v1173_v22 = vadd.f32 %v1172_v47, %v1154_v1  ;;  %v1138_v24 = vadd.f32 %v1137_v52, %v1119_v5 }
  0xd7   :  { %v1192_v26 = vadd.f32 %v1191_v49, %v1173_v22  ;;  %v1157_v31 = vadd.f32 %v1156_v55, %v1138_v24 }
  0xdc   :  { %v1175_v62 = vpop.f32.mrf.mxu2  ;;  %v1139_v2 = vpop.f32.mrf.mxu0 }
  0xdd   :  { %v1194_v63 = vpop.f32.mrf.mxu3  ;;  %v1158_v3 = vpop.f32.mrf.mxu1  ;;  %v1176_v34 = vadd.f32 %v1175_v62, %v1157_v31  ;;  %v1140_v8 = vadd.f32 %v1139_v2, %v1121_v33 }
  0xdf   :  { %v1195_v13 = vadd.f32 %v1194_v63, %v1176_v34  ;;  %v1159_v48 = vadd.f32 %v1158_v3, %v1140_v8  ;;  %v1401_v3 = vlaneseq }
  0xe1   :  { %vm2599_vm0 = vcmp.lt.s32.totalorder %v1401_v3, 256 }
  0xe4   :  { %v1177_v19 = vpop.f32.mrf.mxu2  ;;  %v1208_v0 = vpop.f32.mrf.mxu0 }
  0xe5   :  { %v1196_v57 = vpop.f32.mrf.mxu3  ;;  %v1227_v20 = vpop.f32.mrf.mxu1  ;;  %v1209_v21 = vadd.f32 %v1208_v0, %v1190_v16  ;;  %v1178_v41 = vadd.f32 %v1177_v19, %v1159_v48  ;;  %v2374_v16 = vmov 0.0  }
  0xe6   :  { %1405 = vst.msk [vmem:[%s2646_s3] sm:$0x3] %vm2599_vm0, %v2374_v16 }
  0xe7   :  { %1389 = vst [vmem:[%s2645_s2] sm:$0xff] %v1209_v21  ;;  %v1439_v35 = vmul.f32 %v1209_v21, %v1209_v21  ;;  %v1197_v6 = vadd.f32 %v1196_v57, %v1178_v41 }
  0xe8   :  { %1406 = vst.msk [vmem:[%s2647_s4] sm:$0x3] %vm2599_vm0, %v2374_v16 }
  0xec   :  { %v1246_v27 = vpop.f32.mrf.mxu2  ;;  %v1210_v29 = vpop.f32.mrf.mxu0 }
  0xed   :  { %v1265_v28 = vpop.f32.mrf.mxu3  ;;  %v1229_v30 = vpop.f32.mrf.mxu1  ;;  %v1211_v32 = vadd.f32 %v1210_v29, %v1192_v26  ;;  %v1247_v59 = vadd.f32 %v1246_v27, %v1227_v20 }
  0xef   :  { %1391 = vst [vmem:[%s2645_s2 + $0x10] sm:$0xff] %v1211_v32  ;;  %v1408_v36 = vadd.f32 %v1211_v32, %v1209_v21  ;;  %v1441_v56 = vmul.f32 %v1211_v32, %v1211_v32  ;;  %v1266_v2 = vadd.f32 %v1265_v28, %v1247_v59 }
  0xf1   :  { %v1447_v9 = vadd.f32 %v1441_v56, %v1439_v35 }
  0xf4   :  { %v1248_v37 = vpop.f32.mrf.mxu2  ;;  %v1213_v39 = vpop.f32.mrf.mxu0 }
  0xf5   :  { %v1267_v38 = vpop.f32.mrf.mxu3  ;;  %v1232_v40 = vpop.f32.mrf.mxu1  ;;  %v1214_v44 = vadd.f32 %v1213_v39, %v1195_v13  ;;  %v1249_v11 = vadd.f32 %v1248_v37, %v1229_v30 }
  0xf7   :  { %1393 = vst [vmem:[%s2645_s2 + $0x20] sm:$0xff] %v1214_v44  ;;  %v2592_v42 = vadd.f32 %v1408_v36, %v1214_v44  ;;  %v1443_v43 = vmul.f32 %v1214_v44, %v1214_v44  ;;  %v1268_v1 = vadd.f32 %v1267_v38, %v1249_v11 }
  0xf9   :  { %v2594_v53 = vadd.f32 %v1447_v9, %v1443_v43 }
  0xfc   :  { %v1251_v50 = vpop.f32.mrf.mxu2  ;;  %v1215_v54 = vpop.f32.mrf.mxu0 }
  0xfd   :  { %v1270_v17 = vpop.f32.mrf.mxu3  ;;  %v1234_v14 = vpop.f32.mrf.mxu1  ;;  %v1216_v51 = vadd.f32 %v1215_v54, %v1197_v6  ;;  %v1252_v7 = vadd.f32 %v1251_v50, %v1232_v40 }
  0xff   :  { %1395 = vst [vmem:[%s2645_s2 + $0x30] sm:$0xff] %v1216_v51  ;;  %v1271_v20 = vadd.f32 %v1270_v17, %v1252_v7  ;;  %v1445_v37 = vmul.f32 %v1216_v51, %v1216_v51  ;;  %v1410_v44 = vadd.f32 %v2592_v42, %v1216_v51 }
 0x101   :  { %v1449_v17 = vadd.f32 %v2594_v53, %v1445_v37 }
 0x103   :  { %v1450_v51 = vrot.slane %v1449_v17, 4 }
 0x104   :  { %v1253_v18 = vpop.f32.mrf.mxu2  ;;  %v1284_v46 = vpop.f32.mrf.mxu0 }
 0x105   :  { %v1272_v45 = vpop.f32.mrf.mxu3  ;;  %v1303_v47 = vpop.f32.mrf.mxu1  ;;  %v1285_v4 = vadd.f32 %v1284_v46, %v1266_v2  ;;  %v1254_v23 = vadd.f32 %v1253_v18, %v1234_v14  ;;  %v1411_v14 = vrot.slane %v1410_v44, 4 }
 0x107   :  { %v1304_v0 = vadd.f32 %v1303_v47, %v1285_v4  ;;  %v1273_v32 = vadd.f32 %v1272_v45, %v1254_v23 }
 0x10c   :  { %v1322_v49 = vpop.f32.mrf.mxu2  ;;  %v1286_v55 = vpop.f32.mrf.mxu0 }
 0x10d   :  { %v1341_v52 = vpop.f32.mrf.mxu3  ;;  %v1305_v58 = vpop.f32.mrf.mxu1  ;;  %v1323_v21 = vadd.f32 %v1322_v49, %v1304_v0  ;;  %v1287_v22 = vadd.f32 %v1286_v55, %v1268_v1  ;;  %v1412_v55 = vadd.f32 %v1411_v14, %v1410_v44 }
 0x10f   :  { %v1342_v24 = vadd.f32 %v1341_v52, %v1323_v21  ;;  %v1306_v30 = vadd.f32 %v1305_v58, %v1287_v22  ;;  %v1413_v2 = vrot.slane %v1412_v55, 2 }
 0x114   :  { %v1324_v60 = vpop.f32.mrf.mxu2  ;;  %v1289_v62 = vpop.f32.mrf.mxu0 }
 0x115   :  { %v1343_v61 = vpop.f32.mrf.mxu3  ;;  %v1308_v63 = vpop.f32.mrf.mxu1  ;;  %v1290_v5 = vadd.f32 %v1289_v62, %v1271_v20  ;;  %v1325_v34 = vadd.f32 %v1324_v60, %v1306_v30  ;;  %v1451_v60 = vadd.f32 %v1450_v51, %v1449_v17 }
 0x117   :  { %v1309_v27 = vadd.f32 %v1308_v63, %v1290_v5  ;;  %v1344_v8 = vadd.f32 %v1343_v61, %v1325_v34  ;;  %v1452_v7 = vrot.slane %v1451_v60, 2 }
 0x11c   :  { %v1327_v12 = vpop.f32.mrf.mxu2  ;;  %v1291_v19 = vpop.f32.mrf.mxu0 }
 0x11d   :  { %v1346_v15 = vpop.f32.mrf.mxu3  ;;  %v1310_v57 = vpop.f32.mrf.mxu1  ;;  %v1328_v33 = vadd.f32 %v1327_v12, %v1309_v27  ;;  %v1292_v36 = vadd.f32 %v1291_v19, %v1273_v32 }
 0x11f   :  { %v1347_v56 = vadd.f32 %v1346_v15, %v1328_v33  ;;  %v1311_v38 = vadd.f32 %v1310_v57, %v1292_v36  ;;  %v1414_v15 = vadd.f32 %v1413_v2, %v1412_v55  ;;  %v1453_v57 = vadd.f32 %v1452_v7, %v1451_v60 }
 0x121   :  { %v1415_v1 = vrot.slane %v1414_v15, 1  ;;  %v1454_v22 = vrot.slane %v1453_v57, 1 }
 0x124   :  { %v1329_v25 = vpop.f32.mrf.mxu2  ;;  %v1360_v28 = vpop.f32.mrf.mxu0 }
 0x125   :  { %v1348_v26 = vpop.f32.mrf.mxu3  ;;  %v1379_v29 = vpop.f32.mrf.mxu1  ;;  %v1361_v31 = vadd.f32 %v1360_v28, %v1342_v24  ;;  %v1330_v41 = vadd.f32 %v1329_v25, %v1311_v38  ;;  %v1416_v25 = vadd.f32 %v1415_v1, %v1414_v15 }
 0x127   :  { %v1380_v35 = vadd.f32 %v1379_v29, %v1361_v31  ;;  %v1349_v18 = vadd.f32 %v1348_v26, %v1330_v41  ;;  %v1407_v26 = vld [vmem:[%s2646_s3] sm:$0x3]  ;;  %v1455_v29 = vadd.f32 %v1454_v22, %v1453_v57 }
 0x128   :  { %v1438_v31 = vld [vmem:[%s2647_s4] sm:$0x3] }
 0x129   :  { %1390 = vst [vmem:[%s2645_s2 + $0x8] sm:$0xff] %v1380_v35  ;;  %v1440_v45 = vmul.f32 %v1380_v35, %v1380_v35 }
 0x12c   :  { %v1365_v9 = vpop.f32.mrf.mxu2  ;;  %v1362_v40 = vpop.f32.mrf.mxu0 }
 0x12d   :  { %v1384_v13 = vpop.f32.mrf.mxu3  ;;  %v1366_v39 = vadd.f32 %v1365_v9, %v1347_v56  ;;  %v1363_v48 = vadd.f32 %v1362_v40, %v1344_v8  ;;  %v1381_v6 = vpop.f32.mrf.mxu1 }
 0x12f   :  { %v1385_v43 = vadd.f32 %v1384_v13, %v1366_v39  ;;  %v1382_v50 = vadd.f32 %v1381_v6, %v1363_v48 }
 0x131   :  { %1394 = vst [vmem:[%s2645_s2 + $0x28] sm:$0xff] %v1385_v43  ;;  %v1442_v54 = vmul.f32 %v1382_v50, %v1382_v50  ;;  %v1417_v46 = vadd.f32 %v1382_v50, %v1380_v35  ;;  %v1444_v53 = vmul.f32 %v1385_v43, %v1385_v43 }
 0x132   :  { %1392 = vst [vmem:[%s2645_s2 + $0x18] sm:$0xff] %v1382_v50 }
 0x133   :  { %v1456_v47 = vadd.f32 %v1442_v54, %v1440_v45  ;;  %v1418_v59 = vadd.f32 %v1417_v46, %v1385_v43 }
 0x134   :  { %v1367_v42 = vpop.f32.mrf.mxu2 }
 0x135   :  { %v1368_v49 = vadd.f32 %v1367_v42, %v1349_v18  ;;  %v1386_v52 = vpop.f32.mrf.mxu3  ;;  %v1457_v63 = vadd.f32 %v1456_v47, %v1444_v53 }
 0x137   :  { %v1387_v58 = vadd.f32 %v1386_v52, %v1368_v49 }
 0x139   :  { %1396 = vst [vmem:[%s2645_s2 + $0x38] sm:$0xff] %v1387_v58  ;;  %v1419_v61 = vadd.f32 %v1418_v59, %v1387_v58  ;;  %v1446_v62 = vmul.f32 %v1387_v58, %v1387_v58 }
 0x13b   :  { %v1420_v3 = vrot.slane %v1419_v61, 4  ;;  %v1458_v4 = vadd.f32 %v1457_v63, %v1446_v62 }
 0x13d   :  { %v1421_v11 = vadd.f32 %v1420_v3, %v1419_v61  ;;  %v1459_v12 = vrot.slane %v1458_v4, 4 }
 0x13f   :  { %v1422_v16 = vrot.slane %v1421_v11, 2  ;;  %v1460_v19 = vadd.f32 %v1459_v12, %v1458_v4 }
 0x141   :  { %v1423_v0 = vadd.f32 %v1422_v16, %v1421_v11  ;;  %v1461_v20 = vrot.slane %v1460_v19, 2 }
 0x143   :  { %v1424_v21 = vrot.slane %v1423_v0, 1  ;;  %v1462_v5 = vadd.f32 %v1461_v20, %v1460_v19 }
 0x145   :  { %v1425_v23 = vadd.f32 %v1424_v21, %v1423_v0  ;;  %v1463_v24 = vrot.slane %v1462_v5, 1 }
 0x147   :  { %v1428_v27 = vrot.slane %v1425_v23, 7  ;;  %v1464_v28 = vadd.f32 %v1463_v24, %v1462_v5 }
 0x149   :  { %v1430_v30 = vsel %vm1429_vm1, %v1416_v25, %v1428_v27  ;;  %v1467_v32 = vrot.slane %v1464_v28, 7 }
 0x14a   :  { %v1432_v33 = vadd.f32 %v1430_v30, %v1407_v26 }
 0x14b   :  { %v1468_v34 = vsel %vm1429_vm1, %v1455_v29, %v1467_v32 }
 0x14c   :  { %1437 = vst.msk [vmem:[%s2646_s3] sm:$0x3] %vm2599_vm0, %v1432_v33  ;;  %v1470_v35 = vadd.f32 %v1468_v34, %v1438_v31 }
 0x14e   :  { %1471 = vst.msk [vmem:[%s2647_s4] sm:$0x3] %vm2599_vm0, %v1470_v35 }
 0x14f   :  { %1500 = vsyncpa [#allocation3], 1 }

// kernel: generator_forward.13
= control target key start
LH: loop header
LB: loop body
LE: loop exit
PB: predicated region body
PF: predicated region fallthrough
CT: control target
= control target key end

     0   :  { %vm590_vm0 = vcmask 523264   ;;  %s1889_s1 = inlined_call_operand.vmem [shape: bf16[576,128], index: 1, kind: input, shape index: {}]   ;;  %s1890_s0 = inlined_call_operand.vmem [shape: bf16[128,576], index: 0, kind: input, shape index: {}]   ;;  %s1891_s2 = inlined_call_operand.vmem [shape: f32[128,128], index: 2, kind: output, shape index: {0}]   ;;  %s1892_s3 = inlined_call_operand.vmem [shape: f32[1,1,128], index: 3, kind: output, shape index: {1}]   ;;  %s1893_s4 = inlined_call_operand.vmem [shape: f32[1,1,128], index: 4, kind: output, shape index: {2}]  }
   0x1   :  { %v1345_v0 = vld [vmem:[%s1889_s1 + $0x38] sm:$0xff]  ;;  %v1344_v1 = vld [vmem:[%s1889_s1 + $0x30] sm:$0xff]  ;;  %v1343_v2 = vld [vmem:[%s1889_s1 + $0x28] sm:$0xff] }
   0x2   :  { %1374 = vmatpush.bf16.msra.mxu1 %v1345_v0  ;;  %1375 = vmatpush.bf16.msra.mxu2 %v1345_v0  ;;  %v1342_v3 = vld [vmem:[%s1889_s1 + $0x20] sm:$0xff]  ;;  %v1341_v4 = vld [vmem:[%s1889_s1 + $0x18] sm:$0xff]  ;;  %v1340_v5 = vld [vmem:[%s1889_s1 + $0x10] sm:$0xff] }
   0x3   :  { %1376 = vmatpush.bf16.msra.mxu3 %v1345_v0  ;;  %615 = vmatpush.bf16.msra.mxu0 %v1345_v0  ;;  %v1339_v6 = vld [vmem:[%s1889_s1 + $0x8] sm:$0xff]  ;;  %v1338_v7 = vld [vmem:[%s1889_s1] sm:$0xff]  ;;  %v1028_v8 = vld [vmem:[%s1890_s0 + $0x50] sm:$0xf] }
   0x4   :  { %v1310_v9 = vld [vmem:[%s1890_s0 + $0x60] sm:$0xf0]  ;;  %v1068_v10 = vld [vmem:[%s1890_s0 + $0xa0] sm:$0xf]  ;;  %v1320_v11 = vld [vmem:[%s1890_s0 + $0xb0] sm:$0xf0] }
   0x5   :  { %v1108_v12 = vld [vmem:[%s1890_s0 + $0xf0] sm:$0xf]  ;;  %v1330_v13 = vld [vmem:[%s1890_s0 + $0x100] sm:$0xf0]  ;;  %v988_v14 = vld [vmem:[%s1890_s0] sm:$0xf]  ;;  %v1029_v18 = vor.u32 %v1310_v9, %v1028_v8  ;;  %v1069_v19 = vor.u32 %v1320_v11, %v1068_v10 }
   0x6   :  { %1377 = vmatpush.bf16.msra.mxu1 %v1344_v1  ;;  %1378 = vmatpush.bf16.msra.mxu2 %v1344_v1  ;;  %v1300_v15 = vld [vmem:[%s1890_s0 + $0x10] sm:$0xf0]  ;;  %v1361_v16 = vld [vmem:[%s1889_s1 + $0xb8] sm:$0xff]  ;;  %v1109_v20 = vor.u32 %v1330_v13, %v1108_v12  ;;  %v1359_v28 = vld [vmem:[%s1889_s1 + $0xa8] sm:$0xff] }
   0x7   :  { %1379 = vmatpush.bf16.msra.mxu3 %v1344_v1  ;;  %616 = vmatpush.bf16.msra.mxu0 %v1344_v1  ;;  %v1353_v17 = vld [vmem:[%s1889_s1 + $0x78] sm:$0xff]  ;;  %v989_v21 = vor.u32 %v1300_v15, %v988_v14  ;;  %v1360_v24 = vld [vmem:[%s1889_s1 + $0xb0] sm:$0xff]  ;;  %v1351_v29 = vld [vmem:[%s1889_s1 + $0x68] sm:$0xff] }
   0x8   :  { %v1369_v22 = vld [vmem:[%s1889_s1 + $0xf8] sm:$0xff]  ;;  %v1352_v25 = vld [vmem:[%s1889_s1 + $0x70] sm:$0xff]  ;;  %v1367_v30 = vld [vmem:[%s1889_s1 + $0xe8] sm:$0xff] }
   0x9   :  { %v1373_v23 = vld [vmem:[%s1889_s1 + $0x118] sm:$0xff]  ;;  %v1368_v26 = vld [vmem:[%s1889_s1 + $0xf0] sm:$0xff]  ;;  %v1371_v31 = vld [vmem:[%s1889_s1 + $0x108] sm:$0xff] }
   0xa   :  { %1380 = vmatpush.bf16.msra.mxu1 %v1343_v2  ;;  %1381 = vmatpush.bf16.msra.mxu2 %v1343_v2  ;;  %v1372_v27 = vld [vmem:[%s1889_s1 + $0x110] sm:$0xff]  ;;  %v1358_v32 = vld [vmem:[%s1889_s1 + $0xa0] sm:$0xff]  ;;  %v1048_v35 = vld [vmem:[%s1890_s0 + $0x78] sm:$0xf] }
   0xb   :  { %1382 = vmatpush.bf16.msra.mxu3 %v1343_v2  ;;  %617 = vmatpush.bf16.msra.mxu0 %v1343_v2  ;;  %v1350_v33 = vld [vmem:[%s1889_s1 + $0x60] sm:$0xff]  ;;  %v1315_v36 = vld [vmem:[%s1890_s0 + $0x88] sm:$0xf0]  ;;  %v1088_v37 = vld [vmem:[%s1890_s0 + $0xc8] sm:$0xf] }
   0xc   :  { %v1366_v34 = vld [vmem:[%s1889_s1 + $0xe0] sm:$0xff]  ;;  %v1325_v38 = vld [vmem:[%s1890_s0 + $0xd8] sm:$0xf0]  ;;  %v1128_v39 = vld [vmem:[%s1890_s0 + $0x118] sm:$0xf]  ;;  %v1049_v46 = vor.u32 %v1315_v36, %v1048_v35 }
   0xd   :  { %v1335_v40 = vld [vmem:[%s1890_s0 + $0x128] sm:$0xf0]  ;;  %v1008_v41 = vld [vmem:[%s1890_s0 + $0x28] sm:$0xf]  ;;  %v1305_v42 = vld [vmem:[%s1890_s0 + $0x38] sm:$0xf0]  ;;  %v1089_v47 = vor.u32 %v1325_v38, %v1088_v37 }
   0xe   :  { %1383 = vmatpush.bf16.msra.mxu1 %v1342_v3  ;;  %1384 = vmatpush.bf16.msra.mxu2 %v1342_v3  ;;  %v1370_v43 = vld [vmem:[%s1889_s1 + $0x100] sm:$0xff]  ;;  %v1357_v44 = vld [vmem:[%s1889_s1 + $0x98] sm:$0xff]  ;;  %v1129_v48 = vor.u32 %v1335_v40, %v1128_v39  ;;  %v1009_v49 = vor.u32 %v1305_v42, %v1008_v41  ;;  %v1356_v51 = vld [vmem:[%s1889_s1 + $0x90] sm:$0xff] }
   0xf   :  { %1385 = vmatpush.bf16.msra.mxu3 %v1342_v3  ;;  %618 = vmatpush.bf16.msra.mxu0 %v1342_v3  ;;  %v1349_v45 = vld [vmem:[%s1889_s1 + $0x58] sm:$0xff]  ;;  %v1348_v52 = vld [vmem:[%s1889_s1 + $0x50] sm:$0xff]  ;;  %v1355_v54 = vld [vmem:[%s1889_s1 + $0x88] sm:$0xff] }
  0x10   :  { %v1365_v50 = vld [vmem:[%s1889_s1 + $0xd8] sm:$0xff]  ;;  %v1364_v53 = vld [vmem:[%s1889_s1 + $0xd0] sm:$0xff]  ;;  %v1347_v55 = vld [vmem:[%s1889_s1 + $0x48] sm:$0xff] }
  0x11   :  { %v1363_v56 = vld [vmem:[%s1889_s1 + $0xc8] sm:$0xff]  ;;  %v1354_v57 = vld [vmem:[%s1889_s1 + $0x80] sm:$0xff]  ;;  %v990_v61 = vld [vmem:[%s1890_s0 + $0x14] sm:$0xf0] }
  0x12   :  { %1386 = vmatpush.bf16.msra.mxu1 %v1341_v4  ;;  %1387 = vmatpush.bf16.msra.mxu2 %v1341_v4  ;;  %v1346_v58 = vld [vmem:[%s1889_s1 + $0x40] sm:$0xff]  ;;  %v996_v62 = vld [vmem:[%s1890_s0 + $0x8] sm:$0xf]  ;;  %v1301_v63 = vld [vmem:[%s1890_s0 + $0x18] sm:$0xf0] }
  0x13   :  { %1388 = vmatpush.bf16.msra.mxu3 %v1341_v4  ;;  %619 = vmatpush.bf16.msra.mxu0 %v1341_v4  ;;  %v1362_v59 = vld [vmem:[%s1889_s1 + $0xc0] sm:$0xff]  ;;  %v1299_v0 = vld [vmem:[%s1890_s0 + $0xc] sm:$0xf]  ;;  %v1004_v2 = vld [vmem:[%s1890_s0 + $0x10] sm:$0xf] }
  0x14   :  { %v1298_v60 = vld [vmem:[%s1890_s0 + $0x4] sm:$0xf]  ;;  %v998_v1 = vld [vmem:[%s1890_s0 + $0x1c] sm:$0xf0]  ;;  %v1303_v8 = vld [vmem:[%s1890_s0 + $0x2c] sm:$0xf] }
  0x15   :  { %v1302_v3 = vld [vmem:[%s1890_s0 + $0x20] sm:$0xf0]  ;;  %v993_v4 = vor.u32 %v1298_v60, %v990_v61  ;;  %v1010_v9 = vld [vmem:[%s1890_s0 + $0x3c] sm:$0xf0]  ;;  %v1016_v10 = vld [vmem:[%s1890_s0 + $0x30] sm:$0xf] }
  0x16   :  { %1389 = vmatpush.bf16.msra.mxu1 %v1340_v5  ;;  %1390 = vmatpush.bf16.msra.mxu2 %v1340_v5  ;;  %v1306_v11 = vld [vmem:[%s1890_s0 + $0x40] sm:$0xf0]  ;;  %v1304_v12 = vld [vmem:[%s1890_s0 + $0x34] sm:$0xf]  ;;  %v1018_v13 = vld [vmem:[%s1890_s0 + $0x44] sm:$0xf0] }
  0x17   :  { %1391 = vmatpush.bf16.msra.mxu3 %v1340_v5  ;;  %620 = vmatpush.bf16.msra.mxu0 %v1340_v5  ;;  %v997_v5 = vor.u32 %v1301_v63, %v996_v62  ;;  %v1024_v14 = vld [vmem:[%s1890_s0 + $0x38] sm:$0xf]  ;;  %v1307_v15 = vld [vmem:[%s1890_s0 + $0x48] sm:$0xf0]  ;;  %v1316_v35 = vld [vmem:[%s1890_s0 + $0x90] sm:$0xf0] }
  0x18   :  { %v1314_v36 = vld [vmem:[%s1890_s0 + $0x84] sm:$0xf]  ;;  %v1058_v37 = vld [vmem:[%s1890_s0 + $0x94] sm:$0xf0]  ;;  %v1064_v38 = vld [vmem:[%s1890_s0 + $0x88] sm:$0xf] }
  0x19   :  { %v1317_v39 = vld [vmem:[%s1890_s0 + $0x98] sm:$0xf0]  ;;  %v1061_v42 = vor.u32 %v1314_v36, %v1058_v37  ;;  %v1324_v60 = vld [vmem:[%s1890_s0 + $0xd4] sm:$0xf]  ;;  %v1098_v61 = vld [vmem:[%s1890_s0 + $0xe4] sm:$0xf0] }
  0x1a   :  { %1392 = vmatpush.bf16.msra.mxu1 %v1339_v6  ;;  %1393 = vmatpush.bf16.msra.mxu2 %v1339_v6  ;;  %v1104_v62 = vld [vmem:[%s1890_s0 + $0xd8] sm:$0xf]  ;;  %v1327_v63 = vld [vmem:[%s1890_s0 + $0xe8] sm:$0xf0] }
  0x1b   :  { %1394 = vmatpush.bf16.msra.mxu3 %v1339_v6  ;;  %621 = vmatpush.bf16.msra.mxu0 %v1339_v6  ;;  %v1001_v6 = vor.u32 %v1299_v0, %v998_v1 }
  0x1e   :  { %1395 = vmatpush.bf16.msra.mxu1 %v1338_v7  ;;  %1396 = vmatpush.bf16.msra.mxu2 %v1338_v7 }
  0x1f   :  { %1397 = vmatpush.bf16.msra.mxu3 %v1338_v7  ;;  %622 = vmatpush.bf16.msra.mxu0 %v1338_v7  ;;  %v1005_v7 = vor.u32 %v1302_v3, %v1004_v2  ;;  %v1101_v2 = vor.u32 %v1324_v60, %v1098_v61  ;;  %v1105_v3 = vor.u32 %v1327_v63, %v1104_v62 }
  0x21   :  { %633 = vmatmul.bf16.vlgmr.msra.gmra.mxu1 %v1029_v18  ;;  %643 = vmatmul.bf16.vlgmr.msra.gmra.mxu2 %v1069_v19  ;;  %v1021_v18 = vor.u32 %v1304_v12, %v1018_v13  ;;  %v1025_v19 = vor.u32 %v1307_v15, %v1024_v14 }
  0x22   :  { %713 = vmatpush.bf16.msrb.mxu2 %v1361_v16  ;;  %664 = vmatpush.bf16.msrb.mxu1 %v1353_v17  ;;  %v1013_v16 = vor.u32 %v1303_v8, %v1010_v9  ;;  %v1017_v17 = vor.u32 %v1306_v11, %v1016_v10  ;;  %v1329_v8 = vld [vmem:[%s1890_s0 + $0xfc] sm:$0xf]  ;;  %v1118_v9 = vld [vmem:[%s1890_s0 + $0x10c] sm:$0xf0]  ;;  %v1124_v10 = vld [vmem:[%s1890_s0 + $0x100] sm:$0xf] }
  0x23   :  { %653 = vmatmul.bf16.vlgmr.msra.gmra.mxu3 %v1109_v20  ;;  %623 = vmatmul.bf16.vlgmr.msra.gmra.mxu0 %v989_v21  ;;  %v1308_v20 = vld [vmem:[%s1890_s0 + $0x54] sm:$0xf]  ;;  %v1030_v21 = vld [vmem:[%s1890_s0 + $0x64] sm:$0xf0]  ;;  %v1121_v15 = vor.u32 %v1329_v8, %v1118_v9 }
  0x24   :  { %762 = vmatpush.bf16.msrb.mxu3 %v1369_v22  ;;  %815 = vmatpush.bf16.msrb.mxu0 %v1373_v23  ;;  %v1036_v22 = vld [vmem:[%s1890_s0 + $0x58] sm:$0xf]  ;;  %v1311_v23 = vld [vmem:[%s1890_s0 + $0x68] sm:$0xf0]  ;;  %v1332_v11 = vld [vmem:[%s1890_s0 + $0x110] sm:$0xf0] }
  0x26   :  { %714 = vmatpush.bf16.msrb.mxu2 %v1360_v24  ;;  %665 = vmatpush.bf16.msrb.mxu1 %v1352_v25  ;;  %v1309_v24 = vld [vmem:[%s1890_s0 + $0x5c] sm:$0xf]  ;;  %v1038_v25 = vld [vmem:[%s1890_s0 + $0x6c] sm:$0xf0] }
  0x28   :  { %763 = vmatpush.bf16.msrb.mxu3 %v1368_v26  ;;  %816 = vmatpush.bf16.msrb.mxu0 %v1372_v27  ;;  %v1044_v26 = vld [vmem:[%s1890_s0 + $0x60] sm:$0xf]  ;;  %v1312_v27 = vld [vmem:[%s1890_s0 + $0x70] sm:$0xf0] }
  0x2a   :  { %715 = vmatpush.bf16.msrb.mxu2 %v1359_v28  ;;  %666 = vmatpush.bf16.msrb.mxu1 %v1351_v29  ;;  %v1033_v28 = vor.u32 %v1308_v20, %v1030_v21  ;;  %v1037_v29 = vor.u32 %v1311_v23, %v1036_v22  ;;  %v1333_v22 = vld [vmem:[%s1890_s0 + $0x11c] sm:$0xf]  ;;  %v1130_v23 = vld [vmem:[%s1890_s0 + $0x12c] sm:$0xf0] }
  0x2c   :  { %764 = vmatpush.bf16.msrb.mxu3 %v1367_v30  ;;  %817 = vmatpush.bf16.msrb.mxu0 %v1371_v31  ;;  %v1041_v30 = vor.u32 %v1309_v24, %v1038_v25  ;;  %v1045_v31 = vor.u32 %v1312_v27, %v1044_v26  ;;  %v1136_v24 = vld [vmem:[%s1890_s0 + $0x120] sm:$0xf]  ;;  %v1336_v25 = vld [vmem:[%s1890_s0 + $0x130] sm:$0xf0]  ;;  %v1334_v26 = vld [vmem:[%s1890_s0 + $0x124] sm:$0xf] }
  0x2d   :  { %v1138_v27 = vld [vmem:[%s1890_s0 + $0x134] sm:$0xf0] }
  0x2e   :  { %716 = vmatpush.bf16.msrb.mxu2 %v1358_v32  ;;  %667 = vmatpush.bf16.msrb.mxu1 %v1350_v33  ;;  %v1313_v32 = vld [vmem:[%s1890_s0 + $0x7c] sm:$0xf]  ;;  %v1050_v33 = vld [vmem:[%s1890_s0 + $0x8c] sm:$0xf0] }
  0x2f   :  { %v1053_v40 = vor.u32 %v1313_v32, %v1050_v33  ;;  %v1133_v32 = vor.u32 %v1333_v22, %v1130_v23  ;;  %v1137_v33 = vor.u32 %v1336_v25, %v1136_v24 }
  0x30   :  { %765 = vmatpush.bf16.msrb.mxu3 %v1366_v34  ;;  %818 = vmatpush.bf16.msrb.mxu0 %v1370_v43  ;;  %v1056_v34 = vld [vmem:[%s1890_s0 + $0x80] sm:$0xf]  ;;  %v1065_v43 = vor.u32 %v1317_v39, %v1064_v38 }
  0x31   :  { %638 = vmatmul.bf16.gmra.mxu1 %v1049_v46  ;;  %648 = vmatmul.bf16.gmra.mxu2 %v1089_v47  ;;  %v1057_v41 = vor.u32 %v1316_v35, %v1056_v34  ;;  %v1076_v46 = vld [vmem:[%s1890_s0 + $0xa8] sm:$0xf]  ;;  %v1321_v47 = vld [vmem:[%s1890_s0 + $0xb8] sm:$0xf0]  ;;  %v1141_v35 = vor.u32 %v1334_v26, %v1138_v27 }
  0x32   :  { %717 = vmatpush.bf16.msrb.mxu2 %v1357_v44  ;;  %668 = vmatpush.bf16.msrb.mxu1 %v1349_v45  ;;  %v1318_v44 = vld [vmem:[%s1890_s0 + $0xa4] sm:$0xf]  ;;  %v1070_v45 = vld [vmem:[%s1890_s0 + $0xb4] sm:$0xf0] }
  0x33   :  { %658 = vmatmul.bf16.gmra.mxu3 %v1129_v48  ;;  %628 = vmatmul.bf16.gmra.mxu0 %v1009_v49  ;;  %v1319_v48 = vld [vmem:[%s1890_s0 + $0xac] sm:$0xf]  ;;  %v1078_v49 = vld [vmem:[%s1890_s0 + $0xbc] sm:$0xf0] }
  0x34   :  { %766 = vmatpush.bf16.msrb.mxu3 %v1365_v50  ;;  %v1084_v50 = vld [vmem:[%s1890_s0 + $0xb0] sm:$0xf] }
  0x36   :  { %718 = vmatpush.bf16.msrb.mxu2 %v1356_v51  ;;  %669 = vmatpush.bf16.msrb.mxu1 %v1348_v52  ;;  %v1322_v51 = vld [vmem:[%s1890_s0 + $0xc0] sm:$0xf0]  ;;  %v1073_v52 = vor.u32 %v1318_v44, %v1070_v45 }
  0x38   :  { %767 = vmatpush.bf16.msrb.mxu3 %v1364_v53  ;;  %v1077_v53 = vor.u32 %v1321_v47, %v1076_v46 }
  0x3a   :  { %719 = vmatpush.bf16.msrb.mxu2 %v1355_v54  ;;  %670 = vmatpush.bf16.msrb.mxu1 %v1347_v55  ;;  %v1081_v54 = vor.u32 %v1319_v48, %v1078_v49  ;;  %v1085_v55 = vor.u32 %v1322_v51, %v1084_v50 }
  0x3c   :  { %768 = vmatpush.bf16.msrb.mxu3 %v1363_v56  ;;  %v1323_v56 = vld [vmem:[%s1890_s0 + $0xcc] sm:$0xf] }
  0x3e   :  { %720 = vmatpush.bf16.msrb.mxu2 %v1354_v57  ;;  %671 = vmatpush.bf16.msrb.mxu1 %v1346_v58  ;;  %v1090_v57 = vld [vmem:[%s1890_s0 + $0xdc] sm:$0xf0]  ;;  %v1096_v58 = vld [vmem:[%s1890_s0 + $0xd0] sm:$0xf] }
  0x3f   :  { %v1093_v0 = vor.u32 %v1323_v56, %v1090_v57 }
  0x40   :  { %769 = vmatpush.bf16.msrb.mxu3 %v1362_v59  ;;  %v1326_v59 = vld [vmem:[%s1890_s0 + $0xe0] sm:$0xf0] }
  0x41   :  { %672 = vmatmul.bf16.vlgmr.msrb.gmra.mxu1 %v993_v4  ;;  %721 = vmatmul.bf16.vlgmr.msrb.gmra.mxu2 %v997_v5  ;;  %v1097_v1 = vor.u32 %v1326_v59, %v1096_v58  ;;  %v1328_v4 = vld [vmem:[%s1890_s0 + $0xf4] sm:$0xf]  ;;  %v1110_v5 = vld [vmem:[%s1890_s0 + $0x104] sm:$0xf0] }
  0x42   :  { %v1113_v12 = vor.u32 %v1328_v4, %v1110_v5 }
  0x43   :  { %770 = vmatmul.bf16.vlgmr.msrb.gmra.mxu3 %v1001_v6  ;;  %1290 = vmatmul.msk.bf16.vlgmr.msrb.gmra.mxu0 %vm590_vm0, %v1005_v7  ;;  %v1116_v6 = vld [vmem:[%s1890_s0 + $0xf8] sm:$0xf]  ;;  %v1331_v7 = vld [vmem:[%s1890_s0 + $0x108] sm:$0xf0] }
  0x44   :  { %v1117_v13 = vor.u32 %v1331_v7, %v1116_v6 }
  0x51   :  { %677 = vmatmul.bf16.gmra.mxu1 %v1013_v16  ;;  %726 = vmatmul.bf16.gmra.mxu2 %v1017_v17  ;;  %v1125_v16 = vor.u32 %v1332_v11, %v1124_v10 }
  0x53   :  { %775 = vmatmul.bf16.gmra.mxu3 %v1021_v18  ;;  %1291 = vmatmul.msk.bf16.gmra.mxu0 %vm590_vm0, %v1025_v19 }
  0x61   :  { %682 = vmatmul.bf16.gmra.mxu1 %v1033_v28  ;;  %731 = vmatmul.bf16.gmra.mxu2 %v1037_v29  ;;  %v1144_v28 = vld [vmem:[%s1890_s0 + $0x128] sm:$0xf]  ;;  %v1337_v29 = vld [vmem:[%s1890_s0 + $0x138] sm:$0xf0] }
  0x62   :  { %v1145_v36 = vor.u32 %v1337_v29, %v1144_v28 }
  0x63   :  { %780 = vmatmul.bf16.gmra.mxu3 %v1041_v30  ;;  %1292 = vmatmul.msk.bf16.gmra.mxu0 %vm590_vm0, %v1045_v31 }
  0x71   :  { %687 = vmatmul.bf16.gmra.mxu1 %v1053_v40  ;;  %736 = vmatmul.bf16.gmra.mxu2 %v1057_v41 }
  0x73   :  { %785 = vmatmul.bf16.gmra.mxu3 %v1061_v42  ;;  %1293 = vmatmul.msk.bf16.gmra.mxu0 %vm590_vm0, %v1065_v43 }
  0x81   :  { %692 = vmatmul.bf16.gmra.mxu1 %v1073_v52  ;;  %741 = vmatmul.bf16.gmra.mxu2 %v1077_v53 }
  0x83   :  { %790 = vmatmul.bf16.gmra.mxu3 %v1081_v54  ;;  %1294 = vmatmul.msk.bf16.gmra.mxu0 %vm590_vm0, %v1085_v55 }
  0x91   :  { %697 = vmatmul.bf16.gmra.mxu1 %v1093_v0  ;;  %746 = vmatmul.bf16.gmra.mxu2 %v1097_v1 }
  0x93   :  { %795 = vmatmul.bf16.gmra.mxu3 %v1101_v2  ;;  %1295 = vmatmul.msk.bf16.gmra.mxu0 %vm590_vm0, %v1105_v3 }
  0x9e   :  { %v1755_v14 = vpop.f32.mrf.mxu1 }
  0xa0   :  { %v624_v17 = vpop.f32.mrf.mxu0 }
  0xa1   :  { %702 = vmatmul.bf16.gmra.mxu1 %v1113_v12  ;;  %751 = vmatmul.bf16.gmra.mxu2 %v1117_v13 }
  0xa3   :  { %800 = vmatmul.bf16.gmra.mxu3 %v1121_v15  ;;  %1296 = vmatmul.msk.bf16.gmra.mxu0 %vm590_vm0, %v1125_v16 }
  0xa4   :  { %v1758_v18 = vpop.f32.mrf.mxu2 }
  0xa6   :  { %v1760_v19 = vpop.f32.mrf.mxu3  ;;  %v1762_v20 = vpop.f32.mrf.mxu1 }
  0xa8   :  { %v626_v21 = vpop.f32.mrf.mxu0 }
  0xac   :  { %v1788_v30 = vpop.f32.mrf.mxu2 }
  0xae   :  { %v1790_v31 = vpop.f32.mrf.mxu3  ;;  %v1792_v34 = vpop.f32.mrf.mxu1 }
  0xb0   :  { %v629_v37 = vpop.f32.mrf.mxu0 }
  0xb1   :  { %707 = vmatmul.bf16.gmra.mxu1 %v1133_v32  ;;  %756 = vmatmul.bf16.gmra.mxu2 %v1137_v33 }
  0xb3   :  { %805 = vmatmul.bf16.gmra.mxu3 %v1141_v35  ;;  %1297 = vmatmul.msk.bf16.gmra.mxu0 %vm590_vm0, %v1145_v36 }
  0xb4   :  { %v1795_v38 = vpop.f32.mrf.mxu2 }
  0xb6   :  { %v1797_v39 = vpop.f32.mrf.mxu3  ;;  %v1799_v40 = vpop.f32.mrf.mxu1 }
  0xb8   :  { %v631_v41 = vpop.f32.mrf.mxu0 }
  0xbc   :  { %v1801_v42 = vpop.f32.mrf.mxu2 }
  0xbe   :  { %v1803_v43 = vpop.f32.mrf.mxu3  ;;  %v673_v44 = vpop.f32.mrf.mxu1 }
  0xbf   :  { %v674_v46 = vadd.f32 %v673_v44, %v624_v17 }
  0xc0   :  { %v820_v45 = vpop.f32.mrf.mxu0 }
  0xc4   :  { %v722_v47 = vpop.f32.mrf.mxu2 }
  0xc5   :  { %v723_v48 = vadd.f32 %v722_v47, %v674_v46 }
  0xc6   :  { %v771_v49 = vpop.f32.mrf.mxu3  ;;  %v675_v50 = vpop.f32.mrf.mxu1 }
  0xc7   :  { %v772_v51 = vadd.f32 %v771_v49, %v723_v48  ;;  %v676_v54 = vadd.f32 %v675_v50, %v626_v21 }
  0xc8   :  { %v822_v52 = vpop.f32.mrf.mxu0 }
  0xc9   :  { %v821_v53 = vadd.f32 %v820_v45, %v772_v51 }
  0xcb   :  { %860 = vst [vmem:[%s1891_s2] sm:$0xff] %v821_v53  ;;  %v907_v62 = vmul.f32 %v821_v53, %v821_v53 }
  0xcc   :  { %v724_v55 = vpop.f32.mrf.mxu2 }
  0xcd   :  { %v725_v56 = vadd.f32 %v724_v55, %v676_v54 }
  0xce   :  { %v773_v57 = vpop.f32.mrf.mxu3  ;;  %v678_v58 = vpop.f32.mrf.mxu1 }
  0xcf   :  { %v774_v59 = vadd.f32 %v773_v57, %v725_v56  ;;  %v679_v1 = vadd.f32 %v678_v58, %v629_v37 }
  0xd0   :  { %v825_v60 = vpop.f32.mrf.mxu0 }
  0xd1   :  { %v823_v61 = vadd.f32 %v822_v52, %v774_v59 }
  0xd3   :  { %861 = vst [vmem:[%s1891_s2 + $0x8] sm:$0xff] %v823_v61  ;;  %v883_v63 = vadd.f32 %v823_v61, %v821_v53  ;;  %v908_v0 = vmul.f32 %v823_v61, %v823_v61 }
  0xd4   :  { %v727_v2 = vpop.f32.mrf.mxu2 }
  0xd5   :  { %v923_v3 = vadd.f32 %v908_v0, %v907_v62  ;;  %v728_v4 = vadd.f32 %v727_v2, %v679_v1 }
  0xd6   :  { %v776_v5 = vpop.f32.mrf.mxu3  ;;  %v680_v6 = vpop.f32.mrf.mxu1 }
  0xd7   :  { %v777_v7 = vadd.f32 %v776_v5, %v728_v4  ;;  %v681_v12 = vadd.f32 %v680_v6, %v631_v41 }
  0xd8   :  { %v827_v8 = vpop.f32.mrf.mxu0 }
  0xd9   :  { %v826_v9 = vadd.f32 %v825_v60, %v777_v7 }
  0xdb   :  { %862 = vst [vmem:[%s1891_s2 + $0x10] sm:$0xff] %v826_v9  ;;  %v884_v10 = vadd.f32 %v883_v63, %v826_v9  ;;  %v909_v11 = vmul.f32 %v826_v9, %v826_v9 }
  0xdc   :  { %v729_v13 = vpop.f32.mrf.mxu2 }
  0xdd   :  { %v924_v15 = vadd.f32 %v923_v3, %v909_v11  ;;  %v730_v16 = vadd.f32 %v729_v13, %v681_v12 }
  0xde   :  { %v778_v17 = vpop.f32.mrf.mxu3  ;;  %v683_v21 = vpop.f32.mrf.mxu1 }
  0xdf   :  { %v779_v22 = vadd.f32 %v778_v17, %v730_v16  ;;  %v684_v27 = vadd.f32 %v683_v21, %v1755_v14 }
  0xe0   :  { %v830_v23 = vpop.f32.mrf.mxu0 }
  0xe1   :  { %v828_v24 = vadd.f32 %v827_v8, %v779_v22 }
  0xe3   :  { %863 = vst [vmem:[%s1891_s2 + $0x18] sm:$0xff] %v828_v24  ;;  %v885_v25 = vadd.f32 %v884_v10, %v828_v24  ;;  %v910_v26 = vmul.f32 %v828_v24, %v828_v24 }
  0xe4   :  { %v732_v28 = vpop.f32.mrf.mxu2 }
  0xe5   :  { %v925_v29 = vadd.f32 %v924_v15, %v910_v26  ;;  %v733_v32 = vadd.f32 %v732_v28, %v684_v27 }
  0xe6   :  { %v781_v33 = vpop.f32.mrf.mxu3  ;;  %v685_v35 = vpop.f32.mrf.mxu1 }
  0xe7   :  { %v782_v36 = vadd.f32 %v781_v33, %v733_v32  ;;  %v686_v46 = vadd.f32 %v685_v35, %v1762_v20 }
  0xe8   :  { %v832_v37 = vpop.f32.mrf.mxu0 }
  0xe9   :  { %v831_v41 = vadd.f32 %v830_v23, %v782_v36 }
  0xeb   :  { %864 = vst [vmem:[%s1891_s2 + $0x20] sm:$0xff] %v831_v41  ;;  %v886_v44 = vadd.f32 %v885_v25, %v831_v41  ;;  %v911_v45 = vmul.f32 %v831_v41, %v831_v41 }
  0xec   :  { %v734_v47 = vpop.f32.mrf.mxu2 }
  0xed   :  { %v926_v48 = vadd.f32 %v925_v29, %v911_v45  ;;  %v735_v49 = vadd.f32 %v734_v47, %v686_v46 }
  0xee   :  { %v783_v14 = vpop.f32.mrf.mxu3  ;;  %v688_v50 = vpop.f32.mrf.mxu1 }
  0xef   :  { %v784_v51 = vadd.f32 %v783_v14, %v735_v49  ;;  %v689_v56 = vadd.f32 %v688_v50, %v1792_v34 }
  0xf0   :  { %v835_v52 = vpop.f32.mrf.mxu0 }
  0xf1   :  { %v833_v53 = vadd.f32 %v832_v37, %v784_v51 }
  0xf3   :  { %865 = vst [vmem:[%s1891_s2 + $0x28] sm:$0xff] %v833_v53  ;;  %v887_v54 = vadd.f32 %v886_v44, %v833_v53  ;;  %v912_v55 = vmul.f32 %v833_v53, %v833_v53 }
  0xf4   :  { %v737_v57 = vpop.f32.mrf.mxu2 }
  0xf5   :  { %v927_v58 = vadd.f32 %v926_v48, %v912_v55  ;;  %v738_v59 = vadd.f32 %v737_v57, %v689_v56 }
  0xf6   :  { %v786_v20 = vpop.f32.mrf.mxu3  ;;  %v690_v60 = vpop.f32.mrf.mxu1 }
  0xf7   :  { %v787_v61 = vadd.f32 %v786_v20, %v738_v59  ;;  %v691_v2 = vadd.f32 %v690_v60, %v1799_v40 }
  0xf8   :  { %v837_v62 = vpop.f32.mrf.mxu0 }
  0xf9   :  { %v836_v63 = vadd.f32 %v835_v52, %v787_v61 }
  0xfb   :  { %866 = vst [vmem:[%s1891_s2 + $0x30] sm:$0xff] %v836_v63  ;;  %v888_v0 = vadd.f32 %v887_v54, %v836_v63  ;;  %v913_v1 = vmul.f32 %v836_v63, %v836_v63  ;;  %v1399_v54 = vmov 0.0  }
  0xfc   :  { %v739_v3 = vpop.f32.mrf.mxu2  ;;  %880 = vst [vmem:[%s1892_s3] sm:$0x1] %v1399_v54 }
  0xfd   :  { %v928_v4 = vadd.f32 %v927_v58, %v913_v1  ;;  %v740_v5 = vadd.f32 %v739_v3, %v691_v2  ;;  %881 = vst [vmem:[%s1893_s4] sm:$0x1] %v1399_v54 }
  0xfe   :  { %v788_v34 = vpop.f32.mrf.mxu3  ;;  %v693_v6 = vpop.f32.mrf.mxu1 }
  0xff   :  { %v789_v7 = vadd.f32 %v788_v34, %v740_v5  ;;  %v694_v12 = vadd.f32 %v693_v6, %v1758_v18 }
 0x100   :  { %v840_v8 = vpop.f32.mrf.mxu0 }
 0x101   :  { %v838_v9 = vadd.f32 %v837_v62, %v789_v7 }
 0x103   :  { %867 = vst [vmem:[%s1891_s2 + $0x38] sm:$0xff] %v838_v9  ;;  %v1833_v10 = vadd.f32 %v888_v0, %v838_v9  ;;  %v914_v11 = vmul.f32 %v838_v9, %v838_v9 }
 0x104   :  { %v742_v13 = vpop.f32.mrf.mxu2 }
 0x105   :  { %v1836_v15 = vadd.f32 %v928_v4, %v914_v11  ;;  %v743_v40 = vadd.f32 %v742_v13, %v694_v12 }
 0x106   :  { %v791_v16 = vpop.f32.mrf.mxu3  ;;  %v695_v17 = vpop.f32.mrf.mxu1 }
 0x107   :  { %v792_v21 = vadd.f32 %v791_v16, %v743_v40  ;;  %v696_v24 = vadd.f32 %v695_v17, %v1788_v30 }
 0x108   :  { %v842_v22 = vpop.f32.mrf.mxu0 }
 0x109   :  { %v841_v23 = vadd.f32 %v840_v8, %v792_v21 }
 0x10b   :  { %868 = vst [vmem:[%s1891_s2 + $0x40] sm:$0xff] %v841_v23  ;;  %v915_v1 = vmul.f32 %v841_v23, %v841_v23  ;;  %v890_v4 = vadd.f32 %v1833_v10, %v841_v23 }
 0x10c   :  { %v744_v25 = vpop.f32.mrf.mxu2 }
 0x10d   :  { %v745_v26 = vadd.f32 %v744_v25, %v696_v24  ;;  %v930_v7 = vadd.f32 %v1836_v15, %v915_v1 }
 0x10e   :  { %v793_v27 = vpop.f32.mrf.mxu3  ;;  %v698_v28 = vpop.f32.mrf.mxu1 }
 0x10f   :  { %v794_v18 = vadd.f32 %v793_v27, %v745_v26  ;;  %v699_v33 = vadd.f32 %v698_v28, %v1795_v38 }
 0x110   :  { %v845_v29 = vpop.f32.mrf.mxu0 }
 0x111   :  { %v843_v32 = vadd.f32 %v842_v22, %v794_v18 }
 0x113   :  { %869 = vst [vmem:[%s1891_s2 + $0x48] sm:$0xff] %v843_v32  ;;  %v916_v5 = vmul.f32 %v843_v32, %v843_v32  ;;  %v891_v8 = vadd.f32 %v890_v4, %v843_v32 }
 0x114   :  { %v747_v35 = vpop.f32.mrf.mxu2 }
 0x115   :  { %v748_v36 = vadd.f32 %v747_v35, %v699_v33  ;;  %v931_v13 = vadd.f32 %v930_v7, %v916_v5 }
 0x116   :  { %v796_v37 = vpop.f32.mrf.mxu3  ;;  %v700_v41 = vpop.f32.mrf.mxu1 }
 0x117   :  { %v797_v44 = vadd.f32 %v796_v37, %v748_v36  ;;  %v701_v46 = vadd.f32 %v700_v41, %v1801_v42 }
 0x118   :  { %v847_v45 = vpop.f32.mrf.mxu0 }
 0x119   :  { %v846_v30 = vadd.f32 %v845_v29, %v797_v44 }
 0x11b   :  { %870 = vst [vmem:[%s1891_s2 + $0x50] sm:$0xff] %v846_v30  ;;  %v917_v9 = vmul.f32 %v846_v30, %v846_v30  ;;  %v892_v40 = vadd.f32 %v891_v8, %v846_v30 }
 0x11c   :  { %v749_v47 = vpop.f32.mrf.mxu2 }
 0x11d   :  { %v750_v48 = vadd.f32 %v749_v47, %v701_v46  ;;  %v932_v21 = vadd.f32 %v931_v13, %v917_v9 }
 0x11e   :  { %v798_v49 = vpop.f32.mrf.mxu3  ;;  %v703_v14 = vpop.f32.mrf.mxu1 }
 0x11f   :  { %v799_v50 = vadd.f32 %v798_v49, %v750_v48  ;;  %v704_v52 = vadd.f32 %v703_v14, %v1760_v19 }
 0x120   :  { %v850_v38 = vpop.f32.mrf.mxu0 }
 0x121   :  { %v848_v51 = vadd.f32 %v847_v45, %v799_v50 }
 0x123   :  { %871 = vst [vmem:[%s1891_s2 + $0x58] sm:$0xff] %v848_v51  ;;  %v918_v16 = vmul.f32 %v848_v51, %v848_v51  ;;  %v893_v22 = vadd.f32 %v892_v40, %v848_v51 }
 0x124   :  { %v752_v53 = vpop.f32.mrf.mxu2 }
 0x125   :  { %v753_v42 = vadd.f32 %v752_v53, %v704_v52  ;;  %v933_v24 = vadd.f32 %v932_v21, %v918_v16  ;;  %v882_v52 = vld [vmem:[%s1892_s3] sm:$0x1] }
 0x126   :  { %v801_v55 = vpop.f32.mrf.mxu3  ;;  %v705_v56 = vpop.f32.mrf.mxu1 }
 0x127   :  { %v802_v57 = vadd.f32 %v801_v55, %v753_v42  ;;  %v706_v19 = vadd.f32 %v705_v56, %v1790_v31  ;;  %v906_v42 = vld [vmem:[%s1893_s4] sm:$0x1] }
 0x128   :  { %v852_v59 = vpop.f32.mrf.mxu0 }
 0x129   :  { %v851_v58 = vadd.f32 %v850_v38, %v802_v57 }
 0x12b   :  { %872 = vst [vmem:[%s1891_s2 + $0x60] sm:$0xff] %v851_v58  ;;  %v894_v15 = vadd.f32 %v893_v22, %v851_v58 }
 0x12c   :  { %v754_v20 = vpop.f32.mrf.mxu2 }
 0x12d   :  { %v755_v60 = vadd.f32 %v754_v20, %v706_v19 }
 0x12e   :  { %v803_v61 = vpop.f32.mrf.mxu3  ;;  %v708_v62 = vpop.f32.mrf.mxu1 }
 0x12f   :  { %v804_v63 = vadd.f32 %v803_v61, %v755_v60  ;;  %v709_v2 = vadd.f32 %v708_v62, %v1797_v39  ;;  %v919_v39 = vmul.f32 %v851_v58, %v851_v58 }
 0x130   :  { %v855_v6 = vpop.f32.mrf.mxu0 }
 0x131   :  { %v853_v0 = vadd.f32 %v852_v59, %v804_v63  ;;  %v934_v28 = vadd.f32 %v933_v24, %v919_v39 }
 0x133   :  { %873 = vst [vmem:[%s1891_s2 + $0x68] sm:$0xff] %v853_v0  ;;  %v920_v25 = vmul.f32 %v853_v0, %v853_v0  ;;  %v895_v18 = vadd.f32 %v894_v15, %v853_v0 }
 0x134   :  { %v757_v3 = vpop.f32.mrf.mxu2 }
 0x135   :  { %v758_v34 = vadd.f32 %v757_v3, %v709_v2  ;;  %v935_v35 = vadd.f32 %v934_v28, %v920_v25 }
 0x136   :  { %v806_v31 = vpop.f32.mrf.mxu3  ;;  %v710_v12 = vpop.f32.mrf.mxu1 }
 0x137   :  { %v807_v11 = vadd.f32 %v806_v31, %v758_v34  ;;  %v711_v10 = vadd.f32 %v710_v12, %v1803_v43 }
 0x138   :  { %v857_v33 = vpop.f32.mrf.mxu0 }
 0x139   :  { %v856_v17 = vadd.f32 %v855_v6, %v807_v11 }
 0x13b   :  { %874 = vst [vmem:[%s1891_s2 + $0x70] sm:$0xff] %v856_v17  ;;  %v921_v29 = vmul.f32 %v856_v17, %v856_v17  ;;  %v896_v36 = vadd.f32 %v895_v18, %v856_v17 }
 0x13c   :  { %v759_v23 = vpop.f32.mrf.mxu2 }
 0x13d   :  { %v760_v26 = vadd.f32 %v759_v23, %v711_v10  ;;  %v936_v41 = vadd.f32 %v935_v35, %v921_v29 }
 0x13e   :  { %v808_v27 = vpop.f32.mrf.mxu3 }
 0x13f   :  { %v809_v32 = vadd.f32 %v808_v27, %v760_v26 }
 0x141   :  { %v858_v37 = vadd.f32 %v857_v33, %v809_v32 }
 0x143   :  { %875 = vst [vmem:[%s1891_s2 + $0x78] sm:$0xff] %v858_v37  ;;  %v897_v43 = vadd.f32 %v896_v36, %v858_v37  ;;  %v922_v44 = vmul.f32 %v858_v37, %v858_v37 }
 0x145   :  { %v898_v45 = vrot.slane %v897_v43, 4  ;;  %v937_v30 = vadd.f32 %v936_v41, %v922_v44 }
 0x147   :  { %v899_v46 = vadd.f32 %v898_v45, %v897_v43  ;;  %v938_v47 = vrot.slane %v937_v30, 4 }
 0x149   :  { %v900_v48 = vrot.slane %v899_v46, 2  ;;  %v939_v49 = vadd.f32 %v938_v47, %v937_v30 }
 0x14b   :  { %v901_v14 = vadd.f32 %v900_v48, %v899_v46  ;;  %v940_v50 = vrot.slane %v939_v49, 2 }
 0x14d   :  { %v902_v51 = vrot.slane %v901_v14, 1  ;;  %v941_v38 = vadd.f32 %v940_v50, %v939_v49 }
 0x14f   :  { %v903_v53 = vadd.f32 %v902_v51, %v901_v14  ;;  %v942_v54 = vrot.slane %v941_v38, 1 }
 0x151   :  { %v904_v55 = vadd.f32 %v903_v53, %v882_v52  ;;  %v943_v56 = vadd.f32 %v942_v54, %v941_v38 }
 0x153   :  { %905 = vst [vmem:[%s1892_s3] sm:$0x1] %v904_v55  ;;  %v944_v57 = vadd.f32 %v943_v56, %v906_v42 }
 0x155   :  { %945 = vst [vmem:[%s1893_s4] sm:$0x1] %v944_v57 }

// kernel: generator_forward.14
= control target key start
LH: loop header
LB: loop body
LE: loop exit
PB: predicated region body
PF: predicated region fallthrough
CT: control target
= control target key end

     0   :  { %s287_s0 = inlined_call_operand.vmem [shape: f32[128,128], index: 0, kind: input, shape index: {}]   ;;  %s288_s1 = inlined_call_operand.vmem [shape: f32[1,128], index: 1, kind: input, shape index: {}]   ;;  %s289_s2 = inlined_call_operand.vmem [shape: f32[1,128], index: 2, kind: input, shape index: {}]   ;;  %s290_s3 = inlined_call_operand.vmem [shape: bf16[128,128], index: 3, kind: output, shape index: {}]  }
   0x1   :  { %v14_v0 = vld [vmem:[%s287_s0] sm:$0xff]  ;;  %v15_v1 = vld [vmem:[%s287_s0 + $0x8] sm:$0xff]  ;;  %v16_v4 = vld [vmem:[%s287_s0 + $0x10] sm:$0xff] }
   0x2   :  { %v169_v2 = vld [vmem:[%s288_s1] ss:$0 sm:$0xff]  ;;  %v17_v5 = vld [vmem:[%s287_s0 + $0x18] sm:$0xff]  ;;  %v19_v11 = vld [vmem:[%s287_s0 + $0x28] sm:$0xff] }
   0x3   :  { %v203_v3 = vld [vmem:[%s289_s2] ss:$0 sm:$0xff]  ;;  %v34_v7 = vmul.f32 %v169_v2, %v14_v0  ;;  %v35_v8 = vmul.f32 %v169_v2, %v15_v1  ;;  %v36_v9 = vmul.f32 %v169_v2, %v16_v4  ;;  %v37_v10 = vmul.f32 %v169_v2, %v17_v5  ;;  %v20_v12 = vld [vmem:[%s287_s0 + $0x30] sm:$0xff]  ;;  %v21_v13 = vld [vmem:[%s287_s0 + $0x38] sm:$0xff] }
   0x4   :  { %v18_v6 = vld [vmem:[%s287_s0 + $0x20] sm:$0xff]  ;;  %v39_v15 = vmul.f32 %v169_v2, %v19_v11  ;;  %v40_v16 = vmul.f32 %v169_v2, %v20_v12  ;;  %v41_v17 = vmul.f32 %v169_v2, %v21_v13  ;;  %v23_v27 = vld [vmem:[%s287_s0 + $0x48] sm:$0xff]  ;;  %v24_v32 = vld [vmem:[%s287_s0 + $0x50] sm:$0xff] }
   0x5   :  { %v38_v14 = vmul.f32 %v169_v2, %v18_v6  ;;  %v54_v18 = vadd.f32 %v203_v3, %v34_v7  ;;  %v55_v19 = vadd.f32 %v203_v3, %v35_v8  ;;  %v56_v20 = vadd.f32 %v203_v3, %v36_v9  ;;  %v22_v26 = vld [vmem:[%s287_s0 + $0x40] sm:$0xff]  ;;  %v25_v33 = vld [vmem:[%s287_s0 + $0x58] sm:$0xff]  ;;  %v27_v39 = vld [vmem:[%s287_s0 + $0x68] sm:$0xff] }
   0x6   :  { %v57_v21 = vadd.f32 %v203_v3, %v37_v10  ;;  %v59_v23 = vadd.f32 %v203_v3, %v39_v15  ;;  %v60_v24 = vadd.f32 %v203_v3, %v40_v16  ;;  %v61_v25 = vadd.f32 %v203_v3, %v41_v17  ;;  %v26_v38 = vld [vmem:[%s287_s0 + $0x60] sm:$0xff]  ;;  %v28_v44 = vld [vmem:[%s287_s0 + $0x70] sm:$0xff]  ;;  %v29_v45 = vld [vmem:[%s287_s0 + $0x78] sm:$0xff] }
   0x7   :  { %v58_v22 = vadd.f32 %v203_v3, %v38_v14  ;;  %v70_v28 = vmax.f32 %v54_v18, 0.0  ;;  %v71_v29 = vmax.f32 %v55_v19, 0.0  ;;  %v72_v30 = vmax.f32 %v56_v20, 0.0 }
   0x8   :  { %v73_v31 = vmax.f32 %v57_v21, 0.0  ;;  %v75_v35 = vmax.f32 %v59_v23, 0.0  ;;  %v76_v36 = vmax.f32 %v60_v24, 0.0  ;;  %v77_v37 = vmax.f32 %v61_v25, 0.0 }
   0x9   :  { %v74_v34 = vmax.f32 %v58_v22, 0.0  ;;  %v125_v40 = vpack.c.bf16 %v71_v29, %v70_v28  ;;  %v42_v42 = vmul.f32 %v169_v2, %v22_v26  ;;  %v43_v43 = vmul.f32 %v169_v2, %v23_v27 }
   0xa   :  { %v130_v41 = vpack.c.bf16 %v73_v31, %v72_v30  ;;  %v140_v47 = vpack.c.bf16 %v77_v37, %v76_v36  ;;  %v44_v48 = vmul.f32 %v169_v2, %v24_v32  ;;  %v45_v49 = vmul.f32 %v169_v2, %v25_v33 }
   0xb   :  { %v135_v46 = vpack.c.bf16 %v75_v35, %v74_v34  ;;  %126 = vst [vmem:[%s290_s3] sm:$0xff] %v125_v40   ;;  %v62_v50 = vadd.f32 %v203_v3, %v42_v42  ;;  %v63_v51 = vadd.f32 %v203_v3, %v43_v43  ;;  %v46_v52 = vmul.f32 %v169_v2, %v26_v38 }
   0xc   :  { %v47_v53 = vmul.f32 %v169_v2, %v27_v39  ;;  %162 = vst [vmem:[%s290_s3 + $0x8] sm:$0xff] %v130_v41   ;;  %v64_v54 = vadd.f32 %v203_v3, %v44_v48  ;;  %v65_v55 = vadd.f32 %v203_v3, %v45_v49  ;;  %v48_v56 = vmul.f32 %v169_v2, %v28_v44 }
   0xd   :  { %v49_v57 = vmul.f32 %v169_v2, %v29_v45  ;;  %163 = vst [vmem:[%s290_s3 + $0x10] sm:$0xff] %v135_v46   ;;  %v78_v58 = vmax.f32 %v62_v50, 0.0  ;;  %v79_v59 = vmax.f32 %v63_v51, 0.0  ;;  %v66_v60 = vadd.f32 %v203_v3, %v46_v52 }
   0xe   :  { %v67_v61 = vadd.f32 %v203_v3, %v47_v53  ;;  %164 = vst [vmem:[%s290_s3 + $0x18] sm:$0xff] %v140_v47   ;;  %v80_v62 = vmax.f32 %v64_v54, 0.0  ;;  %v81_v63 = vmax.f32 %v65_v55, 0.0  ;;  %v68_v0 = vadd.f32 %v203_v3, %v48_v56 }
   0xf   :  { %v69_v1 = vadd.f32 %v203_v3, %v49_v57  ;;  %v145_v2 = vpack.c.bf16 %v79_v59, %v78_v58  ;;  %v82_v4 = vmax.f32 %v66_v60, 0.0 }
  0x10   :  { %v83_v5 = vmax.f32 %v67_v61, 0.0  ;;  %v150_v6 = vpack.c.bf16 %v81_v63, %v80_v62  ;;  %v84_v7 = vmax.f32 %v68_v0, 0.0 }
  0x11   :  { %v85_v8 = vmax.f32 %v69_v1, 0.0  ;;  %165 = vst [vmem:[%s290_s3 + $0x20] sm:$0xff] %v145_v2  }
  0x12   :  { %v155_v9 = vpack.c.bf16 %v83_v5, %v82_v4  ;;  %166 = vst [vmem:[%s290_s3 + $0x28] sm:$0xff] %v150_v6  }
  0x13   :  { %v160_v10 = vpack.c.bf16 %v85_v8, %v84_v7 }
  0x14   :  { %167 = vst [vmem:[%s290_s3 + $0x30] sm:$0xff] %v155_v9  }
  0x15   :  { %168 = vst [vmem:[%s290_s3 + $0x38] sm:$0xff] %v160_v10  }

// kernel: generator_forward.15
= control target key start
LH: loop header
LB: loop body
LE: loop exit
PB: predicated region body
PF: predicated region fallthrough
CT: control target
= control target key end

     0   :  { %s1796_s15 = smov 0   ;;  %s1798_s16 = smov 0   ;;  %s2249_s0 = inlined_call_operand.vmem [shape: bf16[512,288], index: 0, kind: input, shape index: {}]   ;;  %s2250_s1 = inlined_call_operand.vmem [shape: bf16[288,64], index: 1, kind: input, shape index: {}]   ;;  %s2251_s2 = inlined_call_operand.vmem [shape: f32[512,64], index: 2, kind: output, shape index: {0}]   ;;  %s2252_s3 = inlined_call_operand.vmem [shape: f32[2,1,64], index: 3, kind: output, shape index: {1}]   ;;  %s2253_s4 = inlined_call_operand.vmem [shape: f32[2,1,64], index: 4, kind: output, shape index: {2}]  }
   0x1   :  { %s1800_s17 = smov 0  }
   0x2 LB: > { %s27_s18 = sadd.s32 1, %s1764_s16  ;;  %p1349_p0 = scmp.ge.s32.totalorder %s1768_s17, 1  ;;  %s1768_s17 = sphi %s1800_s17, %s15_s17   ;;  %s1764_s16 = sphi %s1798_s16, %s2255_s16   ;;  %s1760_s15 = sphi %s1796_s15, %s2254_s15  }
   0x3   : > { %p29_p1 = scmp.ge.s32.totalorder %s27_s18, 2  ;;  %p187_p2 = scmp.lt.s32.totalorder %s1768_s17, 3 }
   0x5   : > { %s2257_s18 = smov (%p29_p1, %s27_s18), 0  ;;  %p188_p3 = pnand %p1349_p0, %p187_p2 }
   0x6   : > { %s1350_s25 = sshll.u32 (!%p188_p3), %s1760_s15, 5  ;;  %p239_p5 = scmp.lt.s32.totalorder (!%p188_p3), %s1760_s15, 1 }
   0x7   : > { %191 = sbr.rel (%p188_p3) target bundleno = 400 (0x190), region = 28  ;;  %p224_p4 = scmp.lt.s32.totalorder (!%p188_p3), %s1350_s25, 63 }
   0xc   : > { %v1691_v0 = vld [vmem:[%s2250_s1 + $0x38] sm:$0xff]  ;;  %v1827_v2 = vld [vmem:[%s2250_s1 + $0x88] sm:$0xff]  ;;  %v1690_v3 = vld [vmem:[%s2250_s1 + $0x30] sm:$0xff]  ;;  %s2259_s25 = smov (!%p224_p4, %s1350_s25), 63  ;;  %vm694_vm0 = vcmask 261120   ;;  %vm1010_vm1 = vcmask 523264  }
   0xd   : > { %v1822_v1 = vld [vmem:[%s2250_s1 + $0x78] sm:$0xff]  ;;  %743 = vmatpush.bf16.msra.mxu0 %v1691_v0  ;;  %1702 = vmatpush.bf16.msra.mxu3 %v1691_v0  ;;  %v1698_v4 = vld [vmem:[%s2250_s1 + $0x70] sm:$0xff]  ;;  %v1841_v5 = vld [vmem:[%s2250_s1 + $0x80] sm:$0xff]  ;;  %s1720_s6 = smul.u32 12, %s2259_s25  ;;  %s1353_s14 = sshll.u32 %s2259_s25, 3  ;;  %vm1047_vm2 = vcmask 516096  }
   0xe   : > { %832 = vmatpush.bf16.msra.mxu1 %v1822_v1  ;;  %927 = vmatpush.bf16.msra.mxu2 %v1827_v2  ;;  %v1689_v6 = vld [vmem:[%s2250_s1 + $0x28] sm:$0xff]  ;;  %v1688_v11 = vld [vmem:[%s2250_s1 + $0x20] sm:$0xff]  ;;  %v1687_v13 = vld [vmem:[%s2250_s1 + $0x18] sm:$0xff]  ;;  %s1979_s21 = scalar_lea.vmem %s2251_s2, %s1353_s14  ;;  %s2261_s15 = smov (!%p239_p5, %s1760_s15), 1 }
   0xf   : > { %v1697_v7 = vld [vmem:[%s2250_s1 + $0x68] sm:$0xff]  ;;  %s1856_s13 = scalar_lea.vmem %s2249_s0, %s1720_s6  ;;  %v1696_v12 = vld [vmem:[%s2250_s1 + $0x60] sm:$0xff]  ;;  %v1695_v14 = vld [vmem:[%s2250_s1 + $0x58] sm:$0xff]  ;;  %s2150_s22 = scalar_lea.vmem %s2252_s3, %s2261_s15 }
  0x10   : > { %v1364_v8 = vld [vmem:[%s1856_s13 + $0x8] sm:$0xf]  ;;  %v1638_v9 = vld [vmem:[%s1856_s13 + $0x10] sm:$0xf0]  ;;  %v1376_v17 = vld [vmem:[%s1856_s13 + $0x20] sm:$0xf]  ;;  %s2157_s26 = scalar_lea.vmem %s2253_s4, %s2261_s15 }
  0x11   : > { %744 = vmatpush.bf16.msra.mxu0 %v1690_v3  ;;  %1703 = vmatpush.bf16.msra.mxu3 %v1690_v3  ;;  %v1365_v10 = vor.u32 %v1638_v9, %v1364_v8  ;;  %v1686_v15 = vld [vmem:[%s2250_s1 + $0x10] sm:$0xff]  ;;  %v1641_v18 = vld [vmem:[%s1856_s13 + $0x28] sm:$0xf0]  ;;  %v1684_v22 = vld [vmem:[%s2250_s1] sm:$0xff] }
  0x12   : > { %833 = vmatpush.bf16.msra.mxu1 %v1698_v4  ;;  %928 = vmatpush.bf16.msra.mxu2 %v1841_v5  ;;  %v1694_v16 = vld [vmem:[%s2250_s1 + $0x50] sm:$0xff]  ;;  %v1685_v19 = vld [vmem:[%s2250_s1 + $0x8] sm:$0xff]  ;;  %v1377_v21 = vor.u32 %v1641_v18, %v1376_v17  ;;  %v1356_v23 = vld [vmem:[%s1856_s13] sm:$0xf] }
  0x13   : > { %v1693_v20 = vld [vmem:[%s2250_s1 + $0x48] sm:$0xff]  ;;  %v1500_v25 = vld [vmem:[%s1856_s13 + $0x120] sm:$0xf]  ;;  %v1636_v28 = vld [vmem:[%s1856_s13 + $0x4] sm:$0xf] }
  0x14   : > { %v1637_v24 = vld [vmem:[%s1856_s13 + $0x8] sm:$0xf0]  ;;  %v1692_v27 = vld [vmem:[%s2250_s1 + $0x40] sm:$0xff]  ;;  %v1358_v29 = vld [vmem:[%s1856_s13 + $0xc] sm:$0xf0] }
  0x15   : > { %745 = vmatpush.bf16.msra.mxu0 %v1689_v6  ;;  %1704 = vmatpush.bf16.msra.mxu3 %v1689_v6  ;;  %v1673_v26 = vld [vmem:[%s1856_s13 + $0x128] sm:$0xf0]  ;;  %v1357_v30 = vor.u32 %v1637_v24, %v1356_v23  ;;  %v1361_v32 = vor.u32 %v1636_v28, %v1358_v29  ;;  %v1388_v33 = vld [vmem:[%s1856_s13 + $0x38] sm:$0xf]  ;;  %v1644_v34 = vld [vmem:[%s1856_s13 + $0x40] sm:$0xf0] }
  0x16   : > { %834 = vmatpush.bf16.msra.mxu1 %v1697_v7  ;;  %1618 = vmatmul.msk.bf16.vlgmr.msra.gmra.mxu2 %vm694_vm0, %v1365_v10  ;;  %v1501_v31 = vor.u32 %v1673_v26, %v1500_v25  ;;  %v1389_v35 = vor.u32 %v1644_v34, %v1388_v33  ;;  %v1368_v36 = vld [vmem:[%s1856_s13 + $0x18] sm:$0xf]  ;;  %v1640_v37 = vld [vmem:[%s1856_s13 + $0x20] sm:$0xf0]  ;;  %v1639_v40 = vld [vmem:[%s1856_s13 + $0x1c] sm:$0xf] }
  0x17   : > { %v1512_v38 = vld [vmem:[%s1856_s13 + $0x138] sm:$0xf]  ;;  %v1676_v39 = vld [vmem:[%s1856_s13 + $0x140] sm:$0xf0]  ;;  %v1370_v41 = vld [vmem:[%s1856_s13 + $0x24] sm:$0xf0]  ;;  %v1369_v42 = vor.u32 %v1640_v37, %v1368_v36 }
  0x18   : > { %v1513_v43 = vor.u32 %v1676_v39, %v1512_v38  ;;  %v1373_v44 = vor.u32 %v1639_v40, %v1370_v41  ;;  %v1400_v45 = vld [vmem:[%s1856_s13 + $0x50] sm:$0xf]  ;;  %v1647_v46 = vld [vmem:[%s1856_s13 + $0x58] sm:$0xf0]  ;;  %v1642_v52 = vld [vmem:[%s1856_s13 + $0x34] sm:$0xf] }
  0x19   : > { %746 = vmatpush.bf16.msra.mxu0 %v1688_v11  ;;  %1705 = vmatpush.bf16.msra.mxu3 %v1688_v11  ;;  %v1401_v47 = vor.u32 %v1647_v46, %v1400_v45  ;;  %v1380_v48 = vld [vmem:[%s1856_s13 + $0x30] sm:$0xf]  ;;  %v1643_v49 = vld [vmem:[%s1856_s13 + $0x38] sm:$0xf0]  ;;  %v1382_v53 = vld [vmem:[%s1856_s13 + $0x3c] sm:$0xf0] }
  0x1a   : > { %835 = vmatpush.bf16.msra.mxu1 %v1696_v12  ;;  %v1524_v50 = vld [vmem:[%s1856_s13 + $0x150] sm:$0xf]  ;;  %v1679_v51 = vld [vmem:[%s1856_s13 + $0x158] sm:$0xf0]  ;;  %v1381_v54 = vor.u32 %v1643_v49, %v1380_v48  ;;  %v1385_v56 = vor.u32 %v1642_v52, %v1382_v53  ;;  %v1412_v57 = vld [vmem:[%s1856_s13 + $0x68] sm:$0xf] }
  0x1b   : > { %v1525_v55 = vor.u32 %v1679_v51, %v1524_v50  ;;  %v1650_v58 = vld [vmem:[%s1856_s13 + $0x70] sm:$0xf0]  ;;  %v1392_v60 = vld [vmem:[%s1856_s13 + $0x48] sm:$0xf]  ;;  %v1645_v0 = vld [vmem:[%s1856_s13 + $0x4c] sm:$0xf] }
  0x1c   : > { %v1413_v59 = vor.u32 %v1650_v58, %v1412_v57  ;;  %v1646_v61 = vld [vmem:[%s1856_s13 + $0x50] sm:$0xf0]  ;;  %v1536_v62 = vld [vmem:[%s1856_s13 + $0x168] sm:$0xf]  ;;  %v1653_v6 = vld [vmem:[%s1856_s13 + $0x88] sm:$0xf0] }
  0x1d   : > { %747 = vmatpush.bf16.msra.mxu0 %v1687_v13  ;;  %1706 = vmatpush.bf16.msra.mxu3 %v1687_v13  ;;  %v1682_v63 = vld [vmem:[%s1856_s13 + $0x170] sm:$0xf0]  ;;  %v1404_v8 = vld [vmem:[%s1856_s13 + $0x60] sm:$0xf]  ;;  %v1649_v9 = vld [vmem:[%s1856_s13 + $0x68] sm:$0xf0] }
  0x1e   : > { %836 = vmatpush.bf16.msra.mxu1 %v1695_v14  ;;  %v1537_v3 = vor.u32 %v1682_v63, %v1536_v62  ;;  %v1672_v10 = vld [vmem:[%s1856_s13 + $0x124] sm:$0xf]  ;;  %v1502_v11 = vld [vmem:[%s1856_s13 + $0x12c] sm:$0xf0]  ;;  %v1436_v17 = vld [vmem:[%s1856_s13 + $0x98] sm:$0xf] }
  0x1f   : > { %v1406_v13 = vld [vmem:[%s1856_s13 + $0x6c] sm:$0xf0]  ;;  %v1656_v18 = vld [vmem:[%s1856_s13 + $0xa0] sm:$0xf0]  ;;  %v1514_v23 = vld [vmem:[%s1856_s13 + $0x144] sm:$0xf0] }
  0x20   : > { %v1651_v24 = vld [vmem:[%s1856_s13 + $0x7c] sm:$0xf]  ;;  %v1418_v25 = vld [vmem:[%s1856_s13 + $0x84] sm:$0xf0]  ;;  %v1448_v29 = vld [vmem:[%s1856_s13 + $0xb0] sm:$0xf] }
  0x21   : > { %748 = vmatpush.bf16.msra.mxu0 %v1686_v15  ;;  %1707 = vmatpush.bf16.msra.mxu3 %v1686_v15  ;;  %v1505_v15 = vor.u32 %v1672_v10, %v1502_v11  ;;  %v1421_v28 = vor.u32 %v1651_v24, %v1418_v25  ;;  %v1655_v33 = vld [vmem:[%s1856_s13 + $0x98] sm:$0xf0]  ;;  %v1678_v34 = vld [vmem:[%s1856_s13 + $0x154] sm:$0xf]  ;;  %v1430_v37 = vld [vmem:[%s1856_s13 + $0x9c] sm:$0xf0] }
  0x22   : > { %837 = vmatpush.bf16.msra.mxu1 %v1694_v16  ;;  %v1654_v36 = vld [vmem:[%s1856_s13 + $0x94] sm:$0xf]  ;;  %v1460_v41 = vld [vmem:[%s1856_s13 + $0xc8] sm:$0xf]  ;;  %v1681_v46 = vld [vmem:[%s1856_s13 + $0x16c] sm:$0xf] }
  0x23   : > { %v1433_v40 = vor.u32 %v1654_v36, %v1430_v37  ;;  %v1658_v45 = vld [vmem:[%s1856_s13 + $0xb0] sm:$0xf0]  ;;  %v1657_v48 = vld [vmem:[%s1856_s13 + $0xac] sm:$0xf]  ;;  %v1442_v49 = vld [vmem:[%s1856_s13 + $0xb4] sm:$0xf0] }
  0x24   : > { %v1445_v53 = vor.u32 %v1657_v48, %v1442_v49  ;;  %v1452_v58 = vld [vmem:[%s1856_s13 + $0xc0] sm:$0xf]  ;;  %v1660_v62 = vld [vmem:[%s1856_s13 + $0xc4] sm:$0xf]  ;;  %v1454_v63 = vld [vmem:[%s1856_s13 + $0xcc] sm:$0xf0] }
  0x25   : > { %749 = vmatpush.bf16.msra.mxu0 %v1685_v19  ;;  %1708 = vmatpush.bf16.msra.mxu3 %v1685_v19  ;;  %v1437_v19 = vor.u32 %v1656_v18, %v1436_v17  ;;  %v1668_v10 = vld [vmem:[%s1856_s13 + $0x100] sm:$0xf0] }
  0x26   : > { %838 = vmatpush.bf16.msra.mxu1 %v1693_v20  ;;  %1619 = vmatmul.msk.bf16.gmra.mxu2 %vm694_vm0, %v1377_v21  ;;  %v1652_v21 = vld [vmem:[%s1856_s13 + $0x80] sm:$0xf0] }
  0x29   : > { %750 = vmatpush.bf16.msra.mxu0 %v1684_v22  ;;  %1709 = vmatpush.bf16.msra.mxu3 %v1684_v22  ;;  %v1675_v22 = vld [vmem:[%s1856_s13 + $0x13c] sm:$0xf] }
  0x2a   : > { %839 = vmatpush.bf16.msra.mxu1 %v1692_v27 }
  0x2c   : > { %751 = vmatmul.bf16.vlgmr.msra.gmra.mxu0 %v1357_v30  ;;  %811 = vmatmul.bf16.vlgmr.msra.gmra.mxu3 %v1501_v31  ;;  %v1659_v30 = vld [vmem:[%s1856_s13 + $0xb8] sm:$0xf0] }
  0x2d   : > { %1710 = vmatpush.bf16.msrb.mxu3 %v1822_v1  ;;  %840 = vmatmul.bf16.vlgmr.msra.gmra.mxu1 %v1361_v32  ;;  %v1394_v1 = vld [vmem:[%s1856_s13 + $0x54] sm:$0xf0]  ;;  %v1449_v31 = vor.u32 %v1659_v30, %v1448_v29  ;;  %v1428_v32 = vld [vmem:[%s1856_s13 + $0x90] sm:$0xf] }
  0x2e   : > { %v1429_v38 = vor.u32 %v1655_v33, %v1428_v32 }
  0x31   : > { %1711 = vmatpush.bf16.msrb.mxu3 %v1698_v4  ;;  %v1397_v4 = vor.u32 %v1645_v0, %v1394_v1 }
  0x35   : > { %1712 = vmatpush.bf16.msrb.mxu3 %v1697_v7 }
  0x36   : > { %1620 = vmatmul.msk.bf16.gmra.mxu2 %vm694_vm0, %v1389_v35  ;;  %v1526_v35 = vld [vmem:[%s1856_s13 + $0x15c] sm:$0xf0] }
  0x37   : > { %v1529_v39 = vor.u32 %v1678_v34, %v1526_v35 }
  0x39   : > { %1713 = vmatpush.bf16.msrb.mxu3 %v1696_v12  ;;  %v1648_v12 = vld [vmem:[%s1856_s13 + $0x64] sm:$0xf] }
  0x3c   : > { %756 = vmatmul.bf16.gmra.mxu0 %v1369_v42  ;;  %816 = vmatmul.bf16.gmra.mxu3 %v1513_v43  ;;  %v1662_v42 = vld [vmem:[%s1856_s13 + $0xd0] sm:$0xf0] }
  0x3d   : > { %1714 = vmatpush.bf16.msrb.mxu3 %v1695_v14  ;;  %845 = vmatmul.bf16.gmra.mxu1 %v1373_v44  ;;  %v1405_v14 = vor.u32 %v1649_v9, %v1404_v8  ;;  %v1461_v43 = vor.u32 %v1662_v42, %v1460_v41  ;;  %v1440_v44 = vld [vmem:[%s1856_s13 + $0xa8] sm:$0xf]  ;;  %v1484_v9 = vld [vmem:[%s1856_s13 + $0xf8] sm:$0xf] }
  0x3e   : > { %v1441_v50 = vor.u32 %v1658_v45, %v1440_v44  ;;  %v1671_v44 = vld [vmem:[%s1856_s13 + $0x118] sm:$0xf0] }
  0x41   : > { %1715 = vmatpush.bf16.msrb.mxu3 %v1694_v16  ;;  %v1409_v16 = vor.u32 %v1648_v12, %v1406_v13 }
  0x45   : > { %1716 = vmatpush.bf16.msrb.mxu3 %v1693_v20  ;;  %v1416_v20 = vld [vmem:[%s1856_s13 + $0x78] sm:$0xf] }
  0x46   : > { %1621 = vmatmul.msk.bf16.gmra.mxu2 %vm694_vm0, %v1401_v47  ;;  %v1417_v26 = vor.u32 %v1652_v21, %v1416_v20  ;;  %v1538_v47 = vld [vmem:[%s1856_s13 + $0x174] sm:$0xf0]  ;;  %v1544_v20 = vld [vmem:[%s1856_s13 + $0x170] sm:$0xf]  ;;  %v1683_v21 = vld [vmem:[%s1856_s13 + $0x178] sm:$0xf0] }
  0x47   : > { %v1541_v51 = vor.u32 %v1681_v46, %v1538_v47  ;;  %v1545_v30 = vor.u32 %v1683_v21, %v1544_v20 }
  0x49   : > { %1717 = vmatpush.bf16.msrb.mxu3 %v1692_v27  ;;  %v1517_v27 = vor.u32 %v1675_v22, %v1514_v23  ;;  %v1663_v22 = vld [vmem:[%s1856_s13 + $0xdc] sm:$0xf]  ;;  %v1466_v23 = vld [vmem:[%s1856_s13 + $0xe4] sm:$0xf0] }
  0x4a   : > { %v1469_v35 = vor.u32 %v1663_v22, %v1466_v23  ;;  %v1488_v22 = vld [vmem:[%s1856_s13 + $0x108] sm:$0xf]  ;;  %v1670_v23 = vld [vmem:[%s1856_s13 + $0x110] sm:$0xf0] }
  0x4c   : > { %761 = vmatmul.bf16.gmra.mxu0 %v1381_v54  ;;  %821 = vmatmul.bf16.gmra.mxu3 %v1525_v55  ;;  %v1472_v54 = vld [vmem:[%s1856_s13 + $0xe0] sm:$0xf]  ;;  %v1665_v55 = vld [vmem:[%s1856_s13 + $0xe8] sm:$0xf0] }
  0x4d   : > { %1718 = vmatpush.bf16.msra.mxu3 %v1827_v2  ;;  %850 = vmatmul.bf16.gmra.mxu1 %v1385_v56  ;;  %v1393_v2 = vor.u32 %v1646_v61, %v1392_v60  ;;  %v1473_v57 = vor.u32 %v1665_v55, %v1472_v54  ;;  %v1532_v60 = vld [vmem:[%s1856_s13 + $0x158] sm:$0xf]  ;;  %v1680_v61 = vld [vmem:[%s1856_s13 + $0x160] sm:$0xf0]  ;;  %v1476_v54 = vld [vmem:[%s1856_s13 + $0xf0] sm:$0xf] }
  0x4e   : > { %v1533_v1 = vor.u32 %v1680_v61, %v1532_v60  ;;  %v1667_v55 = vld [vmem:[%s1856_s13 + $0xf8] sm:$0xf0] }
  0x51   : > { %1719 = vmatpush.bf16.msra.mxu3 %v1841_v5  ;;  %v1424_v5 = vld [vmem:[%s1856_s13 + $0x80] sm:$0xf] }
  0x52   : > { %v1425_v7 = vor.u32 %v1653_v6, %v1424_v5 }
  0x56   : > { %1622 = vmatmul.msk.bf16.gmra.mxu2 %vm694_vm0, %v1413_v59  ;;  %v1661_v59 = vld [vmem:[%s1856_s13 + $0xc8] sm:$0xf0] }
  0x57   : > { %v1453_v0 = vor.u32 %v1661_v59, %v1452_v58 }
  0x5c   : > { %766 = vmatmul.bf16.gmra.mxu0 %v1393_v2  ;;  %826 = vmatmul.bf16.gmra.mxu3 %v1537_v3 }
  0x5d   : > { %855 = vmatmul.bf16.gmra.mxu1 %v1397_v4  ;;  %v1457_v4 = vor.u32 %v1660_v62, %v1454_v63  ;;  %v1477_v62 = vor.u32 %v1667_v55, %v1476_v54 }
  0x66   : > { %1623 = vmatmul.msk.bf16.gmra.mxu2 %vm694_vm0, %v1425_v7 }
  0x6c   : > { %771 = vmatmul.bf16.gmra.mxu0 %v1405_v14  ;;  %900 = vmatmul.bf16.vlgmr.msrb.gmra.mxu3 %v1505_v15  ;;  %v1485_v14 = vor.u32 %v1668_v10, %v1484_v9 }
  0x6d   : > { %860 = vmatmul.bf16.gmra.mxu1 %v1409_v16  ;;  %v1464_v16 = vld [vmem:[%s1856_s13 + $0xd8] sm:$0xf] }
  0x76   : > { %1624 = vmatmul.msk.bf16.gmra.mxu2 %vm694_vm0, %v1437_v19  ;;  %v1664_v19 = vld [vmem:[%s1856_s13 + $0xe0] sm:$0xf0] }
  0x77   : > { %v1465_v29 = vor.u32 %v1664_v19, %v1464_v16 }
  0x7c   : > { %776 = vmatmul.bf16.gmra.mxu0 %v1417_v26  ;;  %905 = vmatmul.bf16.gmra.mxu3 %v1517_v27 }
  0x7d   : > { %865 = vmatmul.bf16.gmra.mxu1 %v1421_v28 }
  0x86   : > { %1625 = vmatmul.msk.bf16.gmra.mxu2 %vm694_vm0, %v1449_v31 }
  0x8c   : > { %781 = vmatmul.bf16.gmra.mxu0 %v1429_v38  ;;  %910 = vmatmul.bf16.gmra.mxu3 %v1529_v39 }
  0x8d   : > { %870 = vmatmul.bf16.gmra.mxu1 %v1433_v40 }
  0x96   : > { %1626 = vmatmul.msk.bf16.gmra.mxu2 %vm694_vm0, %v1461_v43  ;;  %v1496_v43 = vld [vmem:[%s1856_s13 + $0x110] sm:$0xf] }
  0x99   : > { %v930_v52 = vpop.f32.mrf.mxu2 }
  0x9c   : > { %786 = vmatmul.bf16.gmra.mxu0 %v1441_v50  ;;  %915 = vmatmul.bf16.gmra.mxu3 %v1541_v51  ;;  %v1497_v51 = vor.u32 %v1671_v44, %v1496_v43  ;;  %v1520_v44 = vld [vmem:[%s1856_s13 + $0x140] sm:$0xf] }
  0x9d   : > { %875 = vmatmul.bf16.gmra.mxu1 %v1445_v53 }
  0xa1   : > { %v932_v56 = vpop.f32.mrf.mxu2 }
  0xa6   : > { %1627 = vmatmul.msk.bf16.gmra.mxu2 %vm694_vm0, %v1473_v57  ;;  %v1478_v57 = vld [vmem:[%s1856_s13 + $0xfc] sm:$0xf0] }
  0xa9   : > { %v935_v2 = vpop.f32.mrf.mxu2  ;;  %v752_v3 = vpop.f32.mrf.mxu0 }
  0xaa   : > { %v841_v5 = vpop.f32.mrf.mxu1 }
  0xab   : > { %v842_v6 = vadd.f32 %v841_v5, %v752_v3 }
  0xac   : > { %791 = vmatmul.bf16.gmra.mxu0 %v1453_v0  ;;  %1632 = vmatmul.msk.bf16.vlgmr.msra.gmra.mxu3 %vm694_vm0, %v1533_v1 }
  0xad   : > { %v931_v7 = vadd.f32 %v930_v52, %v842_v6  ;;  %880 = vmatmul.bf16.gmra.mxu1 %v1457_v4 }
  0xaf   : > { %1011 = vst.msk [vmem:[%s1979_s21] sm:$0xff] %vm1010_vm1, %v931_v7  ;;  %v1984_v8 = vpop.f32.mrf.mxu3  ;;  %v1124_v17 = vmul.f32 %v931_v7, %v931_v7  ;;  %v1051_v24 = vsel %vm1010_vm1, %v931_v7, 0.0 }
  0xb1   : > { %v937_v11 = vpop.f32.mrf.mxu2  ;;  %v754_v12 = vpop.f32.mrf.mxu0  ;;  %v1156_v31 = vsel %vm1010_vm1, %v1124_v17, 0.0 }
  0xb2   : > { %v843_v13 = vpop.f32.mrf.mxu1 }
  0xb3   : > { %v844_v15 = vadd.f32 %v843_v13, %v754_v12  ;;  %v1674_v12 = vld [vmem:[%s1856_s13 + $0x130] sm:$0xf0] }
  0xb5   : > { %v933_v18 = vadd.f32 %v932_v56, %v844_v15  ;;  %v1666_v56 = vld [vmem:[%s1856_s13 + $0xf4] sm:$0xf] }
  0xb6   : > { %1628 = vmatmul.msk.bf16.gmra.mxu2 %vm694_vm0, %v1485_v14 }
  0xb7   : > { %1012 = vst.msk [vmem:[%s1979_s21 + $0x8] sm:$0xff] %vm1010_vm1, %v933_v18  ;;  %v1052_v25 = vsel %vm1010_vm1, %v933_v18, 0.0  ;;  %v1125_v26 = vmul.f32 %v933_v18, %v933_v18  ;;  %v1999_v27 = vpop.f32.mrf.mxu3 }
  0xb8   : > { %v1053_v28 = vadd.f32 %v1052_v25, %v1051_v24  ;;  %v1669_v24 = vld [vmem:[%s1856_s13 + $0x10c] sm:$0xf]  ;;  %v1490_v25 = vld [vmem:[%s1856_s13 + $0x114] sm:$0xf0] }
  0xb9   : > { %v1157_v32 = vsel %vm1010_vm1, %v1125_v26, 0.0  ;;  %v940_v33 = vpop.f32.mrf.mxu2  ;;  %v757_v34 = vpop.f32.mrf.mxu0 }
  0xba   : > { %v1158_v36 = vadd.f32 %v1157_v32, %v1156_v31  ;;  %v846_v37 = vpop.f32.mrf.mxu1  ;;  %v1489_v31 = vor.u32 %v1670_v23, %v1488_v22 }
  0xbb   : > { %v847_v38 = vadd.f32 %v846_v37, %v757_v34 }
  0xbc   : > { %796 = vmatmul.bf16.gmra.mxu0 %v1465_v29  ;;  %1633 = vmatmul.msk.bf16.gmra.mxu3 %vm694_vm0, %v1545_v30 }
  0xbd   : > { %v936_v39 = vadd.f32 %v935_v2, %v847_v38  ;;  %885 = vmatmul.bf16.gmra.mxu1 %v1469_v35  ;;  %v1481_v2 = vor.u32 %v1666_v56, %v1478_v57  ;;  %v1493_v35 = vor.u32 %v1669_v24, %v1490_v25 }
  0xbf   : > { %1013 = vst.msk [vmem:[%s1979_s21 + $0x10] sm:$0xff] %vm1010_vm1, %v936_v39  ;;  %v1054_v40 = vsel %vm1010_vm1, %v936_v39, 0.0  ;;  %v1126_v41 = vmul.f32 %v936_v39, %v936_v39  ;;  %v2007_v42 = vpop.f32.mrf.mxu3 }
  0xc0   : > { %v1055_v45 = vadd.f32 %v1054_v40, %v1053_v28 }
  0xc1   : > { %v1159_v46 = vsel %vm1010_vm1, %v1126_v41, 0.0  ;;  %v942_v47 = vpop.f32.mrf.mxu2  ;;  %v759_v48 = vpop.f32.mrf.mxu0 }
  0xc2   : > { %v1160_v49 = vadd.f32 %v1159_v46, %v1158_v36  ;;  %v848_v50 = vpop.f32.mrf.mxu1 }
  0xc3   : > { %v849_v52 = vadd.f32 %v848_v50, %v759_v48 }
  0xc5   : > { %v938_v53 = vadd.f32 %v937_v11, %v849_v52  ;;  %v1508_v11 = vld [vmem:[%s1856_s13 + $0x128] sm:$0xf] }
  0xc6   : > { %1629 = vmatmul.msk.bf16.gmra.mxu2 %vm694_vm0, %v1497_v51  ;;  %v1509_v19 = vor.u32 %v1674_v12, %v1508_v11 }
  0xc7   : > { %1014 = vst.msk [vmem:[%s1979_s21 + $0x18] sm:$0xff] %vm1010_vm1, %v938_v53  ;;  %v1056_v58 = vsel %vm1010_vm1, %v938_v53, 0.0  ;;  %v1127_v59 = vmul.f32 %v938_v53, %v938_v53  ;;  %v2020_v60 = vpop.f32.mrf.mxu3 }
  0xc8   : > { %v1057_v61 = vadd.f32 %v1056_v58, %v1055_v45  ;;  %v1677_v45 = vld [vmem:[%s1856_s13 + $0x148] sm:$0xf0] }
  0xc9   : > { %v1161_v63 = vsel %vm1010_vm1, %v1127_v59, 0.0  ;;  %v945_v0 = vpop.f32.mrf.mxu2  ;;  %v762_v1 = vpop.f32.mrf.mxu0  ;;  %v1521_v52 = vor.u32 %v1677_v45, %v1520_v44 }
  0xca   : > { %v1162_v3 = vadd.f32 %v1161_v63, %v1160_v49  ;;  %v851_v4 = vpop.f32.mrf.mxu1 }
  0xcb   : > { %v852_v5 = vadd.f32 %v851_v4, %v762_v1 }
  0xcc   : > { %801 = vmatmul.bf16.gmra.mxu0 %v1477_v62 }
  0xcd   : > { %v941_v6 = vadd.f32 %v940_v33, %v852_v5  ;;  %890 = vmatmul.bf16.gmra.mxu1 %v1481_v2 }
  0xcf   : > { %1015 = vst.msk [vmem:[%s1979_s21 + $0x20] sm:$0xff] %vm1010_vm1, %v941_v6  ;;  %v1058_v7 = vsel %vm1010_vm1, %v941_v6, 0.0  ;;  %v1128_v9 = vmul.f32 %v941_v6, %v941_v6  ;;  %v2026_v10 = vpop.f32.mrf.mxu3 }
  0xd0   : > { %v1059_v13 = vadd.f32 %v1058_v7, %v1057_v61 }
  0xd1   : > { %v1163_v14 = vsel %vm1010_vm1, %v1128_v9, 0.0  ;;  %v947_v15 = vpop.f32.mrf.mxu2  ;;  %v764_v16 = vpop.f32.mrf.mxu0 }
  0xd2   : > { %v1164_v17 = vadd.f32 %v1163_v14, %v1162_v3  ;;  %v853_v18 = vpop.f32.mrf.mxu1 }
  0xd3   : > { %v854_v20 = vadd.f32 %v853_v18, %v764_v16 }
  0xd5   : > { %v943_v21 = vadd.f32 %v942_v47, %v854_v20 }
  0xd6   : > { %1630 = vmatmul.msk.bf16.gmra.mxu2 %vm694_vm0, %v1509_v19 }
  0xd7   : > { %1016 = vst.msk [vmem:[%s1979_s21 + $0x28] sm:$0xff] %vm1010_vm1, %v943_v21  ;;  %v1060_v26 = vsel %vm1010_vm1, %v943_v21, 0.0  ;;  %v1129_v28 = vmul.f32 %v943_v21, %v943_v21  ;;  %v2039_v29 = vpop.f32.mrf.mxu3 }
  0xd8   : > { %v1061_v30 = vadd.f32 %v1060_v26, %v1059_v13 }
  0xd9   : > { %v1165_v32 = vsel %vm1010_vm1, %v1129_v28, 0.0  ;;  %v950_v33 = vpop.f32.mrf.mxu2  ;;  %v767_v34 = vpop.f32.mrf.mxu0 }
  0xda   : > { %v1166_v36 = vadd.f32 %v1165_v32, %v1164_v17  ;;  %v856_v37 = vpop.f32.mrf.mxu1 }
  0xdb   : > { %v857_v38 = vadd.f32 %v856_v37, %v767_v34 }
  0xdc   : > { %806 = vmatmul.bf16.gmra.mxu0 %v1489_v31 }
  0xdd   : > { %v946_v39 = vadd.f32 %v945_v0, %v857_v38  ;;  %895 = vmatmul.bf16.gmra.mxu1 %v1493_v35 }
  0xdf   : > { %1017 = vst.msk [vmem:[%s1979_s21 + $0x30] sm:$0xff] %vm1010_vm1, %v946_v39  ;;  %v1062_v40 = vsel %vm1010_vm1, %v946_v39, 0.0  ;;  %v1130_v41 = vmul.f32 %v946_v39, %v946_v39  ;;  %v2045_v43 = vpop.f32.mrf.mxu3 }
  0xe0   : > { %v1063_v46 = vadd.f32 %v1062_v40, %v1061_v30 }
  0xe1   : > { %v1167_v47 = vsel %vm1010_vm1, %v1130_v41, 0.0  ;;  %v952_v48 = vpop.f32.mrf.mxu2  ;;  %v769_v49 = vpop.f32.mrf.mxu0 }
  0xe2   : > { %v1168_v50 = vadd.f32 %v1167_v47, %v1166_v36  ;;  %v858_v51 = vpop.f32.mrf.mxu1 }
  0xe3   : > { %v859_v53 = vadd.f32 %v858_v51, %v769_v49 }
  0xe5   : > { %v948_v54 = vadd.f32 %v947_v15, %v859_v53 }
  0xe6   : > { %1631 = vmatmul.msk.bf16.gmra.mxu2 %vm694_vm0, %v1521_v52 }
  0xe7   : > { %1018 = vst.msk [vmem:[%s1979_s21 + $0x38] sm:$0xff] %vm1010_vm1, %v948_v54  ;;  %v1064_v55 = vsel %vm1010_vm1, %v948_v54, 0.0  ;;  %v1131_v56 = vmul.f32 %v948_v54, %v948_v54  ;;  %v2054_v57 = vpop.f32.mrf.mxu3 }
  0xe8   : > { %v1065_v58 = vadd.f32 %v1064_v55, %v1063_v46 }
  0xe9   : > { %v1169_v59 = vsel %vm1010_vm1, %v1131_v56, 0.0  ;;  %v955_v61 = vpop.f32.mrf.mxu2  ;;  %v772_v62 = vpop.f32.mrf.mxu0 }
  0xea   : > { %v1170_v63 = vadd.f32 %v1169_v59, %v1168_v50  ;;  %v861_v0 = vpop.f32.mrf.mxu1 }
  0xeb   : > { %v862_v1 = vadd.f32 %v861_v0, %v772_v62 }
  0xed   : > { %v951_v2 = vadd.f32 %v950_v33, %v862_v1 }
  0xef   : > { %1019 = vst.msk [vmem:[%s1979_s21 + $0x40] sm:$0xff] %vm1010_vm1, %v951_v2  ;;  %v1066_v3 = vsel %vm1010_vm1, %v951_v2, 0.0  ;;  %v1132_v4 = vmul.f32 %v951_v2, %v951_v2  ;;  %v901_v5 = vpop.f32.mrf.mxu3 }
  0xf0   : > { %v1067_v6 = vadd.f32 %v1066_v3, %v1065_v58  ;;  %v2061_v7 = vadd.f32 %v901_v5, %v1984_v8 }
  0xf1   : > { %v1171_v9 = vsel %vm1010_vm1, %v1132_v4, 0.0  ;;  %v957_v11 = vpop.f32.mrf.mxu2  ;;  %v774_v12 = vpop.f32.mrf.mxu0 }
  0xf2   : > { %v1172_v13 = vadd.f32 %v1171_v9, %v1170_v63  ;;  %v863_v14 = vpop.f32.mrf.mxu1 }
  0xf3   : > { %v864_v15 = vadd.f32 %v863_v14, %v774_v12 }
  0xf5   : > { %v953_v16 = vadd.f32 %v952_v48, %v864_v15 }
  0xf7   : > { %1020 = vst.msk [vmem:[%s1979_s21 + $0x48] sm:$0xff] %vm1010_vm1, %v953_v16  ;;  %v1068_v17 = vsel %vm1010_vm1, %v953_v16, 0.0  ;;  %v1133_v18 = vmul.f32 %v953_v16, %v953_v16  ;;  %v903_v19 = vpop.f32.mrf.mxu3 }
  0xf8   : > { %v1069_v20 = vadd.f32 %v1068_v17, %v1067_v6  ;;  %v2068_v21 = vadd.f32 %v903_v19, %v1999_v27 }
  0xf9   : > { %v1173_v8 = vsel %vm1010_vm1, %v1133_v18, 0.0  ;;  %v960_v22 = vpop.f32.mrf.mxu2  ;;  %v777_v23 = vpop.f32.mrf.mxu0 }
  0xfa   : > { %v1174_v24 = vadd.f32 %v1173_v8, %v1172_v13  ;;  %v866_v25 = vpop.f32.mrf.mxu1 }
  0xfb   : > { %v867_v26 = vadd.f32 %v866_v25, %v777_v23 }
  0xfd   : > { %v956_v28 = vadd.f32 %v955_v61, %v867_v26 }
  0xff   : > { %1021 = vst.msk [vmem:[%s1979_s21 + $0x50] sm:$0xff] %vm1010_vm1, %v956_v28  ;;  %v1070_v30 = vsel %vm1010_vm1, %v956_v28, 0.0  ;;  %v1134_v31 = vmul.f32 %v956_v28, %v956_v28  ;;  %v906_v32 = vpop.f32.mrf.mxu3 }
 0x100   : > { %v1071_v33 = vadd.f32 %v1070_v30, %v1069_v20  ;;  %v2075_v34 = vadd.f32 %v906_v32, %v2007_v42 }
 0x101   : > { %v1175_v27 = vsel %vm1010_vm1, %v1134_v31, 0.0  ;;  %v962_v35 = vpop.f32.mrf.mxu2  ;;  %v779_v36 = vpop.f32.mrf.mxu0 }
 0x102   : > { %v1176_v37 = vadd.f32 %v1175_v27, %v1174_v24  ;;  %v868_v38 = vpop.f32.mrf.mxu1 }
 0x103   : > { %v869_v39 = vadd.f32 %v868_v38, %v779_v36 }
 0x105   : > { %v958_v40 = vadd.f32 %v957_v11, %v869_v39 }
 0x107   : > { %1022 = vst.msk [vmem:[%s1979_s21 + $0x58] sm:$0xff] %vm1010_vm1, %v958_v40  ;;  %v1072_v41 = vsel %vm1010_vm1, %v958_v40, 0.0  ;;  %v1135_v44 = vmul.f32 %v958_v40, %v958_v40  ;;  %v908_v45 = vpop.f32.mrf.mxu3 }
 0x108   : > { %v1073_v46 = vadd.f32 %v1072_v41, %v1071_v33  ;;  %v2082_v47 = vadd.f32 %v908_v45, %v2020_v60 }
 0x109   : > { %v1177_v42 = vsel %vm1010_vm1, %v1135_v44, 0.0  ;;  %v965_v48 = vpop.f32.mrf.mxu2  ;;  %v782_v49 = vpop.f32.mrf.mxu0 }
 0x10a   : > { %v1178_v50 = vadd.f32 %v1177_v42, %v1176_v37  ;;  %v871_v51 = vpop.f32.mrf.mxu1 }
 0x10b   : > { %v872_v52 = vadd.f32 %v871_v51, %v782_v49 }
 0x10d   : > { %v961_v53 = vadd.f32 %v960_v22, %v872_v52 }
 0x10f   : > { %1023 = vst.msk [vmem:[%s1979_s21 + $0x60] sm:$0xff] %vm1010_vm1, %v961_v53  ;;  %v1074_v54 = vsel %vm1010_vm1, %v961_v53, 0.0  ;;  %v1136_v55 = vmul.f32 %v961_v53, %v961_v53  ;;  %v911_v56 = vpop.f32.mrf.mxu3 }
 0x110   : > { %v1075_v58 = vadd.f32 %v1074_v54, %v1073_v46  ;;  %v912_v30 = vadd.f32 %v911_v56, %v2026_v10 }
 0x111   : > { %v1179_v59 = vsel %vm1010_vm1, %v1136_v55, 0.0  ;;  %v967_v60 = vpop.f32.mrf.mxu2  ;;  %v784_v61 = vpop.f32.mrf.mxu0 }
 0x112   : > { %v1180_v62 = vadd.f32 %v1179_v59, %v1178_v50  ;;  %v873_v63 = vpop.f32.mrf.mxu1 }
 0x113   : > { %v874_v0 = vadd.f32 %v873_v63, %v784_v61 }
 0x115   : > { %v963_v1 = vadd.f32 %v962_v35, %v874_v0 }
 0x117   : > { %1024 = vst.msk [vmem:[%s1979_s21 + $0x68] sm:$0xff] %vm1010_vm1, %v963_v1  ;;  %v1076_v2 = vsel %vm1010_vm1, %v963_v1, 0.0  ;;  %v1137_v3 = vmul.f32 %v963_v1, %v963_v1  ;;  %v913_v4 = vpop.f32.mrf.mxu3 }
 0x118   : > { %v2092_v5 = vadd.f32 %v1076_v2, %v1075_v58  ;;  %v914_v38 = vadd.f32 %v913_v4, %v2039_v29 }
 0x119   : > { %v1181_v6 = vsel %vm1010_vm1, %v1137_v3, 0.0  ;;  %v970_v9 = vpop.f32.mrf.mxu2  ;;  %v787_v11 = vpop.f32.mrf.mxu0 }
 0x11a   : > { %v2095_v12 = vadd.f32 %v1181_v6, %v1180_v62  ;;  %v876_v13 = vpop.f32.mrf.mxu1 }
 0x11b   : > { %v877_v14 = vadd.f32 %v876_v13, %v787_v11  ;;  %v1770_v13 = vmov 0.0  }
 0x11c   : > { %1048 = vst.msk [vmem:[%s2150_s22] sm:$0x1] %vm1047_vm2, %v1770_v13 }
 0x11d   : > { %v2097_v15 = vadd.f32 %v965_v48, %v877_v14  ;;  %1049 = vst.msk [vmem:[%s2157_s26] sm:$0x1] %vm1047_vm2, %v1770_v13 }
 0x11f   : > { %1025 = vst.msk [vmem:[%s1979_s21 + $0x70] sm:$0xff] %vm1010_vm1, %v2097_v15  ;;  %v916_v16 = vpop.f32.mrf.mxu3  ;;  %v1078_v1 = vsel %vm1010_vm1, %v2097_v15, 0.0 }
 0x120   : > { %v917_v42 = vadd.f32 %v916_v16, %v2045_v43  ;;  %v1079_v14 = vadd.f32 %v1078_v1, %v2092_v5 }
 0x121   : > { %v972_v17 = vpop.f32.mrf.mxu2  ;;  %v789_v18 = vpop.f32.mrf.mxu0 }
 0x122   : > { %v878_v19 = vpop.f32.mrf.mxu1 }
 0x123   : > { %v879_v20 = vadd.f32 %v878_v19, %v789_v18 }
 0x125   : > { %v968_v8 = vadd.f32 %v967_v60, %v879_v20 }
 0x127   : > { %1026 = vst.msk [vmem:[%s1979_s21 + $0x78] sm:$0xff] %vm1010_vm1, %v968_v8  ;;  %v918_v22 = vpop.f32.mrf.mxu3  ;;  %v1139_v2 = vmul.f32 %v968_v8, %v968_v8  ;;  %v1080_v6 = vsel %vm1010_vm1, %v968_v8, 0.0 }
 0x128   : > { %v919_v54 = vadd.f32 %v918_v22, %v2054_v57  ;;  %v1138_v57 = vmul.f32 %v2097_v15, %v2097_v15  ;;  %v1081_v19 = vadd.f32 %v1080_v6, %v1079_v14 }
 0x129   : > { %v975_v23 = vpop.f32.mrf.mxu2  ;;  %v792_v24 = vpop.f32.mrf.mxu0  ;;  %v1185_v15 = vsel %vm1010_vm1, %v1139_v2, 0.0 }
 0x12a   : > { %v881_v25 = vpop.f32.mrf.mxu1  ;;  %v1183_v4 = vsel %vm1010_vm1, %v1138_v57, 0.0 }
 0x12b   : > { %v882_v26 = vadd.f32 %v881_v25, %v792_v24  ;;  %v1184_v18 = vadd.f32 %v1183_v4, %v2095_v12 }
 0x12d   : > { %v2104_v28 = vadd.f32 %v970_v9, %v882_v26  ;;  %v1186_v24 = vadd.f32 %v1185_v15, %v1184_v18 }
 0x12f   : > { %1027 = vst.msk [vmem:[%s1979_s21 + $0x80] sm:$0xff] %vm1010_vm1, %v2104_v28  ;;  %v1000_v31 = vpop.f32.mrf.mxu3  ;;  %v1140_v9 = vmul.f32 %v2104_v28, %v2104_v28  ;;  %v1082_v16 = vsel %vm1010_vm1, %v2104_v28, 0.0 }
 0x130   : > { %v2110_v32 = vadd.f32 %v1000_v31, %v912_v30  ;;  %v1083_v25 = vadd.f32 %v1082_v16, %v1081_v19 }
 0x131   : > { %v977_v33 = vpop.f32.mrf.mxu2  ;;  %v794_v27 = vpop.f32.mrf.mxu0  ;;  %v1187_v20 = vsel %vm1010_vm1, %v1140_v9, 0.0 }
 0x132   : > { %1039 = vst.msk [vmem:[%s1979_s21 + $0xe0] sm:$0xff] %vm1010_vm1, %v2110_v32  ;;  %v883_v35 = vpop.f32.mrf.mxu1 }
 0x133   : > { %v884_v36 = vadd.f32 %v883_v35, %v794_v27  ;;  %v1188_v27 = vadd.f32 %v1187_v20, %v1186_v24 }
 0x135   : > { %v973_v37 = vadd.f32 %v972_v17, %v884_v36 }
 0x137   : > { %1028 = vst.msk [vmem:[%s1979_s21 + $0x88] sm:$0xff] %vm1010_vm1, %v973_v37  ;;  %v1002_v10 = vpop.f32.mrf.mxu3  ;;  %v1141_v17 = vmul.f32 %v973_v37, %v973_v37  ;;  %v1084_v8 = vsel %vm1010_vm1, %v973_v37, 0.0 }
 0x138   : > { %v2118_v39 = vadd.f32 %v1002_v10, %v914_v38  ;;  %v1085_v35 = vadd.f32 %v1084_v8, %v1083_v25 }
 0x139   : > { %v980_v40 = vpop.f32.mrf.mxu2  ;;  %v797_v41 = vpop.f32.mrf.mxu0  ;;  %v1189_v28 = vsel %vm1010_vm1, %v1141_v17, 0.0 }
 0x13a   : > { %1040 = vst.msk [vmem:[%s1979_s21 + $0xe8] sm:$0xff] %vm1010_vm1, %v2118_v39  ;;  %v886_v44 = vpop.f32.mrf.mxu1 }
 0x13b   : > { %v887_v45 = vadd.f32 %v886_v44, %v797_v41 }
 0x13d   : > { %v976_v46 = vadd.f32 %v975_v23, %v887_v45 }
 0x13f   : > { %1029 = vst.msk [vmem:[%s1979_s21 + $0x90] sm:$0xff] %vm1010_vm1, %v976_v46  ;;  %v1005_v29 = vpop.f32.mrf.mxu3  ;;  %v1142_v22 = vmul.f32 %v976_v46, %v976_v46  ;;  %v1086_v31 = vsel %vm1010_vm1, %v976_v46, 0.0 }
 0x140   : > { %v2126_v48 = vadd.f32 %v1005_v29, %v917_v42 }
 0x141   : > { %v982_v49 = vpop.f32.mrf.mxu2  ;;  %v799_v50 = vpop.f32.mrf.mxu0  ;;  %v1191_v36 = vsel %vm1010_vm1, %v1142_v22, 0.0 }
 0x142   : > { %1041 = vst.msk [vmem:[%s1979_s21 + $0xf0] sm:$0xff] %vm1010_vm1, %v2126_v48  ;;  %v888_v51 = vpop.f32.mrf.mxu1 }
 0x143   : > { %v889_v52 = vadd.f32 %v888_v51, %v799_v50 }
 0x145   : > { %v978_v53 = vadd.f32 %v977_v33, %v889_v52 }
 0x147   : > { %1030 = vst.msk [vmem:[%s1979_s21 + $0x98] sm:$0xff] %vm1010_vm1, %v978_v53  ;;  %v1007_v43 = vpop.f32.mrf.mxu3  ;;  %v1143_v12 = vmul.f32 %v978_v53, %v978_v53  ;;  %v1088_v37 = vsel %vm1010_vm1, %v978_v53, 0.0 }
 0x148   : > { %v2134_v55 = vadd.f32 %v1007_v43, %v919_v54 }
 0x149   : > { %v985_v56 = vpop.f32.mrf.mxu2  ;;  %v802_v58 = vpop.f32.mrf.mxu0  ;;  %v1193_v41 = vsel %vm1010_vm1, %v1143_v12, 0.0 }
 0x14a   : > { %1042 = vst.msk [vmem:[%s1979_s21 + $0xf8] sm:$0xff] %vm1010_vm1, %v2134_v55  ;;  %v891_v59 = vpop.f32.mrf.mxu1 }
 0x14b   : > { %v892_v60 = vadd.f32 %v891_v59, %v802_v58 }
 0x14d   : > { %v981_v61 = vadd.f32 %v980_v40, %v892_v60  ;;  %v1190_v40 = vadd.f32 %v1189_v28, %v1188_v27 }
 0x14f   : > { %1031 = vst.msk [vmem:[%s1979_s21 + $0xa0] sm:$0xff] %vm1010_vm1, %v981_v61  ;;  %v1144_v38 = vmul.f32 %v981_v61, %v981_v61  ;;  %v1090_v44 = vsel %vm1010_vm1, %v981_v61, 0.0  ;;  %v1192_v46 = vadd.f32 %v1191_v36, %v1190_v40  ;;  %v1153_v36 = vmul.f32 %v2118_v39, %v2118_v39 }
 0x150   : > { %v1108_v40 = vsel %vm1010_vm1, %v2118_v39, 0.0  ;;  %v1112_v39 = vsel %vm1010_vm1, %v2134_v55, 0.0 }
 0x151   : > { %v2145_v62 = vpop.f32.mrf.mxu2  ;;  %v804_v63 = vpop.f32.mrf.mxu0  ;;  %v1195_v29 = vsel %vm1010_vm1, %v1144_v38, 0.0  ;;  %v1194_v53 = vadd.f32 %v1193_v41, %v1192_v46  ;;  %v1155_v46 = vmul.f32 %v2134_v55, %v2134_v55 }
 0x152   : > { %v893_v0 = vpop.f32.mrf.mxu1 }
 0x153   : > { %v894_v3 = vadd.f32 %v893_v0, %v804_v63  ;;  %v1196_v61 = vadd.f32 %v1195_v29, %v1194_v53 }
 0x155   : > { %v983_v11 = vadd.f32 %v982_v49, %v894_v3 }
 0x157   : > { %1032 = vst.msk [vmem:[%s1979_s21 + $0xa8] sm:$0xff] %vm1010_vm1, %v983_v11  ;;  %v1145_v45 = vmul.f32 %v983_v11, %v983_v11  ;;  %v1092_v49 = vsel %vm1010_vm1, %v983_v11, 0.0 }
 0x159   : > { %v990_v5 = vpop.f32.mrf.mxu2  ;;  %v807_v23 = vpop.f32.mrf.mxu0  ;;  %v1197_v58 = vsel %vm1010_vm1, %v1145_v45, 0.0  ;;  %v1213_v45 = vsel %vm1010_vm1, %v1153_v36, 0.0 }
 0x15a   : > { %v991_v26 = vadd.f32 %v990_v5, %v2061_v7  ;;  %v896_v30 = vpop.f32.mrf.mxu1  ;;  %v1087_v7 = vadd.f32 %v1086_v31, %v1085_v35  ;;  %v1198_v1 = vadd.f32 %v1197_v58, %v1196_v61  ;;  %v1152_v31 = vmul.f32 %v2110_v32, %v2110_v32 }
 0x15b   : > { %v897_v33 = vadd.f32 %v896_v30, %v807_v23  ;;  %v1106_v35 = vsel %vm1010_vm1, %v2110_v32, 0.0  ;;  %v1110_v32 = vsel %vm1010_vm1, %v2126_v48, 0.0 }
 0x15c   : > { %1035 = vst.msk [vmem:[%s1979_s21 + $0xc0] sm:$0xff] %vm1010_vm1, %v991_v26  ;;  %v1089_v42 = vadd.f32 %v1088_v37, %v1087_v7  ;;  %v1148_v3 = vmul.f32 %v991_v26, %v991_v26  ;;  %v1098_v11 = vsel %vm1010_vm1, %v991_v26, 0.0  ;;  %v1154_v7 = vmul.f32 %v2126_v48, %v2126_v48 }
 0x15d   : > { %v986_v10 = vadd.f32 %v985_v56, %v897_v33 }
 0x15e   : > { %v1091_v54 = vadd.f32 %v1090_v44, %v1089_v42  ;;  %v1203_v18 = vsel %vm1010_vm1, %v1148_v3, 0.0 }
 0x15f   : > { %1033 = vst.msk [vmem:[%s1979_s21 + $0xb0] sm:$0xff] %vm1010_vm1, %v986_v10  ;;  %v1146_v50 = vmul.f32 %v986_v10, %v986_v10  ;;  %v1094_v59 = vsel %vm1010_vm1, %v986_v10, 0.0 }
 0x160   : > { %v1093_v57 = vadd.f32 %v1092_v49, %v1091_v54  ;;  %v1215_v49 = vsel %vm1010_vm1, %v1154_v7, 0.0 }
 0x161   : > { %v992_v51 = vpop.f32.mrf.mxu2  ;;  %v809_v52 = vpop.f32.mrf.mxu0  ;;  %v1199_v63 = vsel %vm1010_vm1, %v1146_v50, 0.0 }
 0x162   : > { %v993_v43 = vadd.f32 %v992_v51, %v2068_v21  ;;  %v898_v56 = vpop.f32.mrf.mxu1  ;;  %v1095_v2 = vadd.f32 %v1094_v59, %v1093_v57  ;;  %v1200_v6 = vadd.f32 %v1199_v63, %v1198_v1  ;;  %v1050_v63 = vld [vmem:[%s2150_s22] sm:$0x1] }
 0x163   : > { %v899_v60 = vadd.f32 %v898_v56, %v809_v52  ;;  %v1217_v52 = vsel %vm1010_vm1, %v1155_v46, 0.0  ;;  %v1123_v1 = vld [vmem:[%s2157_s26] sm:$0x1] }
 0x164   : > { %1036 = vst.msk [vmem:[%s1979_s21 + $0xc8] sm:$0xff] %vm1010_vm1, %v993_v43  ;;  %v1149_v13 = vmul.f32 %v993_v43, %v993_v43  ;;  %v1100_v19 = vsel %vm1010_vm1, %v993_v43, 0.0 }
 0x165   : > { %v988_v0 = vadd.f32 %v2145_v62, %v899_v60 }
 0x166   : > { %v1205_v23 = vsel %vm1010_vm1, %v1149_v13, 0.0 }
 0x167   : > { %1034 = vst.msk [vmem:[%s1979_s21 + $0xb8] sm:$0xff] %vm1010_vm1, %v988_v0  ;;  %v1096_v21 = vsel %vm1010_vm1, %v988_v0, 0.0  ;;  %v1147_v4 = vmul.f32 %v988_v0, %v988_v0 }
 0x168   : > { %v1097_v9 = vadd.f32 %v1096_v21, %v1095_v2 }
 0x169   : > { %v1201_v14 = vsel %vm1010_vm1, %v1147_v4, 0.0  ;;  %v995_v15 = vpop.f32.mrf.mxu2 }
 0x16a   : > { %v1202_v16 = vadd.f32 %v1201_v14, %v1200_v6  ;;  %v996_v62 = vadd.f32 %v995_v15, %v2075_v34  ;;  %v1099_v17 = vadd.f32 %v1098_v11, %v1097_v9 }
 0x16c   : > { %1037 = vst.msk [vmem:[%s1979_s21 + $0xd0] sm:$0xff] %vm1010_vm1, %v996_v62  ;;  %v1101_v20 = vadd.f32 %v1100_v19, %v1099_v17  ;;  %v1102_v8 = vsel %vm1010_vm1, %v996_v62, 0.0  ;;  %v1150_v22 = vmul.f32 %v996_v62, %v996_v62  ;;  %v1204_v5 = vadd.f32 %v1203_v18, %v1202_v16 }
 0x16e   : > { %v1103_v24 = vadd.f32 %v1102_v8, %v1101_v20  ;;  %v1206_v25 = vadd.f32 %v1205_v23, %v1204_v5  ;;  %v1207_v26 = vsel %vm1010_vm1, %v1150_v22, 0.0 }
 0x170   : > { %v1208_v34 = vadd.f32 %v1207_v26, %v1206_v25 }
 0x171   : > { %v997_v30 = vpop.f32.mrf.mxu2 }
 0x172   : > { %v998_v28 = vadd.f32 %v997_v30, %v2082_v47  ;;  %v1211_v47 = vsel %vm1010_vm1, %v1152_v31, 0.0 }
 0x174   : > { %1038 = vst.msk [vmem:[%s1979_s21 + $0xd8] sm:$0xff] %vm1010_vm1, %v998_v28  ;;  %v1104_v12 = vsel %vm1010_vm1, %v998_v28, 0.0  ;;  %v1151_v33 = vmul.f32 %v998_v28, %v998_v28 }
 0x175   : > { %v1105_v27 = vadd.f32 %v1104_v12, %v1103_v24 }
 0x176   : > { %v1209_v37 = vsel %vm1010_vm1, %v1151_v33, 0.0 }
 0x177   : > { %v1107_v38 = vadd.f32 %v1106_v35, %v1105_v27  ;;  %v1210_v10 = vadd.f32 %v1209_v37, %v1208_v34 }
 0x179   : > { %v1109_v41 = vadd.f32 %v1108_v40, %v1107_v38  ;;  %v1212_v44 = vadd.f32 %v1211_v47, %v1210_v10 }
 0x17b   : > { %v1111_v42 = vadd.f32 %v1110_v32, %v1109_v41  ;;  %v1214_v29 = vadd.f32 %v1213_v45, %v1212_v44 }
 0x17d   : > { %v1113_v50 = vadd.f32 %v1112_v39, %v1111_v42  ;;  %v1216_v51 = vadd.f32 %v1215_v49, %v1214_v29 }
 0x17f   : > { %v1114_v53 = vrot.slane %v1113_v50, 4  ;;  %v1218_v54 = vadd.f32 %v1217_v52, %v1216_v51 }
 0x181   : > { %v1115_v48 = vadd.f32 %v1114_v53, %v1113_v50  ;;  %v1219_v43 = vrot.slane %v1218_v54, 4 }
 0x183   : > { %v1116_v56 = vrot.slane %v1115_v48, 2  ;;  %v1220_v58 = vadd.f32 %v1219_v43, %v1218_v54 }
 0x185   : > { %v1117_v59 = vadd.f32 %v1116_v56, %v1115_v48  ;;  %v1221_v60 = vrot.slane %v1220_v58, 2 }
 0x187   : > { %v1118_v61 = vrot.slane %v1117_v59, 1  ;;  %v1222_v57 = vadd.f32 %v1221_v60, %v1220_v58 }
 0x189   : > { %v1119_v0 = vadd.f32 %v1118_v61, %v1117_v59  ;;  %v1223_v55 = vrot.slane %v1222_v57, 1 }
 0x18b   : > { %v1120_v2 = vadd.f32 %v1119_v0, %v1050_v63  ;;  %v1224_v3 = vadd.f32 %v1223_v55, %v1222_v57 }
 0x18d   : > { %1122 = vst.msk [vmem:[%s2150_s22] sm:$0x1] %vm1047_vm2, %v1120_v2  ;;  %v1225_v21 = vadd.f32 %v1224_v3, %v1123_v1 }
 0x18f   : > { %1226 = vst.msk [vmem:[%s2157_s26] sm:$0x1] %vm1047_vm2, %v1225_v21 }
 0x190 PF: > { %s15_s17 = sadd.s32 1, %s1768_s17   ;;  %s2254_s15 = smov %s1764_s16 }
 0x191   : > { %p12_p6 = scmp.ge.s32.totalorder %s15_s17, 4   ;;  %s2255_s16 = smov %s2257_s18 }
 0x193   :  { %14 = sbr.rel (!%p12_p6) target bundleno = 2 (0x2), region = 86 }

// kernel: generator_forward.16
= control target key start
LH: loop header
LB: loop body
LE: loop exit
PB: predicated region body
PF: predicated region fallthrough
CT: control target
= control target key end

     0   :  { %s553_s0 = inlined_call_operand.vmem [shape: f32[256,128], index: 0, kind: input, shape index: {}]   ;;  %s554_s1 = inlined_call_operand.vmem [shape: f32[1,128], index: 1, kind: input, shape index: {}]   ;;  %s555_s2 = inlined_call_operand.vmem [shape: f32[1,128], index: 2, kind: input, shape index: {}]   ;;  %s556_s3 = inlined_call_operand.vmem [shape: bf16[256,128], index: 3, kind: output, shape index: {}]  }
   0x1   :  { %v14_v0 = vld [vmem:[%s553_s0] sm:$0xff]  ;;  %v15_v1 = vld [vmem:[%s553_s0 + $0x8] sm:$0xff]  ;;  %v16_v4 = vld [vmem:[%s553_s0 + $0x10] sm:$0xff] }
   0x2   :  { %v344_v2 = vld [vmem:[%s554_s1] ss:$0 sm:$0xff]  ;;  %v17_v5 = vld [vmem:[%s553_s0 + $0x18] sm:$0xff]  ;;  %v19_v11 = vld [vmem:[%s553_s0 + $0x28] sm:$0xff] }
   0x3   :  { %v349_v3 = vld [vmem:[%s555_s2] ss:$0 sm:$0xff]  ;;  %v50_v7 = vmul.f32 %v344_v2, %v14_v0  ;;  %v51_v8 = vmul.f32 %v344_v2, %v15_v1  ;;  %v52_v9 = vmul.f32 %v344_v2, %v16_v4  ;;  %v53_v10 = vmul.f32 %v344_v2, %v17_v5  ;;  %v20_v12 = vld [vmem:[%s553_s0 + $0x30] sm:$0xff]  ;;  %v21_v13 = vld [vmem:[%s553_s0 + $0x38] sm:$0xff] }
   0x4   :  { %v18_v6 = vld [vmem:[%s553_s0 + $0x20] sm:$0xff]  ;;  %v55_v15 = vmul.f32 %v344_v2, %v19_v11  ;;  %v56_v16 = vmul.f32 %v344_v2, %v20_v12  ;;  %v57_v17 = vmul.f32 %v344_v2, %v21_v13  ;;  %v23_v27 = vld [vmem:[%s553_s0 + $0x48] sm:$0xff]  ;;  %v24_v32 = vld [vmem:[%s553_s0 + $0x50] sm:$0xff] }
   0x5   :  { %v54_v14 = vmul.f32 %v344_v2, %v18_v6  ;;  %v86_v18 = vadd.f32 %v349_v3, %v50_v7  ;;  %v87_v19 = vadd.f32 %v349_v3, %v51_v8  ;;  %v88_v20 = vadd.f32 %v349_v3, %v52_v9  ;;  %v22_v26 = vld [vmem:[%s553_s0 + $0x40] sm:$0xff]  ;;  %v25_v33 = vld [vmem:[%s553_s0 + $0x58] sm:$0xff]  ;;  %v27_v39 = vld [vmem:[%s553_s0 + $0x68] sm:$0xff] }
   0x6   :  { %v89_v21 = vadd.f32 %v349_v3, %v53_v10  ;;  %v91_v23 = vadd.f32 %v349_v3, %v55_v15  ;;  %v92_v24 = vadd.f32 %v349_v3, %v56_v16  ;;  %v93_v25 = vadd.f32 %v349_v3, %v57_v17  ;;  %v26_v38 = vld [vmem:[%s553_s0 + $0x60] sm:$0xff]  ;;  %v28_v44 = vld [vmem:[%s553_s0 + $0x70] sm:$0xff]  ;;  %v29_v45 = vld [vmem:[%s553_s0 + $0x78] sm:$0xff] }
   0x7   :  { %v90_v22 = vadd.f32 %v349_v3, %v54_v14  ;;  %v118_v28 = vmax.f32 %v86_v18, 0.0  ;;  %v119_v29 = vmax.f32 %v87_v19, 0.0  ;;  %v120_v30 = vmax.f32 %v88_v20, 0.0  ;;  %v30_v58 = vld [vmem:[%s553_s0 + $0x80] sm:$0xff]  ;;  %v31_v63 = vld [vmem:[%s553_s0 + $0x88] sm:$0xff]  ;;  %v32_v6 = vld [vmem:[%s553_s0 + $0x90] sm:$0xff] }
   0x8   :  { %v121_v31 = vmax.f32 %v89_v21, 0.0  ;;  %v123_v35 = vmax.f32 %v91_v23, 0.0  ;;  %v124_v36 = vmax.f32 %v92_v24, 0.0  ;;  %v125_v37 = vmax.f32 %v93_v25, 0.0  ;;  %v33_v7 = vld [vmem:[%s553_s0 + $0x98] sm:$0xff]  ;;  %v34_v12 = vld [vmem:[%s553_s0 + $0xa0] sm:$0xff] }
   0x9   :  { %v122_v34 = vmax.f32 %v90_v22, 0.0  ;;  %v221_v40 = vpack.c.bf16 %v119_v29, %v118_v28  ;;  %v58_v42 = vmul.f32 %v344_v2, %v22_v26  ;;  %v59_v43 = vmul.f32 %v344_v2, %v23_v27  ;;  %v35_v13 = vld [vmem:[%s553_s0 + $0xa8] sm:$0xff]  ;;  %v36_v18 = vld [vmem:[%s553_s0 + $0xb0] sm:$0xff]  ;;  %v37_v23 = vld [vmem:[%s553_s0 + $0xb8] sm:$0xff] }
   0xa   :  { %v226_v41 = vpack.c.bf16 %v121_v31, %v120_v30  ;;  %v236_v47 = vpack.c.bf16 %v125_v37, %v124_v36  ;;  %v60_v48 = vmul.f32 %v344_v2, %v24_v32  ;;  %v61_v49 = vmul.f32 %v344_v2, %v25_v33  ;;  %v38_v28 = vld [vmem:[%s553_s0 + $0xc0] sm:$0xff]  ;;  %v39_v37 = vld [vmem:[%s553_s0 + $0xc8] sm:$0xff] }
   0xb   :  { %v231_v46 = vpack.c.bf16 %v123_v35, %v122_v34  ;;  %222 = vst [vmem:[%s556_s3] sm:$0xff] %v221_v40   ;;  %v94_v50 = vadd.f32 %v349_v3, %v58_v42  ;;  %v95_v51 = vadd.f32 %v349_v3, %v59_v43  ;;  %v62_v52 = vmul.f32 %v344_v2, %v26_v38  ;;  %v40_v42 = vld [vmem:[%s553_s0 + $0xd0] sm:$0xff]  ;;  %v41_v43 = vld [vmem:[%s553_s0 + $0xd8] sm:$0xff] }
   0xc   :  { %v63_v53 = vmul.f32 %v344_v2, %v27_v39  ;;  %298 = vst [vmem:[%s556_s3 + $0x8] sm:$0xff] %v226_v41   ;;  %v96_v54 = vadd.f32 %v349_v3, %v60_v48  ;;  %v97_v55 = vadd.f32 %v349_v3, %v61_v49  ;;  %v64_v56 = vmul.f32 %v344_v2, %v28_v44  ;;  %v42_v48 = vld [vmem:[%s553_s0 + $0xe0] sm:$0xff]  ;;  %v43_v49 = vld [vmem:[%s553_s0 + $0xe8] sm:$0xff] }
   0xd   :  { %v65_v57 = vmul.f32 %v344_v2, %v29_v45  ;;  %299 = vst [vmem:[%s556_s3 + $0x10] sm:$0xff] %v231_v46   ;;  %v126_v59 = vmax.f32 %v94_v50, 0.0  ;;  %v127_v60 = vmax.f32 %v95_v51, 0.0  ;;  %v98_v61 = vadd.f32 %v349_v3, %v62_v52 }
   0xe   :  { %v99_v62 = vadd.f32 %v349_v3, %v63_v53  ;;  %300 = vst [vmem:[%s556_s3 + $0x18] sm:$0xff] %v236_v47   ;;  %v128_v0 = vmax.f32 %v96_v54, 0.0  ;;  %v129_v1 = vmax.f32 %v97_v55, 0.0  ;;  %v100_v4 = vadd.f32 %v349_v3, %v64_v56  ;;  %v44_v54 = vld [vmem:[%s553_s0 + $0xf0] sm:$0xff] }
   0xf   :  { %v101_v5 = vadd.f32 %v349_v3, %v65_v57  ;;  %v241_v8 = vpack.c.bf16 %v127_v60, %v126_v59  ;;  %v130_v9 = vmax.f32 %v98_v61, 0.0  ;;  %v66_v11 = vmul.f32 %v344_v2, %v30_v58  ;;  %v45_v59 = vld [vmem:[%s553_s0 + $0xf8] sm:$0xff] }
  0x10   :  { %v131_v10 = vmax.f32 %v99_v62, 0.0  ;;  %v246_v14 = vpack.c.bf16 %v129_v1, %v128_v0  ;;  %v132_v15 = vmax.f32 %v100_v4, 0.0  ;;  %v67_v17 = vmul.f32 %v344_v2, %v31_v63 }
  0x11   :  { %v133_v16 = vmax.f32 %v101_v5, 0.0  ;;  %301 = vst [vmem:[%s556_s3 + $0x20] sm:$0xff] %v241_v8   ;;  %v102_v20 = vadd.f32 %v349_v3, %v66_v11  ;;  %v68_v21 = vmul.f32 %v344_v2, %v32_v6  ;;  %v69_v22 = vmul.f32 %v344_v2, %v33_v7 }
  0x12   :  { %v251_v19 = vpack.c.bf16 %v131_v10, %v130_v9  ;;  %302 = vst [vmem:[%s556_s3 + $0x28] sm:$0xff] %v246_v14   ;;  %v103_v25 = vadd.f32 %v349_v3, %v67_v17  ;;  %v70_v26 = vmul.f32 %v344_v2, %v34_v12  ;;  %v71_v27 = vmul.f32 %v344_v2, %v35_v13 }
  0x13   :  { %v256_v24 = vpack.c.bf16 %v133_v16, %v132_v15  ;;  %v134_v29 = vmax.f32 %v102_v20, 0.0  ;;  %v104_v30 = vadd.f32 %v349_v3, %v68_v21  ;;  %v105_v31 = vadd.f32 %v349_v3, %v69_v22 }
  0x14   :  { %303 = vst [vmem:[%s556_s3 + $0x30] sm:$0xff] %v251_v19   ;;  %v72_v32 = vmul.f32 %v344_v2, %v36_v18  ;;  %v135_v33 = vmax.f32 %v103_v25, 0.0  ;;  %v106_v34 = vadd.f32 %v349_v3, %v70_v26  ;;  %v107_v35 = vadd.f32 %v349_v3, %v71_v27 }
  0x15   :  { %304 = vst [vmem:[%s556_s3 + $0x38] sm:$0xff] %v256_v24   ;;  %v73_v36 = vmul.f32 %v344_v2, %v37_v23  ;;  %v136_v38 = vmax.f32 %v104_v30, 0.0  ;;  %v137_v39 = vmax.f32 %v105_v31, 0.0  ;;  %v74_v41 = vmul.f32 %v344_v2, %v38_v28 }
  0x16   :  { %v108_v40 = vadd.f32 %v349_v3, %v72_v32  ;;  %v261_v44 = vpack.c.bf16 %v135_v33, %v134_v29  ;;  %v138_v45 = vmax.f32 %v106_v34, 0.0  ;;  %v139_v46 = vmax.f32 %v107_v35, 0.0 }
  0x17   :  { %v109_v47 = vadd.f32 %v349_v3, %v73_v36  ;;  %v266_v50 = vpack.c.bf16 %v137_v39, %v136_v38  ;;  %v75_v52 = vmul.f32 %v344_v2, %v39_v37  ;;  %v110_v53 = vadd.f32 %v349_v3, %v74_v41 }
  0x18   :  { %v140_v51 = vmax.f32 %v108_v40, 0.0  ;;  %305 = vst [vmem:[%s556_s3 + $0x40] sm:$0xff] %v261_v44   ;;  %v271_v55 = vpack.c.bf16 %v139_v46, %v138_v45  ;;  %v76_v57 = vmul.f32 %v344_v2, %v40_v42  ;;  %v77_v58 = vmul.f32 %v344_v2, %v41_v43 }
  0x19   :  { %v141_v56 = vmax.f32 %v109_v47, 0.0  ;;  %306 = vst [vmem:[%s556_s3 + $0x48] sm:$0xff] %v266_v50   ;;  %v111_v60 = vadd.f32 %v349_v3, %v75_v52  ;;  %v142_v61 = vmax.f32 %v110_v53, 0.0  ;;  %v78_v62 = vmul.f32 %v344_v2, %v42_v48 }
  0x1a   :  { %v79_v63 = vmul.f32 %v344_v2, %v43_v49  ;;  %307 = vst [vmem:[%s556_s3 + $0x50] sm:$0xff] %v271_v55   ;;  %v112_v1 = vadd.f32 %v349_v3, %v76_v57  ;;  %v113_v4 = vadd.f32 %v349_v3, %v77_v58  ;;  %v80_v5 = vmul.f32 %v344_v2, %v44_v54 }
  0x1b   :  { %v276_v0 = vpack.c.bf16 %v141_v56, %v140_v51  ;;  %v143_v6 = vmax.f32 %v111_v60, 0.0  ;;  %v114_v7 = vadd.f32 %v349_v3, %v78_v62  ;;  %v81_v9 = vmul.f32 %v344_v2, %v45_v59 }
  0x1c   :  { %v115_v8 = vadd.f32 %v349_v3, %v79_v63  ;;  %v144_v10 = vmax.f32 %v112_v1, 0.0  ;;  %v145_v11 = vmax.f32 %v113_v4, 0.0  ;;  %v116_v12 = vadd.f32 %v349_v3, %v80_v5 }
  0x1d   :  { %308 = vst [vmem:[%s556_s3 + $0x58] sm:$0xff] %v276_v0   ;;  %v281_v13 = vpack.c.bf16 %v143_v6, %v142_v61  ;;  %v146_v14 = vmax.f32 %v114_v7, 0.0  ;;  %v117_v16 = vadd.f32 %v349_v3, %v81_v9 }
  0x1e   :  { %v147_v15 = vmax.f32 %v115_v8, 0.0  ;;  %v286_v17 = vpack.c.bf16 %v145_v11, %v144_v10  ;;  %v148_v18 = vmax.f32 %v116_v12, 0.0 }
  0x1f   :  { %309 = vst [vmem:[%s556_s3 + $0x60] sm:$0xff] %v281_v13   ;;  %v149_v19 = vmax.f32 %v117_v16, 0.0 }
  0x20   :  { %v291_v2 = vpack.c.bf16 %v147_v15, %v146_v14  ;;  %310 = vst [vmem:[%s556_s3 + $0x68] sm:$0xff] %v286_v17  }
  0x21   :  { %v296_v20 = vpack.c.bf16 %v149_v19, %v148_v18 }
  0x22   :  { %311 = vst [vmem:[%s556_s3 + $0x70] sm:$0xff] %v291_v2  }
  0x23   :  { %312 = vst [vmem:[%s556_s3 + $0x78] sm:$0xff] %v296_v20  }

// kernel: generator_forward.17
= control target key start
LH: loop header
LB: loop body
LE: loop exit
PB: predicated region body
PF: predicated region fallthrough
CT: control target
= control target key end

     0   :  { %s3217_s9 = smov 0   ;;  %s3219_s10 = smov 0   ;;  %s4008_s0 = inlined_call_operand.vmem [shape: bf16[2048,144], index: 0, kind: input, shape index: {}]   ;;  %s4009_s1 = inlined_call_operand.vmem [shape: bf16[144,12], index: 1, kind: input, shape index: {}]   ;;  %s4010_s2 = inlined_call_operand.vmem [shape: f32[2048,12], index: 2, kind: output, shape index: {}]  }
   0x1   :  { %s3221_s11 = smov 0  }
   0x2 LB: > { %s24_s12 = sadd.s32 1, %s3196_s10  ;;  %p2131_p0 = scmp.ge.s32.totalorder %s3200_s11, 1  ;;  %s3200_s11 = sphi %s3221_s11, %s12_s11   ;;  %s3196_s10 = sphi %s3219_s10, %s4012_s10   ;;  %s3192_s9 = sphi %s3217_s9, %s4011_s9  }
   0x3   : > { %p26_p1 = scmp.ge.s32.totalorder %s24_s12, 2  ;;  %p132_p2 = scmp.lt.s32.totalorder %s3200_s11, 3 }
   0x5   : > { %s4014_s12 = smov (%p26_p1, %s24_s12), 0  ;;  %p133_p3 = pnand %p2131_p0, %p132_p2 }
   0x6   : > { %s2132_s17 = sshll.u32 (!%p133_p3), %s3192_s9, 7 }
   0x7   : > { %136 = sbr.rel (%p133_p3) target bundleno = 690 (0x2b2), region = 28  ;;  %p159_p4 = scmp.lt.s32.totalorder (!%p133_p3), %s2132_s17, 255 }
   0xc   : > { %v2887_v0 = vld [vmem:[%s4009_s1 + $0x38] sm:$0xff]  ;;  %v2888_v1 = vld [vmem:[%s4009_s1 + $0x40] sm:$0xff]  ;;  %v2886_v2 = vld [vmem:[%s4009_s1 + $0x30] sm:$0xff]  ;;  %s4016_s17 = smov (!%p159_p4, %s2132_s17), 255  ;;  %vm951_vm0 = vcmask 130048   ;;  %vm1930_vm1 = vcmask 97280  }
   0xd   : > { %1144 = vmatpush.bf16.msra.mxu0 %v2887_v0  ;;  %2889 = vmatpush.bf16.msra.mxu2 %v2887_v0  ;;  %s2751_s20 = sshll.u32 %s4016_s17, 3  ;;  %v2885_v3 = vld [vmem:[%s4009_s1 + $0x28] sm:$0xff]  ;;  %v2884_v7 = vld [vmem:[%s4009_s1 + $0x20] sm:$0xff]  ;;  %v2883_v11 = vld [vmem:[%s4009_s1 + $0x18] sm:$0xff] }
   0xe   : > { %1480 = vmatpush.bf16.msra.mxu1 %v2888_v1  ;;  %2897 = vmatpush.bf16.msra.mxu3 %v2888_v1  ;;  %s3252_s23 = scalar_lea.vmem %s4008_s0, %s2751_s20  ;;  %v2882_v12 = vld [vmem:[%s4009_s1 + $0x10] sm:$0xff]  ;;  %v2881_v16 = vld [vmem:[%s4009_s1 + $0x8] sm:$0xff]  ;;  %v2880_v20 = vld [vmem:[%s4009_s1] sm:$0xff]  ;;  %s3381_s13 = scalar_lea.vmem %s4010_s2, %s2751_s20 }
   0xf   : > { %v2752_v4 = vld [vmem:[%s3252_s23 + $0x4] sm:$0xf]  ;;  %v2141_v5 = vld [vmem:[%s3252_s23 + $0x8] sm:$0xf0]  ;;  %v2818_v8 = vld [vmem:[%s3252_s23 + $0x214] sm:$0xf] }
  0x10   : > { %v2144_v6 = vor.u32 %v2752_v4, %v2141_v5  ;;  %v2405_v9 = vld [vmem:[%s3252_s23 + $0x218] sm:$0xf0]  ;;  %v2754_v13 = vld [vmem:[%s3252_s23 + $0x14] sm:$0xf]  ;;  %v2820_v17 = vld [vmem:[%s3252_s23 + $0x224] sm:$0xf] }
  0x11   : > { %1145 = vmatpush.bf16.msra.mxu0 %v2886_v2  ;;  %2890 = vmatpush.bf16.msra.mxu2 %v2886_v2  ;;  %v2408_v10 = vor.u32 %v2818_v8, %v2405_v9  ;;  %v2149_v14 = vld [vmem:[%s3252_s23 + $0x18] sm:$0xf0]  ;;  %v2413_v18 = vld [vmem:[%s3252_s23 + $0x228] sm:$0xf0]  ;;  %v2139_v21 = vld [vmem:[%s3252_s23] sm:$0xf] }
  0x12   : > { %2685 = vmatmul.msk.bf16.vlgmr.msra.gmra.mxu1 %vm951_vm0, %v2144_v6  ;;  %v2152_v15 = vor.u32 %v2754_v13, %v2149_v14  ;;  %v2416_v19 = vor.u32 %v2820_v17, %v2413_v18  ;;  %v2753_v22 = vld [vmem:[%s3252_s23 + $0x4] sm:$0xf0]  ;;  %v2395_v23 = vld [vmem:[%s3252_s23 + $0x200] sm:$0xf]  ;;  %v2756_v27 = vld [vmem:[%s3252_s23 + $0x24] sm:$0xf] }
  0x13   : > { %2718 = vmatmul.msk.bf16.vlgmr.msra.gmra.mxu3 %vm951_vm0, %v2408_v10  ;;  %v2817_v24 = vld [vmem:[%s3252_s23 + $0x204] sm:$0xf0]  ;;  %v2140_v25 = vor.u32 %v2753_v22, %v2139_v21  ;;  %v2157_v28 = vld [vmem:[%s3252_s23 + $0x28] sm:$0xf0]  ;;  %v2822_v30 = vld [vmem:[%s3252_s23 + $0x234] sm:$0xf] }
  0x14   : > { %v2396_v26 = vor.u32 %v2817_v24, %v2395_v23  ;;  %v2160_v29 = vor.u32 %v2756_v27, %v2157_v28  ;;  %v2421_v31 = vld [vmem:[%s3252_s23 + $0x238] sm:$0xf0]  ;;  %v2147_v33 = vld [vmem:[%s3252_s23 + $0x10] sm:$0xf]  ;;  %v2755_v34 = vld [vmem:[%s3252_s23 + $0x14] sm:$0xf0] }
  0x15   : > { %1146 = vmatpush.bf16.msra.mxu0 %v2885_v3  ;;  %2891 = vmatpush.bf16.msra.mxu2 %v2885_v3  ;;  %v2424_v32 = vor.u32 %v2822_v30, %v2421_v31  ;;  %v2403_v35 = vld [vmem:[%s3252_s23 + $0x210] sm:$0xf]  ;;  %v2819_v36 = vld [vmem:[%s3252_s23 + $0x214] sm:$0xf0]  ;;  %v2148_v37 = vor.u32 %v2755_v34, %v2147_v33  ;;  %v2758_v39 = vld [vmem:[%s3252_s23 + $0x34] sm:$0xf] }
  0x16   : > { %v2404_v38 = vor.u32 %v2819_v36, %v2403_v35  ;;  %v2165_v40 = vld [vmem:[%s3252_s23 + $0x38] sm:$0xf0]  ;;  %v2824_v42 = vld [vmem:[%s3252_s23 + $0x244] sm:$0xf]  ;;  %v2429_v43 = vld [vmem:[%s3252_s23 + $0x248] sm:$0xf0] }
  0x17   : > { %v2168_v41 = vor.u32 %v2758_v39, %v2165_v40  ;;  %v2432_v44 = vor.u32 %v2824_v42, %v2429_v43  ;;  %v2155_v45 = vld [vmem:[%s3252_s23 + $0x20] sm:$0xf]  ;;  %v2757_v46 = vld [vmem:[%s3252_s23 + $0x24] sm:$0xf0]  ;;  %v2760_v51 = vld [vmem:[%s3252_s23 + $0x44] sm:$0xf] }
  0x18   : > { %v2411_v47 = vld [vmem:[%s3252_s23 + $0x220] sm:$0xf]  ;;  %v2821_v48 = vld [vmem:[%s3252_s23 + $0x224] sm:$0xf0]  ;;  %v2156_v49 = vor.u32 %v2757_v46, %v2155_v45  ;;  %v2173_v52 = vld [vmem:[%s3252_s23 + $0x48] sm:$0xf0] }
  0x19   : > { %1147 = vmatpush.bf16.msra.mxu0 %v2884_v7  ;;  %2892 = vmatpush.bf16.msra.mxu2 %v2884_v7  ;;  %v2412_v50 = vor.u32 %v2821_v48, %v2411_v47  ;;  %v2176_v53 = vor.u32 %v2760_v51, %v2173_v52  ;;  %v2826_v54 = vld [vmem:[%s3252_s23 + $0x254] sm:$0xf]  ;;  %v2437_v55 = vld [vmem:[%s3252_s23 + $0x258] sm:$0xf0]  ;;  %v2163_v57 = vld [vmem:[%s3252_s23 + $0x30] sm:$0xf] }
  0x1a   : > { %v2440_v56 = vor.u32 %v2826_v54, %v2437_v55  ;;  %v2759_v58 = vld [vmem:[%s3252_s23 + $0x34] sm:$0xf0]  ;;  %v2419_v59 = vld [vmem:[%s3252_s23 + $0x230] sm:$0xf]  ;;  %v2762_v63 = vld [vmem:[%s3252_s23 + $0x54] sm:$0xf] }
  0x1b   : > { %v2823_v60 = vld [vmem:[%s3252_s23 + $0x234] sm:$0xf0]  ;;  %v2164_v61 = vor.u32 %v2759_v58, %v2163_v57  ;;  %v2181_v0 = vld [vmem:[%s3252_s23 + $0x58] sm:$0xf0]  ;;  %v2828_v2 = vld [vmem:[%s3252_s23 + $0x264] sm:$0xf] }
  0x1c   : > { %v2420_v62 = vor.u32 %v2823_v60, %v2419_v59  ;;  %v2184_v1 = vor.u32 %v2762_v63, %v2181_v0  ;;  %v2445_v3 = vld [vmem:[%s3252_s23 + $0x268] sm:$0xf0]  ;;  %v2171_v5 = vld [vmem:[%s3252_s23 + $0x40] sm:$0xf]  ;;  %v2761_v6 = vld [vmem:[%s3252_s23 + $0x44] sm:$0xf0] }
  0x1d   : > { %1148 = vmatpush.bf16.msra.mxu0 %v2883_v11  ;;  %2893 = vmatpush.bf16.msra.mxu2 %v2883_v11  ;;  %v2448_v4 = vor.u32 %v2828_v2, %v2445_v3  ;;  %v2427_v7 = vld [vmem:[%s3252_s23 + $0x240] sm:$0xf]  ;;  %v2825_v8 = vld [vmem:[%s3252_s23 + $0x244] sm:$0xf0]  ;;  %v2172_v9 = vor.u32 %v2761_v6, %v2171_v5  ;;  %v2764_v11 = vld [vmem:[%s3252_s23 + $0x64] sm:$0xf] }
  0x1e   : > { %v2428_v10 = vor.u32 %v2825_v8, %v2427_v7  ;;  %v2830_v14 = vld [vmem:[%s3252_s23 + $0x274] sm:$0xf]  ;;  %v2179_v17 = vld [vmem:[%s3252_s23 + $0x50] sm:$0xf]  ;;  %v2763_v18 = vld [vmem:[%s3252_s23 + $0x54] sm:$0xf0] }
  0x1f   : > { %v2180_v21 = vor.u32 %v2763_v18, %v2179_v17  ;;  %v2766_v23 = vld [vmem:[%s3252_s23 + $0x74] sm:$0xf]  ;;  %v2197_v24 = vld [vmem:[%s3252_s23 + $0x78] sm:$0xf0]  ;;  %v2461_v27 = vld [vmem:[%s3252_s23 + $0x288] sm:$0xf0] }
  0x20   : > { %v2765_v30 = vld [vmem:[%s3252_s23 + $0x64] sm:$0xf0]  ;;  %v2443_v31 = vld [vmem:[%s3252_s23 + $0x260] sm:$0xf]  ;;  %v2768_v35 = vld [vmem:[%s3252_s23 + $0x84] sm:$0xf] }
  0x21   : > { %1149 = vmatpush.bf16.msra.mxu0 %v2882_v12  ;;  %2894 = vmatpush.bf16.msra.mxu2 %v2882_v12  ;;  %v2189_v12 = vld [vmem:[%s3252_s23 + $0x68] sm:$0xf0]  ;;  %v2834_v39 = vld [vmem:[%s3252_s23 + $0x294] sm:$0xf]  ;;  %v2469_v40 = vld [vmem:[%s3252_s23 + $0x298] sm:$0xf0] }
  0x22   : > { %2686 = vmatmul.msk.bf16.gmra.mxu1 %vm951_vm0, %v2152_v15  ;;  %v2192_v13 = vor.u32 %v2764_v11, %v2189_v12  ;;  %v2453_v15 = vld [vmem:[%s3252_s23 + $0x278] sm:$0xf0]  ;;  %v2205_v36 = vld [vmem:[%s3252_s23 + $0x88] sm:$0xf0]  ;;  %v2195_v42 = vld [vmem:[%s3252_s23 + $0x70] sm:$0xf] }
  0x23   : > { %2719 = vmatmul.msk.bf16.gmra.mxu3 %vm951_vm0, %v2416_v19  ;;  %v2435_v19 = vld [vmem:[%s3252_s23 + $0x250] sm:$0xf]  ;;  %v2767_v43 = vld [vmem:[%s3252_s23 + $0x74] sm:$0xf0]  ;;  %v2213_v51 = vld [vmem:[%s3252_s23 + $0x98] sm:$0xf0] }
  0x24   : > { %v2831_v45 = vld [vmem:[%s3252_s23 + $0x274] sm:$0xf0]  ;;  %v2196_v46 = vor.u32 %v2767_v43, %v2195_v42  ;;  %v2836_v54 = vld [vmem:[%s3252_s23 + $0x2a4] sm:$0xf]  ;;  %v2477_v55 = vld [vmem:[%s3252_s23 + $0x2a8] sm:$0xf0] }
  0x25   : > { %1150 = vmatpush.bf16.msra.mxu0 %v2881_v16  ;;  %2895 = vmatpush.bf16.msra.mxu2 %v2881_v16  ;;  %v2456_v16 = vor.u32 %v2830_v14, %v2453_v15  ;;  %v2480_v57 = vor.u32 %v2836_v54, %v2477_v55  ;;  %v2203_v58 = vld [vmem:[%s3252_s23 + $0x80] sm:$0xf]  ;;  %v2769_v59 = vld [vmem:[%s3252_s23 + $0x84] sm:$0xf0]  ;;  %v2221_v5 = vld [vmem:[%s3252_s23 + $0xa8] sm:$0xf0] }
  0x26   : > { %v2459_v60 = vld [vmem:[%s3252_s23 + $0x280] sm:$0xf]  ;;  %v2838_v12 = vld [vmem:[%s3252_s23 + $0x2b4] sm:$0xf]  ;;  %v2771_v17 = vld [vmem:[%s3252_s23 + $0x94] sm:$0xf0] }
  0x27   : > { %v2467_v18 = vld [vmem:[%s3252_s23 + $0x290] sm:$0xf]  ;;  %v2773_v42 = vld [vmem:[%s3252_s23 + $0xa4] sm:$0xf0]  ;;  %v2475_v43 = vld [vmem:[%s3252_s23 + $0x2a0] sm:$0xf] }
  0x28   : > { %v2776_v55 = vld [vmem:[%s3252_s23 + $0xc4] sm:$0xf] }
  0x29   : > { %1151 = vmatpush.bf16.msra.mxu0 %v2880_v20  ;;  %2896 = vmatpush.bf16.msra.mxu2 %v2880_v20  ;;  %v2827_v20 = vld [vmem:[%s3252_s23 + $0x254] sm:$0xf0] }
  0x2a   : > { %v2436_v22 = vor.u32 %v2827_v20, %v2435_v19  ;;  %v2835_v19 = vld [vmem:[%s3252_s23 + $0x294] sm:$0xf0] }
  0x2c   : > { %1152 = vmatmul.bf16.vlgmr.msra.gmra.mxu0 %v2140_v25  ;;  %1312 = vmatmul.bf16.vlgmr.msra.gmra.mxu2 %v2396_v26  ;;  %v2200_v25 = vor.u32 %v2766_v23, %v2197_v24  ;;  %v2832_v26 = vld [vmem:[%s3252_s23 + $0x284] sm:$0xf]  ;;  %v2468_v23 = vor.u32 %v2835_v19, %v2467_v18 }
  0x2d   : > { %v2464_v28 = vor.u32 %v2832_v26, %v2461_v27 }
  0x32   : > { %2687 = vmatmul.msk.bf16.gmra.mxu1 %vm951_vm0, %v2160_v29  ;;  %v2187_v29 = vld [vmem:[%s3252_s23 + $0x60] sm:$0xf] }
  0x33   : > { %2720 = vmatmul.msk.bf16.gmra.mxu3 %vm951_vm0, %v2424_v32  ;;  %v2829_v32 = vld [vmem:[%s3252_s23 + $0x264] sm:$0xf0]  ;;  %v2188_v33 = vor.u32 %v2765_v30, %v2187_v29  ;;  %v2229_v29 = vld [vmem:[%s3252_s23 + $0xb8] sm:$0xf0] }
  0x34   : > { %v2444_v34 = vor.u32 %v2829_v32, %v2443_v31 }
  0x3c   : > { %1157 = vmatmul.bf16.gmra.mxu0 %v2148_v37  ;;  %1317 = vmatmul.bf16.gmra.mxu2 %v2404_v38  ;;  %v2208_v37 = vor.u32 %v2768_v35, %v2205_v36 }
  0x42   : > { %2688 = vmatmul.msk.bf16.gmra.mxu1 %vm951_vm0, %v2168_v41  ;;  %v2472_v41 = vor.u32 %v2834_v39, %v2469_v40 }
  0x43   : > { %2721 = vmatmul.msk.bf16.gmra.mxu3 %vm951_vm0, %v2432_v44  ;;  %v2451_v44 = vld [vmem:[%s3252_s23 + $0x270] sm:$0xf] }
  0x44   : > { %v2452_v47 = vor.u32 %v2831_v45, %v2451_v44  ;;  %v2837_v44 = vld [vmem:[%s3252_s23 + $0x2a4] sm:$0xf0] }
  0x4c   : > { %1162 = vmatmul.bf16.gmra.mxu0 %v2156_v49  ;;  %1322 = vmatmul.bf16.gmra.mxu2 %v2412_v50  ;;  %v2770_v50 = vld [vmem:[%s3252_s23 + $0x94] sm:$0xf] }
  0x4d   : > { %v2216_v52 = vor.u32 %v2770_v50, %v2213_v51  ;;  %v2476_v50 = vor.u32 %v2837_v44, %v2475_v43 }
  0x52   : > { %2689 = vmatmul.msk.bf16.gmra.mxu1 %vm951_vm0, %v2176_v53 }
  0x53   : > { %2722 = vmatmul.msk.bf16.gmra.mxu3 %vm951_vm0, %v2440_v56 }
  0x5c   : > { %1167 = vmatmul.bf16.gmra.mxu0 %v2164_v61  ;;  %1327 = vmatmul.bf16.gmra.mxu2 %v2420_v62  ;;  %v2833_v61 = vld [vmem:[%s3252_s23 + $0x284] sm:$0xf0]  ;;  %v2204_v62 = vor.u32 %v2769_v59, %v2203_v58 }
  0x5d   : > { %v2460_v0 = vor.u32 %v2833_v61, %v2459_v60 }
  0x62   : > { %2690 = vmatmul.msk.bf16.gmra.mxu1 %vm951_vm0, %v2184_v1 }
  0x63   : > { %2723 = vmatmul.msk.bf16.gmra.mxu3 %vm951_vm0, %v2448_v4  ;;  %v2772_v4 = vld [vmem:[%s3252_s23 + $0xa4] sm:$0xf] }
  0x64   : > { %v2224_v8 = vor.u32 %v2772_v4, %v2221_v5  ;;  %v2227_v5 = vld [vmem:[%s3252_s23 + $0xb0] sm:$0xf] }
  0x6c   : > { %1172 = vmatmul.bf16.gmra.mxu0 %v2172_v9  ;;  %1332 = vmatmul.bf16.gmra.mxu2 %v2428_v10 }
  0x72   : > { %2691 = vmatmul.msk.bf16.gmra.mxu1 %vm951_vm0, %v2192_v13  ;;  %v2485_v13 = vld [vmem:[%s3252_s23 + $0x2b8] sm:$0xf0] }
  0x73   : > { %2724 = vmatmul.msk.bf16.gmra.mxu3 %vm951_vm0, %v2456_v16  ;;  %v2488_v15 = vor.u32 %v2838_v12, %v2485_v13  ;;  %v2211_v16 = vld [vmem:[%s3252_s23 + $0x90] sm:$0xf] }
  0x7c   : > { %1177 = vmatmul.bf16.gmra.mxu0 %v2180_v21  ;;  %1337 = vmatmul.bf16.gmra.mxu2 %v2436_v22  ;;  %v2212_v21 = vor.u32 %v2771_v17, %v2211_v16 }
  0x82   : > { %2692 = vmatmul.msk.bf16.gmra.mxu1 %vm951_vm0, %v2200_v25 }
  0x83   : > { %2725 = vmatmul.msk.bf16.gmra.mxu3 %vm951_vm0, %v2464_v28  ;;  %v2774_v28 = vld [vmem:[%s3252_s23 + $0xb4] sm:$0xf] }
  0x8c   : > { %1182 = vmatmul.bf16.gmra.mxu0 %v2188_v33  ;;  %1342 = vmatmul.bf16.gmra.mxu2 %v2444_v34  ;;  %v2232_v33 = vor.u32 %v2774_v28, %v2229_v29 }
  0x8f   : > { %v1482_v38 = vpop.f32.mrf.mxu1 }
  0x92   : > { %2693 = vmatmul.msk.bf16.gmra.mxu1 %vm951_vm0, %v2208_v37  ;;  %v2840_v37 = vld [vmem:[%s3252_s23 + $0x2c4] sm:$0xf] }
  0x93   : > { %2726 = vmatmul.msk.bf16.gmra.mxu3 %vm951_vm0, %v2472_v41  ;;  %v2219_v41 = vld [vmem:[%s3252_s23 + $0xa0] sm:$0xf] }
  0x96   : > { %v3358_v49 = vpop.f32.mrf.mxu3 }
  0x97   : > { %v1484_v48 = vpop.f32.mrf.mxu1 }
  0x9c   : > { %1187 = vmatmul.bf16.gmra.mxu0 %v2196_v46  ;;  %1347 = vmatmul.bf16.gmra.mxu2 %v2452_v47  ;;  %v2220_v46 = vor.u32 %v2773_v42, %v2219_v41 }
  0x9e   : > { %v3364_v56 = vpop.f32.mrf.mxu3 }
  0x9f   : > { %v1487_v53 = vpop.f32.mrf.mxu1 }
  0xa2   : > { %2694 = vmatmul.msk.bf16.gmra.mxu1 %vm951_vm0, %v2216_v52 }
  0xa3   : > { %2727 = vmatmul.msk.bf16.gmra.mxu3 %vm951_vm0, %v2480_v57 }
  0xa6   : > { %v3372_v3 = vpop.f32.mrf.mxu3 }
  0xa7   : > { %v1489_v2 = vpop.f32.mrf.mxu1 }
  0xa9   : > { %v1153_v63 = vpop.f32.mrf.mxu0 }
  0xaa   : > { %v1483_v1 = vadd.f32 %v1482_v38, %v1153_v63  ;;  %v2493_v38 = vld [vmem:[%s3252_s23 + $0x2c8] sm:$0xf0] }
  0xab   : > { %v2496_v40 = vor.u32 %v2840_v37, %v2493_v38  ;;  %v2491_v37 = vld [vmem:[%s3252_s23 + $0x2c0] sm:$0xf]  ;;  %v2841_v38 = vld [vmem:[%s3252_s23 + $0x2c4] sm:$0xf0] }
  0xac   : > { %2922 = vtanh.f32 %v1483_v1  ;;  %1192 = vmatmul.bf16.gmra.mxu0 %v2204_v62  ;;  %1352 = vmatmul.bf16.gmra.mxu2 %v2460_v0  ;;  %v2842_v1 = vld [vmem:[%s3252_s23 + $0x2d4] sm:$0xf] }
  0xae   : > { %v3389_v14 = vpop.f32.mrf.mxu3 }
  0xaf   : > { %v3383_v6 = vpop.f32.mrf.mxu2  ;;  %v1492_v11 = vpop.f32.mrf.mxu1 }
  0xb1   : > { %v1155_v7 = vpop.f32.mrf.mxu0 }
  0xb2   : > { %v2923_v9 = vpop.eup %2922  ;;  %v1485_v10 = vadd.f32 %v1484_v48, %v1155_v7  ;;  %2695 = vmatmul.msk.bf16.gmra.mxu1 %vm951_vm0, %v2224_v8  ;;  %v2775_v7 = vld [vmem:[%s3252_s23 + $0xb4] sm:$0xf0]  ;;  %v2483_v8 = vld [vmem:[%s3252_s23 + $0x2b0] sm:$0xf] }
  0xb3   : > { %1931 = vst.msk [vmem:[%s3381_s13] sm:$0xff] %vm1930_vm1, %v2923_v9  ;;  %2728 = vmatmul.msk.bf16.gmra.mxu3 %vm951_vm0, %v2488_v15  ;;  %v2839_v9 = vld [vmem:[%s3252_s23 + $0x2b4] sm:$0xf0] }
  0xb4   : > { %2924 = vtanh.f32 %v1485_v10  ;;  %v2484_v16 = vor.u32 %v2839_v9, %v2483_v8 }
  0xb6   : > { %v3401_v27 = vpop.f32.mrf.mxu3 }
  0xb7   : > { %v3396_v20 = vpop.f32.mrf.mxu2  ;;  %v1494_v26 = vpop.f32.mrf.mxu1 }
  0xb9   : > { %v1158_v22 = vpop.f32.mrf.mxu0 }
  0xba   : > { %v2925_v24 = vpop.eup %2924  ;;  %v1488_v25 = vadd.f32 %v1487_v53, %v1158_v22  ;;  %v2245_v22 = vld [vmem:[%s3252_s23 + $0xd8] sm:$0xf0] }
  0xbb   : > { %1932 = vst.msk [vmem:[%s3381_s13 + $0x8] sm:$0xff] %vm1930_vm1, %v2925_v24 }
  0xbc   : > { %2926 = vtanh.f32 %v1488_v25  ;;  %1197 = vmatmul.bf16.gmra.mxu0 %v2212_v21  ;;  %1357 = vmatmul.bf16.gmra.mxu2 %v2468_v23 }
  0xbe   : > { %v3410_v39 = vpop.f32.mrf.mxu3 }
  0xbf   : > { %v1318_v30 = vpop.f32.mrf.mxu2  ;;  %v1497_v36 = vpop.f32.mrf.mxu1 }
  0xc0   : > { %v1648_v31 = vadd.f32 %v3358_v49, %v1318_v30 }
  0xc1   : > { %v1160_v32 = vpop.f32.mrf.mxu0 }
  0xc2   : > { %v2927_v34 = vpop.eup %2926  ;;  %v1490_v35 = vadd.f32 %v1489_v2, %v1160_v32  ;;  %2928 = vtanh.f32 %v1648_v31  ;;  %2696 = vmatmul.msk.bf16.gmra.mxu1 %vm951_vm0, %v2232_v33  ;;  %v2501_v2 = vld [vmem:[%s3252_s23 + $0x2d8] sm:$0xf0]  ;;  %v2844_v32 = vld [vmem:[%s3252_s23 + $0x2e4] sm:$0xf]  ;;  %v2509_v33 = vld [vmem:[%s3252_s23 + $0x2e8] sm:$0xf0] }
  0xc3   : > { %1933 = vst.msk [vmem:[%s3381_s13 + $0x10] sm:$0xff] %vm1930_vm1, %v2927_v34  ;;  %2729 = vmatmul.msk.bf16.gmra.mxu3 %vm951_vm0, %v2496_v40 }
  0xc4   : > { %2930 = vtanh.f32 %v1490_v35  ;;  %v2235_v35 = vld [vmem:[%s3252_s23 + $0xc0] sm:$0xf] }
  0xc6   : > { %v3423_v54 = vpop.f32.mrf.mxu3 }
  0xc7   : > { %v1320_v45 = vpop.f32.mrf.mxu2  ;;  %v1499_v53 = vpop.f32.mrf.mxu1 }
  0xc8   : > { %v2929_v47 = vpop.eup %2928  ;;  %v1650_v48 = vadd.f32 %v3364_v56, %v1320_v45  ;;  %v2237_v56 = vld [vmem:[%s3252_s23 + $0xc8] sm:$0xf0]  ;;  %v2492_v45 = vor.u32 %v2841_v38, %v2491_v37 }
  0xc9   : > { %v1163_v49 = vpop.f32.mrf.mxu0  ;;  %1997 = vst.msk [vmem:[%s3381_s13 + $0x210] sm:$0xff] %vm1930_vm1, %v2929_v47  ;;  %v2240_v61 = vor.u32 %v2776_v55, %v2237_v56 }
  0xca   : > { %v2931_v51 = vpop.eup %2930  ;;  %v1493_v52 = vadd.f32 %v1492_v11, %v1163_v49  ;;  %2932 = vtanh.f32 %v1650_v48  ;;  %v2228_v11 = vor.u32 %v2775_v7, %v2227_v5 }
  0xcb   : > { %1934 = vst.msk [vmem:[%s3381_s13 + $0x18] sm:$0xff] %vm1930_vm1, %v2931_v51 }
  0xcc   : > { %2934 = vtanh.f32 %v1493_v52  ;;  %1202 = vmatmul.bf16.gmra.mxu0 %v2220_v46  ;;  %1362 = vmatmul.bf16.gmra.mxu2 %v2476_v50  ;;  %v2253_v50 = vld [vmem:[%s3252_s23 + $0xe8] sm:$0xf0] }
  0xce   : > { %v3434_v4 = vpop.f32.mrf.mxu3 }
  0xcf   : > { %v1323_v57 = vpop.f32.mrf.mxu2  ;;  %v1502_v0 = vpop.f32.mrf.mxu1 }
  0xd0   : > { %v2933_v58 = vpop.eup %2932  ;;  %v1653_v59 = vadd.f32 %v3372_v3, %v1323_v57  ;;  %v2504_v3 = vor.u32 %v2842_v1, %v2501_v2  ;;  %v2499_v1 = vld [vmem:[%s3252_s23 + $0x2d0] sm:$0xf]  ;;  %v2843_v2 = vld [vmem:[%s3252_s23 + $0x2d4] sm:$0xf0] }
  0xd1   : > { %v1165_v60 = vpop.f32.mrf.mxu0  ;;  %1998 = vst.msk [vmem:[%s3381_s13 + $0x218] sm:$0xff] %vm1930_vm1, %v2933_v58 }
  0xd2   : > { %v2935_v62 = vpop.eup %2934  ;;  %v1495_v63 = vadd.f32 %v1494_v26, %v1165_v60  ;;  %2936 = vtanh.f32 %v1653_v59  ;;  %2697 = vmatmul.msk.bf16.gmra.mxu1 %vm951_vm0, %v2240_v61  ;;  %v2846_v60 = vld [vmem:[%s3252_s23 + $0x2f4] sm:$0xf]  ;;  %v2517_v61 = vld [vmem:[%s3252_s23 + $0x2f8] sm:$0xf0] }
  0xd3   : > { %1935 = vst.msk [vmem:[%s3381_s13 + $0x20] sm:$0xff] %vm1930_vm1, %v2935_v62  ;;  %2730 = vmatmul.msk.bf16.gmra.mxu3 %vm951_vm0, %v2504_v3 }
  0xd4   : > { %2938 = vtanh.f32 %v1495_v63  ;;  %v2243_v63 = vld [vmem:[%s3252_s23 + $0xd0] sm:$0xf] }
  0xd6   : > { %v3447_v21 = vpop.f32.mrf.mxu3 }
  0xd7   : > { %v1325_v10 = vpop.f32.mrf.mxu2  ;;  %v1504_v19 = vpop.f32.mrf.mxu1 }
  0xd8   : > { %v2937_v12 = vpop.eup %2936  ;;  %v1655_v13 = vadd.f32 %v3389_v14, %v1325_v10  ;;  %v2778_v14 = vld [vmem:[%s3252_s23 + $0xd4] sm:$0xf]  ;;  %v2500_v10 = vor.u32 %v2843_v2, %v2499_v1 }
  0xd9   : > { %v1168_v15 = vpop.f32.mrf.mxu0  ;;  %1999 = vst.msk [vmem:[%s3381_s13 + $0x220] sm:$0xff] %vm1930_vm1, %v2937_v12  ;;  %v2248_v28 = vor.u32 %v2778_v14, %v2245_v22 }
  0xda   : > { %v2939_v17 = vpop.eup %2938  ;;  %v1498_v18 = vadd.f32 %v1497_v36, %v1168_v15  ;;  %2940 = vtanh.f32 %v1655_v13  ;;  %v2777_v36 = vld [vmem:[%s3252_s23 + $0xc4] sm:$0xf0] }
  0xdb   : > { %1936 = vst.msk [vmem:[%s3381_s13 + $0x28] sm:$0xff] %vm1930_vm1, %v2939_v17  ;;  %v2236_v41 = vor.u32 %v2777_v36, %v2235_v35 }
  0xdc   : > { %2942 = vtanh.f32 %v1498_v18  ;;  %1207 = vmatmul.bf16.gmra.mxu0 %v2228_v11  ;;  %1367 = vmatmul.bf16.gmra.mxu2 %v2484_v16  ;;  %v2261_v16 = vld [vmem:[%s3252_s23 + $0xf8] sm:$0xf0] }
  0xde   : > { %v3458_v34 = vpop.f32.mrf.mxu3 }
  0xdf   : > { %v1328_v23 = vpop.f32.mrf.mxu2  ;;  %v1507_v31 = vpop.f32.mrf.mxu1 }
  0xe0   : > { %v2941_v24 = vpop.eup %2940  ;;  %v1658_v25 = vadd.f32 %v3401_v27, %v1328_v23  ;;  %v2512_v27 = vor.u32 %v2844_v32, %v2509_v33  ;;  %v2507_v32 = vld [vmem:[%s3252_s23 + $0x2e0] sm:$0xf]  ;;  %v2845_v33 = vld [vmem:[%s3252_s23 + $0x2e4] sm:$0xf0] }
  0xe1   : > { %v1170_v26 = vpop.f32.mrf.mxu0  ;;  %2000 = vst.msk [vmem:[%s3381_s13 + $0x228] sm:$0xff] %vm1930_vm1, %v2941_v24 }
  0xe2   : > { %v2943_v29 = vpop.eup %2942  ;;  %v1500_v30 = vadd.f32 %v1499_v53, %v1170_v26  ;;  %2944 = vtanh.f32 %v1658_v25  ;;  %2698 = vmatmul.msk.bf16.gmra.mxu1 %vm951_vm0, %v2248_v28  ;;  %v2848_v26 = vld [vmem:[%s3252_s23 + $0x304] sm:$0xf]  ;;  %v2525_v28 = vld [vmem:[%s3252_s23 + $0x308] sm:$0xf0] }
  0xe3   : > { %1937 = vst.msk [vmem:[%s3381_s13 + $0x30] sm:$0xff] %vm1930_vm1, %v2943_v29  ;;  %2731 = vmatmul.msk.bf16.gmra.mxu3 %vm951_vm0, %v2512_v27 }
  0xe4   : > { %2946 = vtanh.f32 %v1500_v30  ;;  %v2251_v30 = vld [vmem:[%s3252_s23 + $0xe0] sm:$0xf] }
  0xe6   : > { %v3471_v49 = vpop.f32.mrf.mxu3 }
  0xe7   : > { %v1330_v40 = vpop.f32.mrf.mxu2  ;;  %v1509_v48 = vpop.f32.mrf.mxu1 }
  0xe8   : > { %v2945_v42 = vpop.eup %2944  ;;  %v1660_v43 = vadd.f32 %v3410_v39, %v1330_v40  ;;  %v2780_v39 = vld [vmem:[%s3252_s23 + $0xe4] sm:$0xf]  ;;  %v2508_v40 = vor.u32 %v2845_v33, %v2507_v32 }
  0xe9   : > { %v1173_v44 = vpop.f32.mrf.mxu0  ;;  %2001 = vst.msk [vmem:[%s3381_s13 + $0x230] sm:$0xff] %vm1930_vm1, %v2945_v42  ;;  %v2256_v56 = vor.u32 %v2780_v39, %v2253_v50 }
  0xea   : > { %v2947_v46 = vpop.eup %2946  ;;  %v1503_v47 = vadd.f32 %v1502_v0, %v1173_v44  ;;  %2948 = vtanh.f32 %v1660_v43  ;;  %v2779_v0 = vld [vmem:[%s3252_s23 + $0xd4] sm:$0xf0] }
  0xeb   : > { %1938 = vst.msk [vmem:[%s3381_s13 + $0x38] sm:$0xff] %vm1930_vm1, %v2947_v46  ;;  %v2244_v5 = vor.u32 %v2779_v0, %v2243_v63 }
  0xec   : > { %2950 = vtanh.f32 %v1503_v47  ;;  %1212 = vmatmul.bf16.gmra.mxu0 %v2236_v41  ;;  %1372 = vmatmul.bf16.gmra.mxu2 %v2492_v45  ;;  %v2269_v45 = vld [vmem:[%s3252_s23 + $0x108] sm:$0xf0] }
  0xee   : > { %v3482_v62 = vpop.f32.mrf.mxu3 }
  0xef   : > { %v1333_v51 = vpop.f32.mrf.mxu2  ;;  %v1512_v59 = vpop.f32.mrf.mxu1 }
  0xf0   : > { %v2949_v52 = vpop.eup %2948  ;;  %v1663_v53 = vadd.f32 %v3423_v54, %v1333_v51  ;;  %v2520_v54 = vor.u32 %v2846_v60, %v2517_v61  ;;  %v2515_v60 = vld [vmem:[%s3252_s23 + $0x2f0] sm:$0xf]  ;;  %v2847_v61 = vld [vmem:[%s3252_s23 + $0x2f4] sm:$0xf0] }
  0xf1   : > { %v1175_v55 = vpop.f32.mrf.mxu0  ;;  %2002 = vst.msk [vmem:[%s3381_s13 + $0x238] sm:$0xff] %vm1930_vm1, %v2949_v52 }
  0xf2   : > { %v2951_v57 = vpop.eup %2950  ;;  %v1505_v58 = vadd.f32 %v1504_v19, %v1175_v55  ;;  %2952 = vtanh.f32 %v1663_v53  ;;  %2699 = vmatmul.msk.bf16.gmra.mxu1 %vm951_vm0, %v2256_v56  ;;  %v2850_v55 = vld [vmem:[%s3252_s23 + $0x314] sm:$0xf]  ;;  %v2533_v56 = vld [vmem:[%s3252_s23 + $0x318] sm:$0xf0] }
  0xf3   : > { %1939 = vst.msk [vmem:[%s3381_s13 + $0x40] sm:$0xff] %vm1930_vm1, %v2951_v57  ;;  %2732 = vmatmul.msk.bf16.gmra.mxu3 %vm951_vm0, %v2520_v54 }
  0xf4   : > { %2954 = vtanh.f32 %v1505_v58  ;;  %v2259_v58 = vld [vmem:[%s3252_s23 + $0xf0] sm:$0xf] }
  0xf6   : > { %v3495_v15 = vpop.f32.mrf.mxu3 }
  0xf7   : > { %v1335_v3 = vpop.f32.mrf.mxu2  ;;  %v1514_v13 = vpop.f32.mrf.mxu1 }
  0xf8   : > { %v2953_v7 = vpop.eup %2952  ;;  %v1665_v8 = vadd.f32 %v3434_v4, %v1335_v3  ;;  %v2782_v4 = vld [vmem:[%s3252_s23 + $0xf4] sm:$0xf]  ;;  %v2516_v3 = vor.u32 %v2847_v61, %v2515_v60 }
  0xf9   : > { %v1178_v9 = vpop.f32.mrf.mxu0  ;;  %2003 = vst.msk [vmem:[%s3381_s13 + $0x240] sm:$0xff] %vm1930_vm1, %v2953_v7  ;;  %v2264_v22 = vor.u32 %v2782_v4, %v2261_v16 }
  0xfa   : > { %v2955_v11 = vpop.eup %2954  ;;  %v1508_v12 = vadd.f32 %v1507_v31, %v1178_v9  ;;  %2956 = vtanh.f32 %v1665_v8  ;;  %v2781_v31 = vld [vmem:[%s3252_s23 + $0xe4] sm:$0xf0] }
  0xfb   : > { %1940 = vst.msk [vmem:[%s3381_s13 + $0x48] sm:$0xff] %vm1930_vm1, %v2955_v11  ;;  %v2252_v35 = vor.u32 %v2781_v31, %v2251_v30 }
  0xfc   : > { %2958 = vtanh.f32 %v1508_v12  ;;  %1217 = vmatmul.bf16.gmra.mxu0 %v2244_v5  ;;  %1377 = vmatmul.bf16.gmra.mxu2 %v2500_v10  ;;  %v2277_v10 = vld [vmem:[%s3252_s23 + $0x118] sm:$0xf0] }
  0xfe   : > { %v3506_v29 = vpop.f32.mrf.mxu3 }
  0xff   : > { %v1338_v17 = vpop.f32.mrf.mxu2  ;;  %v1517_v25 = vpop.f32.mrf.mxu1 }
 0x100   : > { %v2957_v18 = vpop.eup %2956  ;;  %v1668_v19 = vadd.f32 %v3447_v21, %v1338_v17  ;;  %v2528_v21 = vor.u32 %v2848_v26, %v2525_v28  ;;  %v2523_v26 = vld [vmem:[%s3252_s23 + $0x300] sm:$0xf]  ;;  %v2849_v28 = vld [vmem:[%s3252_s23 + $0x304] sm:$0xf0] }
 0x101   : > { %v1180_v14 = vpop.f32.mrf.mxu0  ;;  %2004 = vst.msk [vmem:[%s3381_s13 + $0x248] sm:$0xff] %vm1930_vm1, %v2957_v18 }
 0x102   : > { %v2959_v23 = vpop.eup %2958  ;;  %v1510_v24 = vadd.f32 %v1509_v48, %v1180_v14  ;;  %2960 = vtanh.f32 %v1668_v19  ;;  %2700 = vmatmul.msk.bf16.gmra.mxu1 %vm951_vm0, %v2264_v22  ;;  %v2852_v14 = vld [vmem:[%s3252_s23 + $0x324] sm:$0xf]  ;;  %v2541_v22 = vld [vmem:[%s3252_s23 + $0x328] sm:$0xf0] }
 0x103   : > { %1941 = vst.msk [vmem:[%s3381_s13 + $0x50] sm:$0xff] %vm1930_vm1, %v2959_v23  ;;  %2733 = vmatmul.msk.bf16.gmra.mxu3 %vm951_vm0, %v2528_v21 }
 0x104   : > { %2962 = vtanh.f32 %v1510_v24  ;;  %v2267_v24 = vld [vmem:[%s3252_s23 + $0x100] sm:$0xf] }
 0x106   : > { %v3519_v44 = vpop.f32.mrf.mxu3 }
 0x107   : > { %v1340_v27 = vpop.f32.mrf.mxu2  ;;  %v1519_v43 = vpop.f32.mrf.mxu1 }
 0x108   : > { %v2961_v36 = vpop.eup %2960  ;;  %v1670_v37 = vadd.f32 %v3458_v34, %v1340_v27  ;;  %v2784_v34 = vld [vmem:[%s3252_s23 + $0x104] sm:$0xf]  ;;  %v2524_v27 = vor.u32 %v2849_v28, %v2523_v26 }
 0x109   : > { %v1183_v38 = vpop.f32.mrf.mxu0  ;;  %2005 = vst.msk [vmem:[%s3381_s13 + $0x250] sm:$0xff] %vm1930_vm1, %v2961_v36  ;;  %v2272_v50 = vor.u32 %v2784_v34, %v2269_v45 }
 0x10a   : > { %v2963_v41 = vpop.eup %2962  ;;  %v1513_v42 = vadd.f32 %v1512_v59, %v1183_v38  ;;  %2964 = vtanh.f32 %v1670_v37  ;;  %v2783_v59 = vld [vmem:[%s3252_s23 + $0xf4] sm:$0xf0] }
 0x10b   : > { %1942 = vst.msk [vmem:[%s3381_s13 + $0x58] sm:$0xff] %vm1930_vm1, %v2963_v41  ;;  %v2260_v63 = vor.u32 %v2783_v59, %v2259_v58 }
 0x10c   : > { %2966 = vtanh.f32 %v1513_v42  ;;  %1222 = vmatmul.bf16.gmra.mxu0 %v2252_v35  ;;  %1382 = vmatmul.bf16.gmra.mxu2 %v2508_v40  ;;  %v2285_v40 = vld [vmem:[%s3252_s23 + $0x128] sm:$0xf0] }
 0x10e   : > { %v3530_v57 = vpop.f32.mrf.mxu3 }
 0x10f   : > { %v1343_v46 = vpop.f32.mrf.mxu2  ;;  %v1522_v53 = vpop.f32.mrf.mxu1 }
 0x110   : > { %v2965_v47 = vpop.eup %2964  ;;  %v1673_v48 = vadd.f32 %v3471_v49, %v1343_v46  ;;  %v2536_v49 = vor.u32 %v2850_v55, %v2533_v56  ;;  %v2531_v55 = vld [vmem:[%s3252_s23 + $0x310] sm:$0xf]  ;;  %v2851_v56 = vld [vmem:[%s3252_s23 + $0x314] sm:$0xf0] }
 0x111   : > { %v1185_v39 = vpop.f32.mrf.mxu0  ;;  %2006 = vst.msk [vmem:[%s3381_s13 + $0x258] sm:$0xff] %vm1930_vm1, %v2965_v47 }
 0x112   : > { %v2967_v51 = vpop.eup %2966  ;;  %v1515_v52 = vadd.f32 %v1514_v13, %v1185_v39  ;;  %2968 = vtanh.f32 %v1673_v48  ;;  %2701 = vmatmul.msk.bf16.gmra.mxu1 %vm951_vm0, %v2272_v50  ;;  %v2854_v39 = vld [vmem:[%s3252_s23 + $0x334] sm:$0xf]  ;;  %v2549_v50 = vld [vmem:[%s3252_s23 + $0x338] sm:$0xf0] }
 0x113   : > { %1943 = vst.msk [vmem:[%s3381_s13 + $0x60] sm:$0xff] %vm1930_vm1, %v2967_v51  ;;  %2734 = vmatmul.msk.bf16.gmra.mxu3 %vm951_vm0, %v2536_v49 }
 0x114   : > { %2970 = vtanh.f32 %v1515_v52  ;;  %v2275_v52 = vld [vmem:[%s3252_s23 + $0x110] sm:$0xf] }
 0x116   : > { %v3543_v9 = vpop.f32.mrf.mxu3 }
 0x117   : > { %v1345_v54 = vpop.f32.mrf.mxu2  ;;  %v1524_v8 = vpop.f32.mrf.mxu1 }
 0x118   : > { %v2969_v0 = vpop.eup %2968  ;;  %v1675_v1 = vadd.f32 %v3482_v62, %v1345_v54  ;;  %v2786_v62 = vld [vmem:[%s3252_s23 + $0x114] sm:$0xf]  ;;  %v2532_v54 = vor.u32 %v2851_v56, %v2531_v55 }
 0x119   : > { %v1188_v2 = vpop.f32.mrf.mxu0  ;;  %2007 = vst.msk [vmem:[%s3381_s13 + $0x260] sm:$0xff] %vm1930_vm1, %v2969_v0  ;;  %v2280_v16 = vor.u32 %v2786_v62, %v2277_v10 }
 0x11a   : > { %v2971_v5 = vpop.eup %2970  ;;  %v1518_v7 = vadd.f32 %v1517_v25, %v1188_v2  ;;  %2972 = vtanh.f32 %v1675_v1  ;;  %v2785_v25 = vld [vmem:[%s3252_s23 + $0x104] sm:$0xf0] }
 0x11b   : > { %1944 = vst.msk [vmem:[%s3381_s13 + $0x68] sm:$0xff] %vm1930_vm1, %v2971_v5  ;;  %v2268_v30 = vor.u32 %v2785_v25, %v2267_v24 }
 0x11c   : > { %2974 = vtanh.f32 %v1518_v7  ;;  %1227 = vmatmul.bf16.gmra.mxu0 %v2260_v63  ;;  %1387 = vmatmul.bf16.gmra.mxu2 %v2516_v3  ;;  %v2293_v3 = vld [vmem:[%s3252_s23 + $0x138] sm:$0xf0] }
 0x11e   : > { %v3554_v23 = vpop.f32.mrf.mxu3 }
 0x11f   : > { %v1348_v11 = vpop.f32.mrf.mxu2  ;;  %v1527_v19 = vpop.f32.mrf.mxu1 }
 0x120   : > { %v2973_v12 = vpop.eup %2972  ;;  %v1678_v13 = vadd.f32 %v3495_v15, %v1348_v11  ;;  %v2544_v15 = vor.u32 %v2852_v14, %v2541_v22  ;;  %v2539_v14 = vld [vmem:[%s3252_s23 + $0x320] sm:$0xf]  ;;  %v2853_v22 = vld [vmem:[%s3252_s23 + $0x324] sm:$0xf0] }
 0x121   : > { %v1190_v4 = vpop.f32.mrf.mxu0  ;;  %2008 = vst.msk [vmem:[%s3381_s13 + $0x268] sm:$0xff] %vm1930_vm1, %v2973_v12 }
 0x122   : > { %v2975_v17 = vpop.eup %2974  ;;  %v1520_v18 = vadd.f32 %v1519_v43, %v1190_v4  ;;  %2976 = vtanh.f32 %v1678_v13  ;;  %2702 = vmatmul.msk.bf16.gmra.mxu1 %vm951_vm0, %v2280_v16  ;;  %v2856_v4 = vld [vmem:[%s3252_s23 + $0x344] sm:$0xf]  ;;  %v2557_v16 = vld [vmem:[%s3252_s23 + $0x348] sm:$0xf0] }
 0x123   : > { %1945 = vst.msk [vmem:[%s3381_s13 + $0x70] sm:$0xff] %vm1930_vm1, %v2975_v17  ;;  %2735 = vmatmul.msk.bf16.gmra.mxu3 %vm951_vm0, %v2544_v15 }
 0x124   : > { %2978 = vtanh.f32 %v1520_v18  ;;  %v2283_v18 = vld [vmem:[%s3252_s23 + $0x120] sm:$0xf] }
 0x126   : > { %v3567_v38 = vpop.f32.mrf.mxu3 }
 0x127   : > { %v1350_v21 = vpop.f32.mrf.mxu2  ;;  %v1529_v37 = vpop.f32.mrf.mxu1 }
 0x128   : > { %v2977_v31 = vpop.eup %2976  ;;  %v1680_v32 = vadd.f32 %v3506_v29, %v1350_v21  ;;  %v2788_v29 = vld [vmem:[%s3252_s23 + $0x124] sm:$0xf]  ;;  %v2540_v21 = vor.u32 %v2853_v22, %v2539_v14 }
 0x129   : > { %v1193_v33 = vpop.f32.mrf.mxu0  ;;  %2009 = vst.msk [vmem:[%s3381_s13 + $0x270] sm:$0xff] %vm1930_vm1, %v2977_v31  ;;  %v2288_v45 = vor.u32 %v2788_v29, %v2285_v40 }
 0x12a   : > { %v2979_v35 = vpop.eup %2978  ;;  %v1523_v36 = vadd.f32 %v1522_v53, %v1193_v33  ;;  %2980 = vtanh.f32 %v1680_v32  ;;  %v2787_v53 = vld [vmem:[%s3252_s23 + $0x114] sm:$0xf0] }
 0x12b   : > { %1946 = vst.msk [vmem:[%s3381_s13 + $0x78] sm:$0xff] %vm1930_vm1, %v2979_v35  ;;  %v2276_v58 = vor.u32 %v2787_v53, %v2275_v52 }
 0x12c   : > { %2982 = vtanh.f32 %v1523_v36  ;;  %1232 = vmatmul.bf16.gmra.mxu0 %v2268_v30  ;;  %1392 = vmatmul.bf16.gmra.mxu2 %v2524_v27  ;;  %v2301_v27 = vld [vmem:[%s3252_s23 + $0x148] sm:$0xf0] }
 0x12e   : > { %v3578_v51 = vpop.f32.mrf.mxu3 }
 0x12f   : > { %v1353_v41 = vpop.f32.mrf.mxu2  ;;  %v1532_v48 = vpop.f32.mrf.mxu1 }
 0x130   : > { %v2981_v42 = vpop.eup %2980  ;;  %v1683_v43 = vadd.f32 %v3519_v44, %v1353_v41  ;;  %v2552_v44 = vor.u32 %v2854_v39, %v2549_v50  ;;  %v2547_v39 = vld [vmem:[%s3252_s23 + $0x330] sm:$0xf]  ;;  %v2855_v50 = vld [vmem:[%s3252_s23 + $0x334] sm:$0xf0] }
 0x131   : > { %v1195_v34 = vpop.f32.mrf.mxu0  ;;  %2010 = vst.msk [vmem:[%s3381_s13 + $0x278] sm:$0xff] %vm1930_vm1, %v2981_v42 }
 0x132   : > { %v2983_v46 = vpop.eup %2982  ;;  %v1525_v47 = vadd.f32 %v1524_v8, %v1195_v34  ;;  %2984 = vtanh.f32 %v1683_v43  ;;  %2703 = vmatmul.msk.bf16.gmra.mxu1 %vm951_vm0, %v2288_v45  ;;  %v2858_v34 = vld [vmem:[%s3252_s23 + $0x354] sm:$0xf]  ;;  %v2565_v45 = vld [vmem:[%s3252_s23 + $0x358] sm:$0xf0] }
 0x133   : > { %1947 = vst.msk [vmem:[%s3381_s13 + $0x80] sm:$0xff] %vm1930_vm1, %v2983_v46  ;;  %2736 = vmatmul.msk.bf16.gmra.mxu3 %vm951_vm0, %v2552_v44 }
 0x134   : > { %2986 = vtanh.f32 %v1525_v47  ;;  %v2291_v47 = vld [vmem:[%s3252_s23 + $0x130] sm:$0xf] }
 0x136   : > { %v3591_v2 = vpop.f32.mrf.mxu3 }
 0x137   : > { %v1355_v49 = vpop.f32.mrf.mxu2  ;;  %v1534_v1 = vpop.f32.mrf.mxu1 }
 0x138   : > { %v2985_v59 = vpop.eup %2984  ;;  %v1685_v60 = vadd.f32 %v3530_v57, %v1355_v49  ;;  %v2790_v57 = vld [vmem:[%s3252_s23 + $0x134] sm:$0xf]  ;;  %v2548_v49 = vor.u32 %v2855_v50, %v2547_v39 }
 0x139   : > { %v1198_v61 = vpop.f32.mrf.mxu0  ;;  %2011 = vst.msk [vmem:[%s3381_s13 + $0x280] sm:$0xff] %vm1930_vm1, %v2985_v59  ;;  %v2296_v10 = vor.u32 %v2790_v57, %v2293_v3 }
 0x13a   : > { %v2987_v63 = vpop.eup %2986  ;;  %v1528_v0 = vadd.f32 %v1527_v19, %v1198_v61  ;;  %2988 = vtanh.f32 %v1685_v60  ;;  %v2789_v19 = vld [vmem:[%s3252_s23 + $0x124] sm:$0xf0] }
 0x13b   : > { %1948 = vst.msk [vmem:[%s3381_s13 + $0x88] sm:$0xff] %vm1930_vm1, %v2987_v63  ;;  %v2284_v24 = vor.u32 %v2789_v19, %v2283_v18 }
 0x13c   : > { %2990 = vtanh.f32 %v1528_v0  ;;  %1237 = vmatmul.bf16.gmra.mxu0 %v2276_v58  ;;  %1397 = vmatmul.bf16.gmra.mxu2 %v2532_v54  ;;  %v2309_v54 = vld [vmem:[%s3252_s23 + $0x158] sm:$0xf0] }
 0x13e   : > { %v3602_v17 = vpop.f32.mrf.mxu3 }
 0x13f   : > { %v1358_v5 = vpop.f32.mrf.mxu2  ;;  %v1537_v13 = vpop.f32.mrf.mxu1 }
 0x140   : > { %v2989_v7 = vpop.eup %2988  ;;  %v1688_v8 = vadd.f32 %v3543_v9, %v1358_v5  ;;  %v2560_v9 = vor.u32 %v2856_v4, %v2557_v16  ;;  %v2555_v4 = vld [vmem:[%s3252_s23 + $0x340] sm:$0xf]  ;;  %v2857_v16 = vld [vmem:[%s3252_s23 + $0x344] sm:$0xf0] }
 0x141   : > { %v1200_v62 = vpop.f32.mrf.mxu0  ;;  %2012 = vst.msk [vmem:[%s3381_s13 + $0x288] sm:$0xff] %vm1930_vm1, %v2989_v7 }
 0x142   : > { %v2991_v11 = vpop.eup %2990  ;;  %v1530_v12 = vadd.f32 %v1529_v37, %v1200_v62  ;;  %2992 = vtanh.f32 %v1688_v8  ;;  %2704 = vmatmul.msk.bf16.gmra.mxu1 %vm951_vm0, %v2296_v10  ;;  %v2860_v62 = vld [vmem:[%s3252_s23 + $0x364] sm:$0xf]  ;;  %v2573_v10 = vld [vmem:[%s3252_s23 + $0x368] sm:$0xf0] }
 0x143   : > { %1949 = vst.msk [vmem:[%s3381_s13 + $0x90] sm:$0xff] %vm1930_vm1, %v2991_v11  ;;  %2737 = vmatmul.msk.bf16.gmra.mxu3 %vm951_vm0, %v2560_v9 }
 0x144   : > { %2994 = vtanh.f32 %v1530_v12  ;;  %v2299_v12 = vld [vmem:[%s3252_s23 + $0x140] sm:$0xf] }
 0x146   : > { %v3615_v33 = vpop.f32.mrf.mxu3 }
 0x147   : > { %v1360_v15 = vpop.f32.mrf.mxu2  ;;  %v1539_v32 = vpop.f32.mrf.mxu1 }
 0x148   : > { %v2993_v25 = vpop.eup %2992  ;;  %v1690_v26 = vadd.f32 %v3554_v23, %v1360_v15  ;;  %v2792_v23 = vld [vmem:[%s3252_s23 + $0x144] sm:$0xf]  ;;  %v2556_v15 = vor.u32 %v2857_v16, %v2555_v4 }
 0x149   : > { %v1203_v28 = vpop.f32.mrf.mxu0  ;;  %2013 = vst.msk [vmem:[%s3381_s13 + $0x290] sm:$0xff] %vm1930_vm1, %v2993_v25  ;;  %v2304_v40 = vor.u32 %v2792_v23, %v2301_v27 }
 0x14a   : > { %v2995_v30 = vpop.eup %2994  ;;  %v1533_v31 = vadd.f32 %v1532_v48, %v1203_v28  ;;  %2996 = vtanh.f32 %v1690_v26  ;;  %v2791_v48 = vld [vmem:[%s3252_s23 + $0x134] sm:$0xf0] }
 0x14b   : > { %1950 = vst.msk [vmem:[%s3381_s13 + $0x98] sm:$0xff] %vm1930_vm1, %v2995_v30  ;;  %v2292_v52 = vor.u32 %v2791_v48, %v2291_v47 }
 0x14c   : > { %2998 = vtanh.f32 %v1533_v31  ;;  %1242 = vmatmul.bf16.gmra.mxu0 %v2284_v24  ;;  %1402 = vmatmul.bf16.gmra.mxu2 %v2540_v21  ;;  %v2317_v21 = vld [vmem:[%s3252_s23 + $0x168] sm:$0xf0] }
 0x14e   : > { %v3626_v46 = vpop.f32.mrf.mxu3 }
 0x14f   : > { %v1363_v35 = vpop.f32.mrf.mxu2  ;;  %v1542_v43 = vpop.f32.mrf.mxu1 }
 0x150   : > { %v2997_v36 = vpop.eup %2996  ;;  %v1693_v37 = vadd.f32 %v3567_v38, %v1363_v35  ;;  %v2568_v38 = vor.u32 %v2858_v34, %v2565_v45  ;;  %v2563_v34 = vld [vmem:[%s3252_s23 + $0x350] sm:$0xf]  ;;  %v2859_v45 = vld [vmem:[%s3252_s23 + $0x354] sm:$0xf0] }
 0x151   : > { %v1205_v29 = vpop.f32.mrf.mxu0  ;;  %2014 = vst.msk [vmem:[%s3381_s13 + $0x298] sm:$0xff] %vm1930_vm1, %v2997_v36 }
 0x152   : > { %v2999_v41 = vpop.eup %2998  ;;  %v1535_v42 = vadd.f32 %v1534_v1, %v1205_v29  ;;  %3000 = vtanh.f32 %v1693_v37  ;;  %2705 = vmatmul.msk.bf16.gmra.mxu1 %vm951_vm0, %v2304_v40  ;;  %v2862_v29 = vld [vmem:[%s3252_s23 + $0x374] sm:$0xf]  ;;  %v2581_v40 = vld [vmem:[%s3252_s23 + $0x378] sm:$0xf0] }
 0x153   : > { %1951 = vst.msk [vmem:[%s3381_s13 + $0xa0] sm:$0xff] %vm1930_vm1, %v2999_v41  ;;  %2738 = vmatmul.msk.bf16.gmra.mxu3 %vm951_vm0, %v2568_v38 }
 0x154   : > { %3002 = vtanh.f32 %v1535_v42  ;;  %v2307_v42 = vld [vmem:[%s3252_s23 + $0x150] sm:$0xf] }
 0x156   : > { %v3639_v61 = vpop.f32.mrf.mxu3 }
 0x157   : > { %v1365_v44 = vpop.f32.mrf.mxu2  ;;  %v1544_v60 = vpop.f32.mrf.mxu1 }
 0x158   : > { %v3001_v53 = vpop.eup %3000  ;;  %v1695_v55 = vadd.f32 %v3578_v51, %v1365_v44  ;;  %v2794_v51 = vld [vmem:[%s3252_s23 + $0x154] sm:$0xf]  ;;  %v2564_v44 = vor.u32 %v2859_v45, %v2563_v34 }
 0x159   : > { %v1208_v56 = vpop.f32.mrf.mxu0  ;;  %2015 = vst.msk [vmem:[%s3381_s13 + $0x2a0] sm:$0xff] %vm1930_vm1, %v3001_v53  ;;  %v2312_v3 = vor.u32 %v2794_v51, %v2309_v54 }
 0x15a   : > { %v3003_v58 = vpop.eup %3002  ;;  %v1538_v59 = vadd.f32 %v1537_v13, %v1208_v56  ;;  %3004 = vtanh.f32 %v1695_v55  ;;  %v2793_v13 = vld [vmem:[%s3252_s23 + $0x144] sm:$0xf0] }
 0x15b   : > { %1952 = vst.msk [vmem:[%s3381_s13 + $0xa8] sm:$0xff] %vm1930_vm1, %v3003_v58  ;;  %v2300_v18 = vor.u32 %v2793_v13, %v2299_v12 }
 0x15c   : > { %3006 = vtanh.f32 %v1538_v59  ;;  %1247 = vmatmul.bf16.gmra.mxu0 %v2292_v52  ;;  %1407 = vmatmul.bf16.gmra.mxu2 %v2548_v49  ;;  %v2325_v49 = vld [vmem:[%s3252_s23 + $0x178] sm:$0xf0] }
 0x15e   : > { %v3650_v11 = vpop.f32.mrf.mxu3 }
 0x15f   : > { %v1368_v63 = vpop.f32.mrf.mxu2  ;;  %v1547_v8 = vpop.f32.mrf.mxu1 }
 0x160   : > { %v3005_v0 = vpop.eup %3004  ;;  %v1698_v1 = vadd.f32 %v3591_v2, %v1368_v63  ;;  %v2576_v2 = vor.u32 %v2860_v62, %v2573_v10  ;;  %v2571_v62 = vld [vmem:[%s3252_s23 + $0x360] sm:$0xf]  ;;  %v2861_v10 = vld [vmem:[%s3252_s23 + $0x364] sm:$0xf0] }
 0x161   : > { %v1210_v57 = vpop.f32.mrf.mxu0  ;;  %2016 = vst.msk [vmem:[%s3381_s13 + $0x2a8] sm:$0xff] %vm1930_vm1, %v3005_v0 }
 0x162   : > { %v3007_v5 = vpop.eup %3006  ;;  %v1540_v7 = vadd.f32 %v1539_v32, %v1210_v57  ;;  %3008 = vtanh.f32 %v1698_v1  ;;  %2706 = vmatmul.msk.bf16.gmra.mxu1 %vm951_vm0, %v2312_v3  ;;  %v2864_v57 = vld [vmem:[%s3252_s23 + $0x384] sm:$0xf]  ;;  %v2589_v3 = vld [vmem:[%s3252_s23 + $0x388] sm:$0xf0] }
 0x163   : > { %1953 = vst.msk [vmem:[%s3381_s13 + $0xb0] sm:$0xff] %vm1930_vm1, %v3007_v5  ;;  %2739 = vmatmul.msk.bf16.gmra.mxu3 %vm951_vm0, %v2576_v2 }
 0x164   : > { %3010 = vtanh.f32 %v1540_v7  ;;  %v2315_v7 = vld [vmem:[%s3252_s23 + $0x160] sm:$0xf] }
 0x166   : > { %v3663_v28 = vpop.f32.mrf.mxu3 }
 0x167   : > { %v1370_v9 = vpop.f32.mrf.mxu2  ;;  %v1549_v26 = vpop.f32.mrf.mxu1 }
 0x168   : > { %v3009_v19 = vpop.eup %3008  ;;  %v1700_v14 = vadd.f32 %v3602_v17, %v1370_v9  ;;  %v2796_v17 = vld [vmem:[%s3252_s23 + $0x164] sm:$0xf]  ;;  %v2572_v9 = vor.u32 %v2861_v10, %v2571_v62 }
 0x169   : > { %v1213_v22 = vpop.f32.mrf.mxu0  ;;  %2017 = vst.msk [vmem:[%s3381_s13 + $0x2b0] sm:$0xff] %vm1930_vm1, %v3009_v19  ;;  %v2320_v27 = vor.u32 %v2796_v17, %v2317_v21 }
 0x16a   : > { %v3011_v24 = vpop.eup %3010  ;;  %v1543_v25 = vadd.f32 %v1542_v43, %v1213_v22  ;;  %3012 = vtanh.f32 %v1700_v14  ;;  %v2795_v43 = vld [vmem:[%s3252_s23 + $0x154] sm:$0xf0] }
 0x16b   : > { %1954 = vst.msk [vmem:[%s3381_s13 + $0xb8] sm:$0xff] %vm1930_vm1, %v3011_v24  ;;  %v2308_v47 = vor.u32 %v2795_v43, %v2307_v42 }
 0x16c   : > { %3014 = vtanh.f32 %v1543_v25  ;;  %1252 = vmatmul.bf16.gmra.mxu0 %v2300_v18  ;;  %1412 = vmatmul.bf16.gmra.mxu2 %v2556_v15  ;;  %v2333_v15 = vld [vmem:[%s3252_s23 + $0x188] sm:$0xf0] }
 0x16e   : > { %v3674_v41 = vpop.f32.mrf.mxu3 }
 0x16f   : > { %v1373_v30 = vpop.f32.mrf.mxu2  ;;  %v1552_v37 = vpop.f32.mrf.mxu1 }
 0x170   : > { %v3013_v31 = vpop.eup %3012  ;;  %v1703_v32 = vadd.f32 %v3615_v33, %v1373_v30  ;;  %v2584_v33 = vor.u32 %v2862_v29, %v2581_v40  ;;  %v2579_v29 = vld [vmem:[%s3252_s23 + $0x370] sm:$0xf]  ;;  %v2863_v40 = vld [vmem:[%s3252_s23 + $0x374] sm:$0xf0] }
 0x171   : > { %v1215_v23 = vpop.f32.mrf.mxu0  ;;  %2018 = vst.msk [vmem:[%s3381_s13 + $0x2b8] sm:$0xff] %vm1930_vm1, %v3013_v31 }
 0x172   : > { %v3015_v35 = vpop.eup %3014  ;;  %v1545_v36 = vadd.f32 %v1544_v60, %v1215_v23  ;;  %3016 = vtanh.f32 %v1703_v32  ;;  %2707 = vmatmul.msk.bf16.gmra.mxu1 %vm951_vm0, %v2320_v27  ;;  %v2866_v23 = vld [vmem:[%s3252_s23 + $0x394] sm:$0xf]  ;;  %v2597_v27 = vld [vmem:[%s3252_s23 + $0x398] sm:$0xf0] }
 0x173   : > { %1955 = vst.msk [vmem:[%s3381_s13 + $0xc0] sm:$0xff] %vm1930_vm1, %v3015_v35  ;;  %2740 = vmatmul.msk.bf16.gmra.mxu3 %vm951_vm0, %v2584_v33 }
 0x174   : > { %3018 = vtanh.f32 %v1545_v36  ;;  %v2323_v36 = vld [vmem:[%s3252_s23 + $0x170] sm:$0xf] }
 0x176   : > { %v3687_v56 = vpop.f32.mrf.mxu3 }
 0x177   : > { %v1375_v38 = vpop.f32.mrf.mxu2  ;;  %v1554_v55 = vpop.f32.mrf.mxu1 }
 0x178   : > { %v3017_v48 = vpop.eup %3016  ;;  %v1705_v39 = vadd.f32 %v3626_v46, %v1375_v38  ;;  %v2798_v46 = vld [vmem:[%s3252_s23 + $0x174] sm:$0xf]  ;;  %v2580_v38 = vor.u32 %v2863_v40, %v2579_v29 }
 0x179   : > { %v1218_v50 = vpop.f32.mrf.mxu0  ;;  %2019 = vst.msk [vmem:[%s3381_s13 + $0x2c0] sm:$0xff] %vm1930_vm1, %v3017_v48  ;;  %v2328_v54 = vor.u32 %v2798_v46, %v2325_v49 }
 0x17a   : > { %v3019_v52 = vpop.eup %3018  ;;  %v1548_v53 = vadd.f32 %v1547_v8, %v1218_v50  ;;  %3020 = vtanh.f32 %v1705_v39  ;;  %v2797_v8 = vld [vmem:[%s3252_s23 + $0x164] sm:$0xf0] }
 0x17b   : > { %1956 = vst.msk [vmem:[%s3381_s13 + $0xc8] sm:$0xff] %vm1930_vm1, %v3019_v52  ;;  %v2316_v12 = vor.u32 %v2797_v8, %v2315_v7 }
 0x17c   : > { %3022 = vtanh.f32 %v1548_v53  ;;  %1257 = vmatmul.bf16.gmra.mxu0 %v2308_v47  ;;  %1417 = vmatmul.bf16.gmra.mxu2 %v2564_v44  ;;  %v2341_v44 = vld [vmem:[%s3252_s23 + $0x198] sm:$0xf0] }
 0x17e   : > { %v3698_v5 = vpop.f32.mrf.mxu3 }
 0x17f   : > { %v1378_v58 = vpop.f32.mrf.mxu2  ;;  %v1557_v1 = vpop.f32.mrf.mxu1 }
 0x180   : > { %v3021_v59 = vpop.eup %3020  ;;  %v1708_v60 = vadd.f32 %v3639_v61, %v1378_v58  ;;  %v2592_v61 = vor.u32 %v2864_v57, %v2589_v3  ;;  %v2587_v57 = vld [vmem:[%s3252_s23 + $0x380] sm:$0xf]  ;;  %v2865_v3 = vld [vmem:[%s3252_s23 + $0x384] sm:$0xf0] }
 0x181   : > { %v1220_v51 = vpop.f32.mrf.mxu0  ;;  %2020 = vst.msk [vmem:[%s3381_s13 + $0x2c8] sm:$0xff] %vm1930_vm1, %v3021_v59 }
 0x182   : > { %v3023_v63 = vpop.eup %3022  ;;  %v1550_v0 = vadd.f32 %v1549_v26, %v1220_v51  ;;  %3024 = vtanh.f32 %v1708_v60  ;;  %2708 = vmatmul.msk.bf16.gmra.mxu1 %vm951_vm0, %v2328_v54  ;;  %v2868_v51 = vld [vmem:[%s3252_s23 + $0x3a4] sm:$0xf]  ;;  %v2605_v54 = vld [vmem:[%s3252_s23 + $0x3a8] sm:$0xf0] }
 0x183   : > { %1957 = vst.msk [vmem:[%s3381_s13 + $0xd0] sm:$0xff] %vm1930_vm1, %v3023_v63  ;;  %2741 = vmatmul.msk.bf16.gmra.mxu3 %vm951_vm0, %v2592_v61 }
 0x184   : > { %3026 = vtanh.f32 %v1550_v0  ;;  %v2331_v0 = vld [vmem:[%s3252_s23 + $0x180] sm:$0xf] }
 0x186   : > { %v3711_v22 = vpop.f32.mrf.mxu3 }
 0x187   : > { %v1380_v2 = vpop.f32.mrf.mxu2  ;;  %v1559_v14 = vpop.f32.mrf.mxu1 }
 0x188   : > { %v3025_v13 = vpop.eup %3024  ;;  %v1710_v4 = vadd.f32 %v3650_v11, %v1380_v2  ;;  %v2800_v11 = vld [vmem:[%s3252_s23 + $0x184] sm:$0xf]  ;;  %v2588_v2 = vor.u32 %v2865_v3, %v2587_v57 }
 0x189   : > { %v1223_v16 = vpop.f32.mrf.mxu0  ;;  %2021 = vst.msk [vmem:[%s3381_s13 + $0x2d0] sm:$0xff] %vm1930_vm1, %v3025_v13  ;;  %v2336_v21 = vor.u32 %v2800_v11, %v2333_v15 }
 0x18a   : > { %v3027_v18 = vpop.eup %3026  ;;  %v1553_v19 = vadd.f32 %v1552_v37, %v1223_v16  ;;  %3028 = vtanh.f32 %v1710_v4  ;;  %v2799_v37 = vld [vmem:[%s3252_s23 + $0x174] sm:$0xf0] }
 0x18b   : > { %1958 = vst.msk [vmem:[%s3381_s13 + $0xd8] sm:$0xff] %vm1930_vm1, %v3027_v18  ;;  %v2324_v42 = vor.u32 %v2799_v37, %v2323_v36 }
 0x18c   : > { %3030 = vtanh.f32 %v1553_v19  ;;  %1262 = vmatmul.bf16.gmra.mxu0 %v2316_v12  ;;  %1422 = vmatmul.bf16.gmra.mxu2 %v2572_v9  ;;  %v2349_v9 = vld [vmem:[%s3252_s23 + $0x1a8] sm:$0xf0] }
 0x18e   : > { %v3722_v35 = vpop.f32.mrf.mxu3 }
 0x18f   : > { %v1383_v24 = vpop.f32.mrf.mxu2  ;;  %v1562_v32 = vpop.f32.mrf.mxu1 }
 0x190   : > { %v3029_v25 = vpop.eup %3028  ;;  %v1713_v26 = vadd.f32 %v3663_v28, %v1383_v24  ;;  %v2600_v28 = vor.u32 %v2866_v23, %v2597_v27  ;;  %v2595_v23 = vld [vmem:[%s3252_s23 + $0x390] sm:$0xf]  ;;  %v2867_v27 = vld [vmem:[%s3252_s23 + $0x394] sm:$0xf0] }
 0x191   : > { %v1225_v17 = vpop.f32.mrf.mxu0  ;;  %2022 = vst.msk [vmem:[%s3381_s13 + $0x2d8] sm:$0xff] %vm1930_vm1, %v3029_v25 }
 0x192   : > { %v3031_v30 = vpop.eup %3030  ;;  %v1555_v31 = vadd.f32 %v1554_v55, %v1225_v17  ;;  %3032 = vtanh.f32 %v1713_v26  ;;  %2709 = vmatmul.msk.bf16.gmra.mxu1 %vm951_vm0, %v2336_v21  ;;  %v2870_v17 = vld [vmem:[%s3252_s23 + $0x3b4] sm:$0xf]  ;;  %v2613_v21 = vld [vmem:[%s3252_s23 + $0x3b8] sm:$0xf0] }
 0x193   : > { %1959 = vst.msk [vmem:[%s3381_s13 + $0xe0] sm:$0xff] %vm1930_vm1, %v3031_v30  ;;  %2742 = vmatmul.msk.bf16.gmra.mxu3 %vm951_vm0, %v2600_v28 }
 0x194   : > { %3034 = vtanh.f32 %v1555_v31  ;;  %v2339_v31 = vld [vmem:[%s3252_s23 + $0x190] sm:$0xf] }
 0x196   : > { %v3735_v50 = vpop.f32.mrf.mxu3 }
 0x197   : > { %v1385_v33 = vpop.f32.mrf.mxu2  ;;  %v1564_v39 = vpop.f32.mrf.mxu1 }
 0x198   : > { %v3033_v43 = vpop.eup %3032  ;;  %v1715_v34 = vadd.f32 %v3674_v41, %v1385_v33  ;;  %v2802_v41 = vld [vmem:[%s3252_s23 + $0x194] sm:$0xf]  ;;  %v2596_v33 = vor.u32 %v2867_v27, %v2595_v23 }
 0x199   : > { %v1228_v45 = vpop.f32.mrf.mxu0  ;;  %2023 = vst.msk [vmem:[%s3381_s13 + $0x2e0] sm:$0xff] %vm1930_vm1, %v3033_v43  ;;  %v2344_v49 = vor.u32 %v2802_v41, %v2341_v44 }
 0x19a   : > { %v3035_v47 = vpop.eup %3034  ;;  %v1558_v48 = vadd.f32 %v1557_v1, %v1228_v45  ;;  %3036 = vtanh.f32 %v1715_v34  ;;  %v2801_v1 = vld [vmem:[%s3252_s23 + $0x184] sm:$0xf0] }
 0x19b   : > { %1960 = vst.msk [vmem:[%s3381_s13 + $0xe8] sm:$0xff] %vm1930_vm1, %v3035_v47  ;;  %v2332_v7 = vor.u32 %v2801_v1, %v2331_v0 }
 0x19c   : > { %3038 = vtanh.f32 %v1558_v48  ;;  %1267 = vmatmul.bf16.gmra.mxu0 %v2324_v42  ;;  %1427 = vmatmul.bf16.gmra.mxu2 %v2580_v38  ;;  %v2357_v38 = vld [vmem:[%s3252_s23 + $0x1b8] sm:$0xf0] }
 0x19e   : > { %v3746_v63 = vpop.f32.mrf.mxu3 }
 0x19f   : > { %v1388_v52 = vpop.f32.mrf.mxu2  ;;  %v1567_v60 = vpop.f32.mrf.mxu1 }
 0x1a0   : > { %v3037_v53 = vpop.eup %3036  ;;  %v1718_v55 = vadd.f32 %v3687_v56, %v1388_v52  ;;  %v2608_v56 = vor.u32 %v2868_v51, %v2605_v54  ;;  %v2603_v51 = vld [vmem:[%s3252_s23 + $0x3a0] sm:$0xf]  ;;  %v2869_v54 = vld [vmem:[%s3252_s23 + $0x3a4] sm:$0xf0] }
 0x1a1   : > { %v1230_v46 = vpop.f32.mrf.mxu0  ;;  %2024 = vst.msk [vmem:[%s3381_s13 + $0x2e8] sm:$0xff] %vm1930_vm1, %v3037_v53 }
 0x1a2   : > { %v3039_v58 = vpop.eup %3038  ;;  %v1560_v59 = vadd.f32 %v1559_v14, %v1230_v46  ;;  %3040 = vtanh.f32 %v1718_v55  ;;  %2710 = vmatmul.msk.bf16.gmra.mxu1 %vm951_vm0, %v2344_v49  ;;  %v2872_v46 = vld [vmem:[%s3252_s23 + $0x3c4] sm:$0xf]  ;;  %v2621_v49 = vld [vmem:[%s3252_s23 + $0x3c8] sm:$0xf0] }
 0x1a3   : > { %1961 = vst.msk [vmem:[%s3381_s13 + $0xf0] sm:$0xff] %vm1930_vm1, %v3039_v58  ;;  %2743 = vmatmul.msk.bf16.gmra.mxu3 %vm951_vm0, %v2608_v56 }
 0x1a4   : > { %3042 = vtanh.f32 %v1560_v59  ;;  %v2347_v59 = vld [vmem:[%s3252_s23 + $0x1a0] sm:$0xf] }
 0x1a6   : > { %v3759_v16 = vpop.f32.mrf.mxu3 }
 0x1a7   : > { %v1390_v61 = vpop.f32.mrf.mxu2  ;;  %v1569_v4 = vpop.f32.mrf.mxu1 }
 0x1a8   : > { %v3041_v8 = vpop.eup %3040  ;;  %v1720_v62 = vadd.f32 %v3698_v5, %v1390_v61  ;;  %v2804_v5 = vld [vmem:[%s3252_s23 + $0x1a4] sm:$0xf]  ;;  %v2604_v61 = vor.u32 %v2869_v54, %v2603_v51 }
 0x1a9   : > { %v1233_v10 = vpop.f32.mrf.mxu0  ;;  %2025 = vst.msk [vmem:[%s3381_s13 + $0x2f0] sm:$0xff] %vm1930_vm1, %v3041_v8  ;;  %v2352_v15 = vor.u32 %v2804_v5, %v2349_v9 }
 0x1aa   : > { %v3043_v12 = vpop.eup %3042  ;;  %v1563_v13 = vadd.f32 %v1562_v32, %v1233_v10  ;;  %3044 = vtanh.f32 %v1720_v62  ;;  %v2803_v32 = vld [vmem:[%s3252_s23 + $0x194] sm:$0xf0] }
 0x1ab   : > { %1962 = vst.msk [vmem:[%s3381_s13 + $0xf8] sm:$0xff] %vm1930_vm1, %v3043_v12  ;;  %v2340_v36 = vor.u32 %v2803_v32, %v2339_v31 }
 0x1ac   : > { %3046 = vtanh.f32 %v1563_v13  ;;  %1272 = vmatmul.bf16.gmra.mxu0 %v2332_v7  ;;  %1432 = vmatmul.bf16.gmra.mxu2 %v2588_v2  ;;  %v2365_v2 = vld [vmem:[%s3252_s23 + $0x1c8] sm:$0xf0] }
 0x1ae   : > { %v3770_v30 = vpop.f32.mrf.mxu3 }
 0x1af   : > { %v1393_v18 = vpop.f32.mrf.mxu2  ;;  %v1572_v26 = vpop.f32.mrf.mxu1 }
 0x1b0   : > { %v3045_v19 = vpop.eup %3044  ;;  %v1723_v14 = vadd.f32 %v3711_v22, %v1393_v18  ;;  %v2616_v22 = vor.u32 %v2870_v17, %v2613_v21  ;;  %v2611_v17 = vld [vmem:[%s3252_s23 + $0x3b0] sm:$0xf]  ;;  %v2871_v21 = vld [vmem:[%s3252_s23 + $0x3b4] sm:$0xf0] }
 0x1b1   : > { %v1235_v11 = vpop.f32.mrf.mxu0  ;;  %2026 = vst.msk [vmem:[%s3381_s13 + $0x2f8] sm:$0xff] %vm1930_vm1, %v3045_v19 }
 0x1b2   : > { %v3047_v24 = vpop.eup %3046  ;;  %v1565_v25 = vadd.f32 %v1564_v39, %v1235_v11  ;;  %3048 = vtanh.f32 %v1723_v14  ;;  %2711 = vmatmul.msk.bf16.gmra.mxu1 %vm951_vm0, %v2352_v15  ;;  %v2874_v11 = vld [vmem:[%s3252_s23 + $0x3d4] sm:$0xf]  ;;  %v2629_v15 = vld [vmem:[%s3252_s23 + $0x3d8] sm:$0xf0] }
 0x1b3   : > { %1963 = vst.msk [vmem:[%s3381_s13 + $0x100] sm:$0xff] %vm1930_vm1, %v3047_v24  ;;  %2744 = vmatmul.msk.bf16.gmra.mxu3 %vm951_vm0, %v2616_v22 }
 0x1b4   : > { %3050 = vtanh.f32 %v1565_v25  ;;  %v2355_v25 = vld [vmem:[%s3252_s23 + $0x1b0] sm:$0xf] }
 0x1b6   : > { %v3783_v45 = vpop.f32.mrf.mxu3 }
 0x1b7   : > { %v1395_v28 = vpop.f32.mrf.mxu2  ;;  %v1574_v34 = vpop.f32.mrf.mxu1 }
 0x1b8   : > { %v3049_v37 = vpop.eup %3048  ;;  %v1725_v29 = vadd.f32 %v3722_v35, %v1395_v28  ;;  %v2806_v35 = vld [vmem:[%s3252_s23 + $0x1b4] sm:$0xf]  ;;  %v2612_v28 = vor.u32 %v2871_v21, %v2611_v17 }
 0x1b9   : > { %v1238_v40 = vpop.f32.mrf.mxu0  ;;  %2027 = vst.msk [vmem:[%s3381_s13 + $0x300] sm:$0xff] %vm1930_vm1, %v3049_v37  ;;  %v2360_v44 = vor.u32 %v2806_v35, %v2357_v38 }
 0x1ba   : > { %v3051_v42 = vpop.eup %3050  ;;  %v1568_v43 = vadd.f32 %v1567_v60, %v1238_v40  ;;  %3052 = vtanh.f32 %v1725_v29  ;;  %v2805_v60 = vld [vmem:[%s3252_s23 + $0x1a4] sm:$0xf0] }
 0x1bb   : > { %1964 = vst.msk [vmem:[%s3381_s13 + $0x108] sm:$0xff] %vm1930_vm1, %v3051_v42  ;;  %v2348_v0 = vor.u32 %v2805_v60, %v2347_v59 }
 0x1bc   : > { %3054 = vtanh.f32 %v1568_v43  ;;  %1277 = vmatmul.bf16.gmra.mxu0 %v2340_v36  ;;  %1437 = vmatmul.bf16.gmra.mxu2 %v2596_v33  ;;  %v2373_v33 = vld [vmem:[%s3252_s23 + $0x1d8] sm:$0xf0] }
 0x1be   : > { %v3794_v58 = vpop.f32.mrf.mxu3 }
 0x1bf   : > { %v1398_v47 = vpop.f32.mrf.mxu2  ;;  %v1577_v55 = vpop.f32.mrf.mxu1 }
 0x1c0   : > { %v3053_v48 = vpop.eup %3052  ;;  %v1728_v39 = vadd.f32 %v3735_v50, %v1398_v47  ;;  %v2624_v50 = vor.u32 %v2872_v46, %v2621_v49  ;;  %v2619_v46 = vld [vmem:[%s3252_s23 + $0x3c0] sm:$0xf]  ;;  %v2873_v49 = vld [vmem:[%s3252_s23 + $0x3c4] sm:$0xf0] }
 0x1c1   : > { %v1240_v41 = vpop.f32.mrf.mxu0  ;;  %2028 = vst.msk [vmem:[%s3381_s13 + $0x308] sm:$0xff] %vm1930_vm1, %v3053_v48 }
 0x1c2   : > { %v3055_v52 = vpop.eup %3054  ;;  %v1570_v53 = vadd.f32 %v1569_v4, %v1240_v41  ;;  %3056 = vtanh.f32 %v1728_v39  ;;  %2712 = vmatmul.msk.bf16.gmra.mxu1 %vm951_vm0, %v2360_v44  ;;  %v2876_v41 = vld [vmem:[%s3252_s23 + $0x3e4] sm:$0xf]  ;;  %v2637_v44 = vld [vmem:[%s3252_s23 + $0x3e8] sm:$0xf0] }
 0x1c3   : > { %1965 = vst.msk [vmem:[%s3381_s13 + $0x110] sm:$0xff] %vm1930_vm1, %v3055_v52  ;;  %2745 = vmatmul.msk.bf16.gmra.mxu3 %vm951_vm0, %v2624_v50 }
 0x1c4   : > { %3058 = vtanh.f32 %v1570_v53  ;;  %v2363_v53 = vld [vmem:[%s3252_s23 + $0x1c0] sm:$0xf] }
 0x1c6   : > { %v3807_v10 = vpop.f32.mrf.mxu3 }
 0x1c7   : > { %v1400_v56 = vpop.f32.mrf.mxu2  ;;  %v1579_v62 = vpop.f32.mrf.mxu1 }
 0x1c8   : > { %v3057_v1 = vpop.eup %3056  ;;  %v1730_v57 = vadd.f32 %v3746_v63, %v1400_v56  ;;  %v2808_v63 = vld [vmem:[%s3252_s23 + $0x1c4] sm:$0xf]  ;;  %v2620_v56 = vor.u32 %v2873_v49, %v2619_v46 }
 0x1c9   : > { %v1243_v3 = vpop.f32.mrf.mxu0  ;;  %2029 = vst.msk [vmem:[%s3381_s13 + $0x310] sm:$0xff] %vm1930_vm1, %v3057_v1  ;;  %v2368_v9 = vor.u32 %v2808_v63, %v2365_v2 }
 0x1ca   : > { %v3059_v7 = vpop.eup %3058  ;;  %v1573_v8 = vadd.f32 %v1572_v26, %v1243_v3  ;;  %3060 = vtanh.f32 %v1730_v57  ;;  %v2807_v26 = vld [vmem:[%s3252_s23 + $0x1b4] sm:$0xf0] }
 0x1cb   : > { %1966 = vst.msk [vmem:[%s3381_s13 + $0x118] sm:$0xff] %vm1930_vm1, %v3059_v7  ;;  %v2356_v31 = vor.u32 %v2807_v26, %v2355_v25 }
 0x1cc   : > { %3062 = vtanh.f32 %v1573_v8  ;;  %1282 = vmatmul.bf16.gmra.mxu0 %v2348_v0  ;;  %1442 = vmatmul.bf16.gmra.mxu2 %v2604_v61  ;;  %v2381_v61 = vld [vmem:[%s3252_s23 + $0x1e8] sm:$0xf0] }
 0x1ce   : > { %v3818_v24 = vpop.f32.mrf.mxu3 }
 0x1cf   : > { %v1403_v12 = vpop.f32.mrf.mxu2  ;;  %v1582_v14 = vpop.f32.mrf.mxu1 }
 0x1d0   : > { %v3061_v13 = vpop.eup %3060  ;;  %v1733_v4 = vadd.f32 %v3759_v16, %v1403_v12  ;;  %v2632_v16 = vor.u32 %v2874_v11, %v2629_v15  ;;  %v2627_v11 = vld [vmem:[%s3252_s23 + $0x3d0] sm:$0xf]  ;;  %v2875_v15 = vld [vmem:[%s3252_s23 + $0x3d4] sm:$0xf0] }
 0x1d1   : > { %v1245_v5 = vpop.f32.mrf.mxu0  ;;  %2030 = vst.msk [vmem:[%s3381_s13 + $0x318] sm:$0xff] %vm1930_vm1, %v3061_v13 }
 0x1d2   : > { %v3063_v18 = vpop.eup %3062  ;;  %v1575_v19 = vadd.f32 %v1574_v34, %v1245_v5  ;;  %3064 = vtanh.f32 %v1733_v4  ;;  %2713 = vmatmul.msk.bf16.gmra.mxu1 %vm951_vm0, %v2368_v9  ;;  %v2878_v5 = vld [vmem:[%s3252_s23 + $0x3f4] sm:$0xf]  ;;  %v2645_v9 = vld [vmem:[%s3252_s23 + $0x3f8] sm:$0xf0] }
 0x1d3   : > { %1967 = vst.msk [vmem:[%s3381_s13 + $0x120] sm:$0xff] %vm1930_vm1, %v3063_v18  ;;  %2746 = vmatmul.msk.bf16.gmra.mxu3 %vm951_vm0, %v2632_v16 }
 0x1d4   : > { %3066 = vtanh.f32 %v1575_v19  ;;  %v2371_v19 = vld [vmem:[%s3252_s23 + $0x1d0] sm:$0xf] }
 0x1d6   : > { %v3831_v40 = vpop.f32.mrf.mxu3 }
 0x1d7   : > { %v1405_v22 = vpop.f32.mrf.mxu2  ;;  %v1584_v29 = vpop.f32.mrf.mxu1 }
 0x1d8   : > { %v3065_v32 = vpop.eup %3064  ;;  %v1735_v23 = vadd.f32 %v3770_v30, %v1405_v22  ;;  %v2810_v30 = vld [vmem:[%s3252_s23 + $0x1d4] sm:$0xf]  ;;  %v2628_v22 = vor.u32 %v2875_v15, %v2627_v11 }
 0x1d9   : > { %v1248_v27 = vpop.f32.mrf.mxu0  ;;  %2031 = vst.msk [vmem:[%s3381_s13 + $0x320] sm:$0xff] %vm1930_vm1, %v3065_v32  ;;  %v2376_v38 = vor.u32 %v2810_v30, %v2373_v33 }
 0x1da   : > { %v3067_v36 = vpop.eup %3066  ;;  %v1578_v37 = vadd.f32 %v1577_v55, %v1248_v27  ;;  %3068 = vtanh.f32 %v1735_v23  ;;  %v2809_v55 = vld [vmem:[%s3252_s23 + $0x1c4] sm:$0xf0]  ;;  %v2814_v27 = vld [vmem:[%s3252_s23 + $0x1f4] sm:$0xf] }
 0x1db   : > { %1968 = vst.msk [vmem:[%s3381_s13 + $0x128] sm:$0xff] %vm1930_vm1, %v3067_v36  ;;  %v2364_v59 = vor.u32 %v2809_v55, %v2363_v53 }
 0x1dc   : > { %3070 = vtanh.f32 %v1578_v37  ;;  %1287 = vmatmul.bf16.gmra.mxu0 %v2356_v31  ;;  %1447 = vmatmul.bf16.gmra.mxu2 %v2612_v28  ;;  %v2389_v28 = vld [vmem:[%s3252_s23 + $0x1f8] sm:$0xf0] }
 0x1dd   : > { %v2392_v33 = vor.u32 %v2814_v27, %v2389_v28 }
 0x1de   : > { %v3842_v52 = vpop.f32.mrf.mxu3 }
 0x1df   : > { %v1408_v42 = vpop.f32.mrf.mxu2  ;;  %v1587_v39 = vpop.f32.mrf.mxu1 }
 0x1e0   : > { %v3069_v43 = vpop.eup %3068  ;;  %v1738_v34 = vadd.f32 %v3783_v45, %v1408_v42  ;;  %v2640_v45 = vor.u32 %v2876_v41, %v2637_v44 }
 0x1e1   : > { %v1250_v35 = vpop.f32.mrf.mxu0  ;;  %2032 = vst.msk [vmem:[%s3381_s13 + $0x328] sm:$0xff] %vm1930_vm1, %v3069_v43 }
 0x1e2   : > { %v3071_v47 = vpop.eup %3070  ;;  %v1580_v48 = vadd.f32 %v1579_v62, %v1250_v35  ;;  %3072 = vtanh.f32 %v1738_v34  ;;  %2714 = vmatmul.msk.bf16.gmra.mxu1 %vm951_vm0, %v2376_v38  ;;  %v2379_v35 = vld [vmem:[%s3252_s23 + $0x1e0] sm:$0xf]  ;;  %v2813_v38 = vld [vmem:[%s3252_s23 + $0x1e4] sm:$0xf0] }
 0x1e3   : > { %1969 = vst.msk [vmem:[%s3381_s13 + $0x130] sm:$0xff] %vm1930_vm1, %v3071_v47  ;;  %2747 = vmatmul.msk.bf16.gmra.mxu3 %vm951_vm0, %v2640_v45  ;;  %v2635_v47 = vld [vmem:[%s3252_s23 + $0x3e0] sm:$0xf] }
 0x1e4   : > { %3074 = vtanh.f32 %v1580_v48  ;;  %v2877_v48 = vld [vmem:[%s3252_s23 + $0x3e4] sm:$0xf0] }
 0x1e5   : > { %v2636_v55 = vor.u32 %v2877_v48, %v2635_v47 }
 0x1e6   : > { %v3855_v3 = vpop.f32.mrf.mxu3 }
 0x1e7   : > { %v1410_v50 = vpop.f32.mrf.mxu2  ;;  %v1589_v57 = vpop.f32.mrf.mxu1 }
 0x1e8   : > { %v3073_v60 = vpop.eup %3072  ;;  %v1740_v51 = vadd.f32 %v3794_v58, %v1410_v50  ;;  %v2812_v58 = vld [vmem:[%s3252_s23 + $0x1e4] sm:$0xf] }
 0x1e9   : > { %v1253_v54 = vpop.f32.mrf.mxu0  ;;  %2033 = vst.msk [vmem:[%s3381_s13 + $0x330] sm:$0xff] %vm1930_vm1, %v3073_v60  ;;  %v2384_v2 = vor.u32 %v2812_v58, %v2381_v61  ;;  %v2397_v60 = vld [vmem:[%s3252_s23 + $0x208] sm:$0xf0] }
 0x1ea   : > { %v3075_v0 = vpop.eup %3074  ;;  %v1583_v1 = vadd.f32 %v1582_v14, %v1253_v54  ;;  %3076 = vtanh.f32 %v1740_v51  ;;  %v2811_v14 = vld [vmem:[%s3252_s23 + $0x1d4] sm:$0xf0] }
 0x1eb   : > { %1970 = vst.msk [vmem:[%s3381_s13 + $0x138] sm:$0xff] %vm1930_vm1, %v3075_v0  ;;  %v2372_v25 = vor.u32 %v2811_v14, %v2371_v19 }
 0x1ec   : > { %3078 = vtanh.f32 %v1583_v1  ;;  %1292 = vmatmul.bf16.gmra.mxu0 %v2364_v59  ;;  %1452 = vmatmul.bf16.gmra.mxu2 %v2620_v56  ;;  %v2816_v59 = vld [vmem:[%s3252_s23 + $0x204] sm:$0xf] }
 0x1ed   : > { %v2400_v0 = vor.u32 %v2816_v59, %v2397_v60 }
 0x1ee   : > { %v3866_v18 = vpop.f32.mrf.mxu3 }
 0x1ef   : > { %v1413_v7 = vpop.f32.mrf.mxu2  ;;  %v1592_v4 = vpop.f32.mrf.mxu1 }
 0x1f0   : > { %v3077_v8 = vpop.eup %3076  ;;  %v1743_v62 = vadd.f32 %v3807_v10, %v1413_v7  ;;  %v2648_v10 = vor.u32 %v2878_v5, %v2645_v9  ;;  %v2387_v7 = vld [vmem:[%s3252_s23 + $0x1f0] sm:$0xf] }
 0x1f1   : > { %v1255_v63 = vpop.f32.mrf.mxu0  ;;  %2034 = vst.msk [vmem:[%s3381_s13 + $0x338] sm:$0xff] %vm1930_vm1, %v3077_v8  ;;  %v2815_v8 = vld [vmem:[%s3252_s23 + $0x1f4] sm:$0xf0] }
 0x1f2   : > { %v3079_v12 = vpop.eup %3078  ;;  %v1585_v13 = vadd.f32 %v1584_v29, %v1255_v63  ;;  %3080 = vtanh.f32 %v1743_v62  ;;  %2715 = vmatmul.msk.bf16.gmra.mxu1 %vm951_vm0, %v2384_v2  ;;  %v2643_v62 = vld [vmem:[%s3252_s23 + $0x3f0] sm:$0xf]  ;;  %v2388_v2 = vor.u32 %v2815_v8, %v2387_v7 }
 0x1f3   : > { %1971 = vst.msk [vmem:[%s3381_s13 + $0x140] sm:$0xff] %vm1930_vm1, %v3079_v12  ;;  %2748 = vmatmul.msk.bf16.gmra.mxu3 %vm951_vm0, %v2648_v10 }
 0x1f4   : > { %3082 = vtanh.f32 %v1585_v13 }
 0x1f7   : > { %v1415_v16 = vpop.f32.mrf.mxu2  ;;  %v1594_v23 = vpop.f32.mrf.mxu1 }
 0x1f8   : > { %v3081_v26 = vpop.eup %3080  ;;  %v1745_v17 = vadd.f32 %v3818_v24, %v1415_v16  ;;  %v3881_v24 = vpop.f32.mrf.mxu3 }
 0x1f9   : > { %v1258_v21 = vpop.f32.mrf.mxu0  ;;  %2035 = vst.msk [vmem:[%s3381_s13 + $0x340] sm:$0xff] %vm1930_vm1, %v3081_v26 }
 0x1fa   : > { %v3083_v31 = vpop.eup %3082  ;;  %v1588_v32 = vadd.f32 %v1587_v39, %v1258_v21  ;;  %3084 = vtanh.f32 %v1745_v17  ;;  %v2380_v39 = vor.u32 %v2813_v38, %v2379_v35 }
 0x1fb   : > { %1972 = vst.msk [vmem:[%s3381_s13 + $0x148] sm:$0xff] %vm1930_vm1, %v3083_v31 }
 0x1fc   : > { %3086 = vtanh.f32 %v1588_v32  ;;  %1297 = vmatmul.bf16.gmra.mxu0 %v2372_v25  ;;  %1457 = vmatmul.bf16.gmra.mxu2 %v2628_v22 }
 0x1ff   : > { %v1418_v36 = vpop.f32.mrf.mxu2  ;;  %v1597_v34 = vpop.f32.mrf.mxu1 }
 0x200   : > { %v3085_v37 = vpop.eup %3084  ;;  %v1748_v29 = vadd.f32 %v3831_v40, %v1418_v36  ;;  %v3893_v41 = vpop.f32.mrf.mxu3 }
 0x201   : > { %v1260_v30 = vpop.f32.mrf.mxu0  ;;  %2036 = vst.msk [vmem:[%s3381_s13 + $0x348] sm:$0xff] %vm1930_vm1, %v3085_v37 }
 0x202   : > { %v3087_v42 = vpop.eup %3086  ;;  %v1590_v43 = vadd.f32 %v1589_v57, %v1260_v30  ;;  %3088 = vtanh.f32 %v1748_v29  ;;  %2716 = vmatmul.msk.bf16.gmra.mxu1 %vm951_vm0, %v2392_v33 }
 0x203   : > { %1973 = vst.msk [vmem:[%s3381_s13 + $0x150] sm:$0xff] %vm1930_vm1, %v3087_v42 }
 0x204   : > { %3090 = vtanh.f32 %v1590_v43 }
 0x207   : > { %v1420_v40 = vpop.f32.mrf.mxu2  ;;  %v1599_v50 = vpop.f32.mrf.mxu1 }
 0x208   : > { %v3089_v44 = vpop.eup %3088  ;;  %v1750_v45 = vadd.f32 %v3842_v52, %v1420_v40  ;;  %v1762_v61 = vpop.f32.mrf.mxu3 }
 0x209   : > { %v1263_v53 = vpop.f32.mrf.mxu0  ;;  %2037 = vst.msk [vmem:[%s3381_s13 + $0x350] sm:$0xff] %vm1930_vm1, %v3089_v44 }
 0x20a   : > { %v3091_v46 = vpop.eup %3090  ;;  %v1593_v49 = vadd.f32 %v1592_v4, %v1263_v53  ;;  %3092 = vtanh.f32 %v1750_v45 }
 0x20b   : > { %1974 = vst.msk [vmem:[%s3381_s13 + $0x158] sm:$0xff] %vm1930_vm1, %v3091_v46 }
 0x20c   : > { %3094 = vtanh.f32 %v1593_v49  ;;  %1302 = vmatmul.bf16.gmra.mxu0 %v2380_v39  ;;  %1462 = vmatmul.bf16.gmra.mxu2 %v2636_v55 }
 0x20f   : > { %v1423_v52 = vpop.f32.mrf.mxu2  ;;  %v1602_v58 = vpop.f32.mrf.mxu1 }
 0x210   : > { %v3093_v51 = vpop.eup %3092  ;;  %v1753_v54 = vadd.f32 %v3855_v3, %v1423_v52  ;;  %v2879_v3 = vld [vmem:[%s3252_s23 + $0x3f4] sm:$0xf0]  ;;  %v1764_v14 = vpop.f32.mrf.mxu3 }
 0x211   : > { %v1265_v56 = vpop.f32.mrf.mxu0  ;;  %2038 = vst.msk [vmem:[%s3381_s13 + $0x358] sm:$0xff] %vm1930_vm1, %v3093_v51  ;;  %v2644_v5 = vor.u32 %v2879_v3, %v2643_v62 }
 0x212   : > { %v3095_v1 = vpop.eup %3094  ;;  %v1595_v57 = vadd.f32 %v1594_v23, %v1265_v56  ;;  %3096 = vtanh.f32 %v1753_v54  ;;  %2717 = vmatmul.msk.bf16.gmra.mxu1 %vm951_vm0, %v2400_v0 }
 0x213   : > { %1975 = vst.msk [vmem:[%s3381_s13 + $0x160] sm:$0xff] %vm1930_vm1, %v3095_v1 }
 0x214   : > { %3098 = vtanh.f32 %v1595_v57 }
 0x217   : > { %v1425_v63 = vpop.f32.mrf.mxu2  ;;  %v1604_v19 = vpop.f32.mrf.mxu1 }
 0x218   : > { %v3097_v12 = vpop.eup %3096  ;;  %v1755_v13 = vadd.f32 %v3866_v18, %v1425_v63  ;;  %v1767_v21 = vpop.f32.mrf.mxu3 }
 0x219   : > { %v1268_v4 = vpop.f32.mrf.mxu0  ;;  %2039 = vst.msk [vmem:[%s3381_s13 + $0x360] sm:$0xff] %vm1930_vm1, %v3097_v12 }
 0x21a   : > { %v3099_v9 = vpop.eup %3098  ;;  %v1598_v10 = vadd.f32 %v1597_v34, %v1268_v4  ;;  %3100 = vtanh.f32 %v1755_v13 }
 0x21b   : > { %1976 = vst.msk [vmem:[%s3381_s13 + $0x168] sm:$0xff] %vm1930_vm1, %v3099_v9 }
 0x21c   : > { %3102 = vtanh.f32 %v1598_v10  ;;  %1307 = vmatmul.bf16.gmra.mxu0 %v2388_v2  ;;  %1467 = vmatmul.bf16.gmra.mxu2 %v2644_v5 }
 0x21f   : > { %v1428_v11 = vpop.f32.mrf.mxu2  ;;  %v1607_v17 = vpop.f32.mrf.mxu1 }
 0x220   : > { %v3101_v15 = vpop.eup %3100  ;;  %v1758_v18 = vadd.f32 %v3881_v24, %v1428_v11  ;;  %v1769_v37 = vpop.f32.mrf.mxu3 }
 0x221   : > { %v1270_v16 = vpop.f32.mrf.mxu0  ;;  %2040 = vst.msk [vmem:[%s3381_s13 + $0x368] sm:$0xff] %vm1930_vm1, %v3101_v15 }
 0x222   : > { %v3103_v25 = vpop.eup %3102  ;;  %v1600_v26 = vadd.f32 %v1599_v50, %v1270_v16  ;;  %3104 = vtanh.f32 %v1758_v18 }
 0x223   : > { %1977 = vst.msk [vmem:[%s3381_s13 + $0x170] sm:$0xff] %vm1930_vm1, %v3103_v25 }
 0x224   : > { %3106 = vtanh.f32 %v1600_v26 }
 0x227   : > { %v1430_v22 = vpop.f32.mrf.mxu2  ;;  %v1609_v24 = vpop.f32.mrf.mxu1 }
 0x228   : > { %v3105_v31 = vpop.eup %3104  ;;  %v1760_v32 = vadd.f32 %v3893_v41, %v1430_v22  ;;  %v1772_v44 = vpop.f32.mrf.mxu3 }
 0x229   : > { %v1273_v23 = vpop.f32.mrf.mxu0  ;;  %2041 = vst.msk [vmem:[%s3381_s13 + $0x370] sm:$0xff] %vm1930_vm1, %v3105_v31 }
 0x22a   : > { %v3107_v27 = vpop.eup %3106  ;;  %v1603_v28 = vadd.f32 %v1602_v58, %v1273_v23  ;;  %3108 = vtanh.f32 %v1760_v32 }
 0x22b   : > { %1978 = vst.msk [vmem:[%s3381_s13 + $0x178] sm:$0xff] %vm1930_vm1, %v3107_v27 }
 0x22c   : > { %3110 = vtanh.f32 %v1603_v28 }
 0x22f   : > { %v1433_v36 = vpop.f32.mrf.mxu2  ;;  %v1612_v34 = vpop.f32.mrf.mxu1 }
 0x230   : > { %v3109_v29 = vpop.eup %3108  ;;  %v1763_v30 = vadd.f32 %v1762_v61, %v1433_v36  ;;  %v1774_v60 = vpop.f32.mrf.mxu3 }
 0x231   : > { %v1275_v33 = vpop.f32.mrf.mxu0  ;;  %2042 = vst.msk [vmem:[%s3381_s13 + $0x378] sm:$0xff] %vm1930_vm1, %v3109_v29 }
 0x232   : > { %v3111_v42 = vpop.eup %3110  ;;  %v1605_v43 = vadd.f32 %v1604_v19, %v1275_v33  ;;  %3112 = vtanh.f32 %v1763_v30 }
 0x233   : > { %1979 = vst.msk [vmem:[%s3381_s13 + $0x180] sm:$0xff] %vm1930_vm1, %v3111_v42 }
 0x234   : > { %3114 = vtanh.f32 %v1605_v43 }
 0x237   : > { %v1435_v35 = vpop.f32.mrf.mxu2  ;;  %v1614_v41 = vpop.f32.mrf.mxu1 }
 0x238   : > { %v3113_v38 = vpop.eup %3112  ;;  %v1765_v47 = vadd.f32 %v1764_v14, %v1435_v35  ;;  %v1777_v58 = vpop.f32.mrf.mxu3 }
 0x239   : > { %v1278_v48 = vpop.f32.mrf.mxu0  ;;  %2043 = vst.msk [vmem:[%s3381_s13 + $0x380] sm:$0xff] %vm1930_vm1, %v3113_v38 }
 0x23a   : > { %v3115_v40 = vpop.eup %3114  ;;  %v1608_v39 = vadd.f32 %v1607_v17, %v1278_v48  ;;  %3116 = vtanh.f32 %v1765_v47 }
 0x23b   : > { %1980 = vst.msk [vmem:[%s3381_s13 + $0x188] sm:$0xff] %vm1930_vm1, %v3115_v40 }
 0x23c   : > { %3118 = vtanh.f32 %v1608_v39 }
 0x23f   : > { %v1438_v45 = vpop.f32.mrf.mxu2  ;;  %v1617_v59 = vpop.f32.mrf.mxu1 }
 0x240   : > { %v3117_v53 = vpop.eup %3116  ;;  %v1768_v55 = vadd.f32 %v1767_v21, %v1438_v45  ;;  %v1779_v13 = vpop.f32.mrf.mxu3 }
 0x241   : > { %v1280_v46 = vpop.f32.mrf.mxu0  ;;  %2044 = vst.msk [vmem:[%s3381_s13 + $0x388] sm:$0xff] %vm1930_vm1, %v3117_v53 }
 0x242   : > { %v3119_v49 = vpop.eup %3118  ;;  %v1610_v50 = vadd.f32 %v1609_v24, %v1280_v46  ;;  %3120 = vtanh.f32 %v1768_v55 }
 0x243   : > { %1981 = vst.msk [vmem:[%s3381_s13 + $0x190] sm:$0xff] %vm1930_vm1, %v3119_v49 }
 0x244   : > { %3122 = vtanh.f32 %v1610_v50 }
 0x247   : > { %v1440_v52 = vpop.f32.mrf.mxu2  ;;  %v1619_v57 = vpop.f32.mrf.mxu1 }
 0x248   : > { %v3121_v51 = vpop.eup %3120  ;;  %v1770_v54 = vadd.f32 %v1769_v37, %v1440_v52  ;;  %v1782_v21 = vpop.f32.mrf.mxu3 }
 0x249   : > { %v1283_v56 = vpop.f32.mrf.mxu0  ;;  %2045 = vst.msk [vmem:[%s3381_s13 + $0x390] sm:$0xff] %vm1930_vm1, %v3121_v51 }
 0x24a   : > { %v3123_v0 = vpop.eup %3122  ;;  %v1613_v1 = vadd.f32 %v1612_v34, %v1283_v56  ;;  %3124 = vtanh.f32 %v1770_v54 }
 0x24b   : > { %1982 = vst.msk [vmem:[%s3381_s13 + $0x198] sm:$0xff] %vm1930_vm1, %v3123_v0 }
 0x24c   : > { %3126 = vtanh.f32 %v1613_v1 }
 0x24f   : > { %v1443_v61 = vpop.f32.mrf.mxu2  ;;  %v1622_v2 = vpop.f32.mrf.mxu1 }
 0x250   : > { %v3125_v7 = vpop.eup %3124  ;;  %v1773_v8 = vadd.f32 %v1772_v44, %v1443_v61  ;;  %v1784_v36 = vpop.f32.mrf.mxu3 }
 0x251   : > { %v1285_v62 = vpop.f32.mrf.mxu0  ;;  %2046 = vst.msk [vmem:[%s3381_s13 + $0x398] sm:$0xff] %vm1930_vm1, %v3125_v7 }
 0x252   : > { %v3127_v3 = vpop.eup %3126  ;;  %v1615_v63 = vadd.f32 %v1614_v41, %v1285_v62  ;;  %3128 = vtanh.f32 %v1773_v8 }
 0x253   : > { %1983 = vst.msk [vmem:[%s3381_s13 + $0x1a0] sm:$0xff] %vm1930_vm1, %v3127_v3 }
 0x254   : > { %3130 = vtanh.f32 %v1615_v63 }
 0x257   : > { %v1445_v12 = vpop.f32.mrf.mxu2  ;;  %v1624_v14 = vpop.f32.mrf.mxu1 }
 0x258   : > { %v3129_v4 = vpop.eup %3128  ;;  %v1775_v5 = vadd.f32 %v1774_v60, %v1445_v12  ;;  %v1787_v35 = vpop.f32.mrf.mxu3 }
 0x259   : > { %v1288_v9 = vpop.f32.mrf.mxu0  ;;  %2047 = vst.msk [vmem:[%s3381_s13 + $0x3a0] sm:$0xff] %vm1930_vm1, %v3129_v4 }
 0x25a   : > { %v3131_v10 = vpop.eup %3130  ;;  %v1618_v19 = vadd.f32 %v1617_v59, %v1288_v9  ;;  %3132 = vtanh.f32 %v1775_v5 }
 0x25b   : > { %1984 = vst.msk [vmem:[%s3381_s13 + $0x1a8] sm:$0xff] %vm1930_vm1, %v3131_v10 }
 0x25c   : > { %3134 = vtanh.f32 %v1618_v19 }
 0x25f   : > { %v1448_v11 = vpop.f32.mrf.mxu2  ;;  %v1627_v17 = vpop.f32.mrf.mxu1 }
 0x260   : > { %v3133_v15 = vpop.eup %3132  ;;  %v1778_v18 = vadd.f32 %v1777_v58, %v1448_v11  ;;  %v1789_v53 = vpop.f32.mrf.mxu3 }
 0x261   : > { %v1290_v16 = vpop.f32.mrf.mxu0  ;;  %2048 = vst.msk [vmem:[%s3381_s13 + $0x3a8] sm:$0xff] %vm1930_vm1, %v3133_v15 }
 0x262   : > { %v3135_v25 = vpop.eup %3134  ;;  %v1620_v26 = vadd.f32 %v1619_v57, %v1290_v16  ;;  %3136 = vtanh.f32 %v1778_v18 }
 0x263   : > { %1985 = vst.msk [vmem:[%s3381_s13 + $0x1b0] sm:$0xff] %vm1930_vm1, %v3135_v25 }
 0x264   : > { %3138 = vtanh.f32 %v1620_v26 }
 0x267   : > { %v1450_v22 = vpop.f32.mrf.mxu2  ;;  %v1629_v24 = vpop.f32.mrf.mxu1 }
 0x268   : > { %v3137_v31 = vpop.eup %3136  ;;  %v1780_v32 = vadd.f32 %v1779_v13, %v1450_v22  ;;  %v1792_v1 = vpop.f32.mrf.mxu3 }
 0x269   : > { %v1293_v23 = vpop.f32.mrf.mxu0  ;;  %2049 = vst.msk [vmem:[%s3381_s13 + $0x3b0] sm:$0xff] %vm1930_vm1, %v3137_v31 }
 0x26a   : > { %v3139_v27 = vpop.eup %3138  ;;  %v1623_v28 = vadd.f32 %v1622_v2, %v1293_v23  ;;  %3140 = vtanh.f32 %v1780_v32 }
 0x26b   : > { %1986 = vst.msk [vmem:[%s3381_s13 + $0x1b8] sm:$0xff] %vm1930_vm1, %v3139_v27 }
 0x26c   : > { %3142 = vtanh.f32 %v1623_v28 }
 0x26f   : > { %v1453_v37 = vpop.f32.mrf.mxu2  ;;  %v1632_v34 = vpop.f32.mrf.mxu1 }
 0x270   : > { %v3141_v29 = vpop.eup %3140  ;;  %v1783_v30 = vadd.f32 %v1782_v21, %v1453_v37  ;;  %v1794_v13 = vpop.f32.mrf.mxu3 }
 0x271   : > { %v1295_v33 = vpop.f32.mrf.mxu0  ;;  %2050 = vst.msk [vmem:[%s3381_s13 + $0x3b8] sm:$0xff] %vm1930_vm1, %v3141_v29 }
 0x272   : > { %v3143_v42 = vpop.eup %3142  ;;  %v1625_v43 = vadd.f32 %v1624_v14, %v1295_v33  ;;  %3144 = vtanh.f32 %v1783_v30 }
 0x273   : > { %1987 = vst.msk [vmem:[%s3381_s13 + $0x1c0] sm:$0xff] %vm1930_vm1, %v3143_v42 }
 0x274   : > { %3146 = vtanh.f32 %v1625_v43 }
 0x277   : > { %v1455_v38 = vpop.f32.mrf.mxu2  ;;  %v1634_v44 = vpop.f32.mrf.mxu1 }
 0x278   : > { %v3145_v47 = vpop.eup %3144  ;;  %v1785_v48 = vadd.f32 %v1784_v36, %v1455_v38  ;;  %v1797_v18 = vpop.f32.mrf.mxu3 }
 0x279   : > { %v1298_v40 = vpop.f32.mrf.mxu0  ;;  %2051 = vst.msk [vmem:[%s3381_s13 + $0x3c0] sm:$0xff] %vm1930_vm1, %v3145_v47 }
 0x27a   : > { %v3147_v39 = vpop.eup %3146  ;;  %v1628_v41 = vadd.f32 %v1627_v17, %v1298_v40  ;;  %3148 = vtanh.f32 %v1785_v48 }
 0x27b   : > { %1988 = vst.msk [vmem:[%s3381_s13 + $0x1c8] sm:$0xff] %vm1930_vm1, %v3147_v39 }
 0x27c   : > { %3150 = vtanh.f32 %v1628_v41 }
 0x27f   : > { %v1458_v45 = vpop.f32.mrf.mxu2  ;;  %v1637_v60 = vpop.f32.mrf.mxu1 }
 0x280   : > { %v3149_v55 = vpop.eup %3148  ;;  %v1788_v46 = vadd.f32 %v1787_v35, %v1458_v45 }
 0x281   : > { %v1300_v49 = vpop.f32.mrf.mxu0  ;;  %2052 = vst.msk [vmem:[%s3381_s13 + $0x3c8] sm:$0xff] %vm1930_vm1, %v3149_v55 }
 0x282   : > { %v3151_v50 = vpop.eup %3150  ;;  %v1630_v59 = vadd.f32 %v1629_v24, %v1300_v49  ;;  %3152 = vtanh.f32 %v1788_v46 }
 0x283   : > { %1989 = vst.msk [vmem:[%s3381_s13 + $0x1d0] sm:$0xff] %vm1930_vm1, %v3151_v50 }
 0x284   : > { %3154 = vtanh.f32 %v1630_v59 }
 0x287   : > { %v1460_v52 = vpop.f32.mrf.mxu2  ;;  %v1639_v58 = vpop.f32.mrf.mxu1 }
 0x288   : > { %v3153_v51 = vpop.eup %3152  ;;  %v1790_v54 = vadd.f32 %v1789_v53, %v1460_v52 }
 0x289   : > { %v1303_v56 = vpop.f32.mrf.mxu0  ;;  %2053 = vst.msk [vmem:[%s3381_s13 + $0x3d0] sm:$0xff] %vm1930_vm1, %v3153_v51 }
 0x28a   : > { %v3155_v0 = vpop.eup %3154  ;;  %v1633_v57 = vadd.f32 %v1632_v34, %v1303_v56  ;;  %3156 = vtanh.f32 %v1790_v54 }
 0x28b   : > { %1990 = vst.msk [vmem:[%s3381_s13 + $0x1d8] sm:$0xff] %vm1930_vm1, %v3155_v0 }
 0x28c   : > { %3158 = vtanh.f32 %v1633_v57 }
 0x28f   : > { %v1463_v61 = vpop.f32.mrf.mxu2  ;;  %v1642_v2 = vpop.f32.mrf.mxu1 }
 0x290   : > { %v3157_v7 = vpop.eup %3156  ;;  %v1793_v8 = vadd.f32 %v1792_v1, %v1463_v61  ;;  %v1643_v12 = vadd.f32 %v1642_v2, %v3383_v6 }
 0x291   : > { %v1305_v62 = vpop.f32.mrf.mxu0  ;;  %2054 = vst.msk [vmem:[%s3381_s13 + $0x3d8] sm:$0xff] %vm1930_vm1, %v3157_v7 }
 0x292   : > { %v3159_v3 = vpop.eup %3158  ;;  %v1635_v63 = vadd.f32 %v1634_v44, %v1305_v62  ;;  %3160 = vtanh.f32 %v1793_v8 }
 0x293   : > { %1991 = vst.msk [vmem:[%s3381_s13 + $0x1e0] sm:$0xff] %vm1930_vm1, %v3159_v3 }
 0x294   : > { %3162 = vtanh.f32 %v1635_v63 }
 0x295   : > { %3164 = vtanh.f32 %v1643_v12 }
 0x297   : > { %v1465_v4 = vpop.f32.mrf.mxu2  ;;  %v1644_v11 = vpop.f32.mrf.mxu1 }
 0x298   : > { %v3161_v5 = vpop.eup %3160  ;;  %v1795_v9 = vadd.f32 %v1794_v13, %v1465_v4  ;;  %v1645_v6 = vadd.f32 %v1644_v11, %v3396_v20  ;;  %v1799_v20 = vpop.f32.mrf.mxu3 }
 0x299   : > { %v1308_v10 = vpop.f32.mrf.mxu0  ;;  %2055 = vst.msk [vmem:[%s3381_s13 + $0x3e0] sm:$0xff] %vm1930_vm1, %v3161_v5 }
 0x29a   : > { %v3163_v19 = vpop.eup %3162  ;;  %v1638_v14 = vadd.f32 %v1637_v60, %v1308_v10  ;;  %3166 = vtanh.f32 %v1795_v9 }
 0x29b   : > { %v3165_v15 = vpop.eup %3164  ;;  %1992 = vst.msk [vmem:[%s3381_s13 + $0x1e8] sm:$0xff] %vm1930_vm1, %v3163_v19 }
 0x29c   : > { %1995 = vst.msk [vmem:[%s3381_s13 + $0x200] sm:$0xff] %vm1930_vm1, %v3165_v15  ;;  %3168 = vtanh.f32 %v1638_v14 }
 0x29d   : > { %3170 = vtanh.f32 %v1645_v6 }
 0x29f   : > { %v1468_v16 = vpop.f32.mrf.mxu2 }
 0x2a0   : > { %v3167_v25 = vpop.eup %3166  ;;  %v1798_v26 = vadd.f32 %v1797_v18, %v1468_v16 }
 0x2a1   : > { %v1310_v17 = vpop.f32.mrf.mxu0  ;;  %2056 = vst.msk [vmem:[%s3381_s13 + $0x3e8] sm:$0xff] %vm1930_vm1, %v3167_v25 }
 0x2a2   : > { %v3169_v21 = vpop.eup %3168  ;;  %v1640_v22 = vadd.f32 %v1639_v58, %v1310_v17  ;;  %3172 = vtanh.f32 %v1798_v26 }
 0x2a3   : > { %v3171_v31 = vpop.eup %3170  ;;  %1993 = vst.msk [vmem:[%s3381_s13 + $0x1f0] sm:$0xff] %vm1930_vm1, %v3169_v21 }
 0x2a4   : > { %1996 = vst.msk [vmem:[%s3381_s13 + $0x208] sm:$0xff] %vm1930_vm1, %v3171_v31  ;;  %3174 = vtanh.f32 %v1640_v22 }
 0x2a7   : > { %v1470_v32 = vpop.f32.mrf.mxu2 }
 0x2a8   : > { %v3173_v23 = vpop.eup %3172  ;;  %v1800_v27 = vadd.f32 %v1799_v20, %v1470_v32 }
 0x2a9   : > { %2057 = vst.msk [vmem:[%s3381_s13 + $0x3f0] sm:$0xff] %vm1930_vm1, %v3173_v23 }
 0x2aa   : > { %v3175_v28 = vpop.eup %3174  ;;  %3176 = vtanh.f32 %v1800_v27 }
 0x2ab   : > { %1994 = vst.msk [vmem:[%s3381_s13 + $0x1f8] sm:$0xff] %vm1930_vm1, %v3175_v28 }
 0x2b0   : > { %v3177_v24 = vpop.eup %3176 }
 0x2b1   : > { %2058 = vst.msk [vmem:[%s3381_s13 + $0x3f8] sm:$0xff] %vm1930_vm1, %v3177_v24 }
 0x2b2 PF: > { %s12_s11 = sadd.s32 1, %s3200_s11   ;;  %s4011_s9 = smov %s3196_s10 }
 0x2b3   : > { %p9_p5 = scmp.ge.s32.totalorder %s12_s11, 4   ;;  %s4012_s10 = smov %s4014_s12 }
 0x2b5   :  { %11 = sbr.rel (!%p9_p5) target bundleno = 2 (0x2), region = 58 }

</bundles_post_ra>
